<compile_context>
chip_gen: v7x
topology: tpu7x:2x2x1
jax: 0.10.0
libtpu: 0.0.40
codegen_flags: <defaults>
</compile_context>

<pallas_src>
import functools

import jax
import jax.numpy as jnp
import numpy as np
from jax.experimental import pallas as pl
from jax.experimental.pallas import tpu as pltpu

NORM_EPS = 1e-5
SQRT_2_OVER_PI = 0.7978845608028654
VMEM_LIMIT = 64 * 1024 * 1024   # v7x-safe scoped-VMEM budget


# ------------------------------ helpers ------------------------------------

def _layernorm_f32(x, gamma, beta):
    mean = jnp.mean(x, axis=-1, keepdims=True)
    var = jnp.mean(jnp.square(x - mean), axis=-1, keepdims=True)
    return (x - mean) * jax.lax.rsqrt(var + NORM_EPS) * gamma + beta


def _gelu_tanh(x):
    # TODO(synk): torch F.gelu default is exact erf; tanh approximation deviates by <~1e-3.
    return 0.5 * x * (1.0 + jnp.tanh(SQRT_2_OVER_PI * (x + 0.044715 * x * x * x)))


def _largest_divisor(n, cap, mult):
    best = None
    for t in range(mult, min(n, cap) + 1, mult):
        if n % t == 0:
            best = t
    return best if best is not None else n


def _pick_rows_per_step(bf, p, row_cap=512):
    # Process several (b, f) rows per kernel-1 grid step when P is small, but keep
    # at least 2 grid steps so megacore / 2-TC sharding has work to split.
    best = 1
    for r in range(1, bf + 1):
        if bf % r == 0 and r * p <= row_cap and bf // r >= 2:
            best = r
    return best


# -------------------- kernel 1: norm1 + cross-attn + residual ----------------

def _attn1_kernel(x_ref, enc_ref, gamma_ref, beta_ref,
                  wq_ref, wkv_ref, wo_ref, bo_ref, o_ref, head_out,
                  *, heads, head_dim):
    R, P, C = x_ref.shape
    L = enc_ref.shape[1]
    HDh = heads * head_dim

    x = x_ref[...].reshape(R * P, C).astype(jnp.float32)
    n1 = _layernorm_f32(x, gamma_ref[...], beta_ref[...]).astype(jnp.bfloat16)
    enc = enc_ref[...].reshape(R * L, C).astype(jnp.bfloat16)

    # Fused, lane-dense projections (scale already folded into wq).
    q_all = jnp.dot(n1, wq_ref[...], preferred_element_type=jnp.float32).astype(jnp.bfloat16)
    kv = jnp.dot(enc, wkv_ref[...], preferred_element_type=jnp.float32)
    k_all = kv[:, :HDh].astype(jnp.bfloat16)
    v_all = kv[:, HDh:].astype(jnp.bfloat16)

    for r in range(R):
        q_r = q_all[r * P:(r + 1) * P, :]
        k_r = k_all[r * L:(r + 1) * L, :]
        v_r = v_all[r * L:(r + 1) * L, :]
        for h in range(heads):
            q_h = q_r[:, h * head_dim:(h + 1) * head_dim]
            k_h = k_r[:, h * head_dim:(h + 1) * head_dim]
            v_h = v_r[:, h * head_dim:(h + 1) * head_dim]
            # Contract last dims -> no in-kernel transpose of K.
            s = jax.lax.dot_general(q_h, k_h, (((1,), (1,)), ((), ())),
                                    preferred_element_type=jnp.float32)       # (P, L)
            s = s - jnp.max(s, axis=-1, keepdims=True)
            p = jnp.exp(s)
            p = p * pl.reciprocal(jnp.sum(p, axis=-1, keepdims=True), approx=True)
            o_h = jnp.dot(p.astype(jnp.bfloat16), v_h,
                          preferred_element_type=jnp.float32)                 # (P, Dh)
            head_out[r * P:(r + 1) * P, h * head_dim:(h + 1) * head_dim] = (
                o_h.astype(jnp.bfloat16))

    attn = jnp.dot(head_out[...], wo_ref[...], preferred_element_type=jnp.float32)
    out = attn + bo_ref[...] + x
    o_ref[...] = out.reshape(R, P, C).astype(o_ref.dtype)


def _attn1_call(x, enc, prep, heads, head_dim):
    bf, P, C = x.shape
    L = enc.shape[1]
    HDh = heads * head_dim
    R = _pick_rows_per_step(bf, P)
    kernel = functools.partial(_attn1_kernel, heads=heads, head_dim=head_dim)
    return pl.pallas_call(
        kernel,
        out_shape=jax.ShapeDtypeStruct((bf, P, C), x.dtype),
        grid=(bf // R,),
        in_specs=[
            pl.BlockSpec((R, P, C), lambda i: (i, 0, 0)),
            pl.BlockSpec((R, L, C), lambda i: (i, 0, 0)),
            pl.BlockSpec((1, C), lambda i: (0, 0)),
            pl.BlockSpec((1, C), lambda i: (0, 0)),
            pl.BlockSpec((C, HDh), lambda i: (0, 0)),
            pl.BlockSpec((C, 2 * HDh), lambda i: (0, 0)),
            pl.BlockSpec((HDh, C), lambda i: (0, 0)),
            pl.BlockSpec((1, C), lambda i: (0, 0)),
        ],
        out_specs=pl.BlockSpec((R, P, C), lambda i: (i, 0, 0)),
        scratch_shapes=[pltpu.VMEM((R * P, HDh), jnp.bfloat16)],
        compiler_params=pltpu.CompilerParams(
            dimension_semantics=("parallel",), vmem_limit_bytes=VMEM_LIMIT),
    )(x, enc, prep["norm1_g"], prep["norm1_b"],
      prep["a1_wq"], prep["a1_wkv"], prep["a1_wo"], prep["a1_bo"])


# ------------- kernel 2: norm2 + cross-frame self-attn + residual ------------
# Input viewed as (B, F, P, C); block (None, F, pt, C) -> the '(b f) p c -> (b p) f c'
# rearrange is folded into the BlockSpec; nothing is relaid-out in HBM.

def _attn2_kernel(x_ref, gamma_ref, beta_ref, wqkv_ref, wo_ref, bo_ref, o_ref,
                  head_out, *, heads, head_dim):
    F, PT, C = x_ref.shape
    HDh = heads * head_dim

    x2 = x_ref[...].reshape(F * PT, C).astype(jnp.float32)      # frame-major, pixel-minor
    n2 = _layernorm_f32(x2, gamma_ref[...], beta_ref[...]).astype(jnp.bfloat16)

    # Fused QKV projection (scale folded into the Q columns of wqkv).
    qkv = jnp.dot(n2, wqkv_ref[...], preferred_element_type=jnp.float32)   # (F*PT, 3*HDh)

    # TODO(synk): for large num_frames, replace the per-query-frame loop below with an
    # MXU-batched (pixel-major) score matmul.
    for h in range(heads):
        q_h = qkv[:, h * head_dim:(h + 1) * head_dim].reshape(F, PT, head_dim)
        k_h = qkv[:, HDh + h * head_dim:HDh + (h + 1) * head_dim].reshape(F, PT, head_dim)
        v_h = qkv[:, 2 * HDh + h * head_dim:2 * HDh + (h + 1) * head_dim].reshape(
            F, PT, head_dim)
        for f in range(F):
            # Stacked scores over all key frames: one multiply + one lane reduce.
            s = jnp.sum(q_h[f:f + 1] * k_h, axis=-1, keepdims=True)        # (F, PT, 1)
            m = jnp.max(s, axis=0, keepdims=True)                          # (1, PT, 1)
            e = jnp.exp(s - m)                                             # (F, PT, 1)
            denom = jnp.sum(e, axis=0, keepdims=True)                      # (1, PT, 1)
            p = e * pl.reciprocal(denom, approx=True)                      # (F, PT, 1)
            o_f = jnp.sum(p * v_h, axis=0)                                 # (PT, Dh)
            head_out[f * PT:(f + 1) * PT, h * head_dim:(h + 1) * head_dim] = (
                o_f.astype(jnp.bfloat16))

    attn = jnp.dot(head_out[...], wo_ref[...], preferred_element_type=jnp.float32)
    out = attn + bo_ref[...] + x2
    o_ref[...] = out.reshape(F, PT, C).astype(o_ref.dtype)


def _attn2_call(x4, prep, heads, head_dim):
    B, F, P, C = x4.shape
    HDh = heads * head_dim
    pt = _largest_divisor(P, 512, 8)
    kernel = functools.partial(_attn2_kernel, heads=heads, head_dim=head_dim)
    return pl.pallas_call(
        kernel,
        out_shape=jax.ShapeDtypeStruct((B, F, P, C), x4.dtype),
        grid=(B, P // pt),
        in_specs=[
            pl.BlockSpec((None, F, pt, C), lambda b, p: (b, 0, p, 0)),
            pl.BlockSpec((1, C), lambda b, p: (0, 0)),
            pl.BlockSpec((1, C), lambda b, p: (0, 0)),
            pl.BlockSpec((C, 3 * HDh), lambda b, p: (0, 0)),
            pl.BlockSpec((HDh, C), lambda b, p: (0, 0)),
            pl.BlockSpec((1, C), lambda b, p: (0, 0)),
        ],
        out_specs=pl.BlockSpec((None, F, pt, C), lambda b, p: (b, 0, p, 0)),
        scratch_shapes=[pltpu.VMEM((F * pt, HDh), jnp.bfloat16)],
        compiler_params=pltpu.CompilerParams(
            dimension_semantics=("parallel", "parallel"), vmem_limit_bytes=VMEM_LIMIT),
    )(x4, prep["norm2_g"], prep["norm2_b"],
      prep["a2_wqkv"], prep["a2_wo"], prep["a2_bo"])


# ----------------- kernel 3: norm3 + GEGLU FF + residual ---------------------
# Grid = (row tiles, FF-hidden tiles); the FF hidden (Fi) axis is a resident-output
# reduction ("arbitrary", last) with a VMEM f32 accumulator, so the bf16 weights stream
# tile-by-tile instead of being fully resident (v7x 64 MiB safe at production dims).

def _ff_kernel(x_ref, gamma_ref, beta_ref, w1h_ref, b1h_ref,
               w1g_ref, b1g_ref, w2_ref, b2_ref, o_ref, n3_scratch, acc_scratch):
    fi = pl.program_id(1)

    @pl.when(fi == 0)
    def _():
        x = x_ref[...].astype(jnp.float32)
        n3_scratch[...] = _layernorm_f32(x, gamma_ref[...], beta_ref[...]).astype(jnp.bfloat16)
        acc_scratch[...] = jnp.zeros_like(acc_scratch)

    n3 = n3_scratch[...]
    h = jnp.dot(n3, w1h_ref[...], preferred_element_type=jnp.float32) + b1h_ref[...]
    g = jnp.dot(n3, w1g_ref[...], preferred_element_type=jnp.float32) + b1g_ref[...]
    act = (h * _gelu_tanh(g)).astype(jnp.bfloat16)
    acc_scratch[...] += jnp.dot(act, w2_ref[...], preferred_element_type=jnp.float32)

    @pl.when(fi == pl.num_programs(1) - 1)
    def _():
        out = acc_scratch[...] + b2_ref[...] + x_ref[...].astype(jnp.float32)
        o_ref[...] = out.astype(o_ref.dtype)


def _ff_call(x2d, prep):
    N, C = x2d.shape
    Fi = prep["ff_w2"].shape[0]
    rt = _largest_divisor(N, 512, 8)
    ft = _largest_divisor(Fi, 1024, 128)
    # TODO(synk): on v7x consider pipeline_mode=pl.Buffered(1) for the row-constant specs
    # (x / biases) to drop the unused double buffer.
    return pl.pallas_call(
        _ff_kernel,
        out_shape=jax.ShapeDtypeStruct((N, C), x2d.dtype),
        grid=(N // rt, Fi // ft),
        in_specs=[
            pl.BlockSpec((rt, C), lambda i, j: (i, 0)),
            pl.BlockSpec((1, C), lambda i, j: (0, 0)),
            pl.BlockSpec((1, C), lambda i, j: (0, 0)),
            pl.BlockSpec((C, ft), lambda i, j: (0, j)),
            pl.BlockSpec((1, ft), lambda i, j: (0, j)),
            pl.BlockSpec((C, ft), lambda i, j: (0, j)),
            pl.BlockSpec((1, ft), lambda i, j: (0, j)),
            pl.BlockSpec((ft, C), lambda i, j: (j, 0)),
            pl.BlockSpec((1, C), lambda i, j: (0, 0)),
        ],
        out_specs=pl.BlockSpec((rt, C), lambda i, j: (i, 0)),
        scratch_shapes=[pltpu.VMEM((rt, C), jnp.bfloat16),
                        pltpu.VMEM((rt, C), jnp.float32)],
        compiler_params=pltpu.CompilerParams(
            dimension_semantics=("parallel", "arbitrary"), vmem_limit_bytes=VMEM_LIMIT),
    )(x2d, prep["norm3_g"], prep["norm3_b"],
      prep["ff_w1h"], prep["ff_b1h"], prep["ff_w1g"], prep["ff_b1g"],
      prep["ff_w2"], prep["ff_b2"])


# ------------------------- one-time parameter prep ----------------------------

def prepare_params(params, heads, head_dim):
    """Fuse + bf16-cast weights ONCE, outside the per-forward jit path."""
    C = params["norm1_g"].shape[0]
    scale = float(head_dim) ** -0.5
    a1, a2, ff = params["attn1"], params["attn2"], params["ff"]
    Fi = ff["w2"].shape[0]
    f32, bf16 = jnp.float32, jnp.bfloat16
    return {
        "norm1_g": params["norm1_g"].reshape(1, C).astype(f32),
        "norm1_b": params["norm1_b"].reshape(1, C).astype(f32),
        "norm2_g": params["norm2_g"].reshape(1, C).astype(f32),
        "norm2_b": params["norm2_b"].reshape(1, C).astype(f32),
        "norm3_g": params["norm3_g"].reshape(1, C).astype(f32),
        "norm3_b": params["norm3_b"].reshape(1, C).astype(f32),
        # scale folded into the Q weights (removes a per-step VPU multiply).
        "a1_wq": (a1["wq"] * scale).astype(bf16),
        "a1_wkv": jnp.concatenate([a1["wk"], a1["wv"]], axis=1).astype(bf16),
        "a1_wo": a1["wo"].astype(bf16),
        "a1_bo": a1["bo"].reshape(1, C).astype(f32),
        "a2_wqkv": jnp.concatenate([a2["wq"] * scale, a2["wk"], a2["wv"]],
                                   axis=1).astype(bf16),
        "a2_wo": a2["wo"].astype(bf16),
        "a2_bo": a2["bo"].reshape(1, C).astype(f32),
        "ff_w1h": ff["w1"][:, :Fi].astype(bf16),
        "ff_b1h": ff["b1"][:Fi].reshape(1, Fi).astype(f32),
        "ff_w1g": ff["w1"][:, Fi:].astype(bf16),
        "ff_b1g": ff["b1"][Fi:].reshape(1, Fi).astype(f32),
        "ff_w2": ff["w2"].astype(bf16),
        "ff_b2": ff["b2"].reshape(1, C).astype(f32),
    }


# ------------------------------ block wrapper --------------------------------

@functools.partial(jax.jit, static_argnums=(2, 4, 5))
def block_forward(hidden_states, encoder_hidden_states, num_frames, prep, heads, head_dim):
    bf, P, C = hidden_states.shape
    b = bf // num_frames

    x = _attn1_call(hidden_states, encoder_hidden_states, prep, heads, head_dim)
    x = _attn2_call(x.reshape(b, num_frames, P, C),     # pure view, no HBM relayout
                    prep, heads, head_dim).reshape(bf, P, C)
    out = _ff_call(x.reshape(bf * P, C), prep)
    return out.reshape(bf, P, C)


# --------------------------- pure-JAX reference -------------------------------

def ref_forward(hidden_states, encoder_hidden_states, num_frames, params, heads, head_dim):
    def ln(x, g, b):
        m = x.mean(-1, keepdims=True)
        v = ((x - m) ** 2).mean(-1, keepdims=True)
        return (x - m) / jnp.sqrt(v + NORM_EPS) * g + b

    def attn(h, ctx, p):
        bq, s, c = h.shape
        l = ctx.shape[1]
        q = h @ p["wq"]; k = ctx @ p["wk"]; v = ctx @ p["wv"]
        q = q.reshape(bq, s, heads, head_dim).transpose(0, 2, 1, 3)
        k = k.reshape(bq, l, heads, head_dim).transpose(0, 2, 1, 3)
        v = v.reshape(bq, l, heads, head_dim).transpose(0, 2, 1, 3)
        sc = jnp.einsum("bhqd,bhkd->bhqk", q, k) * (head_dim ** -0.5)
        pr = jax.nn.softmax(sc, axis=-1)
        o = jnp.einsum("bhqk,bhkd->bhqd", pr, v)
        o = o.transpose(0, 2, 1, 3).reshape(bq, s, heads * head_dim)
        return o @ p["wo"] + p["bo"]

    bf, p_pix, c = hidden_states.shape
    b = bf // num_frames
    x = hidden_states
    x = x + attn(ln(x, params["norm1_g"], params["norm1_b"]), encoder_hidden_states, params["attn1"])
    x = x.reshape(b, num_frames, p_pix, c).transpose(0, 2, 1, 3).reshape(b * p_pix, num_frames, c)
    n2 = ln(x, params["norm2_g"], params["norm2_b"])
    x = x + attn(n2, n2, params["attn2"])
    x = x.reshape(b, p_pix, num_frames, c).transpose(0, 2, 1, 3).reshape(bf, p_pix, c)
    n3 = ln(x, params["norm3_g"], params["norm3_b"])
    h = n3 @ params["ff"]["w1"] + params["ff"]["b1"]
    hh, gg = jnp.split(h, 2, axis=-1)
    act = hh * jax.nn.gelu(gg, approximate=False)
    return x + (act @ params["ff"]["w2"] + params["ff"]["b2"])


# --------------------------------- main ---------------------------------------

def init_params(key, dim, heads, head_dim):
    inner = heads * head_dim
    ff_inner = 4 * dim
    keys = jax.random.split(key, 16)

    def w(k, shape, scale=0.02):
        return jax.random.normal(k, shape, jnp.float32) * scale

    def attn_p(k0, k1, k2, k3, k4):
        return {"wq": w(k0, (dim, inner)), "wk": w(k1, (dim, inner)),
                "wv": w(k2, (dim, inner)), "wo": w(k3, (inner, dim)),
                "bo": w(k4, (dim,))}

    return {
        "norm1_g": 1.0 + w(keys[0], (dim,), 0.1), "norm1_b": w(keys[1], (dim,), 0.05),
        "norm2_g": 1.0 + w(keys[2], (dim,), 0.1), "norm2_b": w(keys[3], (dim,), 0.05),
        "norm3_g": 1.0 + w(keys[4], (dim,), 0.1), "norm3_b": w(keys[5], (dim,), 0.05),
        "attn1": attn_p(*jax.random.split(keys[6], 5)),
        "attn2": attn_p(*jax.random.split(keys[7], 5)),
        "ff": {"w1": w(keys[8], (dim, 2 * ff_inner)), "b1": w(keys[9], (2 * ff_inner,), 0.05),
               "w2": w(keys[10], (ff_inner, dim)), "b2": w(keys[11], (dim,), 0.05)},
    }


if __name__ == "__main__":
    dim = 32
    heads = 2
    head_dim = 16
    batch = 2
    num_frames = 4
    num_pixels = 16
    enc_len = 8

    key = jax.random.PRNGKey(0)
    k_par, k_x, k_e = jax.random.split(key, 3)
    params = init_params(k_par, dim, heads, head_dim)
    prep = prepare_params(params, heads, head_dim)          # one-time weight fuse + bf16 cast

    hidden_states = jax.random.normal(k_x, (batch * num_frames, num_pixels, dim), jnp.float32)
    encoder_hidden_states = jax.random.normal(k_e, (batch * num_frames, enc_len, dim), jnp.float32)

    out = block_forward(hidden_states, encoder_hidden_states, num_frames, prep, heads, head_dim)
    out = jax.block_until_ready(out)

    ref = ref_forward(hidden_states, encoder_hidden_states, num_frames, params, heads, head_dim)
    assert out.shape == hidden_states.shape
    # bf16 matmul operands + approx softmax reciprocal + tanh-GELU -> relaxed tolerance.
    np.testing.assert_allclose(np.asarray(out), np.asarray(ref), rtol=2e-2, atol=2e-2)

    print("KERNEL_OK")
</pallas_src>

<mosaic_0001>
module attributes {stable_mosaic.version = 11 : i64} {
  func.func @_attn2_kernel(%arg0: i32, %arg1: i32, %arg2: memref<1x4x16x32xf32, #tpu.memory_space<vmem>>, %arg3: memref<1x32xf32, #tpu.memory_space<vmem>>, %arg4: memref<1x32xf32, #tpu.memory_space<vmem>>, %arg5: memref<32x96xbf16, #tpu.memory_space<vmem>>, %arg6: memref<32x32xbf16, #tpu.memory_space<vmem>>, %arg7: memref<1x32xf32, #tpu.memory_space<vmem>>, %arg8: memref<1x4x16x32xf32, #tpu.memory_space<vmem>>, %arg9: memref<64x32xbf16, #tpu.memory_space<vmem>>) attributes {dimension_semantics = [#tpu.dimension_semantics<parallel>, #tpu.dimension_semantics<parallel>], iteration_bounds = array<i64: 2, 1>, scalar_prefetch = 0 : i64, scratch_operands = 1 : i64, tpu.core_type = #tpu.core_type<tc>, window_params = [{transform_indices = @transform_0, window_bounds = array<i64: 1, 4, 16, 32>}, {pipeline_mode = #tpu.pipeline_mode<synchronous>, transform_indices = @transform_1, window_bounds = array<i64: 1, 32>}, {pipeline_mode = #tpu.pipeline_mode<synchronous>, transform_indices = @transform_2, window_bounds = array<i64: 1, 32>}, {pipeline_mode = #tpu.pipeline_mode<synchronous>, transform_indices = @transform_3, window_bounds = array<i64: 32, 96>}, {pipeline_mode = #tpu.pipeline_mode<synchronous>, transform_indices = @transform_4, window_bounds = array<i64: 32, 32>}, {pipeline_mode = #tpu.pipeline_mode<synchronous>, transform_indices = @transform_5, window_bounds = array<i64: 1, 32>}, {transform_indices = @transform_6, window_bounds = array<i64: 1, 4, 16, 32>}]} {
    %c0 = arith.constant 0 : index
    %c0_0 = arith.constant 0 : index
    %c0_1 = arith.constant 0 : index
    %c0_2 = arith.constant 0 : index
    %0 = vector.load %arg2[%c0, %c0_0, %c0_1, %c0_2] : memref<1x4x16x32xf32, #tpu.memory_space<vmem>>, vector<1x4x16x32xf32>
    %1 = vector.shape_cast %0 : vector<1x4x16x32xf32> to vector<4x16x32xf32>
    %2 = vector.shape_cast %1 : vector<4x16x32xf32> to vector<64x32xf32>
    %c0_3 = arith.constant 0 : index
    %c0_4 = arith.constant 0 : index
    %3 = vector.load %arg3[%c0_3, %c0_4] : memref<1x32xf32, #tpu.memory_space<vmem>>, vector<1x32xf32>
    %c0_5 = arith.constant 0 : index
    %c0_6 = arith.constant 0 : index
    %4 = vector.load %arg4[%c0_5, %c0_6] : memref<1x32xf32, #tpu.memory_space<vmem>>, vector<1x32xf32>
    %cst = arith.constant dense<0.000000e+00> : vector<64xf32>
    %5 = vector.multi_reduction <add>, %2, %cst [1] : vector<64x32xf32> to vector<64xf32>
    %6 = vector.shape_cast %5 : vector<64xf32> to vector<64x1xf32>
    %cst_7 = arith.constant 3.200000e+01 : f32
    %7 = vector.broadcast %cst_7 : f32 to vector<64x1xf32>
    %8 = arith.divf %6, %7 : vector<64x1xf32>
    %9 = vector.broadcast %8 : vector<64x1xf32> to vector<64x32xf32>
    %10 = arith.subf %2, %9 : vector<64x32xf32>
    %11 = arith.mulf %10, %10 : vector<64x32xf32>
    %cst_8 = arith.constant dense<0.000000e+00> : vector<64xf32>
    %12 = vector.multi_reduction <add>, %11, %cst_8 [1] : vector<64x32xf32> to vector<64xf32>
    %13 = vector.shape_cast %12 : vector<64xf32> to vector<64x1xf32>
    %cst_9 = arith.constant 3.200000e+01 : f32
    %14 = vector.broadcast %cst_9 : f32 to vector<64x1xf32>
    %15 = arith.divf %13, %14 : vector<64x1xf32>
    %16 = vector.broadcast %8 : vector<64x1xf32> to vector<64x32xf32>
    %17 = arith.subf %2, %16 : vector<64x32xf32>
    %cst_10 = arith.constant 9.99999974E-6 : f32
    %18 = vector.broadcast %cst_10 : f32 to vector<64x1xf32>
    %19 = arith.addf %15, %18 : vector<64x1xf32>
    %20 = math.rsqrt %19 : vector<64x1xf32>
    %21 = vector.broadcast %20 : vector<64x1xf32> to vector<64x32xf32>
    %22 = arith.mulf %17, %21 : vector<64x32xf32>
    %23 = vector.broadcast %3 : vector<1x32xf32> to vector<64x32xf32>
    %24 = arith.mulf %22, %23 : vector<64x32xf32>
    %25 = vector.broadcast %4 : vector<1x32xf32> to vector<64x32xf32>
    %26 = arith.addf %24, %25 : vector<64x32xf32>
    %27 = arith.truncf %26 : vector<64x32xf32> to vector<64x32xbf16>
    %c0_11 = arith.constant 0 : index
    %c0_12 = arith.constant 0 : index
    %28 = vector.load %arg5[%c0_11, %c0_12] : memref<32x96xbf16, #tpu.memory_space<vmem>>, vector<32x96xbf16>
    %cst_13 = arith.constant dense<0.000000e+00> : vector<64x96xf32>
    %29 = tpu.matmul %27, %28, %cst_13 {dimension_numbers = #tpu.dot_dimension_numbers<[1], [0], [0], [1], [0, 0, 1, 1], [], []>} : vector<64x32xbf16>, vector<32x96xbf16>, vector<64x96xf32> -> vector<64x96xf32>
    %30 = vector.extract_strided_slice %29 {offsets = [0, 0], sizes = [64, 16], strides = [1, 1]} : vector<64x96xf32> to vector<64x16xf32>
    %31 = vector.shape_cast %30 : vector<64x16xf32> to vector<4x16x16xf32>
    %32 = vector.extract_strided_slice %29 {offsets = [0, 32], sizes = [64, 16], strides = [1, 1]} : vector<64x96xf32> to vector<64x16xf32>
    %33 = vector.shape_cast %32 : vector<64x16xf32> to vector<4x16x16xf32>
    %34 = vector.extract_strided_slice %29 {offsets = [0, 64], sizes = [64, 16], strides = [1, 1]} : vector<64x96xf32> to vector<64x16xf32>
    %35 = vector.shape_cast %34 : vector<64x16xf32> to vector<4x16x16xf32>
    %36 = vector.extract_strided_slice %31 {offsets = [0, 0, 0], sizes = [1, 16, 16], strides = [1, 1, 1]} : vector<4x16x16xf32> to vector<1x16x16xf32>
    %37 = vector.broadcast %36 : vector<1x16x16xf32> to vector<4x16x16xf32>
    %38 = arith.mulf %37, %33 : vector<4x16x16xf32>
    %cst_14 = arith.constant dense<0.000000e+00> : vector<4x16xf32>
    %39 = vector.multi_reduction <add>, %38, %cst_14 [2] : vector<4x16x16xf32> to vector<4x16xf32>
    %40 = vector.shape_cast %39 : vector<4x16xf32> to vector<4x16x1xf32>
    %cst_15 = arith.constant dense<0xFF800000> : vector<16x1xf32>
    %41 = vector.multi_reduction <maximumf>, %40, %cst_15 [0] : vector<4x16x1xf32> to vector<16x1xf32>
    %42 = vector.shape_cast %41 : vector<16x1xf32> to vector<1x16x1xf32>
    %43 = vector.broadcast %42 : vector<1x16x1xf32> to vector<4x16x1xf32>
    %44 = arith.subf %40, %43 : vector<4x16x1xf32>
    %45 = math.exp %44 : vector<4x16x1xf32>
    %cst_16 = arith.constant dense<0.000000e+00> : vector<16x1xf32>
    %46 = vector.multi_reduction <add>, %45, %cst_16 [0] : vector<4x16x1xf32> to vector<16x1xf32>
    %47 = vector.shape_cast %46 : vector<16x1xf32> to vector<1x16x1xf32>
    %48 = tpu.reciprocal %47 {approx = true} : vector<1x16x1xf32> -> vector<1x16x1xf32>
    %49 = vector.broadcast %48 : vector<1x16x1xf32> to vector<4x16x1xf32>
    %50 = arith.mulf %45, %49 : vector<4x16x1xf32>
    %51 = vector.broadcast %50 : vector<4x16x1xf32> to vector<4x16x16xf32>
    %52 = arith.mulf %51, %35 : vector<4x16x16xf32>
    %cst_17 = arith.constant dense<0.000000e+00> : vector<16x16xf32>
    %53 = vector.multi_reduction <add>, %52, %cst_17 [0] : vector<4x16x16xf32> to vector<16x16xf32>
    %54 = arith.truncf %53 : vector<16x16xf32> to vector<16x16xbf16>
    %c0_18 = arith.constant 0 : index
    %c0_19 = arith.constant 0 : index
    %55 = vector.load %arg9[%c0_18, %c0_19] : memref<64x32xbf16, #tpu.memory_space<vmem>>, vector<16x16xbf16>
    tpu.vector_store %arg9[%c0_18, %c0_19], %54 {strides = array<i32>} : memref<64x32xbf16, #tpu.memory_space<vmem>>, vector<16x16xbf16>,
    %56 = vector.extract_strided_slice %31 {offsets = [1, 0, 0], sizes = [1, 16, 16], strides = [1, 1, 1]} : vector<4x16x16xf32> to vector<1x16x16xf32>
    %57 = vector.broadcast %56 : vector<1x16x16xf32> to vector<4x16x16xf32>
    %58 = arith.mulf %57, %33 : vector<4x16x16xf32>
    %cst_20 = arith.constant dense<0.000000e+00> : vector<4x16xf32>
    %59 = vector.multi_reduction <add>, %58, %cst_20 [2] : vector<4x16x16xf32> to vector<4x16xf32>
    %60 = vector.shape_cast %59 : vector<4x16xf32> to vector<4x16x1xf32>
    %cst_21 = arith.constant dense<0xFF800000> : vector<16x1xf32>
    %61 = vector.multi_reduction <maximumf>, %60, %cst_21 [0] : vector<4x16x1xf32> to vector<16x1xf32>
    %62 = vector.shape_cast %61 : vector<16x1xf32> to vector<1x16x1xf32>
    %63 = vector.broadcast %62 : vector<1x16x1xf32> to vector<4x16x1xf32>
    %64 = arith.subf %60, %63 : vector<4x16x1xf32>
    %65 = math.exp %64 : vector<4x16x1xf32>
    %cst_22 = arith.constant dense<0.000000e+00> : vector<16x1xf32>
    %66 = vector.multi_reduction <add>, %65, %cst_22 [0] : vector<4x16x1xf32> to vector<16x1xf32>
    %67 = vector.shape_cast %66 : vector<16x1xf32> to vector<1x16x1xf32>
    %68 = tpu.reciprocal %67 {approx = true} : vector<1x16x1xf32> -> vector<1x16x1xf32>
    %69 = vector.broadcast %68 : vector<1x16x1xf32> to vector<4x16x1xf32>
    %70 = arith.mulf %65, %69 : vector<4x16x1xf32>
    %71 = vector.broadcast %70 : vector<4x16x1xf32> to vector<4x16x16xf32>
    %72 = arith.mulf %71, %35 : vector<4x16x16xf32>
    %cst_23 = arith.constant dense<0.000000e+00> : vector<16x16xf32>
    %73 = vector.multi_reduction <add>, %72, %cst_23 [0] : vector<4x16x16xf32> to vector<16x16xf32>
    %74 = arith.truncf %73 : vector<16x16xf32> to vector<16x16xbf16>
    %c16 = arith.constant 16 : index
    %c0_24 = arith.constant 0 : index
    %75 = vector.load %arg9[%c16, %c0_24] : memref<64x32xbf16, #tpu.memory_space<vmem>>, vector<16x16xbf16>
    tpu.vector_store %arg9[%c16, %c0_24], %74 {strides = array<i32>} : memref<64x32xbf16, #tpu.memory_space<vmem>>, vector<16x16xbf16>,
    %76 = vector.extract_strided_slice %31 {offsets = [2, 0, 0], sizes = [1, 16, 16], strides = [1, 1, 1]} : vector<4x16x16xf32> to vector<1x16x16xf32>
    %77 = vector.broadcast %76 : vector<1x16x16xf32> to vector<4x16x16xf32>
    %78 = arith.mulf %77, %33 : vector<4x16x16xf32>
    %cst_25 = arith.constant dense<0.000000e+00> : vector<4x16xf32>
    %79 = vector.multi_reduction <add>, %78, %cst_25 [2] : vector<4x16x16xf32> to vector<4x16xf32>
    %80 = vector.shape_cast %79 : vector<4x16xf32> to vector<4x16x1xf32>
    %cst_26 = arith.constant dense<0xFF800000> : vector<16x1xf32>
    %81 = vector.multi_reduction <maximumf>, %80, %cst_26 [0] : vector<4x16x1xf32> to vector<16x1xf32>
    %82 = vector.shape_cast %81 : vector<16x1xf32> to vector<1x16x1xf32>
    %83 = vector.broadcast %82 : vector<1x16x1xf32> to vector<4x16x1xf32>
    %84 = arith.subf %80, %83 : vector<4x16x1xf32>
    %85 = math.exp %84 : vector<4x16x1xf32>
    %cst_27 = arith.constant dense<0.000000e+00> : vector<16x1xf32>
    %86 = vector.multi_reduction <add>, %85, %cst_27 [0] : vector<4x16x1xf32> to vector<16x1xf32>
    %87 = vector.shape_cast %86 : vector<16x1xf32> to vector<1x16x1xf32>
    %88 = tpu.reciprocal %87 {approx = true} : vector<1x16x1xf32> -> vector<1x16x1xf32>
    %89 = vector.broadcast %88 : vector<1x16x1xf32> to vector<4x16x1xf32>
    %90 = arith.mulf %85, %89 : vector<4x16x1xf32>
    %91 = vector.broadcast %90 : vector<4x16x1xf32> to vector<4x16x16xf32>
    %92 = arith.mulf %91, %35 : vector<4x16x16xf32>
    %cst_28 = arith.constant dense<0.000000e+00> : vector<16x16xf32>
    %93 = vector.multi_reduction <add>, %92, %cst_28 [0] : vector<4x16x16xf32> to vector<16x16xf32>
    %94 = arith.truncf %93 : vector<16x16xf32> to vector<16x16xbf16>
    %c32 = arith.constant 32 : index
    %c0_29 = arith.constant 0 : index
    %95 = vector.load %arg9[%c32, %c0_29] : memref<64x32xbf16, #tpu.memory_space<vmem>>, vector<16x16xbf16>
    tpu.vector_store %arg9[%c32, %c0_29], %94 {strides = array<i32>} : memref<64x32xbf16, #tpu.memory_space<vmem>>, vector<16x16xbf16>,
    %96 = vector.extract_strided_slice %31 {offsets = [3, 0, 0], sizes = [1, 16, 16], strides = [1, 1, 1]} : vector<4x16x16xf32> to vector<1x16x16xf32>
    %97 = vector.broadcast %96 : vector<1x16x16xf32> to vector<4x16x16xf32>
    %98 = arith.mulf %97, %33 : vector<4x16x16xf32>
    %cst_30 = arith.constant dense<0.000000e+00> : vector<4x16xf32>
    %99 = vector.multi_reduction <add>, %98, %cst_30 [2] : vector<4x16x16xf32> to vector<4x16xf32>
    %100 = vector.shape_cast %99 : vector<4x16xf32> to vector<4x16x1xf32>
    %cst_31 = arith.constant dense<0xFF800000> : vector<16x1xf32>
    %101 = vector.multi_reduction <maximumf>, %100, %cst_31 [0] : vector<4x16x1xf32> to vector<16x1xf32>
    %102 = vector.shape_cast %101 : vector<16x1xf32> to vector<1x16x1xf32>
    %103 = vector.broadcast %102 : vector<1x16x1xf32> to vector<4x16x1xf32>
    %104 = arith.subf %100, %103 : vector<4x16x1xf32>
    %105 = math.exp %104 : vector<4x16x1xf32>
    %cst_32 = arith.constant dense<0.000000e+00> : vector<16x1xf32>
    %106 = vector.multi_reduction <add>, %105, %cst_32 [0] : vector<4x16x1xf32> to vector<16x1xf32>
    %107 = vector.shape_cast %106 : vector<16x1xf32> to vector<1x16x1xf32>
    %108 = tpu.reciprocal %107 {approx = true} : vector<1x16x1xf32> -> vector<1x16x1xf32>
    %109 = vector.broadcast %108 : vector<1x16x1xf32> to vector<4x16x1xf32>
    %110 = arith.mulf %105, %109 : vector<4x16x1xf32>
    %111 = vector.broadcast %110 : vector<4x16x1xf32> to vector<4x16x16xf32>
    %112 = arith.mulf %111, %35 : vector<4x16x16xf32>
    %cst_33 = arith.constant dense<0.000000e+00> : vector<16x16xf32>
    %113 = vector.multi_reduction <add>, %112, %cst_33 [0] : vector<4x16x16xf32> to vector<16x16xf32>
    %114 = arith.truncf %113 : vector<16x16xf32> to vector<16x16xbf16>
    %c48 = arith.constant 48 : index
    %c0_34 = arith.constant 0 : index
    %115 = vector.load %arg9[%c48, %c0_34] : memref<64x32xbf16, #tpu.memory_space<vmem>>, vector<16x16xbf16>
    tpu.vector_store %arg9[%c48, %c0_34], %114 {strides = array<i32>} : memref<64x32xbf16, #tpu.memory_space<vmem>>, vector<16x16xbf16>,
    %116 = vector.extract_strided_slice %29 {offsets = [0, 16], sizes = [64, 16], strides = [1, 1]} : vector<64x96xf32> to vector<64x16xf32>
    %117 = vector.shape_cast %116 : vector<64x16xf32> to vector<4x16x16xf32>
    %118 = vector.extract_strided_slice %29 {offsets = [0, 48], sizes = [64, 16], strides = [1, 1]} : vector<64x96xf32> to vector<64x16xf32>
    %119 = vector.shape_cast %118 : vector<64x16xf32> to vector<4x16x16xf32>
    %120 = vector.extract_strided_slice %29 {offsets = [0, 80], sizes = [64, 16], strides = [1, 1]} : vector<64x96xf32> to vector<64x16xf32>
    %121 = vector.shape_cast %120 : vector<64x16xf32> to vector<4x16x16xf32>
    %122 = vector.extract_strided_slice %117 {offsets = [0, 0, 0], sizes = [1, 16, 16], strides = [1, 1, 1]} : vector<4x16x16xf32> to vector<1x16x16xf32>
    %123 = vector.broadcast %122 : vector<1x16x16xf32> to vector<4x16x16xf32>
    %124 = arith.mulf %123, %119 : vector<4x16x16xf32>
    %cst_35 = arith.constant dense<0.000000e+00> : vector<4x16xf32>
    %125 = vector.multi_reduction <add>, %124, %cst_35 [2] : vector<4x16x16xf32> to vector<4x16xf32>
    %126 = vector.shape_cast %125 : vector<4x16xf32> to vector<4x16x1xf32>
    %cst_36 = arith.constant dense<0xFF800000> : vector<16x1xf32>
    %127 = vector.multi_reduction <maximumf>, %126, %cst_36 [0] : vector<4x16x1xf32> to vector<16x1xf32>
    %128 = vector.shape_cast %127 : vector<16x1xf32> to vector<1x16x1xf32>
    %129 = vector.broadcast %128 : vector<1x16x1xf32> to vector<4x16x1xf32>
    %130 = arith.subf %126, %129 : vector<4x16x1xf32>
    %131 = math.exp %130 : vector<4x16x1xf32>
    %cst_37 = arith.constant dense<0.000000e+00> : vector<16x1xf32>
    %132 = vector.multi_reduction <add>, %131, %cst_37 [0] : vector<4x16x1xf32> to vector<16x1xf32>
    %133 = vector.shape_cast %132 : vector<16x1xf32> to vector<1x16x1xf32>
    %134 = tpu.reciprocal %133 {approx = true} : vector<1x16x1xf32> -> vector<1x16x1xf32>
    %135 = vector.broadcast %134 : vector<1x16x1xf32> to vector<4x16x1xf32>
    %136 = arith.mulf %131, %135 : vector<4x16x1xf32>
    %137 = vector.broadcast %136 : vector<4x16x1xf32> to vector<4x16x16xf32>
    %138 = arith.mulf %137, %121 : vector<4x16x16xf32>
    %cst_38 = arith.constant dense<0.000000e+00> : vector<16x16xf32>
    %139 = vector.multi_reduction <add>, %138, %cst_38 [0] : vector<4x16x16xf32> to vector<16x16xf32>
    %140 = arith.truncf %139 : vector<16x16xf32> to vector<16x16xbf16>
    %c0_39 = arith.constant 0 : index
    %c16_40 = arith.constant 16 : index
    %141 = vector.load %arg9[%c0_39, %c16_40] : memref<64x32xbf16, #tpu.memory_space<vmem>>, vector<16x16xbf16>
    tpu.vector_store %arg9[%c0_39, %c16_40], %140 {strides = array<i32>} : memref<64x32xbf16, #tpu.memory_space<vmem>>, vector<16x16xbf16>,
    %142 = vector.extract_strided_slice %117 {offsets = [1, 0, 0], sizes = [1, 16, 16], strides = [1, 1, 1]} : vector<4x16x16xf32> to vector<1x16x16xf32>
    %143 = vector.broadcast %142 : vector<1x16x16xf32> to vector<4x16x16xf32>
    %144 = arith.mulf %143, %119 : vector<4x16x16xf32>
    %cst_41 = arith.constant dense<0.000000e+00> : vector<4x16xf32>
    %145 = vector.multi_reduction <add>, %144, %cst_41 [2] : vector<4x16x16xf32> to vector<4x16xf32>
    %146 = vector.shape_cast %145 : vector<4x16xf32> to vector<4x16x1xf32>
    %cst_42 = arith.constant dense<0xFF800000> : vector<16x1xf32>
    %147 = vector.multi_reduction <maximumf>, %146, %cst_42 [0] : vector<4x16x1xf32> to vector<16x1xf32>
    %148 = vector.shape_cast %147 : vector<16x1xf32> to vector<1x16x1xf32>
    %149 = vector.broadcast %148 : vector<1x16x1xf32> to vector<4x16x1xf32>
    %150 = arith.subf %146, %149 : vector<4x16x1xf32>
    %151 = math.exp %150 : vector<4x16x1xf32>
    %cst_43 = arith.constant dense<0.000000e+00> : vector<16x1xf32>
    %152 = vector.multi_reduction <add>, %151, %cst_43 [0] : vector<4x16x1xf32> to vector<16x1xf32>
    %153 = vector.shape_cast %152 : vector<16x1xf32> to vector<1x16x1xf32>
    %154 = tpu.reciprocal %153 {approx = true} : vector<1x16x1xf32> -> vector<1x16x1xf32>
    %155 = vector.broadcast %154 : vector<1x16x1xf32> to vector<4x16x1xf32>
    %156 = arith.mulf %151, %155 : vector<4x16x1xf32>
    %157 = vector.broadcast %156 : vector<4x16x1xf32> to vector<4x16x16xf32>
    %158 = arith.mulf %157, %121 : vector<4x16x16xf32>
    %cst_44 = arith.constant dense<0.000000e+00> : vector<16x16xf32>
    %159 = vector.multi_reduction <add>, %158, %cst_44 [0] : vector<4x16x16xf32> to vector<16x16xf32>
    %160 = arith.truncf %159 : vector<16x16xf32> to vector<16x16xbf16>
    %c16_45 = arith.constant 16 : index
    %c16_46 = arith.constant 16 : index
    %161 = vector.load %arg9[%c16_45, %c16_46] : memref<64x32xbf16, #tpu.memory_space<vmem>>, vector<16x16xbf16>
    tpu.vector_store %arg9[%c16_45, %c16_46], %160 {strides = array<i32>} : memref<64x32xbf16, #tpu.memory_space<vmem>>, vector<16x16xbf16>,
    %162 = vector.extract_strided_slice %117 {offsets = [2, 0, 0], sizes = [1, 16, 16], strides = [1, 1, 1]} : vector<4x16x16xf32> to vector<1x16x16xf32>
    %163 = vector.broadcast %162 : vector<1x16x16xf32> to vector<4x16x16xf32>
    %164 = arith.mulf %163, %119 : vector<4x16x16xf32>
    %cst_47 = arith.constant dense<0.000000e+00> : vector<4x16xf32>
    %165 = vector.multi_reduction <add>, %164, %cst_47 [2] : vector<4x16x16xf32> to vector<4x16xf32>
    %166 = vector.shape_cast %165 : vector<4x16xf32> to vector<4x16x1xf32>
    %cst_48 = arith.constant dense<0xFF800000> : vector<16x1xf32>
    %167 = vector.multi_reduction <maximumf>, %166, %cst_48 [0] : vector<4x16x1xf32> to vector<16x1xf32>
    %168 = vector.shape_cast %167 : vector<16x1xf32> to vector<1x16x1xf32>
    %169 = vector.broadcast %168 : vector<1x16x1xf32> to vector<4x16x1xf32>
    %170 = arith.subf %166, %169 : vector<4x16x1xf32>
    %171 = math.exp %170 : vector<4x16x1xf32>
    %cst_49 = arith.constant dense<0.000000e+00> : vector<16x1xf32>
    %172 = vector.multi_reduction <add>, %171, %cst_49 [0] : vector<4x16x1xf32> to vector<16x1xf32>
    %173 = vector.shape_cast %172 : vector<16x1xf32> to vector<1x16x1xf32>
    %174 = tpu.reciprocal %173 {approx = true} : vector<1x16x1xf32> -> vector<1x16x1xf32>
    %175 = vector.broadcast %174 : vector<1x16x1xf32> to vector<4x16x1xf32>
    %176 = arith.mulf %171, %175 : vector<4x16x1xf32>
    %177 = vector.broadcast %176 : vector<4x16x1xf32> to vector<4x16x16xf32>
    %178 = arith.mulf %177, %121 : vector<4x16x16xf32>
    %cst_50 = arith.constant dense<0.000000e+00> : vector<16x16xf32>
    %179 = vector.multi_reduction <add>, %178, %cst_50 [0] : vector<4x16x16xf32> to vector<16x16xf32>
    %180 = arith.truncf %179 : vector<16x16xf32> to vector<16x16xbf16>
    %c32_51 = arith.constant 32 : index
    %c16_52 = arith.constant 16 : index
    %181 = vector.load %arg9[%c32_51, %c16_52] : memref<64x32xbf16, #tpu.memory_space<vmem>>, vector<16x16xbf16>
    tpu.vector_store %arg9[%c32_51, %c16_52], %180 {strides = array<i32>} : memref<64x32xbf16, #tpu.memory_space<vmem>>, vector<16x16xbf16>,
    %182 = vector.extract_strided_slice %117 {offsets = [3, 0, 0], sizes = [1, 16, 16], strides = [1, 1, 1]} : vector<4x16x16xf32> to vector<1x16x16xf32>
    %183 = vector.broadcast %182 : vector<1x16x16xf32> to vector<4x16x16xf32>
    %184 = arith.mulf %183, %119 : vector<4x16x16xf32>
    %cst_53 = arith.constant dense<0.000000e+00> : vector<4x16xf32>
    %185 = vector.multi_reduction <add>, %184, %cst_53 [2] : vector<4x16x16xf32> to vector<4x16xf32>
    %186 = vector.shape_cast %185 : vector<4x16xf32> to vector<4x16x1xf32>
    %cst_54 = arith.constant dense<0xFF800000> : vector<16x1xf32>
    %187 = vector.multi_reduction <maximumf>, %186, %cst_54 [0] : vector<4x16x1xf32> to vector<16x1xf32>
    %188 = vector.shape_cast %187 : vector<16x1xf32> to vector<1x16x1xf32>
    %189 = vector.broadcast %188 : vector<1x16x1xf32> to vector<4x16x1xf32>
    %190 = arith.subf %186, %189 : vector<4x16x1xf32>
    %191 = math.exp %190 : vector<4x16x1xf32>
    %cst_55 = arith.constant dense<0.000000e+00> : vector<16x1xf32>
    %192 = vector.multi_reduction <add>, %191, %cst_55 [0] : vector<4x16x1xf32> to vector<16x1xf32>
    %193 = vector.shape_cast %192 : vector<16x1xf32> to vector<1x16x1xf32>
    %194 = tpu.reciprocal %193 {approx = true} : vector<1x16x1xf32> -> vector<1x16x1xf32>
    %195 = vector.broadcast %194 : vector<1x16x1xf32> to vector<4x16x1xf32>
    %196 = arith.mulf %191, %195 : vector<4x16x1xf32>
    %197 = vector.broadcast %196 : vector<4x16x1xf32> to vector<4x16x16xf32>
    %198 = arith.mulf %197, %121 : vector<4x16x16xf32>
    %cst_56 = arith.constant dense<0.000000e+00> : vector<16x16xf32>
    %199 = vector.multi_reduction <add>, %198, %cst_56 [0] : vector<4x16x16xf32> to vector<16x16xf32>
    %200 = arith.truncf %199 : vector<16x16xf32> to vector<16x16xbf16>
    %c48_57 = arith.constant 48 : index
    %c16_58 = arith.constant 16 : index
    %201 = vector.load %arg9[%c48_57, %c16_58] : memref<64x32xbf16, #tpu.memory_space<vmem>>, vector<16x16xbf16>
    tpu.vector_store %arg9[%c48_57, %c16_58], %200 {strides = array<i32>} : memref<64x32xbf16, #tpu.memory_space<vmem>>, vector<16x16xbf16>,
    %c0_59 = arith.constant 0 : index
    %c0_60 = arith.constant 0 : index
    %202 = vector.load %arg9[%c0_59, %c0_60] : memref<64x32xbf16, #tpu.memory_space<vmem>>, vector<64x32xbf16>
    %c0_61 = arith.constant 0 : index
    %c0_62 = arith.constant 0 : index
    %203 = vector.load %arg6[%c0_61, %c0_62] : memref<32x32xbf16, #tpu.memory_space<vmem>>, vector<32x32xbf16>
    %cst_63 = arith.constant dense<0.000000e+00> : vector<64x32xf32>
    %204 = tpu.matmul %202, %203, %cst_63 {dimension_numbers = #tpu.dot_dimension_numbers<[1], [0], [0], [1], [0, 0, 1, 1], [], []>} : vector<64x32xbf16>, vector<32x32xbf16>, vector<64x32xf32> -> vector<64x32xf32>
    %c0_64 = arith.constant 0 : index
    %c0_65 = arith.constant 0 : index
    %205 = vector.load %arg7[%c0_64, %c0_65] : memref<1x32xf32, #tpu.memory_space<vmem>>, vector<1x32xf32>
    %206 = vector.broadcast %205 : vector<1x32xf32> to vector<64x32xf32>
    %207 = arith.addf %204, %206 : vector<64x32xf32>
    %208 = arith.addf %207, %2 : vector<64x32xf32>
    %209 = vector.shape_cast %208 : vector<64x32xf32> to vector<4x16x32xf32>
    %c0_66 = arith.constant 0 : index
    %c0_67 = arith.constant 0 : index
    %c0_68 = arith.constant 0 : index
    %c0_69 = arith.constant 0 : index
    %210 = vector.load %arg8[%c0_66, %c0_67, %c0_68, %c0_69] : memref<1x4x16x32xf32, #tpu.memory_space<vmem>>, vector<1x4x16x32xf32>
    %211 = vector.shape_cast %210 : vector<1x4x16x32xf32> to vector<4x16x32xf32>
    %212 = vector.shape_cast %209 : vector<4x16x32xf32> to vector<1x4x16x32xf32>
    tpu.vector_store %arg8[%c0_66, %c0_67, %c0_68, %c0_69], %212 {strides = array<i32>} : memref<1x4x16x32xf32, #tpu.memory_space<vmem>>, vector<1x4x16x32xf32>,
    return
  }
  func.func @transform_0(%arg0: i32, %arg1: i32) -> (i32, i32, i32, i32) {
    %c0_i32 = arith.constant 0 : i32
    %c0_i32_0 = arith.constant 0 : i32
    %c0_i32_1 = arith.constant 0 : i32
    return %arg0, %c0_i32, %arg1, %c0_i32_0 : i32, i32, i32, i32
  }
  func.func @transform_1(%arg0: i32, %arg1: i32) -> (i32, i32) {
    %c0_i32 = arith.constant 0 : i32
    %c0_i32_0 = arith.constant 0 : i32
    %c0_i32_1 = arith.constant 0 : i32
    return %c0_i32, %c0_i32_0 : i32, i32
  }
  func.func @transform_2(%arg0: i32, %arg1: i32) -> (i32, i32) {
    %c0_i32 = arith.constant 0 : i32
    %c0_i32_0 = arith.constant 0 : i32
    %c0_i32_1 = arith.constant 0 : i32
    return %c0_i32, %c0_i32_0 : i32, i32
  }
  func.func @transform_3(%arg0: i32, %arg1: i32) -> (i32, i32) {
    %c0_i32 = arith.constant 0 : i32
    %c0_i32_0 = arith.constant 0 : i32
    %c0_i32_1 = arith.constant 0 : i32
    return %c0_i32, %c0_i32_0 : i32, i32
  }
  func.func @transform_4(%arg0: i32, %arg1: i32) -> (i32, i32) {
    %c0_i32 = arith.constant 0 : i32
    %c0_i32_0 = arith.constant 0 : i32
    %c0_i32_1 = arith.constant 0 : i32
    return %c0_i32, %c0_i32_0 : i32, i32
  }
  func.func @transform_5(%arg0: i32, %arg1: i32) -> (i32, i32) {
    %c0_i32 = arith.constant 0 : i32
    %c0_i32_0 = arith.constant 0 : i32
    %c0_i32_1 = arith.constant 0 : i32
    return %c0_i32, %c0_i32_0 : i32, i32
  }
  func.func @transform_6(%arg0: i32, %arg1: i32) -> (i32, i32, i32, i32) {
    %c0_i32 = arith.constant 0 : i32
    %c0_i32_0 = arith.constant 0 : i32
    %c0_i32_1 = arith.constant 0 : i32
    return %arg0, %c0_i32, %arg1, %c0_i32_0 : i32, i32, i32, i32
  }
}

module attributes {stable_mosaic.version = 11 : i64} {
  func.func @_ff_kernel(%arg0: i32, %arg1: i32, %arg2: memref<128x32xf32, #tpu.memory_space<vmem>>, %arg3: memref<1x32xf32, #tpu.memory_space<vmem>>, %arg4: memref<1x32xf32, #tpu.memory_space<vmem>>, %arg5: memref<32x128xbf16, #tpu.memory_space<vmem>>, %arg6: memref<1x128xf32, #tpu.memory_space<vmem>>, %arg7: memref<32x128xbf16, #tpu.memory_space<vmem>>, %arg8: memref<1x128xf32, #tpu.memory_space<vmem>>, %arg9: memref<128x32xbf16, #tpu.memory_space<vmem>>, %arg10: memref<1x32xf32, #tpu.memory_space<vmem>>, %arg11: memref<128x32xf32, #tpu.memory_space<vmem>>, %arg12: memref<128x32xbf16, #tpu.memory_space<vmem>>, %arg13: memref<128x32xf32, #tpu.memory_space<vmem>>) attributes {dimension_semantics = [#tpu.dimension_semantics<parallel>, #tpu.dimension_semantics<arbitrary>], iteration_bounds = array<i64: 1, 1>, scalar_prefetch = 0 : i64, scratch_operands = 2 : i64, tpu.core_type = #tpu.core_type<tc>, window_params = [{transform_indices = @transform_0, window_bounds = array<i64: 128, 32>}, {pipeline_mode = #tpu.pipeline_mode<synchronous>, transform_indices = @transform_1, window_bounds = array<i64: 1, 32>}, {pipeline_mode = #tpu.pipeline_mode<synchronous>, transform_indices = @transform_2, window_bounds = array<i64: 1, 32>}, {transform_indices = @transform_3, window_bounds = array<i64: 32, 128>}, {transform_indices = @transform_4, window_bounds = array<i64: 1, 128>}, {transform_indices = @transform_5, window_bounds = array<i64: 32, 128>}, {transform_indices = @transform_6, window_bounds = array<i64: 1, 128>}, {transform_indices = @transform_7, window_bounds = array<i64: 128, 32>}, {pipeline_mode = #tpu.pipeline_mode<synchronous>, transform_indices = @transform_8, window_bounds = array<i64: 1, 32>}, {transform_indices = @transform_9, window_bounds = array<i64: 128, 32>}]} {
    %c0_i32 = arith.constant 0 : i32
    %0 = arith.cmpi eq, %arg1, %c0_i32 : i32
    %1 = arith.extui %0 : i1 to i32
    %c0_i32_0 = arith.constant 0 : i32
    %2 = arith.cmpi ne, %1, %c0_i32_0 : i32
    scf.if %2 {
      %c0_24 = arith.constant 0 : index
      %c0_25 = arith.constant 0 : index
      %37 = vector.load %arg2[%c0_24, %c0_25] : memref<128x32xf32, #tpu.memory_space<vmem>>, vector<128x32xf32>
      %c0_26 = arith.constant 0 : index
      %c0_27 = arith.constant 0 : index
      %38 = vector.load %arg3[%c0_26, %c0_27] : memref<1x32xf32, #tpu.memory_space<vmem>>, vector<1x32xf32>
      %c0_28 = arith.constant 0 : index
      %c0_29 = arith.constant 0 : index
      %39 = vector.load %arg4[%c0_28, %c0_29] : memref<1x32xf32, #tpu.memory_space<vmem>>, vector<1x32xf32>
      %cst_30 = arith.constant dense<0.000000e+00> : vector<128xf32>
      %40 = vector.multi_reduction <add>, %37, %cst_30 [1] : vector<128x32xf32> to vector<128xf32>
      %41 = vector.shape_cast %40 : vector<128xf32> to vector<128x1xf32>
      %cst_31 = arith.constant 3.200000e+01 : f32
      %42 = vector.broadcast %cst_31 : f32 to vector<128x1xf32>
      %43 = arith.divf %41, %42 : vector<128x1xf32>
      %44 = vector.broadcast %43 : vector<128x1xf32> to vector<128x32xf32>
      %45 = arith.subf %37, %44 : vector<128x32xf32>
      %46 = arith.mulf %45, %45 : vector<128x32xf32>
      %cst_32 = arith.constant dense<0.000000e+00> : vector<128xf32>
      %47 = vector.multi_reduction <add>, %46, %cst_32 [1] : vector<128x32xf32> to vector<128xf32>
      %48 = vector.shape_cast %47 : vector<128xf32> to vector<128x1xf32>
      %cst_33 = arith.constant 3.200000e+01 : f32
      %49 = vector.broadcast %cst_33 : f32 to vector<128x1xf32>
      %50 = arith.divf %48, %49 : vector<128x1xf32>
      %51 = vector.broadcast %43 : vector<128x1xf32> to vector<128x32xf32>
      %52 = arith.subf %37, %51 : vector<128x32xf32>
      %cst_34 = arith.constant 9.99999974E-6 : f32
      %53 = vector.broadcast %cst_34 : f32 to vector<128x1xf32>
      %54 = arith.addf %50, %53 : vector<128x1xf32>
      %55 = math.rsqrt %54 : vector<128x1xf32>
      %56 = vector.broadcast %55 : vector<128x1xf32> to vector<128x32xf32>
      %57 = arith.mulf %52, %56 : vector<128x32xf32>
      %58 = vector.broadcast %38 : vector<1x32xf32> to vector<128x32xf32>
      %59 = arith.mulf %57, %58 : vector<128x32xf32>
      %60 = vector.broadcast %39 : vector<1x32xf32> to vector<128x32xf32>
      %61 = arith.addf %59, %60 : vector<128x32xf32>
      %62 = arith.truncf %61 : vector<128x32xf32> to vector<128x32xbf16>
      %c0_35 = arith.constant 0 : index
      %c0_36 = arith.constant 0 : index
      %63 = vector.load %arg12[%c0_35, %c0_36] : memref<128x32xbf16, #tpu.memory_space<vmem>>, vector<128x32xbf16>
      tpu.vector_store %arg12[%c0_35, %c0_36], %62 {strides = array<i32>} : memref<128x32xbf16, #tpu.memory_space<vmem>>, vector<128x32xbf16>,
      %cst_37 = arith.constant 0.000000e+00 : f32
      %64 = vector.broadcast %cst_37 : f32 to vector<128x32xf32>
      %c0_38 = arith.constant 0 : index
      %c0_39 = arith.constant 0 : index
      %65 = vector.load %arg13[%c0_38, %c0_39] : memref<128x32xf32, #tpu.memory_space<vmem>>, vector<128x32xf32>
      tpu.vector_store %arg13[%c0_38, %c0_39], %64 {strides = array<i32>} : memref<128x32xf32, #tpu.memory_space<vmem>>, vector<128x32xf32>,
    } else {
    }
    %c0 = arith.constant 0 : index
    %c0_1 = arith.constant 0 : index
    %3 = vector.load %arg12[%c0, %c0_1] : memref<128x32xbf16, #tpu.memory_space<vmem>>, vector<128x32xbf16>
    %c0_2 = arith.constant 0 : index
    %c0_3 = arith.constant 0 : index
    %4 = vector.load %arg5[%c0_2, %c0_3] : memref<32x128xbf16, #tpu.memory_space<vmem>>, vector<32x128xbf16>
    %cst = arith.constant dense<0.000000e+00> : vector<128x128xf32>
    %5 = tpu.matmul %3, %4, %cst {dimension_numbers = #tpu.dot_dimension_numbers<[1], [0], [0], [1], [0, 0, 1, 1], [], []>} : vector<128x32xbf16>, vector<32x128xbf16>, vector<128x128xf32> -> vector<128x128xf32>
    %c0_4 = arith.constant 0 : index
    %c0_5 = arith.constant 0 : index
    %6 = vector.load %arg6[%c0_4, %c0_5] : memref<1x128xf32, #tpu.memory_space<vmem>>, vector<1x128xf32>
    %7 = vector.broadcast %6 : vector<1x128xf32> to vector<128x128xf32>
    %8 = arith.addf %5, %7 : vector<128x128xf32>
    %c0_6 = arith.constant 0 : index
    %c0_7 = arith.constant 0 : index
    %9 = vector.load %arg7[%c0_6, %c0_7] : memref<32x128xbf16, #tpu.memory_space<vmem>>, vector<32x128xbf16>
    %cst_8 = arith.constant dense<0.000000e+00> : vector<128x128xf32>
    %10 = tpu.matmul %3, %9, %cst_8 {dimension_numbers = #tpu.dot_dimension_numbers<[1], [0], [0], [1], [0, 0, 1, 1], [], []>} : vector<128x32xbf16>, vector<32x128xbf16>, vector<128x128xf32> -> vector<128x128xf32>
    %c0_9 = arith.constant 0 : index
    %c0_10 = arith.constant 0 : index
    %11 = vector.load %arg8[%c0_9, %c0_10] : memref<1x128xf32, #tpu.memory_space<vmem>>, vector<1x128xf32>
    %12 = vector.broadcast %11 : vector<1x128xf32> to vector<128x128xf32>
    %13 = arith.addf %10, %12 : vector<128x128xf32>
    %cst_11 = arith.constant 5.000000e-01 : f32
    %14 = vector.broadcast %cst_11 : f32 to vector<128x128xf32>
    %15 = arith.mulf %14, %13 : vector<128x128xf32>
    %cst_12 = arith.constant 4.471500e-02 : f32
    %16 = vector.broadcast %cst_12 : f32 to vector<128x128xf32>
    %17 = arith.mulf %16, %13 : vector<128x128xf32>
    %18 = arith.mulf %17, %13 : vector<128x128xf32>
    %19 = arith.mulf %18, %13 : vector<128x128xf32>
    %20 = arith.addf %13, %19 : vector<128x128xf32>
    %cst_13 = arith.constant 0.797884583 : f32
    %21 = vector.broadcast %cst_13 : f32 to vector<128x128xf32>
    %22 = arith.mulf %21, %20 : vector<128x128xf32>
    %23 = math.tanh %22 : vector<128x128xf32>
    %cst_14 = arith.constant 1.000000e+00 : f32
    %24 = vector.broadcast %cst_14 : f32 to vector<128x128xf32>
    %25 = arith.addf %24, %23 : vector<128x128xf32>
    %26 = arith.mulf %15, %25 : vector<128x128xf32>
    %27 = arith.mulf %8, %26 : vector<128x128xf32>
    %28 = arith.truncf %27 : vector<128x128xf32> to vector<128x128xbf16>
    %c0_15 = arith.constant 0 : index
    %c0_16 = arith.constant 0 : index
    %29 = vector.load %arg13[%c0_15, %c0_16] : memref<128x32xf32, #tpu.memory_space<vmem>>, vector<128x32xf32>
    %c0_17 = arith.constant 0 : index
    %c0_18 = arith.constant 0 : index
    %30 = vector.load %arg9[%c0_17, %c0_18] : memref<128x32xbf16, #tpu.memory_space<vmem>>, vector<128x32xbf16>
    %cst_19 = arith.constant dense<0.000000e+00> : vector<128x32xf32>
    %31 = tpu.matmul %28, %30, %cst_19 {dimension_numbers = #tpu.dot_dimension_numbers<[1], [0], [0], [1], [0, 0, 1, 1], [], []>} : vector<128x128xbf16>, vector<128x32xbf16>, vector<128x32xf32> -> vector<128x32xf32>
    %32 = arith.addf %29, %31 : vector<128x32xf32>
    %c0_20 = arith.constant 0 : index
    %c0_21 = arith.constant 0 : index
    %33 = vector.load %arg13[%c0_20, %c0_21] : memref<128x32xf32, #tpu.memory_space<vmem>>, vector<128x32xf32>
    tpu.vector_store %arg13[%c0_20, %c0_21], %32 {strides = array<i32>} : memref<128x32xf32, #tpu.memory_space<vmem>>, vector<128x32xf32>,
    %c0_i32_22 = arith.constant 0 : i32
    %34 = arith.cmpi eq, %arg1, %c0_i32_22 : i32
    %35 = arith.extui %34 : i1 to i32
    %c0_i32_23 = arith.constant 0 : i32
    %36 = arith.cmpi ne, %35, %c0_i32_23 : i32
    scf.if %36 {
      %c0_24 = arith.constant 0 : index
      %c0_25 = arith.constant 0 : index
      %37 = vector.load %arg13[%c0_24, %c0_25] : memref<128x32xf32, #tpu.memory_space<vmem>>, vector<128x32xf32>
      %c0_26 = arith.constant 0 : index
      %c0_27 = arith.constant 0 : index
      %38 = vector.load %arg10[%c0_26, %c0_27] : memref<1x32xf32, #tpu.memory_space<vmem>>, vector<1x32xf32>
      %39 = vector.broadcast %38 : vector<1x32xf32> to vector<128x32xf32>
      %40 = arith.addf %37, %39 : vector<128x32xf32>
      %c0_28 = arith.constant 0 : index
      %c0_29 = arith.constant 0 : index
      %41 = vector.load %arg2[%c0_28, %c0_29] : memref<128x32xf32, #tpu.memory_space<vmem>>, vector<128x32xf32>
      %42 = arith.addf %40, %41 : vector<128x32xf32>
      %c0_30 = arith.constant 0 : index
      %c0_31 = arith.constant 0 : index
      %43 = vector.load %arg11[%c0_30, %c0_31] : memref<128x32xf32, #tpu.memory_space<vmem>>, vector<128x32xf32>
      tpu.vector_store %arg11[%c0_30, %c0_31], %42 {strides = array<i32>} : memref<128x32xf32, #tpu.memory_space<vmem>>, vector<128x32xf32>,
    } else {
    }
    return
  }
  func.func @transform_0(%arg0: i32, %arg1: i32) -> (i32, i32) {
    %c0_i32 = arith.constant 0 : i32
    %c0_i32_0 = arith.constant 0 : i32
    return %arg0, %c0_i32 : i32, i32
  }
  func.func @transform_1(%arg0: i32, %arg1: i32) -> (i32, i32) {
    %c0_i32 = arith.constant 0 : i32
    %c0_i32_0 = arith.constant 0 : i32
    %c0_i32_1 = arith.constant 0 : i32
    return %c0_i32, %c0_i32_0 : i32, i32
  }
  func.func @transform_2(%arg0: i32, %arg1: i32) -> (i32, i32) {
    %c0_i32 = arith.constant 0 : i32
    %c0_i32_0 = arith.constant 0 : i32
    %c0_i32_1 = arith.constant 0 : i32
    return %c0_i32, %c0_i32_0 : i32, i32
  }
  func.func @transform_3(%arg0: i32, %arg1: i32) -> (i32, i32) {
    %c0_i32 = arith.constant 0 : i32
    %c0_i32_0 = arith.constant 0 : i32
    return %c0_i32, %arg1 : i32, i32
  }
  func.func @transform_4(%arg0: i32, %arg1: i32) -> (i32, i32) {
    %c0_i32 = arith.constant 0 : i32
    %c0_i32_0 = arith.constant 0 : i32
    return %c0_i32, %arg1 : i32, i32
  }
  func.func @transform_5(%arg0: i32, %arg1: i32) -> (i32, i32) {
    %c0_i32 = arith.constant 0 : i32
    %c0_i32_0 = arith.constant 0 : i32
    return %c0_i32, %arg1 : i32, i32
  }
  func.func @transform_6(%arg0: i32, %arg1: i32) -> (i32, i32) {
    %c0_i32 = arith.constant 0 : i32
    %c0_i32_0 = arith.constant 0 : i32
    return %c0_i32, %arg1 : i32, i32
  }
  func.func @transform_7(%arg0: i32, %arg1: i32) -> (i32, i32) {
    %c0_i32 = arith.constant 0 : i32
    %c0_i32_0 = arith.constant 0 : i32
    return %arg1, %c0_i32 : i32, i32
  }
  func.func @transform_8(%arg0: i32, %arg1: i32) -> (i32, i32) {
    %c0_i32 = arith.constant 0 : i32
    %c0_i32_0 = arith.constant 0 : i32
    %c0_i32_1 = arith.constant 0 : i32
    return %c0_i32, %c0_i32_0 : i32, i32
  }
  func.func @transform_9(%arg0: i32, %arg1: i32) -> (i32, i32) {
    %c0_i32 = arith.constant 0 : i32
    %c0_i32_0 = arith.constant 0 : i32
    return %arg0, %c0_i32 : i32, i32
  }
}

module attributes {stable_mosaic.version = 11 : i64} {
  func.func @_attn1_kernel(%arg0: i32, %arg1: memref<4x16x32xf32, #tpu.memory_space<vmem>>, %arg2: memref<4x8x32xf32, #tpu.memory_space<vmem>>, %arg3: memref<1x32xf32, #tpu.memory_space<vmem>>, %arg4: memref<1x32xf32, #tpu.memory_space<vmem>>, %arg5: memref<32x32xbf16, #tpu.memory_space<vmem>>, %arg6: memref<32x64xbf16, #tpu.memory_space<vmem>>, %arg7: memref<32x32xbf16, #tpu.memory_space<vmem>>, %arg8: memref<1x32xf32, #tpu.memory_space<vmem>>, %arg9: memref<4x16x32xf32, #tpu.memory_space<vmem>>, %arg10: memref<64x32xbf16, #tpu.memory_space<vmem>>) attributes {dimension_semantics = [#tpu.dimension_semantics<parallel>], iteration_bounds = array<i64: 2>, scalar_prefetch = 0 : i64, scratch_operands = 1 : i64, tpu.core_type = #tpu.core_type<tc>, window_params = [{transform_indices = @transform_0, window_bounds = array<i64: 4, 16, 32>}, {transform_indices = @transform_1, window_bounds = array<i64: 4, 8, 32>}, {pipeline_mode = #tpu.pipeline_mode<synchronous>, transform_indices = @transform_2, window_bounds = array<i64: 1, 32>}, {pipeline_mode = #tpu.pipeline_mode<synchronous>, transform_indices = @transform_3, window_bounds = array<i64: 1, 32>}, {pipeline_mode = #tpu.pipeline_mode<synchronous>, transform_indices = @transform_4, window_bounds = array<i64: 32, 32>}, {pipeline_mode = #tpu.pipeline_mode<synchronous>, transform_indices = @transform_5, window_bounds = array<i64: 32, 64>}, {pipeline_mode = #tpu.pipeline_mode<synchronous>, transform_indices = @transform_6, window_bounds = array<i64: 32, 32>}, {pipeline_mode = #tpu.pipeline_mode<synchronous>, transform_indices = @transform_7, window_bounds = array<i64: 1, 32>}, {transform_indices = @transform_8, window_bounds = array<i64: 4, 16, 32>}]} {
    %c0 = arith.constant 0 : index
    %c0_0 = arith.constant 0 : index
    %c0_1 = arith.constant 0 : index
    %0 = vector.load %arg1[%c0, %c0_0, %c0_1] : memref<4x16x32xf32, #tpu.memory_space<vmem>>, vector<4x16x32xf32>
    %1 = vector.shape_cast %0 : vector<4x16x32xf32> to vector<64x32xf32>
    %c0_2 = arith.constant 0 : index
    %c0_3 = arith.constant 0 : index
    %2 = vector.load %arg3[%c0_2, %c0_3] : memref<1x32xf32, #tpu.memory_space<vmem>>, vector<1x32xf32>
    %c0_4 = arith.constant 0 : index
    %c0_5 = arith.constant 0 : index
    %3 = vector.load %arg4[%c0_4, %c0_5] : memref<1x32xf32, #tpu.memory_space<vmem>>, vector<1x32xf32>
    %cst = arith.constant dense<0.000000e+00> : vector<64xf32>
    %4 = vector.multi_reduction <add>, %1, %cst [1] : vector<64x32xf32> to vector<64xf32>
    %5 = vector.shape_cast %4 : vector<64xf32> to vector<64x1xf32>
    %cst_6 = arith.constant 3.200000e+01 : f32
    %6 = vector.broadcast %cst_6 : f32 to vector<64x1xf32>
    %7 = arith.divf %5, %6 : vector<64x1xf32>
    %8 = vector.broadcast %7 : vector<64x1xf32> to vector<64x32xf32>
    %9 = arith.subf %1, %8 : vector<64x32xf32>
    %10 = arith.mulf %9, %9 : vector<64x32xf32>
    %cst_7 = arith.constant dense<0.000000e+00> : vector<64xf32>
    %11 = vector.multi_reduction <add>, %10, %cst_7 [1] : vector<64x32xf32> to vector<64xf32>
    %12 = vector.shape_cast %11 : vector<64xf32> to vector<64x1xf32>
    %cst_8 = arith.constant 3.200000e+01 : f32
    %13 = vector.broadcast %cst_8 : f32 to vector<64x1xf32>
    %14 = arith.divf %12, %13 : vector<64x1xf32>
    %15 = vector.broadcast %7 : vector<64x1xf32> to vector<64x32xf32>
    %16 = arith.subf %1, %15 : vector<64x32xf32>
    %cst_9 = arith.constant 9.99999974E-6 : f32
    %17 = vector.broadcast %cst_9 : f32 to vector<64x1xf32>
    %18 = arith.addf %14, %17 : vector<64x1xf32>
    %19 = math.rsqrt %18 : vector<64x1xf32>
    %20 = vector.broadcast %19 : vector<64x1xf32> to vector<64x32xf32>
    %21 = arith.mulf %16, %20 : vector<64x32xf32>
    %22 = vector.broadcast %2 : vector<1x32xf32> to vector<64x32xf32>
    %23 = arith.mulf %21, %22 : vector<64x32xf32>
    %24 = vector.broadcast %3 : vector<1x32xf32> to vector<64x32xf32>
    %25 = arith.addf %23, %24 : vector<64x32xf32>
    %26 = arith.truncf %25 : vector<64x32xf32> to vector<64x32xbf16>
    %c0_10 = arith.constant 0 : index
    %c0_11 = arith.constant 0 : index
    %c0_12 = arith.constant 0 : index
    %27 = vector.load %arg2[%c0_10, %c0_11, %c0_12] : memref<4x8x32xf32, #tpu.memory_space<vmem>>, vector<4x8x32xf32>
    %28 = vector.shape_cast %27 : vector<4x8x32xf32> to vector<32x32xf32>
    %29 = arith.truncf %28 : vector<32x32xf32> to vector<32x32xbf16>
    %c0_13 = arith.constant 0 : index
    %c0_14 = arith.constant 0 : index
    %30 = vector.load %arg5[%c0_13, %c0_14] : memref<32x32xbf16, #tpu.memory_space<vmem>>, vector<32x32xbf16>
    %cst_15 = arith.constant dense<0.000000e+00> : vector<64x32xf32>
    %31 = tpu.matmul %26, %30, %cst_15 {dimension_numbers = #tpu.dot_dimension_numbers<[1], [0], [0], [1], [0, 0, 1, 1], [], []>} : vector<64x32xbf16>, vector<32x32xbf16>, vector<64x32xf32> -> vector<64x32xf32>
    %32 = arith.truncf %31 : vector<64x32xf32> to vector<64x32xbf16>
    %c0_16 = arith.constant 0 : index
    %c0_17 = arith.constant 0 : index
    %33 = vector.load %arg6[%c0_16, %c0_17] : memref<32x64xbf16, #tpu.memory_space<vmem>>, vector<32x64xbf16>
    %cst_18 = arith.constant dense<0.000000e+00> : vector<32x64xf32>
    %34 = tpu.matmul %29, %33, %cst_18 {dimension_numbers = #tpu.dot_dimension_numbers<[1], [0], [0], [1], [0, 0, 1, 1], [], []>} : vector<32x32xbf16>, vector<32x64xbf16>, vector<32x64xf32> -> vector<32x64xf32>
    %35 = vector.extract_strided_slice %34 {offsets = [0, 0], sizes = [32, 32], strides = [1, 1]} : vector<32x64xf32> to vector<32x32xf32>
    %36 = arith.truncf %35 : vector<32x32xf32> to vector<32x32xbf16>
    %37 = vector.extract_strided_slice %34 {offsets = [0, 32], sizes = [32, 32], strides = [1, 1]} : vector<32x64xf32> to vector<32x32xf32>
    %38 = arith.truncf %37 : vector<32x32xf32> to vector<32x32xbf16>
    %39 = vector.extract_strided_slice %32 {offsets = [0, 0], sizes = [16, 32], strides = [1, 1]} : vector<64x32xbf16> to vector<16x32xbf16>
    %40 = vector.extract_strided_slice %36 {offsets = [0, 0], sizes = [8, 32], strides = [1, 1]} : vector<32x32xbf16> to vector<8x32xbf16>
    %41 = vector.extract_strided_slice %38 {offsets = [0, 0], sizes = [8, 32], strides = [1, 1]} : vector<32x32xbf16> to vector<8x32xbf16>
    %42 = vector.extract_strided_slice %39 {offsets = [0, 0], sizes = [16, 16], strides = [1, 1]} : vector<16x32xbf16> to vector<16x16xbf16>
    %43 = vector.extract_strided_slice %40 {offsets = [0, 0], sizes = [8, 16], strides = [1, 1]} : vector<8x32xbf16> to vector<8x16xbf16>
    %44 = vector.extract_strided_slice %41 {offsets = [0, 0], sizes = [8, 16], strides = [1, 1]} : vector<8x32xbf16> to vector<8x16xbf16>
    %cst_19 = arith.constant dense<0.000000e+00> : vector<16x8xf32>
    %45 = tpu.matmul %42, %43, %cst_19 {dimension_numbers = #tpu.dot_dimension_numbers<[1], [1], [0], [0], [0, 0, 1, 0], [], []>} : vector<16x16xbf16>, vector<8x16xbf16>, vector<16x8xf32> -> vector<16x8xf32>
    %cst_20 = arith.constant dense<0xFF800000> : vector<16xf32>
    %46 = vector.multi_reduction <maximumf>, %45, %cst_20 [1] : vector<16x8xf32> to vector<16xf32>
    %47 = vector.shape_cast %46 : vector<16xf32> to vector<16x1xf32>
    %48 = vector.broadcast %47 : vector<16x1xf32> to vector<16x8xf32>
    %49 = arith.subf %45, %48 : vector<16x8xf32>
    %50 = math.exp %49 : vector<16x8xf32>
    %cst_21 = arith.constant dense<0.000000e+00> : vector<16xf32>
    %51 = vector.multi_reduction <add>, %50, %cst_21 [1] : vector<16x8xf32> to vector<16xf32>
    %52 = vector.shape_cast %51 : vector<16xf32> to vector<16x1xf32>
    %53 = tpu.reciprocal %52 {approx = true} : vector<16x1xf32> -> vector<16x1xf32>
    %54 = vector.broadcast %53 : vector<16x1xf32> to vector<16x8xf32>
    %55 = arith.mulf %50, %54 : vector<16x8xf32>
    %56 = arith.truncf %55 : vector<16x8xf32> to vector<16x8xbf16>
    %cst_22 = arith.constant dense<0.000000e+00> : vector<16x16xf32>
    %57 = tpu.matmul %56, %44, %cst_22 {dimension_numbers = #tpu.dot_dimension_numbers<[1], [0], [0], [1], [0, 0, 1, 1], [], []>} : vector<16x8xbf16>, vector<8x16xbf16>, vector<16x16xf32> -> vector<16x16xf32>
    %58 = arith.truncf %57 : vector<16x16xf32> to vector<16x16xbf16>
    %c0_23 = arith.constant 0 : index
    %c0_24 = arith.constant 0 : index
    %59 = vector.load %arg10[%c0_23, %c0_24] : memref<64x32xbf16, #tpu.memory_space<vmem>>, vector<16x16xbf16>
    tpu.vector_store %arg10[%c0_23, %c0_24], %58 {strides = array<i32>} : memref<64x32xbf16, #tpu.memory_space<vmem>>, vector<16x16xbf16>,
    %60 = vector.extract_strided_slice %39 {offsets = [0, 16], sizes = [16, 16], strides = [1, 1]} : vector<16x32xbf16> to vector<16x16xbf16>
    %61 = vector.extract_strided_slice %40 {offsets = [0, 16], sizes = [8, 16], strides = [1, 1]} : vector<8x32xbf16> to vector<8x16xbf16>
    %62 = vector.extract_strided_slice %41 {offsets = [0, 16], sizes = [8, 16], strides = [1, 1]} : vector<8x32xbf16> to vector<8x16xbf16>
    %cst_25 = arith.constant dense<0.000000e+00> : vector<16x8xf32>
    %63 = tpu.matmul %60, %61, %cst_25 {dimension_numbers = #tpu.dot_dimension_numbers<[1], [1], [0], [0], [0, 0, 1, 0], [], []>} : vector<16x16xbf16>, vector<8x16xbf16>, vector<16x8xf32> -> vector<16x8xf32>
    %cst_26 = arith.constant dense<0xFF800000> : vector<16xf32>
    %64 = vector.multi_reduction <maximumf>, %63, %cst_26 [1] : vector<16x8xf32> to vector<16xf32>
    %65 = vector.shape_cast %64 : vector<16xf32> to vector<16x1xf32>
    %66 = vector.broadcast %65 : vector<16x1xf32> to vector<16x8xf32>
    %67 = arith.subf %63, %66 : vector<16x8xf32>
    %68 = math.exp %67 : vector<16x8xf32>
    %cst_27 = arith.constant dense<0.000000e+00> : vector<16xf32>
    %69 = vector.multi_reduction <add>, %68, %cst_27 [1] : vector<16x8xf32> to vector<16xf32>
    %70 = vector.shape_cast %69 : vector<16xf32> to vector<16x1xf32>
    %71 = tpu.reciprocal %70 {approx = true} : vector<16x1xf32> -> vector<16x1xf32>
    %72 = vector.broadcast %71 : vector<16x1xf32> to vector<16x8xf32>
    %73 = arith.mulf %68, %72 : vector<16x8xf32>
    %74 = arith.truncf %73 : vector<16x8xf32> to vector<16x8xbf16>
    %cst_28 = arith.constant dense<0.000000e+00> : vector<16x16xf32>
    %75 = tpu.matmul %74, %62, %cst_28 {dimension_numbers = #tpu.dot_dimension_numbers<[1], [0], [0], [1], [0, 0, 1, 1], [], []>} : vector<16x8xbf16>, vector<8x16xbf16>, vector<16x16xf32> -> vector<16x16xf32>
    %76 = arith.truncf %75 : vector<16x16xf32> to vector<16x16xbf16>
    %c0_29 = arith.constant 0 : index
    %c16 = arith.constant 16 : index
    %77 = vector.load %arg10[%c0_29, %c16] : memref<64x32xbf16, #tpu.memory_space<vmem>>, vector<16x16xbf16>
    tpu.vector_store %arg10[%c0_29, %c16], %76 {strides = array<i32>} : memref<64x32xbf16, #tpu.memory_space<vmem>>, vector<16x16xbf16>,
    %78 = vector.extract_strided_slice %32 {offsets = [16, 0], sizes = [16, 32], strides = [1, 1]} : vector<64x32xbf16> to vector<16x32xbf16>
    %79 = vector.extract_strided_slice %36 {offsets = [8, 0], sizes = [8, 32], strides = [1, 1]} : vector<32x32xbf16> to vector<8x32xbf16>
    %80 = vector.extract_strided_slice %38 {offsets = [8, 0], sizes = [8, 32], strides = [1, 1]} : vector<32x32xbf16> to vector<8x32xbf16>
    %81 = vector.extract_strided_slice %78 {offsets = [0, 0], sizes = [16, 16], strides = [1, 1]} : vector<16x32xbf16> to vector<16x16xbf16>
    %82 = vector.extract_strided_slice %79 {offsets = [0, 0], sizes = [8, 16], strides = [1, 1]} : vector<8x32xbf16> to vector<8x16xbf16>
    %83 = vector.extract_strided_slice %80 {offsets = [0, 0], sizes = [8, 16], strides = [1, 1]} : vector<8x32xbf16> to vector<8x16xbf16>
    %cst_30 = arith.constant dense<0.000000e+00> : vector<16x8xf32>
    %84 = tpu.matmul %81, %82, %cst_30 {dimension_numbers = #tpu.dot_dimension_numbers<[1], [1], [0], [0], [0, 0, 1, 0], [], []>} : vector<16x16xbf16>, vector<8x16xbf16>, vector<16x8xf32> -> vector<16x8xf32>
    %cst_31 = arith.constant dense<0xFF800000> : vector<16xf32>
    %85 = vector.multi_reduction <maximumf>, %84, %cst_31 [1] : vector<16x8xf32> to vector<16xf32>
    %86 = vector.shape_cast %85 : vector<16xf32> to vector<16x1xf32>
    %87 = vector.broadcast %86 : vector<16x1xf32> to vector<16x8xf32>
    %88 = arith.subf %84, %87 : vector<16x8xf32>
    %89 = math.exp %88 : vector<16x8xf32>
    %cst_32 = arith.constant dense<0.000000e+00> : vector<16xf32>
    %90 = vector.multi_reduction <add>, %89, %cst_32 [1] : vector<16x8xf32> to vector<16xf32>
    %91 = vector.shape_cast %90 : vector<16xf32> to vector<16x1xf32>
    %92 = tpu.reciprocal %91 {approx = true} : vector<16x1xf32> -> vector<16x1xf32>
    %93 = vector.broadcast %92 : vector<16x1xf32> to vector<16x8xf32>
    %94 = arith.mulf %89, %93 : vector<16x8xf32>
    %95 = arith.truncf %94 : vector<16x8xf32> to vector<16x8xbf16>
    %cst_33 = arith.constant dense<0.000000e+00> : vector<16x16xf32>
    %96 = tpu.matmul %95, %83, %cst_33 {dimension_numbers = #tpu.dot_dimension_numbers<[1], [0], [0], [1], [0, 0, 1, 1], [], []>} : vector<16x8xbf16>, vector<8x16xbf16>, vector<16x16xf32> -> vector<16x16xf32>
    %97 = arith.truncf %96 : vector<16x16xf32> to vector<16x16xbf16>
    %c16_34 = arith.constant 16 : index
    %c0_35 = arith.constant 0 : index
    %98 = vector.load %arg10[%c16_34, %c0_35] : memref<64x32xbf16, #tpu.memory_space<vmem>>, vector<16x16xbf16>
    tpu.vector_store %arg10[%c16_34, %c0_35], %97 {strides = array<i32>} : memref<64x32xbf16, #tpu.memory_space<vmem>>, vector<16x16xbf16>,
    %99 = vector.extract_strided_slice %78 {offsets = [0, 16], sizes = [16, 16], strides = [1, 1]} : vector<16x32xbf16> to vector<16x16xbf16>
    %100 = vector.extract_strided_slice %79 {offsets = [0, 16], sizes = [8, 16], strides = [1, 1]} : vector<8x32xbf16> to vector<8x16xbf16>
    %101 = vector.extract_strided_slice %80 {offsets = [0, 16], sizes = [8, 16], strides = [1, 1]} : vector<8x32xbf16> to vector<8x16xbf16>
    %cst_36 = arith.constant dense<0.000000e+00> : vector<16x8xf32>
    %102 = tpu.matmul %99, %100, %cst_36 {dimension_numbers = #tpu.dot_dimension_numbers<[1], [1], [0], [0], [0, 0, 1, 0], [], []>} : vector<16x16xbf16>, vector<8x16xbf16>, vector<16x8xf32> -> vector<16x8xf32>
    %cst_37 = arith.constant dense<0xFF800000> : vector<16xf32>
    %103 = vector.multi_reduction <maximumf>, %102, %cst_37 [1] : vector<16x8xf32> to vector<16xf32>
    %104 = vector.shape_cast %103 : vector<16xf32> to vector<16x1xf32>
    %105 = vector.broadcast %104 : vector<16x1xf32> to vector<16x8xf32>
    %106 = arith.subf %102, %105 : vector<16x8xf32>
    %107 = math.exp %106 : vector<16x8xf32>
    %cst_38 = arith.constant dense<0.000000e+00> : vector<16xf32>
    %108 = vector.multi_reduction <add>, %107, %cst_38 [1] : vector<16x8xf32> to vector<16xf32>
    %109 = vector.shape_cast %108 : vector<16xf32> to vector<16x1xf32>
    %110 = tpu.reciprocal %109 {approx = true} : vector<16x1xf32> -> vector<16x1xf32>
    %111 = vector.broadcast %110 : vector<16x1xf32> to vector<16x8xf32>
    %112 = arith.mulf %107, %111 : vector<16x8xf32>
    %113 = arith.truncf %112 : vector<16x8xf32> to vector<16x8xbf16>
    %cst_39 = arith.constant dense<0.000000e+00> : vector<16x16xf32>
    %114 = tpu.matmul %113, %101, %cst_39 {dimension_numbers = #tpu.dot_dimension_numbers<[1], [0], [0], [1], [0, 0, 1, 1], [], []>} : vector<16x8xbf16>, vector<8x16xbf16>, vector<16x16xf32> -> vector<16x16xf32>
    %115 = arith.truncf %114 : vector<16x16xf32> to vector<16x16xbf16>
    %c16_40 = arith.constant 16 : index
    %c16_41 = arith.constant 16 : index
    %116 = vector.load %arg10[%c16_40, %c16_41] : memref<64x32xbf16, #tpu.memory_space<vmem>>, vector<16x16xbf16>
    tpu.vector_store %arg10[%c16_40, %c16_41], %115 {strides = array<i32>} : memref<64x32xbf16, #tpu.memory_space<vmem>>, vector<16x16xbf16>,
    %117 = vector.extract_strided_slice %32 {offsets = [32, 0], sizes = [16, 32], strides = [1, 1]} : vector<64x32xbf16> to vector<16x32xbf16>
    %118 = vector.extract_strided_slice %36 {offsets = [16, 0], sizes = [8, 32], strides = [1, 1]} : vector<32x32xbf16> to vector<8x32xbf16>
    %119 = vector.extract_strided_slice %38 {offsets = [16, 0], sizes = [8, 32], strides = [1, 1]} : vector<32x32xbf16> to vector<8x32xbf16>
    %120 = vector.extract_strided_slice %117 {offsets = [0, 0], sizes = [16, 16], strides = [1, 1]} : vector<16x32xbf16> to vector<16x16xbf16>
    %121 = vector.extract_strided_slice %118 {offsets = [0, 0], sizes = [8, 16], strides = [1, 1]} : vector<8x32xbf16> to vector<8x16xbf16>
    %122 = vector.extract_strided_slice %119 {offsets = [0, 0], sizes = [8, 16], strides = [1, 1]} : vector<8x32xbf16> to vector<8x16xbf16>
    %cst_42 = arith.constant dense<0.000000e+00> : vector<16x8xf32>
    %123 = tpu.matmul %120, %121, %cst_42 {dimension_numbers = #tpu.dot_dimension_numbers<[1], [1], [0], [0], [0, 0, 1, 0], [], []>} : vector<16x16xbf16>, vector<8x16xbf16>, vector<16x8xf32> -> vector<16x8xf32>
    %cst_43 = arith.constant dense<0xFF800000> : vector<16xf32>
    %124 = vector.multi_reduction <maximumf>, %123, %cst_43 [1] : vector<16x8xf32> to vector<16xf32>
    %125 = vector.shape_cast %124 : vector<16xf32> to vector<16x1xf32>
    %126 = vector.broadcast %125 : vector<16x1xf32> to vector<16x8xf32>
    %127 = arith.subf %123, %126 : vector<16x8xf32>
    %128 = math.exp %127 : vector<16x8xf32>
    %cst_44 = arith.constant dense<0.000000e+00> : vector<16xf32>
    %129 = vector.multi_reduction <add>, %128, %cst_44 [1] : vector<16x8xf32> to vector<16xf32>
    %130 = vector.shape_cast %129 : vector<16xf32> to vector<16x1xf32>
    %131 = tpu.reciprocal %130 {approx = true} : vector<16x1xf32> -> vector<16x1xf32>
    %132 = vector.broadcast %131 : vector<16x1xf32> to vector<16x8xf32>
    %133 = arith.mulf %128, %132 : vector<16x8xf32>
    %134 = arith.truncf %133 : vector<16x8xf32> to vector<16x8xbf16>
    %cst_45 = arith.constant dense<0.000000e+00> : vector<16x16xf32>
    %135 = tpu.matmul %134, %122, %cst_45 {dimension_numbers = #tpu.dot_dimension_numbers<[1], [0], [0], [1], [0, 0, 1, 1], [], []>} : vector<16x8xbf16>, vector<8x16xbf16>, vector<16x16xf32> -> vector<16x16xf32>
    %136 = arith.truncf %135 : vector<16x16xf32> to vector<16x16xbf16>
    %c32 = arith.constant 32 : index
    %c0_46 = arith.constant 0 : index
    %137 = vector.load %arg10[%c32, %c0_46] : memref<64x32xbf16, #tpu.memory_space<vmem>>, vector<16x16xbf16>
    tpu.vector_store %arg10[%c32, %c0_46], %136 {strides = array<i32>} : memref<64x32xbf16, #tpu.memory_space<vmem>>, vector<16x16xbf16>,
    %138 = vector.extract_strided_slice %117 {offsets = [0, 16], sizes = [16, 16], strides = [1, 1]} : vector<16x32xbf16> to vector<16x16xbf16>
    %139 = vector.extract_strided_slice %118 {offsets = [0, 16], sizes = [8, 16], strides = [1, 1]} : vector<8x32xbf16> to vector<8x16xbf16>
    %140 = vector.extract_strided_slice %119 {offsets = [0, 16], sizes = [8, 16], strides = [1, 1]} : vector<8x32xbf16> to vector<8x16xbf16>
    %cst_47 = arith.constant dense<0.000000e+00> : vector<16x8xf32>
    %141 = tpu.matmul %138, %139, %cst_47 {dimension_numbers = #tpu.dot_dimension_numbers<[1], [1], [0], [0], [0, 0, 1, 0], [], []>} : vector<16x16xbf16>, vector<8x16xbf16>, vector<16x8xf32> -> vector<16x8xf32>
    %cst_48 = arith.constant dense<0xFF800000> : vector<16xf32>
    %142 = vector.multi_reduction <maximumf>, %141, %cst_48 [1] : vector<16x8xf32> to vector<16xf32>
    %143 = vector.shape_cast %142 : vector<16xf32> to vector<16x1xf32>
    %144 = vector.broadcast %143 : vector<16x1xf32> to vector<16x8xf32>
    %145 = arith.subf %141, %144 : vector<16x8xf32>
    %146 = math.exp %145 : vector<16x8xf32>
    %cst_49 = arith.constant dense<0.000000e+00> : vector<16xf32>
    %147 = vector.multi_reduction <add>, %146, %cst_49 [1] : vector<16x8xf32> to vector<16xf32>
    %148 = vector.shape_cast %147 : vector<16xf32> to vector<16x1xf32>
    %149 = tpu.reciprocal %148 {approx = true} : vector<16x1xf32> -> vector<16x1xf32>
    %150 = vector.broadcast %149 : vector<16x1xf32> to vector<16x8xf32>
    %151 = arith.mulf %146, %150 : vector<16x8xf32>
    %152 = arith.truncf %151 : vector<16x8xf32> to vector<16x8xbf16>
    %cst_50 = arith.constant dense<0.000000e+00> : vector<16x16xf32>
    %153 = tpu.matmul %152, %140, %cst_50 {dimension_numbers = #tpu.dot_dimension_numbers<[1], [0], [0], [1], [0, 0, 1, 1], [], []>} : vector<16x8xbf16>, vector<8x16xbf16>, vector<16x16xf32> -> vector<16x16xf32>
    %154 = arith.truncf %153 : vector<16x16xf32> to vector<16x16xbf16>
    %c32_51 = arith.constant 32 : index
    %c16_52 = arith.constant 16 : index
    %155 = vector.load %arg10[%c32_51, %c16_52] : memref<64x32xbf16, #tpu.memory_space<vmem>>, vector<16x16xbf16>
    tpu.vector_store %arg10[%c32_51, %c16_52], %154 {strides = array<i32>} : memref<64x32xbf16, #tpu.memory_space<vmem>>, vector<16x16xbf16>,
    %156 = vector.extract_strided_slice %32 {offsets = [48, 0], sizes = [16, 32], strides = [1, 1]} : vector<64x32xbf16> to vector<16x32xbf16>
    %157 = vector.extract_strided_slice %36 {offsets = [24, 0], sizes = [8, 32], strides = [1, 1]} : vector<32x32xbf16> to vector<8x32xbf16>
    %158 = vector.extract_strided_slice %38 {offsets = [24, 0], sizes = [8, 32], strides = [1, 1]} : vector<32x32xbf16> to vector<8x32xbf16>
    %159 = vector.extract_strided_slice %156 {offsets = [0, 0], sizes = [16, 16], strides = [1, 1]} : vector<16x32xbf16> to vector<16x16xbf16>
    %160 = vector.extract_strided_slice %157 {offsets = [0, 0], sizes = [8, 16], strides = [1, 1]} : vector<8x32xbf16> to vector<8x16xbf16>
    %161 = vector.extract_strided_slice %158 {offsets = [0, 0], sizes = [8, 16], strides = [1, 1]} : vector<8x32xbf16> to vector<8x16xbf16>
    %cst_53 = arith.constant dense<0.000000e+00> : vector<16x8xf32>
    %162 = tpu.matmul %159, %160, %cst_53 {dimension_numbers = #tpu.dot_dimension_numbers<[1], [1], [0], [0], [0, 0, 1, 0], [], []>} : vector<16x16xbf16>, vector<8x16xbf16>, vector<16x8xf32> -> vector<16x8xf32>
    %cst_54 = arith.constant dense<0xFF800000> : vector<16xf32>
    %163 = vector.multi_reduction <maximumf>, %162, %cst_54 [1] : vector<16x8xf32> to vector<16xf32>
    %164 = vector.shape_cast %163 : vector<16xf32> to vector<16x1xf32>
    %165 = vector.broadcast %164 : vector<16x1xf32> to vector<16x8xf32>
    %166 = arith.subf %162, %165 : vector<16x8xf32>
    %167 = math.exp %166 : vector<16x8xf32>
    %cst_55 = arith.constant dense<0.000000e+00> : vector<16xf32>
    %168 = vector.multi_reduction <add>, %167, %cst_55 [1] : vector<16x8xf32> to vector<16xf32>
    %169 = vector.shape_cast %168 : vector<16xf32> to vector<16x1xf32>
    %170 = tpu.reciprocal %169 {approx = true} : vector<16x1xf32> -> vector<16x1xf32>
    %171 = vector.broadcast %170 : vector<16x1xf32> to vector<16x8xf32>
    %172 = arith.mulf %167, %171 : vector<16x8xf32>
    %173 = arith.truncf %172 : vector<16x8xf32> to vector<16x8xbf16>
    %cst_56 = arith.constant dense<0.000000e+00> : vector<16x16xf32>
    %174 = tpu.matmul %173, %161, %cst_56 {dimension_numbers = #tpu.dot_dimension_numbers<[1], [0], [0], [1], [0, 0, 1, 1], [], []>} : vector<16x8xbf16>, vector<8x16xbf16>, vector<16x16xf32> -> vector<16x16xf32>
    %175 = arith.truncf %174 : vector<16x16xf32> to vector<16x16xbf16>
    %c48 = arith.constant 48 : index
    %c0_57 = arith.constant 0 : index
    %176 = vector.load %arg10[%c48, %c0_57] : memref<64x32xbf16, #tpu.memory_space<vmem>>, vector<16x16xbf16>
    tpu.vector_store %arg10[%c48, %c0_57], %175 {strides = array<i32>} : memref<64x32xbf16, #tpu.memory_space<vmem>>, vector<16x16xbf16>,
    %177 = vector.extract_strided_slice %156 {offsets = [0, 16], sizes = [16, 16], strides = [1, 1]} : vector<16x32xbf16> to vector<16x16xbf16>
    %178 = vector.extract_strided_slice %157 {offsets = [0, 16], sizes = [8, 16], strides = [1, 1]} : vector<8x32xbf16> to vector<8x16xbf16>
    %179 = vector.extract_strided_slice %158 {offsets = [0, 16], sizes = [8, 16], strides = [1, 1]} : vector<8x32xbf16> to vector<8x16xbf16>
    %cst_58 = arith.constant dense<0.000000e+00> : vector<16x8xf32>
    %180 = tpu.matmul %177, %178, %cst_58 {dimension_numbers = #tpu.dot_dimension_numbers<[1], [1], [0], [0], [0, 0, 1, 0], [], []>} : vector<16x16xbf16>, vector<8x16xbf16>, vector<16x8xf32> -> vector<16x8xf32>
    %cst_59 = arith.constant dense<0xFF800000> : vector<16xf32>
    %181 = vector.multi_reduction <maximumf>, %180, %cst_59 [1] : vector<16x8xf32> to vector<16xf32>
    %182 = vector.shape_cast %181 : vector<16xf32> to vector<16x1xf32>
    %183 = vector.broadcast %182 : vector<16x1xf32> to vector<16x8xf32>
    %184 = arith.subf %180, %183 : vector<16x8xf32>
    %185 = math.exp %184 : vector<16x8xf32>
    %cst_60 = arith.constant dense<0.000000e+00> : vector<16xf32>
    %186 = vector.multi_reduction <add>, %185, %cst_60 [1] : vector<16x8xf32> to vector<16xf32>
    %187 = vector.shape_cast %186 : vector<16xf32> to vector<16x1xf32>
    %188 = tpu.reciprocal %187 {approx = true} : vector<16x1xf32> -> vector<16x1xf32>
    %189 = vector.broadcast %188 : vector<16x1xf32> to vector<16x8xf32>
    %190 = arith.mulf %185, %189 : vector<16x8xf32>
    %191 = arith.truncf %190 : vector<16x8xf32> to vector<16x8xbf16>
    %cst_61 = arith.constant dense<0.000000e+00> : vector<16x16xf32>
    %192 = tpu.matmul %191, %179, %cst_61 {dimension_numbers = #tpu.dot_dimension_numbers<[1], [0], [0], [1], [0, 0, 1, 1], [], []>} : vector<16x8xbf16>, vector<8x16xbf16>, vector<16x16xf32> -> vector<16x16xf32>
    %193 = arith.truncf %192 : vector<16x16xf32> to vector<16x16xbf16>
    %c48_62 = arith.constant 48 : index
    %c16_63 = arith.constant 16 : index
    %194 = vector.load %arg10[%c48_62, %c16_63] : memref<64x32xbf16, #tpu.memory_space<vmem>>, vector<16x16xbf16>
    tpu.vector_store %arg10[%c48_62, %c16_63], %193 {strides = array<i32>} : memref<64x32xbf16, #tpu.memory_space<vmem>>, vector<16x16xbf16>,
    %c0_64 = arith.constant 0 : index
    %c0_65 = arith.constant 0 : index
    %195 = vector.load %arg10[%c0_64, %c0_65] : memref<64x32xbf16, #tpu.memory_space<vmem>>, vector<64x32xbf16>
    %c0_66 = arith.constant 0 : index
    %c0_67 = arith.constant 0 : index
    %196 = vector.load %arg7[%c0_66, %c0_67] : memref<32x32xbf16, #tpu.memory_space<vmem>>, vector<32x32xbf16>
    %cst_68 = arith.constant dense<0.000000e+00> : vector<64x32xf32>
    %197 = tpu.matmul %195, %196, %cst_68 {dimension_numbers = #tpu.dot_dimension_numbers<[1], [0], [0], [1], [0, 0, 1, 1], [], []>} : vector<64x32xbf16>, vector<32x32xbf16>, vector<64x32xf32> -> vector<64x32xf32>
    %c0_69 = arith.constant 0 : index
    %c0_70 = arith.constant 0 : index
    %198 = vector.load %arg8[%c0_69, %c0_70] : memref<1x32xf32, #tpu.memory_space<vmem>>, vector<1x32xf32>
    %199 = vector.broadcast %198 : vector<1x32xf32> to vector<64x32xf32>
    %200 = arith.addf %197, %199 : vector<64x32xf32>
    %201 = arith.addf %200, %1 : vector<64x32xf32>
    %202 = vector.shape_cast %201 : vector<64x32xf32> to vector<4x16x32xf32>
    %c0_71 = arith.constant 0 : index
    %c0_72 = arith.constant 0 : index
    %c0_73 = arith.constant 0 : index
    %203 = vector.load %arg9[%c0_71, %c0_72, %c0_73] : memref<4x16x32xf32, #tpu.memory_space<vmem>>, vector<4x16x32xf32>
    tpu.vector_store %arg9[%c0_71, %c0_72, %c0_73], %202 {strides = array<i32>} : memref<4x16x32xf32, #tpu.memory_space<vmem>>, vector<4x16x32xf32>,
    return
  }
  func.func @transform_0(%arg0: i32) -> (i32, i32, i32) {
    %c0_i32 = arith.constant 0 : i32
    %c0_i32_0 = arith.constant 0 : i32
    %c0_i32_1 = arith.constant 0 : i32
    return %arg0, %c0_i32, %c0_i32_0 : i32, i32, i32
  }
  func.func @transform_1(%arg0: i32) -> (i32, i32, i32) {
    %c0_i32 = arith.constant 0 : i32
    %c0_i32_0 = arith.constant 0 : i32
    %c0_i32_1 = arith.constant 0 : i32
    return %arg0, %c0_i32, %c0_i32_0 : i32, i32, i32
  }
  func.func @transform_2(%arg0: i32) -> (i32, i32) {
    %c0_i32 = arith.constant 0 : i32
    %c0_i32_0 = arith.constant 0 : i32
    %c0_i32_1 = arith.constant 0 : i32
    return %c0_i32, %c0_i32_0 : i32, i32
  }
  func.func @transform_3(%arg0: i32) -> (i32, i32) {
    %c0_i32 = arith.constant 0 : i32
    %c0_i32_0 = arith.constant 0 : i32
    %c0_i32_1 = arith.constant 0 : i32
    return %c0_i32, %c0_i32_0 : i32, i32
  }
  func.func @transform_4(%arg0: i32) -> (i32, i32) {
    %c0_i32 = arith.constant 0 : i32
    %c0_i32_0 = arith.constant 0 : i32
    %c0_i32_1 = arith.constant 0 : i32
    return %c0_i32, %c0_i32_0 : i32, i32
  }
  func.func @transform_5(%arg0: i32) -> (i32, i32) {
    %c0_i32 = arith.constant 0 : i32
    %c0_i32_0 = arith.constant 0 : i32
    %c0_i32_1 = arith.constant 0 : i32
    return %c0_i32, %c0_i32_0 : i32, i32
  }
  func.func @transform_6(%arg0: i32) -> (i32, i32) {
    %c0_i32 = arith.constant 0 : i32
    %c0_i32_0 = arith.constant 0 : i32
    %c0_i32_1 = arith.constant 0 : i32
    return %c0_i32, %c0_i32_0 : i32, i32
  }
  func.func @transform_7(%arg0: i32) -> (i32, i32) {
    %c0_i32 = arith.constant 0 : i32
    %c0_i32_0 = arith.constant 0 : i32
    %c0_i32_1 = arith.constant 0 : i32
    return %c0_i32, %c0_i32_0 : i32, i32
  }
  func.func @transform_8(%arg0: i32) -> (i32, i32, i32) {
    %c0_i32 = arith.constant 0 : i32
    %c0_i32_0 = arith.constant 0 : i32
    %c0_i32_1 = arith.constant 0 : i32
    return %arg0, %c0_i32, %c0_i32_0 : i32, i32, i32
  }
}

</mosaic_0001>

<bundles_post_ra>
// kernel: block_forward.5
= control target key start
LH: loop header
LB: loop body
LE: loop exit
PB: predicated region body
PF: predicated region fallthrough
CT: control target
= control target key end

     0   :  { %14 = vsyncpa [#allocation5], 0  ;;  %s2390_s0 = inlined_call_operand.hbm [shape: f32[128,32], index: 0, kind: input, shape index: {}]   ;;  %s2391_s1 = inlined_call_operand.hbm [shape: f32[1,32], index: 1, kind: input, shape index: {}]   ;;  %s2392_s2 = inlined_call_operand.hbm [shape: f32[1,32], index: 2, kind: input, shape index: {}]   ;;  %s2393_s3 = inlined_call_operand.hbm [shape: bf16[32,128], index: 3, kind: input, shape index: {}]   ;;  %s2394_s4 = inlined_call_operand.hbm [shape: f32[1,128], index: 4, kind: input, shape index: {}]   ;;  %s2395_s5 = inlined_call_operand.hbm [shape: bf16[32,128], index: 5, kind: input, shape index: {}]   ;;  %s2396_s6 = inlined_call_operand.hbm [shape: f32[1,128], index: 6, kind: input, shape index: {}]   ;;  %s2397_s7 = inlined_call_operand.hbm [shape: bf16[128,32], index: 7, kind: input, shape index: {}]   ;;  %s2398_s8 = inlined_call_operand.hbm [shape: f32[1,32], index: 8, kind: input, shape index: {}]   ;;  %s2399_s9 = inlined_call_operand.hbm [shape: f32[128,32], index: 9, kind: output, shape index: {}]  }
   0x1   :  { %15 = vsyncpa [#allocation8], 0 }
   0x2   :  { %16 = vsyncpa [#allocation11], 0 }
   0x3   :  { %17 = vsyncpa [#allocation14], 0 }
   0x4   :  { %18 = vsyncpa [#allocation17], 0 }
   0x5   :  { %19 = vsyncpa [#allocation6], 0  ;;  %s1695_s30 = smov [#allocation7]   ;;  %s1696_s11 = smov [#allocation10]  }
   0x6   :  { %s38_s10 = sshll.u32 %s1695_s30, 4  ;;  %s57_s12 = sshll.u32 %s1696_s11, 4  ;;  %s39_s10 = int_to_ptr.vmem [resolvable:$true] %s38_s10  ;;  %s1760_s12 = int_to_ptr.vmem [resolvable:$true] %s57_s12 }
   0x7   :  { %s1463_s15 = scalar_lea.hbm %s2391_s1, 16 }
   0x8   :  { %p1464_p0 = scmp.ne.s32.totalorder %s2391_s1, %s1463_s15  ;;  %p1467_p1 = scmp.lt.u32.totalorder %s1463_s15, %s2391_s1 }
   0xa   :  { %p1469_p2 = pnand %p1467_p1, %p1464_p0 }
   0xc   :  { %1472 = shalt.err (!%p1469_p2)
}
   0xd   :  { %s1473_s20 = scalar_lea.vmem %s39_s10, 16  ;;  %s1477_s21 = scalar_lea.vmem %s39_s10, 32 }
   0xe   :  { %p1474_p3 = scmp.ne.s32.totalorder %s39_s10, %s1473_s20  ;;  %p1478_p4 = scmp.lt.s32.totalorder %s39_s10, %s39_s10 }
   0xf   :  { %p1479_p5 = scmp.lt.s32.totalorder %s1477_s21, %s1473_s20 }
  0x11   :  { %p1480_p6 = por %p1479_p5, %p1478_p4 }
  0x13   :  { %p1481_p7 = pnand %p1480_p6, %p1474_p3 }
  0x15   :  { %1484 = shalt.err (!%p1481_p7)
}
  0x16   :  { %41 = dma.hbm_to_vmem [thread:$0]  %s2391_s1, 16, %s39_s10, [#allocation8]  }
  0x17   :  { %s1485_s26 = scalar_lea.hbm %s2393_s3, 256 }
  0x18   :  { %p1486_p8 = scmp.ne.s32.totalorder %s2393_s3, %s1485_s26  ;;  %p1489_p9 = scmp.lt.u32.totalorder %s1485_s26, %s2393_s3 }
  0x1a   :  { %p1491_p10 = pnand %p1489_p9, %p1486_p8 }
  0x1c   :  { %1494 = shalt.err (!%p1491_p10)
}
  0x1d   :  { %s1495_s11 = scalar_lea.vmem %s1760_s12, 256  ;;  %p1500_p12 = scmp.lt.s32.totalorder %s1760_s12, %s1760_s12 }
  0x1e   :  { %p1496_p11 = scmp.ne.s32.totalorder %s1760_s12, %s1495_s11  ;;  %p1501_p13 = scmp.lt.s32.totalorder %s1495_s11, %s1495_s11 }
  0x20   :  { %p1502_p0 = por %p1501_p13, %p1500_p12 }
  0x22   :  { %p1503_p1 = pnand %p1502_p0, %p1496_p11 }
  0x24   :  { %1506 = shalt.err (!%p1503_p1)
}
  0x25   :  { %s1697_s1 = smov 64   ;;  %s1698_s10 = smov 4  }
  0x26   :  { %63 = dma.hbm_to_vmem [thread:$0]  %s2393_s3, 256, %s1760_s12, [#allocation11], %s1697_s1, %s1697_s1, %s1698_s10  }
  0x27   :  { %s1699_s15 = smov [#allocation13]   ;;  %s1700_s17 = smov [#allocation16]  }
  0x28   :  { %s79_s16 = sshll.u32 %s1699_s15, 4  ;;  %s101_s18 = sshll.u32 %s1700_s17, 4  ;;  %s80_s16 = int_to_ptr.vmem [resolvable:$true] %s79_s16  ;;  %s1794_s18 = int_to_ptr.vmem [resolvable:$true] %s101_s18 }
  0x29   :  { %s1507_s21 = scalar_lea.hbm %s2395_s5, 256 }
  0x2a   :  { %p1508_p2 = scmp.ne.s32.totalorder %s2395_s5, %s1507_s21  ;;  %p1511_p3 = scmp.lt.u32.totalorder %s1507_s21, %s2395_s5 }
  0x2c   :  { %p1513_p4 = pnand %p1511_p3, %p1508_p2 }
  0x2e   :  { %1516 = shalt.err (!%p1513_p4)
}
  0x2f   :  { %s1517_s3 = scalar_lea.vmem %s80_s16, 256  ;;  %p1522_p6 = scmp.lt.s32.totalorder %s80_s16, %s80_s16 }
  0x30   :  { %p1518_p5 = scmp.ne.s32.totalorder %s80_s16, %s1517_s3  ;;  %p1523_p7 = scmp.lt.s32.totalorder %s1517_s3, %s1517_s3 }
  0x32   :  { %p1524_p8 = por %p1523_p7, %p1522_p6 }
  0x34   :  { %p1525_p9 = pnand %p1524_p8, %p1518_p5 }
  0x36   :  { %1528 = shalt.err (!%p1525_p9)
}
  0x37   :  { %85 = dma.hbm_to_vmem [thread:$0]  %s2395_s5, 256, %s80_s16, [#allocation14], %s1697_s1, %s1697_s1, %s1698_s10  }
  0x38   :  { %s1529_s29 = scalar_lea.hbm %s2397_s7, 1024 }
  0x39   :  { %p1530_p10 = scmp.ne.s32.totalorder %s2397_s7, %s1529_s29  ;;  %p1533_p11 = scmp.lt.u32.totalorder %s1529_s29, %s2397_s7 }
  0x3b   :  { %p1535_p12 = pnand %p1533_p11, %p1530_p10 }
  0x3d   :  { %1538 = shalt.err (!%p1535_p12)
}
  0x3e   :  { %s1539_s15 = scalar_lea.vmem %s1794_s18, 1024  ;;  %p1544_p0 = scmp.lt.s32.totalorder %s1794_s18, %s1794_s18 }
  0x3f   :  { %p1540_p13 = scmp.ne.s32.totalorder %s1794_s18, %s1539_s15  ;;  %p1545_p1 = scmp.lt.s32.totalorder %s1539_s15, %s1539_s15 }
  0x41   :  { %p1546_p2 = por %p1545_p1, %p1544_p0 }
  0x43   :  { %p1547_p3 = pnand %p1546_p2, %p1540_p13 }
  0x45   :  { %1550 = shalt.err (!%p1547_p3)
}
  0x46   :  { %107 = dma.hbm_to_vmem [thread:$0]  %s2397_s7, 1024, %s1794_s18, [#allocation17], %s1697_s1, %s1697_s1, %s1698_s10  }
  0x47   :  { %s1701_s17 = smov [#allocation4]   ;;  %s1551_s22 = scalar_lea.hbm %s2390_s0, 2048 }
  0x48   :  { %s25_s19 = sshll.u32 %s1701_s17, 4  ;;  %p1552_p4 = scmp.ne.s32.totalorder %s2390_s0, %s1551_s22  ;;  %s26_s19 = int_to_ptr.vmem [resolvable:$true] %s25_s19 }
  0x49   :  { %p1555_p5 = scmp.lt.u32.totalorder %s1551_s22, %s2390_s0 }
  0x4b   :  { %p1557_p6 = pnand %p1555_p5, %p1552_p4 }
  0x4d   :  { %1560 = shalt.err (!%p1557_p6)
}
  0x4e   :  { %s1561_s12 = scalar_lea.vmem %s26_s19, 2048  ;;  %p1566_p8 = scmp.lt.s32.totalorder %s26_s19, %s26_s19 }
  0x4f   :  { %p1562_p7 = scmp.ne.s32.totalorder %s26_s19, %s1561_s12  ;;  %p1567_p9 = scmp.lt.s32.totalorder %s1561_s12, %s1561_s12 }
  0x51   :  { %p1568_p10 = por %p1567_p9, %p1566_p8 }
  0x53   :  { %p1569_p11 = pnand %p1568_p10, %p1562_p7 }
  0x55   :  { %1572 = shalt.err (!%p1569_p11)
}
  0x56   :  { %s1702_s7 = smov 128   ;;  %s1703_s1 = smov 8  }
  0x57   :  { %31 = dma.hbm_to_vmem [thread:$0]  %s2390_s0, 2048, %s26_s19, [#allocation5], %s1702_s7, %s1702_s7, %s1703_s1  }
  0x58   :  { %s1704_s26 = smov [#allocation9]   ;;  %s1705_s28 = smov [#allocation12]  }
  0x59   :  { %s48_s27 = sshll.u32 %s1704_s26, 4  ;;  %s70_s29 = sshll.u32 %s1705_s28, 4  ;;  %s49_s27 = int_to_ptr.vmem [resolvable:$true] %s48_s27  ;;  %s71_s29 = int_to_ptr.vmem [resolvable:$true] %s70_s29 }
  0x5a   :  { %s1573_s13 = scalar_lea.hbm %s2392_s2, 16 }
  0x5b   :  { %p1574_p12 = scmp.ne.s32.totalorder %s2392_s2, %s1573_s13  ;;  %p1577_p13 = scmp.lt.u32.totalorder %s1573_s13, %s2392_s2 }
  0x5d   :  { %p1579_p0 = pnand %p1577_p13, %p1574_p12 }
  0x5f   :  { %1582 = shalt.err (!%p1579_p0)
}
  0x60   :  { %s1583_s0 = scalar_lea.vmem %s49_s27, 16  ;;  %s1587_s17 = scalar_lea.vmem %s49_s27, 32 }
  0x61   :  { %p1584_p1 = scmp.ne.s32.totalorder %s49_s27, %s1583_s0  ;;  %p1588_p2 = scmp.lt.s32.totalorder %s49_s27, %s49_s27 }
  0x62   :  { %p1589_p3 = scmp.lt.s32.totalorder %s1587_s17, %s1583_s0 }
  0x64   :  { %p1590_p4 = por %p1589_p3, %p1588_p2 }
  0x66   :  { %p1591_p5 = pnand %p1590_p4, %p1584_p1 }
  0x68   :  { %1594 = shalt.err (!%p1591_p5)
}
  0x69   :  { %51 = dma.hbm_to_vmem [thread:$0]  %s2392_s2, 16, %s49_s27, [#allocation8]  }
  0x6a   :  { %s1595_s23 = scalar_lea.hbm %s2394_s4, 16 }
  0x6b   :  { %p1596_p6 = scmp.ne.s32.totalorder %s2394_s4, %s1595_s23  ;;  %p1599_p7 = scmp.lt.u32.totalorder %s1595_s23, %s2394_s4 }
  0x6d   :  { %p1601_p8 = pnand %p1599_p7, %p1596_p6 }
  0x6f   :  { %1604 = shalt.err (!%p1601_p8)
}
  0x70   :  { %s1605_s10 = scalar_lea.vmem %s71_s29, 16  ;;  %s1609_s18 = scalar_lea.vmem %s71_s29, 32 }
  0x71   :  { %p1606_p9 = scmp.ne.s32.totalorder %s71_s29, %s1605_s10  ;;  %p1610_p10 = scmp.lt.s32.totalorder %s71_s29, %s71_s29 }
  0x72   :  { %p1611_p11 = scmp.lt.s32.totalorder %s1609_s18, %s1605_s10 }
  0x74   :  { %p1612_p12 = por %p1611_p11, %p1610_p10 }
  0x76   :  { %p1613_p13 = pnand %p1612_p12, %p1606_p9 }
  0x78   :  { %1616 = shalt.err (!%p1613_p13)
}
  0x79   :  { %73 = dma.hbm_to_vmem [thread:$0]  %s2394_s4, 16, %s71_s29, [#allocation11]  }
  0x7a   :  { %s1706_s27 = smov [#allocation15]   ;;  %s1707_s30 = smov [#allocation18]  }
  0x7b   :  { %s92_s28 = sshll.u32 %s1706_s27, 4  ;;  %s114_s11 = sshll.u32 %s1707_s30, 4  ;;  %s93_s28 = int_to_ptr.vmem [resolvable:$true] %s92_s28  ;;  %s115_s11 = int_to_ptr.vmem [resolvable:$true] %s114_s11 }
  0x7c   :  { %s1617_s15 = scalar_lea.hbm %s2396_s6, 16 }
  0x7d   :  { %p1618_p0 = scmp.ne.s32.totalorder %s2396_s6, %s1617_s15  ;;  %p1621_p1 = scmp.lt.u32.totalorder %s1617_s15, %s2396_s6 }
  0x7f   :  { %p1623_p2 = pnand %p1621_p1, %p1618_p0 }
  0x81   :  { %1626 = shalt.err (!%p1623_p2)
}
  0x82   :  { %s1627_s4 = scalar_lea.vmem %s93_s28, 16  ;;  %s1631_s29 = scalar_lea.vmem %s93_s28, 32 }
  0x83   :  { %p1628_p3 = scmp.ne.s32.totalorder %s93_s28, %s1627_s4  ;;  %p1632_p4 = scmp.lt.s32.totalorder %s93_s28, %s93_s28 }
  0x84   :  { %p1633_p5 = scmp.lt.s32.totalorder %s1631_s29, %s1627_s4 }
  0x86   :  { %p1634_p6 = por %p1633_p5, %p1632_p4 }
  0x88   :  { %p1635_p7 = pnand %p1634_p6, %p1628_p3 }
  0x8a   :  { %1638 = shalt.err (!%p1635_p7)
}
  0x8b   :  { %95 = dma.hbm_to_vmem [thread:$0]  %s2396_s6, 16, %s93_s28, [#allocation14]  }
  0x8c   :  { %s1639_s23 = scalar_lea.hbm %s2398_s8, 16 }
  0x8d   :  { %p1640_p8 = scmp.ne.s32.totalorder %s2398_s8, %s1639_s23  ;;  %p1643_p9 = scmp.lt.u32.totalorder %s1639_s23, %s2398_s8 }
  0x8f   :  { %p1645_p10 = pnand %p1643_p9, %p1640_p8 }
  0x91   :  { %1648 = shalt.err (!%p1645_p10)
}
  0x92   :  { %s1649_s10 = scalar_lea.vmem %s115_s11, 16  ;;  %s1653_s18 = scalar_lea.vmem %s115_s11, 32 }
  0x93   :  { %p1650_p11 = scmp.ne.s32.totalorder %s115_s11, %s1649_s10  ;;  %p1654_p12 = scmp.lt.s32.totalorder %s115_s11, %s115_s11 }
  0x94   :  { %p1655_p13 = scmp.lt.s32.totalorder %s1653_s18, %s1649_s10 }
  0x96   :  { %p1656_p0 = por %p1655_p13, %p1654_p12 }
  0x98   :  { %p1657_p1 = pnand %p1656_p0, %p1650_p11 }
  0x9a   :  { %1660 = shalt.err (!%p1657_p1)
}
  0x9b   :  { %117 = dma.hbm_to_vmem [thread:$0]  %s2398_s8, 16, %s115_s11, [#allocation17]  }
  0x9c   :  { %1683 = dma.done.wait [#allocation5], 2048  }
  0x9d   :  { %1684 = vsyncadd [#allocation5], 4294965248 }
  0x9e   :  { %1685 = dma.done.wait [#allocation8], 32  }
  0x9f   :  { %1686 = vsyncadd [#allocation8], 4294967264 }
  0xa0   :  { %1687 = dma.done.wait [#allocation11], 272  }
  0xa1   :  { %1688 = vsyncadd [#allocation11], 4294967024 }
  0xa2   :  { %1689 = dma.done.wait [#allocation14], 272  }
  0xa3   :  { %1690 = vsyncadd [#allocation14], 4294967024 }
  0xa4   :  { %1691 = dma.done.wait [#allocation17], 1040  }
  0xa5   :  { %1692 = vsyncadd [#allocation17], 4294966256  ;;  %vm168_vm0 = vcmask 261120   ;;  %v150_v0 = vld [vmem:[#allocation4] sm:$0xff]  ;;  %v152_v1 = vld [vmem:[#allocation4 + $0x10] sm:$0xff]  ;;  %s1709_s8 = smov [#allocation19]  }
  0xa6   :  { %v151_v2 = vld [vmem:[#allocation4 + $0x8] sm:$0xff]  ;;  %v169_v3 = vsel %vm168_vm0, %v150_v0, 0.0  ;;  %v175_v4 = vsel %vm168_vm0, %v152_v1, 0.0  ;;  %v153_v5 = vld [vmem:[#allocation4 + $0x18] sm:$0xff]  ;;  %v1896_v6 = vld [vmem:[#allocation4 + $0x20] sm:$0xff]  ;;  %s1199_s26 = sshll.u32 %s1709_s8, 4  ;;  %s1200_s26 = int_to_ptr.vmem [resolvable:$true] %s1199_s26 }
  0xa7   :  { %170 = vadd.xlane.f32.xlu0 %v169_v3  ;;  %176 = vadd.xlane.f32.xlu1 %v175_v4  ;;  %v1898_v7 = vld [vmem:[#allocation4 + $0x28] sm:$0xff]  ;;  %v172_v8 = vsel %vm168_vm0, %v151_v2, 0.0  ;;  %v178_v9 = vsel %vm168_vm0, %v153_v5, 0.0  ;;  %v1902_v10 = vld [vmem:[#allocation4 + $0x30] sm:$0xff]  ;;  %v1904_v11 = vld [vmem:[#allocation4 + $0x38] sm:$0xff]  ;;  %v181_v12 = vsel %vm168_vm0, %v1896_v6, 0.0  ;;  %p1666_p3 = scmp.lt.s32.totalorder %s1200_s26, %s1200_s26 }
  0xa8   :  { %v184_v13 = vsel %vm168_vm0, %v1898_v7, 0.0  ;;  %v187_v14 = vsel %vm168_vm0, %v1902_v10, 0.0  ;;  %v190_v15 = vsel %vm168_vm0, %v1904_v11, 0.0  ;;  %v1914_v16 = vld [vmem:[#allocation4 + $0x40] sm:$0xff]  ;;  %v1916_v17 = vld [vmem:[#allocation4 + $0x48] sm:$0xff]  ;;  %v1922_v20 = vld [vmem:[#allocation4 + $0x50] sm:$0xff] }
  0xa9   :  { %v193_v18 = vsel %vm168_vm0, %v1914_v16, 0.0  ;;  %v196_v19 = vsel %vm168_vm0, %v1916_v17, 0.0  ;;  %v1924_v21 = vld [vmem:[#allocation4 + $0x58] sm:$0xff]  ;;  %v199_v22 = vsel %vm168_vm0, %v1922_v20, 0.0  ;;  %v1930_v24 = vld [vmem:[#allocation4 + $0x60] sm:$0xff]  ;;  %v1932_v25 = vld [vmem:[#allocation4 + $0x68] sm:$0xff] }
  0xaa   :  { %v202_v23 = vsel %vm168_vm0, %v1924_v21, 0.0  ;;  %v205_v26 = vsel %vm168_vm0, %v1930_v24, 0.0  ;;  %v208_v27 = vsel %vm168_vm0, %v1932_v25, 0.0  ;;  %v1938_v28 = vld [vmem:[#allocation4 + $0x70] sm:$0xff]  ;;  %v1940_v29 = vld [vmem:[#allocation4 + $0x78] sm:$0xff]  ;;  %s1661_s27 = scalar_lea.vmem %s1200_s26, 2048 }
  0xab   :  { %173 = vadd.xlane.f32.xlu0 %v172_v8  ;;  %179 = vadd.xlane.f32.xlu1 %v178_v9  ;;  %v211_v30 = vsel %vm168_vm0, %v1938_v28, 0.0  ;;  %v214_v31 = vsel %vm168_vm0, %v1940_v29, 0.0  ;;  %p1662_p2 = scmp.ne.s32.totalorder %s1200_s26, %s1661_s27  ;;  %p1667_p4 = scmp.lt.s32.totalorder %s1661_s27, %s1661_s27 }
  0xad   :  { %p1668_p5 = por %p1667_p4, %p1666_p3 }
  0xaf   :  { %182 = vadd.xlane.f32.xlu0 %v181_v12  ;;  %185 = vadd.xlane.f32.xlu1 %v184_v13  ;;  %p1669_p6 = pnand %p1668_p5, %p1662_p2 }
  0xb3   :  { %188 = vadd.xlane.f32.xlu0 %v187_v14  ;;  %191 = vadd.xlane.f32.xlu1 %v190_v15 }
  0xb7   :  { %194 = vadd.xlane.f32.xlu0 %v193_v18  ;;  %197 = vadd.xlane.f32.xlu1 %v196_v19 }
  0xbb   :  { %200 = vadd.xlane.f32.xlu0 %v199_v22  ;;  %203 = vadd.xlane.f32.xlu1 %v202_v23 }
  0xbf   :  { %206 = vadd.xlane.f32.xlu0 %v205_v26  ;;  %209 = vadd.xlane.f32.xlu1 %v208_v27 }
  0xc3   :  { %212 = vadd.xlane.f32.xlu0 %v211_v30  ;;  %215 = vadd.xlane.f32.xlu1 %v214_v31 }
 0x134   :  { %v171_v32 = vpop.xlane.xlu0 %170  ;;  %v177_v33 = vpop.xlane.xlu1 %176 }
 0x135   :  { %v218_v34 = vmul.f32 0.03125, %v171_v32  ;;  %v220_v35 = vmul.f32 0.03125, %v177_v33 }
 0x137   :  { %v1946_v36 = vsub.f32 %v150_v0, %v218_v34  ;;  %v1948_v37 = vsub.f32 %v152_v1, %v220_v35 }
 0x138   :  { %v174_v38 = vpop.xlane.xlu0 %173  ;;  %v180_v39 = vpop.xlane.xlu1 %179 }
 0x139   :  { %v219_v40 = vmul.f32 0.03125, %v174_v38  ;;  %v221_v41 = vmul.f32 0.03125, %v180_v39  ;;  %v250_v42 = vmul.f32 %v1946_v36, %v1946_v36  ;;  %v252_v43 = vmul.f32 %v1948_v37, %v1948_v37 }
 0x13b   :  { %v1954_v44 = vsub.f32 %v151_v2, %v219_v40  ;;  %v1956_v45 = vsub.f32 %v153_v5, %v221_v41  ;;  %v266_v46 = vsel %vm168_vm0, %v250_v42, 0.0  ;;  %v272_v49 = vsel %vm168_vm0, %v252_v43, 0.0 }
 0x13c   :  { %267 = vadd.xlane.f32.xlu0 %v266_v46  ;;  %v183_v47 = vpop.xlane.xlu0 %182  ;;  %v186_v48 = vpop.xlane.xlu1 %185 }
 0x13d   :  { %v222_v50 = vmul.f32 0.03125, %v183_v47  ;;  %v223_v51 = vmul.f32 0.03125, %v186_v48  ;;  %v251_v52 = vmul.f32 %v1954_v44, %v1954_v44  ;;  %v253_v53 = vmul.f32 %v1956_v45, %v1956_v45 }
 0x13f   :  { %v1965_v54 = vsub.f32 %v1896_v6, %v222_v50  ;;  %v1968_v55 = vsub.f32 %v1898_v7, %v223_v51  ;;  %v269_v56 = vsel %vm168_vm0, %v251_v52, 0.0  ;;  %v275_v59 = vsel %vm168_vm0, %v253_v53, 0.0  ;;  %v1388_v53 = vld [vmem:[#allocation13] sm:$0xff]  }
 0x140   :  { %273 = vadd.xlane.f32.xlu0 %v272_v49  ;;  %270 = vadd.xlane.f32.xlu1 %v269_v56  ;;  %v189_v57 = vpop.xlane.xlu0 %188  ;;  %v192_v58 = vpop.xlane.xlu1 %191  ;;  %v1389_v56 = vld [vmem:[#allocation10 + $0x8] sm:$0xff]  }
 0x141   :  { %v224_v60 = vmul.f32 0.03125, %v189_v57  ;;  %v225_v61 = vmul.f32 0.03125, %v192_v58  ;;  %v254_v62 = vmul.f32 %v1965_v54, %v1965_v54  ;;  %v255_v63 = vmul.f32 %v1968_v55, %v1968_v55  ;;  %1304 = vmatprep.subr.bf16.mxu1 %v1388_v53  ;;  %v1390_v57 = vld [vmem:[#allocation13 + $0x8] sm:$0xff]  }
 0x142   :  { %1305 = vmatpush3.bf16.msra.mxu1 %v1388_v53 }
 0x143   :  { %v1977_v0 = vsub.f32 %v1902_v10, %v224_v60  ;;  %v1980_v1 = vsub.f32 %v1904_v11, %v225_v61  ;;  %v278_v2 = vsel %vm168_vm0, %v254_v62, 0.0  ;;  %v281_v5 = vsel %vm168_vm0, %v255_v63, 0.0  ;;  %1306 = vmatprep.subr.bf16.mxu1 %v1390_v57 }
 0x144   :  { %276 = vadd.xlane.f32.xlu1 %v275_v59  ;;  %279 = vadd.xlane.f32.xlu0 %v278_v2  ;;  %v195_v3 = vpop.xlane.xlu0 %194  ;;  %v198_v4 = vpop.xlane.xlu1 %197 }
 0x145   :  { %v226_v6 = vmul.f32 0.03125, %v195_v3  ;;  %v227_v7 = vmul.f32 0.03125, %v198_v4  ;;  %v256_v8 = vmul.f32 %v1977_v0, %v1977_v0  ;;  %v257_v9 = vmul.f32 %v1980_v1, %v1980_v1 }
 0x146   :  { %1307 = vmatpush3.bf16.msra.mxu1 %v1390_v57 }
 0x147   :  { %v1989_v10 = vsub.f32 %v1914_v16, %v226_v6  ;;  %v1992_v11 = vsub.f32 %v1916_v17, %v227_v7  ;;  %v284_v12 = vsel %vm168_vm0, %v256_v8, 0.0  ;;  %v287_v15 = vsel %vm168_vm0, %v257_v9, 0.0 }
 0x148   :  { %282 = vadd.xlane.f32.xlu1 %v281_v5  ;;  %285 = vadd.xlane.f32.xlu0 %v284_v12  ;;  %v201_v13 = vpop.xlane.xlu0 %200  ;;  %v204_v14 = vpop.xlane.xlu1 %203 }
 0x149   :  { %v228_v18 = vmul.f32 0.03125, %v201_v13  ;;  %v229_v19 = vmul.f32 0.03125, %v204_v14  ;;  %v258_v22 = vmul.f32 %v1989_v10, %v1989_v10  ;;  %v259_v16 = vmul.f32 %v1992_v11, %v1992_v11 }
 0x14b   :  { %v2001_v23 = vsub.f32 %v1922_v20, %v228_v18  ;;  %v2004_v17 = vsub.f32 %v1924_v21, %v229_v19  ;;  %v290_v26 = vsel %vm168_vm0, %v258_v22, 0.0  ;;  %v293_v31 = vsel %vm168_vm0, %v259_v16, 0.0 }
 0x14c   :  { %288 = vadd.xlane.f32.xlu1 %v287_v15  ;;  %291 = vadd.xlane.f32.xlu0 %v290_v26  ;;  %v207_v27 = vpop.xlane.xlu0 %206  ;;  %v210_v30 = vpop.xlane.xlu1 %209 }
 0x14d   :  { %v230_v32 = vmul.f32 0.03125, %v207_v27  ;;  %v231_v33 = vmul.f32 0.03125, %v210_v30  ;;  %v260_v34 = vmul.f32 %v2001_v23, %v2001_v23  ;;  %v261_v20 = vmul.f32 %v2004_v17, %v2004_v17 }
 0x14f   :  { %v2013_v35 = vsub.f32 %v1930_v24, %v230_v32  ;;  %v2016_v21 = vsub.f32 %v1932_v25, %v231_v33  ;;  %v296_v38 = vsel %vm168_vm0, %v260_v34, 0.0  ;;  %v299_v41 = vsel %vm168_vm0, %v261_v20, 0.0 }
 0x150   :  { %294 = vadd.xlane.f32.xlu1 %v293_v31  ;;  %297 = vadd.xlane.f32.xlu0 %v296_v38  ;;  %v213_v39 = vpop.xlane.xlu0 %212  ;;  %v216_v40 = vpop.xlane.xlu1 %215  ;;  %v2039_v31 = vld [vmem:[#allocation7] ss:$0 sm:$0xff] }
 0x151   :  { %v232_v42 = vmul.f32 0.03125, %v213_v39  ;;  %v233_v43 = vmul.f32 0.03125, %v216_v40  ;;  %v262_v46 = vmul.f32 %v2013_v35, %v2013_v35  ;;  %v263_v24 = vmul.f32 %v2016_v21, %v2016_v21 }
 0x153   :  { %v2025_v47 = vsub.f32 %v1938_v28, %v232_v42  ;;  %v2028_v25 = vsub.f32 %v1940_v29, %v233_v43  ;;  %v302_v48 = vsel %vm168_vm0, %v262_v46, 0.0  ;;  %v305_v49 = vsel %vm168_vm0, %v263_v24, 0.0  ;;  %v1387_v29 = vld [vmem:[#allocation10] sm:$0xff]   ;;  %v2043_v46 = vld [vmem:[#allocation9] ss:$0 sm:$0xff] }
 0x154   :  { %300 = vadd.xlane.f32.xlu1 %v299_v41  ;;  %303 = vadd.xlane.f32.xlu0 %v302_v48 }
 0x155   :  { %v264_v50 = vmul.f32 %v2025_v47, %v2025_v47  ;;  %v265_v51 = vmul.f32 %v2028_v25, %v2028_v25  ;;  %1284 = vmatprep.subr.bf16.mxu0 %v1387_v29 }
 0x156   :  { %1285 = vmatpush3.bf16.msra.mxu0 %v1387_v29 }
 0x157   :  { %v308_v52 = vsel %vm168_vm0, %v264_v50, 0.0  ;;  %v311_v28 = vsel %vm168_vm0, %v265_v51, 0.0  ;;  %1286 = vmatprep.subr.bf16.mxu0 %v1389_v56 }
 0x158   :  { %306 = vadd.xlane.f32.xlu1 %v305_v49  ;;  %309 = vadd.xlane.f32.xlu0 %v308_v52 }
 0x15a   :  { %1287 = vmatpush3.bf16.msra.mxu0 %v1389_v56 }
 0x15c   :  { %312 = vadd.xlane.f32.xlu1 %v311_v28 }
 0x1c9   :  { %v268_v58 = vpop.xlane.xlu0 %267 }
 0x1ca   :  { %v314_v59 = vmul.f32 0.03125, %v268_v58 }
 0x1cc   :  { %v330_v60 = vadd.f32 1e-05, %v314_v59 }
 0x1cd   :  { %v271_v61 = vpop.xlane.xlu1 %270  ;;  %v274_v62 = vpop.xlane.xlu0 %273 }
 0x1ce   :  { %1399 = vrsqrt.f32 %v330_v60  ;;  %v315_v63 = vmul.f32 0.03125, %v271_v61  ;;  %v316_v2 = vmul.f32 0.03125, %v274_v62 }
 0x1d0   :  { %v331_v3 = vadd.f32 1e-05, %v315_v63  ;;  %v332_v4 = vadd.f32 1e-05, %v316_v2 }
 0x1d1   :  { %v277_v5 = vpop.xlane.xlu1 %276  ;;  %v280_v6 = vpop.xlane.xlu0 %279 }
 0x1d2   :  { %1401 = vrsqrt.f32 %v331_v3  ;;  %v317_v7 = vmul.f32 0.03125, %v277_v5  ;;  %v318_v8 = vmul.f32 0.03125, %v280_v6 }
 0x1d3   :  { %1403 = vrsqrt.f32 %v332_v4 }
 0x1d4   :  { %v333_v9 = vadd.f32 1e-05, %v317_v7  ;;  %v334_v12 = vadd.f32 1e-05, %v318_v8 }
 0x1d5   :  { %v283_v13 = vpop.xlane.xlu1 %282  ;;  %v286_v14 = vpop.xlane.xlu0 %285 }
 0x1d6   :  { %1405 = vrsqrt.f32 %v333_v9  ;;  %v319_v15 = vmul.f32 0.03125, %v283_v13  ;;  %v320_v18 = vmul.f32 0.03125, %v286_v14 }
 0x1d7   :  { %1407 = vrsqrt.f32 %v334_v12 }
 0x1d8   :  { %v1400_v19 = vpop.eup %1399  ;;  %v335_v22 = vadd.f32 1e-05, %v319_v15  ;;  %v336_v16 = vadd.f32 1e-05, %v320_v18 }
 0x1d9   :  { %v362_v26 = vmul.f32 %v1400_v19, %v1946_v36  ;;  %v289_v27 = vpop.xlane.xlu1 %288  ;;  %v292_v30 = vpop.xlane.xlu0 %291 }
 0x1da   :  { %1409 = vrsqrt.f32 %v335_v22  ;;  %v321_v32 = vmul.f32 0.03125, %v289_v27  ;;  %v322_v33 = vmul.f32 0.03125, %v292_v30 }
 0x1db   :  { %1411 = vrsqrt.f32 %v336_v16  ;;  %v384_v40 = vmul.f32 %v2039_v31, %v362_v26 }
 0x1dc   :  { %v1402_v34 = vpop.eup %1401  ;;  %v337_v20 = vadd.f32 1e-05, %v321_v32  ;;  %v338_v38 = vadd.f32 1e-05, %v322_v33 }
 0x1dd   :  { %v1404_v39 = vpop.eup %1403  ;;  %v363_v41 = vmul.f32 %v1402_v34, %v1954_v44  ;;  %v295_v42 = vpop.xlane.xlu1 %294  ;;  %v406_v29 = vadd.f32 %v2043_v46, %v384_v40 }
 0x1de   :  { %v298_v43 = vpop.xlane.xlu0 %297  ;;  %v364_v36 = vmul.f32 %v1404_v39, %v1948_v37  ;;  %1413 = vrsqrt.f32 %v337_v20  ;;  %v323_v24 = vmul.f32 0.03125, %v295_v42 }
 0x1df   :  { %v324_v48 = vmul.f32 0.03125, %v298_v43  ;;  %v385_v49 = vmul.f32 %v2039_v31, %v363_v41  ;;  %1415 = vrsqrt.f32 %v338_v38 }
 0x1e0   :  { %v1406_v50 = vpop.eup %1405  ;;  %v339_v51 = vadd.f32 1e-05, %v323_v24  ;;  %v386_v53 = vmul.f32 %v2039_v31, %v364_v36 }
 0x1e1   :  { %v340_v52 = vadd.f32 1e-05, %v324_v48  ;;  %v1408_v28 = vpop.eup %1407  ;;  %v407_v44 = vadd.f32 %v2043_v46, %v385_v49  ;;  %v365_v56 = vmul.f32 %v1406_v50, %v1956_v45  ;;  %v301_v57 = vpop.xlane.xlu1 %300 }
 0x1e2   :  { %v304_v37 = vpop.xlane.xlu0 %303  ;;  %v366_v58 = vmul.f32 %v1408_v28, %v1965_v54  ;;  %1417 = vrsqrt.f32 %v339_v51  ;;  %v325_v59 = vmul.f32 0.03125, %v301_v57  ;;  %v408_v45 = vadd.f32 %v2043_v46, %v386_v53 }
 0x1e3   :  { %v422_v60 = vpack.c.bf16 %v407_v44, %v406_v29  ;;  %v387_v61 = vmul.f32 %v2039_v31, %v365_v56  ;;  %1419 = vrsqrt.f32 %v340_v52  ;;  %v326_v62 = vmul.f32 0.03125, %v304_v37 }
 0x1e4   :  { %v1410_v63 = vpop.eup %1409  ;;  %v388_v2 = vmul.f32 %v2039_v31, %v366_v58  ;;  %v341_v3 = vadd.f32 1e-05, %v325_v59 }
 0x1e5   :  { %v1412_v4 = vpop.eup %1411  ;;  %430 = vst.msk [vmem:[#allocation2] sm:$0xff] %vm168_vm0, %v422_v60  ;;  %v409_v5 = vadd.f32 %v2043_v46, %v387_v61  ;;  %v367_v54 = vmul.f32 %v1410_v63, %v1968_v55  ;;  %v342_v6 = vadd.f32 1e-05, %v326_v62  ;;  %v307_v7 = vpop.xlane.xlu1 %306 }
 0x1e6   :  { %v310_v8 = vpop.xlane.xlu0 %309  ;;  %v368_v9 = vmul.f32 %v1412_v4, %v1977_v0  ;;  %1421 = vrsqrt.f32 %v341_v3  ;;  %v327_v12 = vmul.f32 0.03125, %v307_v7  ;;  %v410_v19 = vadd.f32 %v2043_v46, %v388_v2 }
 0x1e7   :  { %v423_v13 = vpack.c.bf16 %v409_v5, %v408_v45  ;;  %v389_v14 = vmul.f32 %v2039_v31, %v367_v54  ;;  %1423 = vrsqrt.f32 %v342_v6  ;;  %v328_v15 = vmul.f32 0.03125, %v310_v8 }
 0x1e8   :  { %v1414_v18 = vpop.eup %1413  ;;  %v343_v22 = vadd.f32 1e-05, %v327_v12  ;;  %v390_v26 = vmul.f32 %v2039_v31, %v368_v9  ;;  %v1392_v12 = vld [vmem:[#allocation16 + $0x8] sm:$0xff]  }
 0x1e9   :  { %v1416_v16 = vpop.eup %1415  ;;  %431 = vst.msk [vmem:[#allocation2 + $0x8] sm:$0xff] %vm168_vm0, %v423_v13  ;;  %v411_v55 = vadd.f32 %v2043_v46, %v389_v14  ;;  %v369_v0 = vmul.f32 %v1414_v18, %v1980_v1  ;;  %v344_v27 = vadd.f32 1e-05, %v328_v15  ;;  %v313_v30 = vpop.xlane.xlu1 %312  ;;  %v1393_v13 = vld [vmem:[#allocation16 + $0x10] sm:$0xff]   ;;  %v1394_v14 = vld [vmem:[#allocation16 + $0x18] sm:$0xff]   ;;  %v1395_v15 = vld [vmem:[#allocation16 + $0x20] sm:$0xff]  }
 0x1ea   :  { %v370_v32 = vmul.f32 %v1416_v16, %v1989_v10  ;;  %1425 = vrsqrt.f32 %v343_v22  ;;  %v329_v33 = vmul.f32 0.03125, %v313_v30  ;;  %v412_v1 = vadd.f32 %v2043_v46, %v390_v26  ;;  %v1396_v18 = vld [vmem:[#allocation16 + $0x28] sm:$0xff]   ;;  %v1398_v22 = vld [vmem:[#allocation16 + $0x38] sm:$0xff]  }
 0x1eb   :  { %v424_v34 = vpack.c.bf16 %v411_v55, %v410_v19  ;;  %v391_v20 = vmul.f32 %v2039_v31, %v369_v0  ;;  %1427 = vrsqrt.f32 %v344_v27  ;;  %v1397_v19 = vld [vmem:[#allocation16 + $0x30] sm:$0xff]   ;;  %v1708_v16 = vmov 0.0   ;;  %v2130_v55 = vld [vmem:[#allocation15] ss:$0 sm:$0xff] }
 0x1ec   :  { %v1418_v38 = vpop.eup %1417  ;;  %v392_v39 = vmul.f32 %v2039_v31, %v370_v32  ;;  %v345_v40 = vadd.f32 1e-05, %v329_v33  ;;  %v454_v41 = vld [vmem:[#allocation2] sm:$0xff]  ;;  %440 = vst.msk [vmem:[#allocation3 + $0x10] sm:$0xff] %vm168_vm0, %v1708_v16  ;;  %438 = vst.msk [vmem:[#allocation3] sm:$0xff] %vm168_vm0, %v1708_v16 }
 0x1ed   :  { %v1420_v42 = vpop.eup %1419  ;;  %432 = vst.msk [vmem:[#allocation2 + $0x10] sm:$0xff] %vm168_vm0, %v424_v34  ;;  %v413_v43 = vadd.f32 %v2043_v46, %v391_v20  ;;  %v371_v10 = vmul.f32 %v1418_v38, %v1992_v11  ;;  %1288 = vmatprep.mubr.msk.bf16.mxu0 %vm168_vm0, %v454_v41  ;;  %1308 = vmatprep.mubr.msk.bf16.mxu1 %vm168_vm0, %v454_v41  ;;  %439 = vst.msk [vmem:[#allocation3 + $0x8] sm:$0xff] %vm168_vm0, %v1708_v16 }
 0x1ee   :  { %v372_v36 = vmul.f32 %v1420_v42, %v2001_v23  ;;  %1429 = vrsqrt.f32 %v345_v40  ;;  %v414_v50 = vadd.f32 %v2043_v46, %v392_v39  ;;  %441 = vst.msk [vmem:[#allocation3 + $0x18] sm:$0xff] %vm168_vm0, %v1708_v16  ;;  %442 = vst.msk [vmem:[#allocation3 + $0x20] sm:$0xff] %vm168_vm0, %v1708_v16 }
 0x1ef   :  { %v425_v24 = vpack.c.bf16 %v413_v43, %v412_v1  ;;  %v393_v48 = vmul.f32 %v2039_v31, %v371_v10  ;;  %443 = vst.msk [vmem:[#allocation3 + $0x28] sm:$0xff] %vm168_vm0, %v1708_v16  ;;  %444 = vst.msk [vmem:[#allocation3 + $0x30] sm:$0xff] %vm168_vm0, %v1708_v16 }
 0x1f0   :  { %v1422_v49 = vpop.eup %1421  ;;  %v455_v51 = vld [vmem:[#allocation2 + $0x8] sm:$0xff]  ;;  %v394_v11 = vmul.f32 %v2039_v31, %v372_v36  ;;  %445 = vst.msk [vmem:[#allocation3 + $0x38] sm:$0xff] %vm168_vm0, %v1708_v16  ;;  %446 = vst.msk [vmem:[#allocation3 + $0x40] sm:$0xff] %vm168_vm0, %v1708_v16 }
 0x1f1   :  { %v1424_v52 = vpop.eup %1423  ;;  %433 = vst.msk [vmem:[#allocation2 + $0x18] sm:$0xff] %vm168_vm0, %v425_v24  ;;  %v415_v28 = vadd.f32 %v2043_v46, %v393_v48  ;;  %v373_v29 = vmul.f32 %v1422_v49, %v2004_v17  ;;  %1289 = vmatmul.mubr.msk.bf16.vlgmr.msra.gmra.mrb[0].mxu0 %vm168_vm0, %v455_v51  ;;  %1309 = vmatmul.mubr.msk.bf16.vlgmr.msra.gmra.mrb[0].mxu1 %vm168_vm0, %v455_v51  ;;  %447 = vst.msk [vmem:[#allocation3 + $0x48] sm:$0xff] %vm168_vm0, %v1708_v16 }
 0x1f2   :  { %v374_v23 = vmul.f32 %v1424_v52, %v2013_v35  ;;  %v416_v59 = vadd.f32 %v2043_v46, %v394_v11  ;;  %448 = vst.msk [vmem:[#allocation3 + $0x50] sm:$0xff] %vm168_vm0, %v1708_v16  ;;  %449 = vst.msk [vmem:[#allocation3 + $0x58] sm:$0xff] %vm168_vm0, %v1708_v16 }
 0x1f3   :  { %v426_v44 = vpack.c.bf16 %v415_v28, %v414_v50  ;;  %v395_v53 = vmul.f32 %v2039_v31, %v373_v29  ;;  %450 = vst.msk [vmem:[#allocation3 + $0x60] sm:$0xff] %vm168_vm0, %v1708_v16  ;;  %451 = vst.msk [vmem:[#allocation3 + $0x68] sm:$0xff] %vm168_vm0, %v1708_v16 }
 0x1f4   :  { %v1426_v56 = vpop.eup %1425  ;;  %v396_v57 = vmul.f32 %v2039_v31, %v374_v23  ;;  %v456_v37 = vld [vmem:[#allocation2 + $0x10] sm:$0xff]  ;;  %452 = vst.msk [vmem:[#allocation3 + $0x70] sm:$0xff] %vm168_vm0, %v1708_v16  ;;  %453 = vst.msk [vmem:[#allocation3 + $0x78] sm:$0xff] %vm168_vm0, %v1708_v16 }
 0x1f5   :  { %v1428_v58 = vpop.eup %1427  ;;  %434 = vst.msk [vmem:[#allocation2 + $0x20] sm:$0xff] %vm168_vm0, %v426_v44  ;;  %v417_v17 = vadd.f32 %v2043_v46, %v395_v53  ;;  %v375_v60 = vmul.f32 %v1426_v56, %v2016_v21  ;;  %1292 = vmatprep.mubr.msk.bf16.mxu0 %vm168_vm0, %v456_v37  ;;  %1312 = vmatprep.mubr.msk.bf16.mxu1 %vm168_vm0, %v456_v37 }
 0x1f6   :  { %v376_v35 = vmul.f32 %v1428_v58, %v2025_v47  ;;  %v418_v2 = vadd.f32 %v2043_v46, %v396_v57 }
 0x1f7   :  { %v427_v61 = vpack.c.bf16 %v417_v17, %v416_v59  ;;  %v397_v62 = vmul.f32 %v2039_v31, %v375_v60 }
 0x1f8   :  { %v1430_v63 = vpop.eup %1429  ;;  %v457_v3 = vld [vmem:[#allocation2 + $0x18] sm:$0xff]  ;;  %v398_v45 = vmul.f32 %v2039_v31, %v376_v35 }
 0x1f9   :  { %435 = vst.msk [vmem:[#allocation2 + $0x28] sm:$0xff] %vm168_vm0, %v427_v61  ;;  %v419_v4 = vadd.f32 %v2043_v46, %v397_v62  ;;  %v377_v21 = vmul.f32 %v1430_v63, %v2028_v25  ;;  %1293 = vmatmul.mubr.msk.bf16.gmra.mrb[4].mxu0 %vm168_vm0, %v457_v3  ;;  %1313 = vmatmul.mubr.msk.bf16.gmra.mrb[4].mxu1 %vm168_vm0, %v457_v3 }
 0x1fa   :  { %v420_v6 = vadd.f32 %v2043_v46, %v398_v45 }
 0x1fb   :  { %v428_v47 = vpack.c.bf16 %v419_v4, %v418_v2  ;;  %v399_v5 = vmul.f32 %v2039_v31, %v377_v21  ;;  %v2171_v2 = vld [vmem:[#allocation12] ss:$0 sm:$0xff] }
 0x1fc   :  { %v458_v54 = vld [vmem:[#allocation2 + $0x20] sm:$0xff] }
 0x1fd   :  { %436 = vst.msk [vmem:[#allocation2 + $0x30] sm:$0xff] %vm168_vm0, %v428_v47  ;;  %v421_v7 = vadd.f32 %v2043_v46, %v399_v5  ;;  %1296 = vmatprep.mubr.msk.bf16.mxu0 %vm168_vm0, %v458_v54  ;;  %1316 = vmatprep.mubr.msk.bf16.mxu1 %vm168_vm0, %v458_v54  ;;  %v1391_v46 = vld [vmem:[#allocation16] sm:$0xff]  }
 0x1fe   :  { %1324 = vmatprep.subr.bf16.mxu0 %v1391_v46  ;;  %1356 = vmatprep.subr.bf16.mxu1 %v1391_v46 }
 0x1ff   :  { %v429_v8 = vpack.c.bf16 %v421_v7, %v420_v6  ;;  %1325 = vmatpush3.bf16.msra.mxu0 %v1391_v46  ;;  %1364 = vmatpush3.bf16.msra.mxu1 %v1391_v46 }
 0x200   :  { %v459_v25 = vld [vmem:[#allocation2 + $0x28] sm:$0xff]  ;;  %1326 = vmatprep.subr.bf16.mxu0 %v1392_v12  ;;  %1357 = vmatprep.subr.bf16.mxu1 %v1392_v12 }
 0x201   :  { %437 = vst.msk [vmem:[#allocation2 + $0x38] sm:$0xff] %vm168_vm0, %v429_v8  ;;  %1297 = vmatmul.mubr.msk.bf16.gmra.mrb[8].mxu0 %vm168_vm0, %v459_v25  ;;  %1317 = vmatmul.mubr.msk.bf16.gmra.mrb[8].mxu1 %vm168_vm0, %v459_v25 }
 0x203   :  { %1327 = vmatpush3.bf16.msra.mxu0 %v1392_v12  ;;  %1365 = vmatpush3.bf16.msra.mxu1 %v1392_v12 }
 0x204   :  { %v460_v31 = vld [vmem:[#allocation2 + $0x30] sm:$0xff]  ;;  %1328 = vmatprep.subr.bf16.mxu0 %v1393_v13  ;;  %1358 = vmatprep.subr.bf16.mxu1 %v1393_v13 }
 0x205   :  { %1300 = vmatprep.mubr.msk.bf16.mxu0 %vm168_vm0, %v460_v31  ;;  %1320 = vmatprep.mubr.msk.bf16.mxu1 %vm168_vm0, %v460_v31 }
 0x207   :  { %1329 = vmatpush3.bf16.msra.mxu0 %v1393_v13  ;;  %1366 = vmatpush3.bf16.msra.mxu1 %v1393_v13 }
 0x208   :  { %v461_v9 = vld [vmem:[#allocation2 + $0x38] sm:$0xff]  ;;  %1330 = vmatprep.subr.bf16.mxu0 %v1394_v14  ;;  %1359 = vmatprep.subr.bf16.mxu1 %v1394_v14 }
 0x209   :  { %1301 = vmatmul.mubr.msk.bf16.gmra.mrb[12].mxu0 %vm168_vm0, %v461_v9  ;;  %1321 = vmatmul.mubr.msk.bf16.gmra.mrb[12].mxu1 %vm168_vm0, %v461_v9 }
 0x20b   :  { %1331 = vmatpush3.bf16.msra.mxu0 %v1394_v14  ;;  %1367 = vmatpush3.bf16.msra.mxu1 %v1394_v14 }
 0x20c   :  { %1332 = vmatprep.subr.bf16.mxu0 %v1395_v15  ;;  %1360 = vmatprep.subr.bf16.mxu1 %v1395_v15 }
 0x20f   :  { %1333 = vmatpush3.bf16.msra.mxu0 %v1395_v15  ;;  %1368 = vmatpush3.bf16.msra.mxu1 %v1395_v15 }
 0x210   :  { %1334 = vmatprep.subr.bf16.mxu0 %v1396_v18  ;;  %1361 = vmatprep.subr.bf16.mxu1 %v1396_v18 }
 0x213   :  { %1335 = vmatpush3.bf16.msra.mxu0 %v1396_v18  ;;  %1369 = vmatpush3.bf16.msra.mxu1 %v1396_v18 }
 0x214   :  { %1336 = vmatprep.subr.bf16.mxu0 %v1397_v19  ;;  %1362 = vmatprep.subr.bf16.mxu1 %v1397_v19 }
 0x217   :  { %1337 = vmatpush3.bf16.msra.mxu0 %v1397_v19  ;;  %1370 = vmatpush3.bf16.msra.mxu1 %v1397_v19 }
 0x218   :  { %1338 = vmatprep.subr.bf16.mxu0 %v1398_v22  ;;  %1363 = vmatprep.subr.bf16.mxu1 %v1398_v22 }
 0x21b   :  { %1339 = vmatpush3.bf16.msra.mxu0 %v1398_v22  ;;  %1371 = vmatpush3.bf16.msra.mxu1 %v1398_v22 }
 0x2c4   :  { %v1290_v26 = vpop.f32.mrb[0].mxu0  ;;  %v1310_v0 = vpop.f32.mrb[0].mxu1 }
 0x2c5   :  { %v673_v27 = vadd.f32 %v1310_v0, %v2130_v55  ;;  %v544_v30 = vpop.f32.mrb[1].mxu0  ;;  %v664_v32 = vpop.f32.mrb[1].mxu1  ;;  %v2182_v7 = vadd.f32 %v1290_v26, %v2171_v2 }
 0x2c6   :  { %v2134_v33 = vadd.f32 %v2130_v55, %v664_v32  ;;  %v1291_v34 = vpop.f32.mrb[2].mxu0  ;;  %v1311_v20 = vpop.f32.mrb[2].mxu1  ;;  %v2185_v8 = vadd.f32 %v2171_v2, %v544_v30 }
 0x2c7   :  { %v745_v38 = vmul.f32 0.044715, %v673_v27  ;;  %v2137_v39 = vadd.f32 %v1311_v20, %v2130_v55  ;;  %v547_v40 = vpop.f32.mrb[3].mxu0  ;;  %v667_v41 = vpop.f32.mrb[3].mxu1  ;;  %v729_v46 = vmul.f32 0.5, %v673_v27 }
 0x2c8   :  { %v743_v42 = vmul.f32 0.044715, %v2134_v33  ;;  %v2141_v1 = vadd.f32 %v2130_v55, %v667_v41  ;;  %v2207_v30 = vadd.f32 %v2171_v2, %v547_v40 }
 0x2c9   :  { %v761_v43 = vmul.f32 %v745_v38, %v673_v27  ;;  %v746_v10 = vmul.f32 0.044715, %v2137_v39  ;;  %v730_v40 = vmul.f32 0.5, %v2137_v39 }
 0x2ca   :  { %v759_v36 = vmul.f32 %v743_v42, %v2134_v33  ;;  %v744_v24 = vmul.f32 0.044715, %v2141_v1 }
 0x2cb   :  { %v777_v48 = vmul.f32 %v761_v43, %v673_v27  ;;  %v762_v49 = vmul.f32 %v746_v10, %v2137_v39 }
 0x2cc   :  { %v775_v50 = vmul.f32 %v759_v36, %v2134_v33  ;;  %v760_v51 = vmul.f32 %v744_v24, %v2141_v1  ;;  %v2149_v52 = vpop.f32.mrb[4].mxu0  ;;  %v1314_v28 = vpop.f32.mrb[4].mxu1 }
 0x2cd   :  { %v793_v11 = vadd.f32 %v777_v48, %v673_v27  ;;  %v778_v29 = vmul.f32 %v762_v49, %v2137_v39  ;;  %v2152_v23 = vpop.f32.mrb[5].mxu0  ;;  %v680_v44 = vpop.f32.mrb[5].mxu1  ;;  %v2157_v57 = vadd.f32 %v1314_v28, %v2130_v55  ;;  %v2204_v27 = vadd.f32 %v1291_v34, %v2171_v2 }
 0x2ce   :  { %v791_v53 = vadd.f32 %v775_v50, %v2134_v33  ;;  %v776_v56 = vmul.f32 %v760_v51, %v2141_v1  ;;  %v2160_v37 = vadd.f32 %v2130_v55, %v680_v44  ;;  %v2162_v58 = vpop.f32.mrb[6].mxu0  ;;  %v1315_v59 = vpop.f32.mrb[6].mxu1  ;;  %v2219_v34 = vmul.f32 0.5, %v2134_v33 }
 0x2cf   :  { %v809_v17 = vmul.f32 0.7978846, %v793_v11  ;;  %v794_v60 = vadd.f32 %v778_v29, %v2137_v39  ;;  %v2165_v35 = vpop.f32.mrb[7].mxu0  ;;  %v683_v61 = vpop.f32.mrb[7].mxu1  ;;  %v2169_v63 = vadd.f32 %v1315_v59, %v2130_v55  ;;  %v749_v21 = vmul.f32 0.044715, %v2157_v57 }
 0x2d0   :  { %v747_v62 = vmul.f32 0.044715, %v2160_v37  ;;  %v792_v4 = vadd.f32 %v776_v56, %v2141_v1  ;;  %v2175_v45 = vadd.f32 %v2130_v55, %v683_v61  ;;  %v807_v5 = vmul.f32 0.7978846, %v791_v53 }
 0x2d1   :  { %1431 = vtanh.f32 %v809_v17  ;;  %v810_v3 = vmul.f32 0.7978846, %v794_v60  ;;  %v750_v54 = vmul.f32 0.044715, %v2169_v63  ;;  %v765_v19 = vmul.f32 %v749_v21, %v2157_v57 }
 0x2d2   :  { %v763_v47 = vmul.f32 %v747_v62, %v2160_v37  ;;  %v748_v6 = vmul.f32 0.044715, %v2175_v45  ;;  %v808_v18 = vmul.f32 0.7978846, %v792_v4  ;;  %v728_v29 = vmul.f32 0.5, %v2141_v1 }
 0x2d3   :  { %1433 = vtanh.f32 %v810_v3  ;;  %v766_v32 = vmul.f32 %v750_v54, %v2169_v63  ;;  %v781_v48 = vmul.f32 %v765_v19, %v2157_v57  ;;  %v731_v21 = vmul.f32 0.5, %v2160_v37 }
 0x2d4   :  { %v779_v25 = vmul.f32 %v763_v47, %v2160_v37  ;;  %v2188_v31 = vpop.f32.mrb[8].mxu0  ;;  %v1318_v9 = vpop.f32.mrb[8].mxu1  ;;  %v764_v12 = vmul.f32 %v748_v6, %v2175_v45  ;;  %1435 = vtanh.f32 %v807_v5 }
 0x2d5   :  { %v2192_v13 = vadd.f32 %v1318_v9, %v2130_v55  ;;  %v2194_v14 = vpop.f32.mrb[9].mxu0  ;;  %v696_v15 = vpop.f32.mrb[9].mxu1  ;;  %1437 = vtanh.f32 %v808_v18  ;;  %v782_v11 = vmul.f32 %v766_v32, %v2169_v63  ;;  %v797_v5 = vadd.f32 %v781_v48, %v2157_v57 }
 0x2d6   :  { %v795_v22 = vadd.f32 %v779_v25, %v2160_v37  ;;  %v2199_v16 = vadd.f32 %v2130_v55, %v696_v15  ;;  %v2201_v26 = vpop.f32.mrb[10].mxu0  ;;  %v1319_v0 = vpop.f32.mrb[10].mxu1  ;;  %v780_v42 = vmul.f32 %v764_v12, %v2175_v45 }
 0x2d7   :  { %v753_v20 = vmul.f32 0.044715, %v2192_v13  ;;  %v2211_v38 = vpop.f32.mrb[11].mxu0  ;;  %v699_v41 = vpop.f32.mrb[11].mxu1  ;;  %v2216_v10 = vadd.f32 %v1319_v0, %v2130_v55  ;;  %v798_v32 = vadd.f32 %v782_v11, %v2169_v63 }
 0x2d8   :  { %v751_v43 = vmul.f32 0.044715, %v2199_v16  ;;  %v2224_v24 = vadd.f32 %v2130_v55, %v699_v41  ;;  %v811_v51 = vmul.f32 0.7978846, %v795_v22  ;;  %v796_v53 = vadd.f32 %v780_v42, %v2175_v45 }
 0x2d9   :  { %v769_v36 = vmul.f32 %v753_v20, %v2192_v13  ;;  %v754_v50 = vmul.f32 0.044715, %v2216_v10 }
 0x2da   :  { %v767_v49 = vmul.f32 %v751_v43, %v2199_v16  ;;  %v752_v39 = vmul.f32 0.044715, %v2224_v24  ;;  %1439 = vtanh.f32 %v811_v51  ;;  %v812_v42 = vmul.f32 0.7978846, %v796_v53 }
 0x2db   :  { %v1432_v28 = vpop.eup %1431  ;;  %v785_v33 = vmul.f32 %v769_v36, %v2192_v13  ;;  %v770_v56 = vmul.f32 %v754_v50, %v2216_v10 }
 0x2dc   :  { %v841_v44 = vadd.f32 1.0, %v1432_v28  ;;  %v2235_v59 = vpop.f32.mrb[12].mxu0  ;;  %v1322_v17 = vpop.f32.mrb[12].mxu1  ;;  %v768_v62 = vmul.f32 %v752_v39, %v2224_v24  ;;  %v783_v54 = vmul.f32 %v767_v49, %v2199_v16 }
 0x2dd   :  { %v1434_v60 = vpop.eup %1433  ;;  %v801_v61 = vadd.f32 %v785_v33, %v2192_v13  ;;  %v2240_v3 = vadd.f32 %v1322_v17, %v2130_v55  ;;  %v2242_v4 = vpop.f32.mrb[13].mxu0  ;;  %v786_v6 = vmul.f32 %v770_v56, %v2216_v10 }
 0x2de   :  { %v712_v1 = vpop.f32.mrb[13].mxu1  ;;  %v842_v47 = vadd.f32 1.0, %v1434_v60  ;;  %v2248_v25 = vpop.f32.mrb[14].mxu0  ;;  %v857_v12 = vmul.f32 %v841_v44, %v729_v46  ;;  %v784_v18 = vmul.f32 %v768_v62, %v2224_v24  ;;  %v799_v48 = vadd.f32 %v783_v54, %v2199_v16 }
 0x2df   :  { %v1323_v9 = vpop.f32.mrb[14].mxu1  ;;  %v817_v15 = vmul.f32 0.7978846, %v801_v61  ;;  %v757_v19 = vmul.f32 0.044715, %v2240_v3  ;;  %v2252_v22 = vpop.f32.mrb[15].mxu0  ;;  %v802_v20 = vadd.f32 %v786_v6, %v2216_v10  ;;  %v2257_v41 = vadd.f32 %v2130_v55, %v712_v1 }
 0x2e0   :  { %v715_v0 = vpop.f32.mrb[15].mxu1  ;;  %v1436_v37 = vpop.eup %1435  ;;  %v858_v43 = vmul.f32 %v842_v47, %v730_v40  ;;  %v2261_v36 = vadd.f32 %v1323_v9, %v2130_v55  ;;  %v800_v11 = vadd.f32 %v784_v18, %v2224_v24  ;;  %v873_v39 = vmul.f32 %v857_v12, %v2182_v7 }
 0x2e1   :  { %1441 = vtanh.f32 %v817_v15  ;;  %v773_v46 = vmul.f32 %v757_v19, %v2240_v3  ;;  %v818_v49 = vmul.f32 0.7978846, %v802_v20  ;;  %v755_v50 = vmul.f32 0.044715, %v2257_v41  ;;  %v1438_v28 = vpop.eup %1437 }
 0x2e2   :  { %v2266_v51 = vadd.f32 %v2130_v55, %v715_v0  ;;  %v758_v33 = vmul.f32 0.044715, %v2261_v36  ;;  %v839_v40 = vadd.f32 1.0, %v1436_v37  ;;  %v840_v56 = vadd.f32 1.0, %v1438_v28 }
 0x2e3   :  { %1443 = vtanh.f32 %v818_v49  ;;  %v771_v44 = vmul.f32 %v755_v50, %v2257_v41  ;;  %v789_v17 = vmul.f32 %v773_v46, %v2240_v3  ;;  %v874_v61 = vmul.f32 %v858_v43, %v2204_v27 }
 0x2e4   :  { %v756_v53 = vmul.f32 0.044715, %v2266_v51  ;;  %v774_v60 = vmul.f32 %v758_v33, %v2261_v36  ;;  %v855_v55 = vmul.f32 %v839_v40, %v2219_v34  ;;  %v1440_v62 = vpop.eup %1439  ;;  %v856_v7 = vmul.f32 %v840_v56, %v728_v29 }
 0x2e5   :  { %v787_v1 = vmul.f32 %v771_v44, %v2257_v41  ;;  %1445 = vtanh.f32 %v812_v42  ;;  %v888_v9 = vpack.c.bf16 %v874_v61, %v873_v39  ;;  %v843_v12 = vadd.f32 1.0, %v1440_v62 }
 0x2e6   :  { %v772_v47 = vmul.f32 %v756_v53, %v2266_v51  ;;  %v790_v54 = vmul.f32 %v774_v60, %v2261_v36  ;;  %v871_v6 = vmul.f32 %v855_v55, %v2185_v8  ;;  %v561_v15 = vadd.f32 %v2171_v2, %v2152_v23 }
 0x2e7   :  { %v872_v27 = vmul.f32 %v856_v7, %v2207_v30  ;;  %v803_v18 = vadd.f32 %v787_v1, %v2257_v41  ;;  %v859_v19 = vmul.f32 %v843_v12, %v731_v21  ;;  %v813_v0 = vmul.f32 0.7978846, %v797_v5 }
 0x2e8   :  { %v788_v34 = vmul.f32 %v772_v47, %v2266_v51  ;;  %v814_v37 = vmul.f32 0.7978846, %v798_v32  ;;  %v805_v29 = vadd.f32 %v789_v17, %v2240_v3  ;;  %v806_v20 = vadd.f32 %v790_v54, %v2261_v36 }
 0x2e9   :  { %v887_v42 = vpack.c.bf16 %v872_v27, %v871_v6  ;;  %v875_v46 = vmul.f32 %v859_v19, %v561_v15  ;;  %1447 = vtanh.f32 %v813_v0  ;;  %v815_v23 = vmul.f32 0.7978846, %v799_v48 }
 0x2ea   :  { %v804_v8 = vadd.f32 %v788_v34, %v2266_v51  ;;  %v816_v49 = vmul.f32 0.7978846, %v800_v11  ;;  %v737_v50 = vmul.f32 0.5, %v2192_v13  ;;  %1449 = vtanh.f32 %v814_v37 }
 0x2eb   :  { %v1442_v43 = vpop.eup %1441  ;;  %1340 = vmatprep.mubr.bf16.mxu0 %v887_v42  ;;  %1451 = vtanh.f32 %v815_v23  ;;  %v819_v21 = vmul.f32 0.7978846, %v803_v18  ;;  %v585_v28 = vadd.f32 %v2188_v31, %v2171_v2  ;;  %v821_v40 = vmul.f32 0.7978846, %v805_v29 }
 0x2ec   :  { %v849_v30 = vadd.f32 1.0, %v1442_v43  ;;  %1341 = vmatmul.mubr.bf16.vlgmr.msra.gmra.mrb[16].mxu0 %v888_v9  ;;  %v820_v5 = vmul.f32 0.7978846, %v804_v8  ;;  %1453 = vtanh.f32 %v816_v49  ;;  %v738_v39 = vmul.f32 0.5, %v2216_v10 }
 0x2ed   :  { %v1444_v32 = vpop.eup %1443  ;;  %1455 = vtanh.f32 %v819_v21  ;;  %v822_v11 = vmul.f32 0.7978846, %v806_v20  ;;  %v732_v44 = vmul.f32 0.5, %v2175_v45  ;;  %v588_v56 = vadd.f32 %v2201_v26, %v2171_v2 }
 0x2ee   :  { %v865_v33 = vmul.f32 %v849_v30, %v737_v50  ;;  %v850_v48 = vadd.f32 1.0, %v1444_v32  ;;  %1457 = vtanh.f32 %v820_v5  ;;  %v564_v31 = vadd.f32 %v2171_v2, %v2165_v35 }
 0x2ef   :  { %v1446_v13 = vpop.eup %1445  ;;  %1459 = vtanh.f32 %v821_v40  ;;  %v569_v62 = vadd.f32 %v2149_v52, %v2171_v2  ;;  %v572_v45 = vadd.f32 %v2162_v58, %v2171_v2  ;;  %v577_v7 = vadd.f32 %v2171_v2, %v2194_v14 }
 0x2f0   :  { %v2294_v53 = vmul.f32 %v865_v33, %v585_v28  ;;  %v866_v17 = vmul.f32 %v850_v48, %v738_v39  ;;  %v844_v60 = vadd.f32 1.0, %v1446_v13  ;;  %1461 = vtanh.f32 %v822_v11 }
 0x2f1   :  { %v580_v54 = vadd.f32 %v2171_v2, %v2211_v38  ;;  %v733_v35 = vmul.f32 0.5, %v2157_v57  ;;  %v593_v52 = vadd.f32 %v2171_v2, %v2242_v4  ;;  %v734_v58 = vmul.f32 0.5, %v2169_v63 }
 0x2f2   :  { %v860_v10 = vmul.f32 %v844_v60, %v732_v44  ;;  %v882_v55 = vmul.f32 %v866_v17, %v588_v56  ;;  %v596_v27 = vadd.f32 %v2171_v2, %v2252_v22  ;;  %v735_v14 = vmul.f32 0.5, %v2199_v16  ;;  %v897_v56 = vld [vmem:[#allocation3 + $0x10] sm:$0xff]  ;;  %v895_v17 = vld [vmem:[#allocation3] sm:$0xff]  ;;  %v898_v60 = vld [vmem:[#allocation3 + $0x18] sm:$0xff] }
 0x2f3   :  { %v1448_v61 = vpop.eup %1447  ;;  %v736_v0 = vmul.f32 0.5, %v2224_v24  ;;  %v739_v4 = vmul.f32 0.5, %v2257_v41  ;;  %v740_v8 = vmul.f32 0.5, %v2266_v51  ;;  %v741_v16 = vmul.f32 0.5, %v2240_v3 }
 0x2f4   :  { %v876_v1 = vmul.f32 %v860_v10, %v564_v31  ;;  %v892_v47 = vpack.c.bf16 %v882_v55, %v2294_v53  ;;  %v1450_v26 = vpop.eup %1449  ;;  %v845_v6 = vadd.f32 1.0, %v1448_v61  ;;  %v742_v24 = vmul.f32 0.5, %v2261_v36  ;;  %v896_v55 = vld [vmem:[#allocation3 + $0x8] sm:$0xff] }
 0x2f5   :  { %v1452_v9 = vpop.eup %1451  ;;  %v846_v15 = vadd.f32 1.0, %v1450_v26  ;;  %v601_v51 = vadd.f32 %v2235_v59, %v2171_v2  ;;  %v604_v39 = vadd.f32 %v2248_v25, %v2171_v2  ;;  %v1148_v26 = vld [vmem:[#allocation4 + $0x10] sm:$0xff] }
 0x2f6   :  { %v889_v12 = vpack.c.bf16 %v876_v1, %v875_v46  ;;  %v1454_v34 = vpop.eup %1453  ;;  %v861_v18 = vmul.f32 %v845_v6, %v733_v35  ;;  %v847_v19 = vadd.f32 1.0, %v1452_v9  ;;  %v2329_v1 = vld [vmem:[#allocation18] ss:$0 sm:$0xff]  ;;  %v1146_v35 = vld [vmem:[#allocation4] sm:$0xff] }
 0x2f7   :  { %v1456_v38 = vpop.eup %1455  ;;  %v862_v57 = vmul.f32 %v846_v15, %v734_v58  ;;  %v848_v37 = vadd.f32 1.0, %v1454_v34  ;;  %v1147_v34 = vld [vmem:[#allocation4 + $0x8] sm:$0xff] }
 0x2f8   :  { %1344 = vmatprep.mubr.bf16.mxu0 %v889_v12  ;;  %v1458_v29 = vpop.eup %1457  ;;  %v877_v20 = vmul.f32 %v861_v18, %v569_v62  ;;  %v863_v63 = vmul.f32 %v847_v19, %v735_v14  ;;  %v851_v42 = vadd.f32 1.0, %v1456_v38  ;;  %v901_v38 = vld [vmem:[#allocation3 + $0x30] sm:$0xff] }
 0x2f9   :  { %v1460_v43 = vpop.eup %1459  ;;  %v878_v22 = vmul.f32 %v862_v57, %v572_v45  ;;  %v864_v46 = vmul.f32 %v848_v37, %v736_v0  ;;  %v852_v23 = vadd.f32 1.0, %v1458_v29  ;;  %v899_v57 = vld [vmem:[#allocation3 + $0x20] sm:$0xff]  ;;  %v902_v37 = vld [vmem:[#allocation3 + $0x38] sm:$0xff] }
 0x2fa   :  { %v1462_v49 = vpop.eup %1461  ;;  %v879_v50 = vmul.f32 %v863_v63, %v577_v7  ;;  %v867_v30 = vmul.f32 %v851_v42, %v739_v4  ;;  %v853_v21 = vadd.f32 1.0, %v1460_v43  ;;  %v905_v63 = vld [vmem:[#allocation3 + $0x50] sm:$0xff]  ;;  %v903_v43 = vld [vmem:[#allocation3 + $0x40] sm:$0xff] }
 0x2fb   :  { %v890_v5 = vpack.c.bf16 %v878_v22, %v877_v20  ;;  %v880_v41 = vmul.f32 %v864_v46, %v580_v54  ;;  %v868_v32 = vmul.f32 %v852_v23, %v740_v8  ;;  %v854_v28 = vadd.f32 1.0, %v1462_v49  ;;  %v900_v20 = vld [vmem:[#allocation3 + $0x28] sm:$0xff] }
 0x2fc   :  { %v883_v33 = vmul.f32 %v867_v30, %v593_v52  ;;  %v869_v40 = vmul.f32 %v853_v21, %v741_v16  ;;  %v1149_v52 = vld [vmem:[#allocation4 + $0x18] sm:$0xff] }
 0x2fd   :  { %1345 = vmatmul.mubr.bf16.gmra.mrb[20].mxu0 %v890_v5  ;;  %v891_v3 = vpack.c.bf16 %v880_v41, %v879_v50  ;;  %v884_v48 = vmul.f32 %v868_v32, %v596_v27  ;;  %v870_v11 = vmul.f32 %v854_v28, %v742_v24  ;;  %v906_v16 = vld [vmem:[#allocation3 + $0x58] sm:$0xff]  ;;  %v904_v24 = vld [vmem:[#allocation3 + $0x48] sm:$0xff] }
 0x2fe   :  { %v885_v13 = vmul.f32 %v869_v40, %v601_v51  ;;  %v1152_v51 = vld [vmem:[#allocation4 + $0x30] sm:$0xff] }
 0x2ff   :  { %1348 = vmatprep.mubr.bf16.mxu1 %v891_v3  ;;  %v893_v36 = vpack.c.bf16 %v884_v48, %v883_v33  ;;  %v886_v44 = vmul.f32 %v870_v11, %v604_v39  ;;  %v909_v33 = vld [vmem:[#allocation3 + $0x70] sm:$0xff]  ;;  %v1150_v39 = vld [vmem:[#allocation4 + $0x20] sm:$0xff] }
 0x300   :  { %1349 = vmatmul.mubr.bf16.vlgmr.msra.gmra.mrb[16].mxu1 %v892_v47  ;;  %v907_v3 = vld [vmem:[#allocation3 + $0x60] sm:$0xff] }
 0x301   :  { %1352 = vmatprep.mubr.bf16.mxu1 %v893_v36  ;;  %v894_v53 = vpack.c.bf16 %v886_v44, %v885_v13  ;;  %v1153_v13 = vld [vmem:[#allocation4 + $0x38] sm:$0xff] }
 0x302   :  { %v910_v44 = vld [vmem:[#allocation3 + $0x78] sm:$0xff] }
 0x308   :  { %1353 = vmatmul.mubr.bf16.gmra.mrb[20].mxu1 %v894_v53 }
 0x3bf   :  { %v1342_v59 = vpop.f32.mrb[16].mxu0 }
 0x3c0   :  { %v1074_v31 = vadd.f32 %v1342_v59, %v897_v56  ;;  %v1009_v10 = vpop.f32.mrb[17].mxu0 }
 0x3c1   :  { %v1072_v2 = vadd.f32 %v1009_v10, %v895_v17  ;;  %v1343_v25 = vpop.f32.mrb[18].mxu0  ;;  %v1151_v17 = vld [vmem:[#allocation4 + $0x28] sm:$0xff] }
 0x3c2   :  { %1090 = vst.msk [vmem:[#allocation3 + $0x10] sm:$0xff] %vm168_vm0, %v1074_v31  ;;  %v1075_v61 = vadd.f32 %v1343_v25, %v898_v60  ;;  %v1012_v62 = vpop.f32.mrb[19].mxu0  ;;  %v908_v31 = vld [vmem:[#allocation3 + $0x68] sm:$0xff] }
 0x3c3   :  { %1088 = vst.msk [vmem:[#allocation3] sm:$0xff] %vm168_vm0, %v1072_v2  ;;  %v1073_v45 = vadd.f32 %v1012_v62, %v896_v55 }
 0x3c4   :  { %1091 = vst.msk [vmem:[#allocation3 + $0x18] sm:$0xff] %vm168_vm0, %v1075_v61  ;;  %v1156_v61 = vld [vmem:[#allocation4 + $0x50] sm:$0xff] }
 0x3c5   :  { %1089 = vst.msk [vmem:[#allocation3 + $0x8] sm:$0xff] %vm168_vm0, %v1073_v45 }
 0x3c9   :  { %v1109_v47 = vld [vmem:[#allocation3 + $0x10] sm:$0xff] }
 0x3ca   :  { %v1132_v7 = vadd.f32 %v2329_v1, %v1109_v47  ;;  %v1107_v54 = vld [vmem:[#allocation3] sm:$0xff] }
 0x3cb   :  { %v1130_v6 = vadd.f32 %v2329_v1, %v1107_v54  ;;  %v1110_v9 = vld [vmem:[#allocation3 + $0x18] sm:$0xff] }
 0x3cc   :  { %v1164_v12 = vadd.f32 %v1148_v26, %v1132_v7  ;;  %v1133_v58 = vadd.f32 %v2329_v1, %v1110_v9  ;;  %v1108_v15 = vld [vmem:[#allocation3 + $0x8] sm:$0xff] }
 0x3cd   :  { %v1162_v27 = vadd.f32 %v1146_v35, %v1130_v6  ;;  %v1131_v18 = vadd.f32 %v2329_v1, %v1108_v15  ;;  %v1154_v35 = vld [vmem:[#allocation4 + $0x40] sm:$0xff]  ;;  %v1157_v15 = vld [vmem:[#allocation4 + $0x58] sm:$0xff] }
 0x3ce   :  { %1180 = vst.msk [vmem:[#allocation19 + $0x10] sm:$0xff] %vm168_vm0, %v1164_v12  ;;  %v1165_v14 = vadd.f32 %v1149_v52, %v1133_v58 }
 0x3cf   :  { %1178 = vst.msk [vmem:[#allocation19] sm:$0xff] %vm168_vm0, %v1162_v27  ;;  %v1163_v19 = vadd.f32 %v1147_v34, %v1131_v18 }
 0x3d0   :  { %1181 = vst.msk [vmem:[#allocation19 + $0x18] sm:$0xff] %vm168_vm0, %v1165_v14  ;;  %v1346_v0 = vpop.f32.mrb[20].mxu0 }
 0x3d1   :  { %1179 = vst.msk [vmem:[#allocation19 + $0x8] sm:$0xff] %vm168_vm0, %v1163_v19  ;;  %v1078_v4 = vadd.f32 %v1346_v0, %v901_v38  ;;  %v1025_v29 = vpop.f32.mrb[21].mxu0  ;;  %v1155_v38 = vld [vmem:[#allocation4 + $0x48] sm:$0xff] }
 0x3d2   :  { %v1076_v8 = vadd.f32 %v1025_v29, %v899_v57  ;;  %v1347_v42 = vpop.f32.mrb[22].mxu0 }
 0x3d3   :  { %1094 = vst.msk [vmem:[#allocation3 + $0x30] sm:$0xff] %vm168_vm0, %v1078_v4  ;;  %v1079_v22 = vadd.f32 %v1347_v42, %v902_v37  ;;  %v1028_v46 = vpop.f32.mrb[23].mxu0  ;;  %v1350_v23 = vpop.f32.mrb[16].mxu1  ;;  %v1158_v42 = vld [vmem:[#allocation4 + $0x60] sm:$0xff] }
 0x3d4   :  { %1092 = vst.msk [vmem:[#allocation3 + $0x20] sm:$0xff] %vm168_vm0, %v1076_v8  ;;  %v1077_v49 = vadd.f32 %v1028_v46, %v900_v20  ;;  %v1082_v50 = vadd.f32 %v1350_v23, %v905_v63  ;;  %v1041_v30 = vpop.f32.mrb[17].mxu1  ;;  %v1160_v20 = vld [vmem:[#allocation4 + $0x70] sm:$0xff]  ;;  %v1161_v46 = vld [vmem:[#allocation4 + $0x78] sm:$0xff] }
 0x3d5   :  { %1095 = vst.msk [vmem:[#allocation3 + $0x38] sm:$0xff] %vm168_vm0, %v1079_v22  ;;  %v1080_v21 = vadd.f32 %v1041_v30, %v903_v43  ;;  %v1351_v5 = vpop.f32.mrb[18].mxu1 }
 0x3d6   :  { %1093 = vst.msk [vmem:[#allocation3 + $0x28] sm:$0xff] %vm168_vm0, %v1077_v49  ;;  %1098 = vst.msk [vmem:[#allocation3 + $0x50] sm:$0xff] %vm168_vm0, %v1082_v50  ;;  %v1083_v41 = vadd.f32 %v1351_v5, %v906_v16  ;;  %v1044_v32 = vpop.f32.mrb[19].mxu1  ;;  %v1159_v50 = vld [vmem:[#allocation4 + $0x68] sm:$0xff] }
 0x3d7   :  { %1096 = vst.msk [vmem:[#allocation3 + $0x40] sm:$0xff] %vm168_vm0, %v1080_v21  ;;  %v1081_v28 = vadd.f32 %v1044_v32, %v904_v24 }
 0x3d8   :  { %1099 = vst.msk [vmem:[#allocation3 + $0x58] sm:$0xff] %vm168_vm0, %v1083_v41 }
 0x3d9   :  { %1097 = vst.msk [vmem:[#allocation3 + $0x48] sm:$0xff] %vm168_vm0, %v1081_v28 }
 0x3da   :  { %v1113_v40 = vld [vmem:[#allocation3 + $0x30] sm:$0xff] }
 0x3db   :  { %v1136_v48 = vadd.f32 %v2329_v1, %v1113_v40  ;;  %v1111_v11 = vld [vmem:[#allocation3 + $0x20] sm:$0xff]  ;;  %v1354_v36 = vpop.f32.mrb[20].mxu1 }
 0x3dc   :  { %v1134_v53 = vadd.f32 %v2329_v1, %v1111_v11  ;;  %v1114_v56 = vld [vmem:[#allocation3 + $0x38] sm:$0xff]  ;;  %v1086_v59 = vadd.f32 %v1354_v36, %v909_v33  ;;  %v1057_v60 = vpop.f32.mrb[21].mxu1 }
 0x3dd   :  { %v1168_v10 = vadd.f32 %v1152_v51, %v1136_v48  ;;  %v1137_v55 = vadd.f32 %v2329_v1, %v1114_v56  ;;  %v1112_v2 = vld [vmem:[#allocation3 + $0x28] sm:$0xff]  ;;  %v1117_v25 = vld [vmem:[#allocation3 + $0x50] sm:$0xff]  ;;  %v1084_v62 = vadd.f32 %v1057_v60, %v907_v3  ;;  %v1355_v45 = vpop.f32.mrb[22].mxu1 }
 0x3de   :  { %v1166_v47 = vadd.f32 %v1150_v39, %v1134_v53  ;;  %v1135_v26 = vadd.f32 %v2329_v1, %v1112_v2  ;;  %v1140_v7 = vadd.f32 %v2329_v1, %v1117_v25  ;;  %v1115_v54 = vld [vmem:[#allocation3 + $0x40] sm:$0xff]  ;;  %1102 = vst.msk [vmem:[#allocation3 + $0x70] sm:$0xff] %vm168_vm0, %v1086_v59  ;;  %v1087_v6 = vadd.f32 %v1355_v45, %v910_v44  ;;  %v1060_v9 = vpop.f32.mrb[23].mxu1 }
 0x3df   :  { %1184 = vst.msk [vmem:[#allocation19 + $0x30] sm:$0xff] %vm168_vm0, %v1168_v10  ;;  %v1169_v52 = vadd.f32 %v1153_v13, %v1137_v55  ;;  %v1138_v12 = vadd.f32 %v2329_v1, %v1115_v54  ;;  %v1118_v58 = vld [vmem:[#allocation3 + $0x58] sm:$0xff]  ;;  %1100 = vst.msk [vmem:[#allocation3 + $0x60] sm:$0xff] %vm168_vm0, %v1084_v62  ;;  %v1085_v34 = vadd.f32 %v1060_v9, %v908_v31 }
 0x3e0   :  { %1182 = vst.msk [vmem:[#allocation19 + $0x20] sm:$0xff] %vm168_vm0, %v1166_v47  ;;  %v1167_v27 = vadd.f32 %v1151_v17, %v1135_v26  ;;  %v1172_v18 = vadd.f32 %v1156_v61, %v1140_v7  ;;  %v1141_v14 = vadd.f32 %v2329_v1, %v1118_v58  ;;  %v1116_v19 = vld [vmem:[#allocation3 + $0x48] sm:$0xff]  ;;  %1103 = vst.msk [vmem:[#allocation3 + $0x78] sm:$0xff] %vm168_vm0, %v1087_v6 }
 0x3e1   :  { %1185 = vst.msk [vmem:[#allocation19 + $0x38] sm:$0xff] %vm168_vm0, %v1169_v52  ;;  %v1170_v57 = vadd.f32 %v1154_v35, %v1138_v12  ;;  %v1139_v0 = vadd.f32 %v2329_v1, %v1116_v19  ;;  %1101 = vst.msk [vmem:[#allocation3 + $0x68] sm:$0xff] %vm168_vm0, %v1085_v34 }
 0x3e2   :  { %1183 = vst.msk [vmem:[#allocation19 + $0x28] sm:$0xff] %vm168_vm0, %v1167_v27  ;;  %1188 = vst.msk [vmem:[#allocation19 + $0x50] sm:$0xff] %vm168_vm0, %v1172_v18  ;;  %v1173_v37 = vadd.f32 %v1157_v15, %v1141_v14 }
 0x3e3   :  { %1186 = vst.msk [vmem:[#allocation19 + $0x40] sm:$0xff] %vm168_vm0, %v1170_v57  ;;  %v1171_v4 = vadd.f32 %v1155_v38, %v1139_v0 }
 0x3e4   :  { %1189 = vst.msk [vmem:[#allocation19 + $0x58] sm:$0xff] %vm168_vm0, %v1173_v37 }
 0x3e5   :  { %1187 = vst.msk [vmem:[#allocation19 + $0x48] sm:$0xff] %vm168_vm0, %v1171_v4  ;;  %v1121_v29 = vld [vmem:[#allocation3 + $0x70] sm:$0xff] }
 0x3e6   :  { %v1144_v63 = vadd.f32 %v2329_v1, %v1121_v29  ;;  %v1119_v8 = vld [vmem:[#allocation3 + $0x60] sm:$0xff] }
 0x3e7   :  { %v1142_v43 = vadd.f32 %v2329_v1, %v1119_v8  ;;  %v1122_v22 = vld [vmem:[#allocation3 + $0x78] sm:$0xff] }
 0x3e8   :  { %v1176_v23 = vadd.f32 %v1160_v20, %v1144_v63  ;;  %v1145_v16 = vadd.f32 %v2329_v1, %v1122_v22  ;;  %v1120_v49 = vld [vmem:[#allocation3 + $0x68] sm:$0xff] }
 0x3e9   :  { %v1174_v30 = vadd.f32 %v1158_v42, %v1142_v43  ;;  %v1143_v24 = vadd.f32 %v2329_v1, %v1120_v49 }
 0x3ea   :  { %1192 = vst.msk [vmem:[#allocation19 + $0x70] sm:$0xff] %vm168_vm0, %v1176_v23  ;;  %v1177_v21 = vadd.f32 %v1161_v46, %v1145_v16 }
 0x3eb   :  { %1190 = vst.msk [vmem:[#allocation19 + $0x60] sm:$0xff] %vm168_vm0, %v1174_v30  ;;  %v1175_v5 = vadd.f32 %v1159_v50, %v1143_v24 }
 0x3ec   :  { %1193 = vst.msk [vmem:[#allocation19 + $0x78] sm:$0xff] %vm168_vm0, %v1177_v21 }
 0x3ed   :  { %1191 = vst.msk [vmem:[#allocation19 + $0x68] sm:$0xff] %vm168_vm0, %v1175_v5 }
 0x3ee   :  { %1672 = shalt.err (!%p1669_p6)
}
 0x3ef   :  { %s1673_s11 = scalar_lea.hbm %s2399_s9, 2048 }
 0x3f0   :  { %p1674_p7 = scmp.ne.s32.totalorder %s2399_s9, %s1673_s11  ;;  %p1677_p8 = scmp.lt.u32.totalorder %s1673_s11, %s2399_s9 }
 0x3f2   :  { %p1679_p9 = pnand %p1677_p8, %p1674_p7 }
 0x3f4   :  { %1682 = shalt.err (!%p1679_p9)
}
 0x3f5   :  { %1205 = dma.vmem_to_hbm [thread:$0]  %s1200_s26, 2048, %s2399_s9, [#allocation6], %s1702_s7, %s1702_s7, %s1703_s1  }
 0x3f6   :  { %1693 = dma.done.wait [#allocation6], 2048  }
 0x3f7   :  { %1694 = vsyncadd [#allocation6], 4294965248 }
 0x3f8   :  { %1209 = vsyncpa [#allocation5], 1 }
 0x3f9   :  { %1210 = vsyncpa [#allocation8], 1 }
 0x3fa   :  { %1211 = vsyncpa [#allocation11], 1 }
 0x3fb   :  { %1212 = vsyncpa [#allocation14], 1 }
 0x3fc   :  { %1213 = vsyncpa [#allocation17], 1 }
 0x3fd   :  { %1214 = vsyncpa [#allocation6], 1 }

// kernel: block_forward.4
= control target key start
LH: loop header
LB: loop body
LE: loop exit
PB: predicated region body
PF: predicated region fallthrough
CT: control target
= control target key end

     0   :  { %11 = vsyncpa [#allocation4], 0  ;;  %s3809_s0 = inlined_call_operand.hbm [shape: f32[2,4,16,32], index: 0, kind: input, shape index: {}]   ;;  %s3810_s1 = inlined_call_operand.hbm [shape: f32[1,32], index: 1, kind: input, shape index: {}]   ;;  %s3811_s2 = inlined_call_operand.hbm [shape: f32[1,32], index: 2, kind: input, shape index: {}]   ;;  %s3812_s3 = inlined_call_operand.hbm [shape: bf16[32,96], index: 3, kind: input, shape index: {}]   ;;  %s3813_s4 = inlined_call_operand.hbm [shape: bf16[32,32], index: 4, kind: input, shape index: {}]   ;;  %s3814_s5 = inlined_call_operand.hbm [shape: f32[1,32], index: 5, kind: input, shape index: {}]   ;;  %s3815_s6 = inlined_call_operand.hbm [shape: f32[2,4,16,32], index: 6, kind: output, shape index: {}]  }
   0x1   :  { %13 = vsyncpa [#allocation4 + $0x1], 0 }
   0x2   :  { %14 = vsyncpa [#allocation7], 0 }
   0x3   :  { %15 = vsyncpa [#allocation10], 0 }
   0x4   :  { %16 = vsyncpa [#allocation13], 0 }
   0x5   :  { %17 = vsyncpa [#allocation5], 0 }
   0x6   :  { %19 = vsyncpa [#allocation5 + $0x1], 0  ;;  %s2555_s21 = smov 0   ;;  %s2557_s22 = smov 0  }
   0x7   :  { %s2559_s23 = smov 0   ;;  %s2561_s24 = smov 0  }
   0x8   :  { %s2563_s25 = smov 0   ;;  %s2565_s26 = smov 0  }
   0x9 LB: > { %s3819_s27 = sadd.s32 4294967295, %s2502_s26   ;;  %p1852_p0 = scmp.ge.s32.totalorder %s2502_s26, 1  ;;  %s2502_s26 = sphi %s2565_s26, %s25_s26   ;;  %s2498_s25 = sphi %s2563_s25, %s3854_s25   ;;  %s2494_s24 = sphi %s2561_s24, %s3853_s24   ;;  %s2490_s23 = sphi %s2559_s23, %s3852_s23   ;;  %s2486_s22 = sphi %s2557_s22, %s3851_s22   ;;  %s2482_s21 = sphi %s2555_s21, %s3850_s21  }
   0xa   : > { %p2589_p1 = scmp.eq.s32.totalorder %s3819_s27, 0  ;;  %p203_p2 = scmp.lt.s32.totalorder %s2502_s26, 3 }
   0xb   : > { %s2504_s30 = smov [#allocation6]   ;;  %s2505_s8 = smov [#allocation9]  }
   0xc   : > { %s3824_s28 = scalar_select %p2589_p1, 1, 0 }
   0xd   : > { %p2594_p3 = pnand %p1852_p0, %p203_p2  ;;  %s216_s7 = sshll.u32 %s2504_s30, 4  ;;  %s217_s7 = int_to_ptr.vmem [resolvable:$true] %s216_s7 }
   0xe   : > { %s237_s9 = sshll.u32 %s2505_s8, 4  ;;  %s2506_s11 = smov [#allocation8]   ;;  %s2607_s9 = int_to_ptr.vmem [resolvable:$true] %s237_s9 }
   0xf   : > { %s3825_s29 = scalar_select %p2594_p3, 1, 0 }
  0x10   : > { %p1952_p5 = pneg %p2594_p3  ;;  %s2609_s12 = sshll.u32 %s2506_s11, 4  ;;  %s228_s12 = int_to_ptr.vmem [resolvable:$true] %s2609_s12 }
  0x11   : > { %s2238_s15 = scalar_lea.hbm %s3810_s1, 16 }
  0x12   : > { %p2603_p6 = pnand %p1952_p5, %p2589_p1  ;;  %p2239_p7 = scmp.ne.s32.totalorder %s3810_s1, %s2238_s15 }
  0x13   : > { %p2245_p11 = scmp.lt.u32.totalorder %s2238_s15, %s3810_s1 }
  0x14   : > { %p2619_p8 = pneg %p2603_p6 }
  0x16   : > { %p2241_p9 = pnand %p2619_p8, %p2239_p7 }
  0x18   : > { %p2242_p10 = pneg %p2241_p9 }
  0x1a   : > { %p2247_p12 = pnand %p2245_p11, %p2242_p10 }
  0x1c   : > { %2250 = shalt.err (!%p2247_p12)
}
  0x1d   : > { %s2251_s30 = scalar_lea.vmem %s217_s7, 16  ;;  %s2258_s8 = scalar_lea.vmem %s217_s7, 32 }
  0x1e   : > { %p2252_p13 = scmp.ne.s32.totalorder %s217_s7, %s2251_s30  ;;  %p2259_p5 = scmp.lt.s32.totalorder %s217_s7, %s217_s7 }
  0x1f   : > { %p2260_p4 = scmp.lt.s32.totalorder %s2258_s8, %s2251_s30 }
  0x20   : > { %p2254_p0 = pnand %p2252_p13, %p2619_p8 }
  0x21   : > { %p2261_p3 = por %p2260_p4, %p2259_p5 }
  0x22   : > { %p2255_p2 = pneg %p2254_p0 }
  0x24   : > { %p2262_p1 = pnand %p2261_p3, %p2255_p2 }
  0x26   : > { %2265 = shalt.err (!%p2262_p1)
}
  0x27   : > { %1955 = dma.hbm_to_vmem [thread:$0]  (!%p2603_p6), %s3810_s1, 16, %s217_s7, [#allocation7]  }
  0x28   : > { %s2266_s16 = scalar_lea.hbm %s3812_s3, 256 }
  0x29   : > { %p2267_p7 = scmp.ne.s32.totalorder %s3812_s3, %s2266_s16  ;;  %p2273_p1 = scmp.lt.u32.totalorder %s2266_s16, %s3812_s3 }
  0x2b   : > { %p2269_p9 = pnand %p2267_p7, %p2619_p8 }
  0x2d   : > { %p2270_p4 = pneg %p2269_p9 }
  0x2f   : > { %p2275_p3 = pnand %p2273_p1, %p2270_p4 }
  0x31   : > { %2278 = shalt.err (!%p2275_p3)
}
  0x32   : > { %s2279_s7 = scalar_lea.vmem %s2607_s9, 256  ;;  %p2287_p13 = scmp.lt.s32.totalorder %s2607_s9, %s2607_s9 }
  0x33   : > { %p2280_p10 = scmp.ne.s32.totalorder %s2607_s9, %s2279_s7  ;;  %p2288_p0 = scmp.lt.s32.totalorder %s2279_s7, %s2279_s7 }
  0x35   : > { %p2282_p11 = pnand %p2280_p10, %p2619_p8  ;;  %p2289_p2 = por %p2288_p0, %p2287_p13 }
  0x37   : > { %p2283_p12 = pneg %p2282_p11 }
  0x39   : > { %p2290_p5 = pnand %p2289_p2, %p2283_p12 }
  0x3b   : > { %2293 = shalt.err (!%p2290_p5)
}
  0x3c   : > { %s3820_s8 = smov 64   ;;  %s2508_s11 = smov 4  }
  0x3d   : > { %1961 = dma.hbm_to_vmem [thread:$0]  (!%p2603_p6), %s3812_s3, 256, %s2607_s9, [#allocation10], %s3820_s8, %s3820_s8, %s2508_s11  }
  0x3e   : > { %s2294_s17 = scalar_lea.hbm %s3811_s2, 16 }
  0x3f   : > { %p2295_p7 = scmp.ne.s32.totalorder %s3811_s2, %s2294_s17  ;;  %p2301_p1 = scmp.lt.u32.totalorder %s2294_s17, %s3811_s2 }
  0x41   : > { %p2297_p9 = pnand %p2295_p7, %p2619_p8 }
  0x43   : > { %p2298_p4 = pneg %p2297_p9 }
  0x45   : > { %p2303_p3 = pnand %p2301_p1, %p2298_p4 }
  0x47   : > { %2306 = shalt.err (!%p2303_p3)
}
  0x48   : > { %s2307_s13 = scalar_lea.vmem %s228_s12, 16  ;;  %s2314_s9 = scalar_lea.vmem %s228_s12, 32 }
  0x49   : > { %p2308_p10 = scmp.ne.s32.totalorder %s228_s12, %s2307_s13  ;;  %p2315_p13 = scmp.lt.s32.totalorder %s228_s12, %s228_s12 }
  0x4a   : > { %p2316_p0 = scmp.lt.s32.totalorder %s2314_s9, %s2307_s13 }
  0x4b   : > { %p2310_p11 = pnand %p2308_p10, %p2619_p8 }
  0x4c   : > { %p2317_p2 = por %p2316_p0, %p2315_p13 }
  0x4d   : > { %p2311_p12 = pneg %p2310_p11 }
  0x4f   : > { %p2318_p5 = pnand %p2317_p2, %p2311_p12 }
  0x51   : > { %2321 = shalt.err (!%p2318_p5)
}
  0x52   : > { %1958 = dma.hbm_to_vmem [thread:$0]  (!%p2603_p6), %s3811_s2, 16, %s228_s12, [#allocation7]  }
  0x53   : > { %s2509_s16 = smov [#allocation11]   ;;  %s2510_s19 = smov [#allocation12]  }
  0x54   : > { %s250_s17 = sshll.u32 %s2509_s16, 4  ;;  %s264_s20 = sshll.u32 %s2510_s19, 4  ;;  %s251_s17 = int_to_ptr.vmem [resolvable:$true] %s250_s17  ;;  %s265_s20 = int_to_ptr.vmem [resolvable:$true] %s264_s20 }
  0x55   : > { %s2322_s27 = scalar_lea.hbm %s3813_s4, 256 }
  0x56   : > { %p2323_p7 = scmp.ne.s32.totalorder %s3813_s4, %s2322_s27  ;;  %p2329_p1 = scmp.lt.u32.totalorder %s2322_s27, %s3813_s4 }
  0x58   : > { %p2325_p9 = pnand %p2323_p7, %p2619_p8 }
  0x5a   : > { %p2326_p4 = pneg %p2325_p9 }
  0x5c   : > { %p2331_p3 = pnand %p2329_p1, %p2326_p4 }
  0x5e   : > { %2334 = shalt.err (!%p2331_p3)
}
  0x5f   : > { %s2335_s12 = scalar_lea.vmem %s251_s17, 256  ;;  %p2343_p13 = scmp.lt.s32.totalorder %s251_s17, %s251_s17 }
  0x60   : > { %p2336_p10 = scmp.ne.s32.totalorder %s251_s17, %s2335_s12  ;;  %p2344_p0 = scmp.lt.s32.totalorder %s2335_s12, %s2335_s12 }
  0x62   : > { %p2338_p11 = pnand %p2336_p10, %p2619_p8  ;;  %p2345_p2 = por %p2344_p0, %p2343_p13 }
  0x64   : > { %p2339_p12 = pneg %p2338_p11 }
  0x66   : > { %p2346_p5 = pnand %p2345_p2, %p2339_p12 }
  0x68   : > { %2349 = shalt.err (!%p2346_p5)
}
  0x69   : > { %s3828_s15 = smov 64   ;;  %s2350_s30 = scalar_lea.hbm %s3814_s5, 16 }
  0x6a   : > { %1964 = dma.hbm_to_vmem [thread:$0]  (!%p2603_p6), %s3813_s4, 256, %s251_s17, [#allocation10], %s3828_s15, %s3828_s15, %s2508_s11  }
  0x6b   : > { %p2351_p7 = scmp.ne.s32.totalorder %s3814_s5, %s2350_s30  ;;  %p2357_p1 = scmp.lt.u32.totalorder %s2350_s30, %s3814_s5 }
  0x6d   : > { %p2353_p9 = pnand %p2351_p7, %p2619_p8 }
  0x6f   : > { %p2354_p4 = pneg %p2353_p9 }
  0x71   : > { %p2359_p3 = pnand %p2357_p1, %p2354_p4 }
  0x73   : > { %2362 = shalt.err (!%p2359_p3)
}
  0x74   : > { %s2363_s12 = scalar_lea.vmem %s265_s20, 16  ;;  %s2370_s11 = scalar_lea.vmem %s265_s20, 32 }
  0x75   : > { %p2364_p10 = scmp.ne.s32.totalorder %s265_s20, %s2363_s12  ;;  %p2371_p13 = scmp.lt.s32.totalorder %s265_s20, %s265_s20 }
  0x76   : > { %p2372_p0 = scmp.lt.s32.totalorder %s2370_s11, %s2363_s12 }
  0x77   : > { %p2366_p11 = pnand %p2364_p10, %p2619_p8 }
  0x78   : > { %p2373_p2 = por %p2372_p0, %p2371_p13 }
  0x79   : > { %p2367_p12 = pneg %p2366_p11 }
  0x7b   : > { %p2374_p5 = pnand %p2373_p2, %p2367_p12 }
  0x7d   : > { %2377 = shalt.err (!%p2374_p5)
}
  0x7e   : > { %1967 = dma.hbm_to_vmem [thread:$0]  (!%p2603_p6), %s3814_s5, 16, %s265_s20, [#allocation13]  }
  0x7f   : > { %s1851_s18 = sadd.s32 4294967294, %s2502_s26   ;;  %s37_s8 = sadd.s32 1, %s2498_s25 }
  0x80   : > { %s46_s10 = sadd.s32 1, %s2490_s23  ;;  %p39_p8 = scmp.ge.s32.totalorder %s37_s8, 2 }
  0x81   : > { %p53_p7 = scmp.ne.s32.totalorder %s2490_s23, %s2486_s22  ;;  %p54_p9 = scmp.eq.s32.totalorder %s2502_s26, 0 }
  0x82   : > { %p59_p4 = scmp.ne.s32.totalorder %s2486_s22, %s2482_s21  ;;  %s3856_s8 = smov (%p39_p8, %s37_s8), 0 }
  0x83   : > { %p2729_p1 = por %p54_p9, %p53_p7  ;;  %p3830_p3 = scmp.ne.s32.totalorder %s3824_s28, 0 }
  0x84   : > { %s41_s16 = ssub.s32 %s2498_s25, %s3856_s8  ;;  %s3832_s19 = sadd.s32 4294967295, %s2502_s26  }
  0x85   : > { %p2735_p6 = por %p3830_p3, %p59_p4  ;;  %p190_p10 = scmp.eq.s32.totalorder %s3832_s19, 1 }
  0x86   : > { %p44_p11 = scmp.eq.s32.totalorder %s41_s16, 0  ;;  %p196_p12 = scmp.eq.s32.totalorder %s1851_s18, 1 }
  0x87   : > { %p2743_p13 = por %p190_p10, %p53_p7  ;;  %p1981_p0 = scmp.lt.s32.totalorder %s2502_s26, 2 }
  0x88   : > { %s2749_s7 = scalar_select %p44_p11, %s2490_s23, %s46_s10  }
  0x89   : > { %s3833_s30 = scalar_select %p2743_p13, 1, 0 }
  0x8a   : > { %p2751_p2 = por %p196_p12, %p59_p4  ;;  %s275_s9 = sand.u32 1, %s2490_s23  }
  0x8b   : > { %s1859_s14 = sshll.u32 %s275_s9, 6  ;;  %s1890_s12 = sshll.u32 %s2498_s25, 10 }
  0x8c   : > { %s3834_s13 = scalar_select %p2751_p2, 1, 0 }
  0x8d   : > { %s2760_s15 = scalar_lea.hbm %s3809_s0, %s1890_s12  ;;  %s279_s18 = scalar_lea.vmem [#allocation3], %s1859_s14 }
  0x8e   : > { %s288_s16 = sshll.u32 %s279_s18, 4  ;;  %p2766_p5 = pnand %p1981_p0, %p2729_p1  ;;  %s2762_s16 = int_to_ptr.vmem [resolvable:$true] %s288_s16 }
  0x8f   : > { %s2770_s19 = scalar_lea.sflag [#allocation4], %s275_s9  ;;  %s2378_s11 = scalar_lea.hbm %s2760_s15, 1024 }
  0x90   : > { %p2379_p8 = scmp.ne.s32.totalorder %s2760_s15, %s2378_s11  ;;  %p2380_p7 = pneg %p2766_p5 }
  0x91   : > { %s2383_s27 = scalar_lea.hbm %s3809_s0, 2048  ;;  %p2384_p1 = scmp.lt.u32.totalorder %s2760_s15, %s3809_s0 }
  0x92   : > { %p2381_p9 = pnand %p2380_p7, %p2379_p8  ;;  %p2385_p3 = scmp.lt.u32.totalorder %s2383_s27, %s2378_s11 }
  0x93   : > { %p2387_p11 = scmp.lt.u32.totalorder %s2378_s11, %s2760_s15 }
  0x94   : > { %p2382_p4 = pneg %p2381_p9  ;;  %p2386_p10 = por %p2385_p3, %p2384_p1 }
  0x96   : > { %p2388_p12 = por %p2387_p11, %p2386_p10 }
  0x98   : > { %p2389_p0 = pnand %p2388_p12, %p2382_p4 }
  0x9a   : > { %2392 = shalt.err (!%p2389_p0)
}
  0x9b   : > { %s2393_s9 = scalar_lea.vmem %s2762_s16, 1024  ;;  %s2511_s14 = smov [#allocation3]  }
  0x9c   : > { %p2394_p8 = scmp.ne.s32.totalorder %s2762_s16, %s2393_s9  ;;  %s2398_s12 = sshll.u32 %s2511_s14, 4  ;;  %s2399_s12 = int_to_ptr.vmem [resolvable:$false] %s2398_s12 }
  0x9d   : > { %s2400_s17 = scalar_lea.vmem %s2399_s12, 2048  ;;  %p2401_p13 = scmp.lt.s32.totalorder %s2762_s16, %s2399_s12 }
  0x9e   : > { %p2396_p9 = pnand %p2394_p8, %p2380_p7  ;;  %p2402_p1 = scmp.lt.s32.totalorder %s2400_s17, %s2393_s9 }
  0xa0   : > { %p2397_p2 = pneg %p2396_p9  ;;  %p2403_p3 = por %p2402_p1, %p2401_p13 }
  0xa2   : > { %p2404_p10 = pnand %p2403_p3, %p2397_p2 }
  0xa4   : > { %2407 = shalt.err (!%p2404_p10)
}
  0xa5   : > { %s2512_s11 = smov 128   ;;  %s2513_s27 = smov 8  }
  0xa6   : > { %1971 = dma.hbm_to_vmem [thread:$0]  (!%p2766_p5), %s2760_s15, 1024, %s2762_s16, %s2770_s19, %s2512_s11, %s2512_s11, %s2513_s27  }
  0xa7   : > { %p3836_p7 = scmp.ne.s32.totalorder %s3825_s29, 0 }
  0xa9   : > { %300 = sbr.rel (%p3836_p7) target bundleno = 1677 (0x68d), region = 44 }
  0xb0   : > { %s2801_s18 = sand.u32 1, %s2486_s22  }
  0xb1   : > { %s1863_s9 = sshll.u32 %s2801_s18, 6  ;;  %s303_s14 = scalar_lea.sflag [#allocation4], %s2801_s18 }
  0xb2   : > { %s2807_s12 = scalar_lea.vmem [#allocation3], %s1863_s9 }
  0xb3   : > { %2461 = dma.done.wait (%p2735_p6), %s303_s14, 1024  }
  0xb4   : > { %2463 = vsyncadd (%p2735_p6), %s303_s14, 4294966272  ;;  %p3837_p13 = scmp.ne.s32.totalorder %s3824_s28, 0 }
  0xb6   : > { %2465 = dma.done.wait (%p3837_p13), [#allocation7], 32  }
  0xb7   : > { %2467 = vsyncadd (%p3837_p13), [#allocation7], 4294967264 }
  0xb8   : > { %2469 = dma.done.wait (%p3837_p13), [#allocation10], 512  }
  0xb9   : > { %2471 = vsyncadd (%p3837_p13), [#allocation10], 4294966784 }
  0xba   : > { %2473 = dma.done.wait (%p3837_p13), [#allocation13], 16  }
  0xbb   : > { %2475 = vsyncadd (%p3837_p13), [#allocation13], 4294967280  ;;  %vm368_vm0 = vcmask 261120   ;;  %v358_v0 = vld [vmem:[%s2807_s12] sm:$0xff]  ;;  %v360_v1 = vld [vmem:[%s2807_s12 + $0x10] sm:$0xff]  ;;  %s2514_s28 = smov 96  }
  0xbc   : > { %v359_v2 = vld [vmem:[%s2807_s12 + $0x8] sm:$0xff]  ;;  %v369_v3 = vsel %vm368_vm0, %v358_v0, 0.0  ;;  %v375_v4 = vsel %vm368_vm0, %v360_v1, 0.0  ;;  %v361_v5 = vld [vmem:[%s2807_s12 + $0x18] sm:$0xff]  ;;  %v362_v7 = vld [vmem:[%s2807_s12 + $0x20] sm:$0xff]  ;;  %s2515_s29 = smov 112  }
  0xbd   : > { %370 = vadd.xlane.f32.xlu0 %v369_v3  ;;  %376 = vadd.xlane.f32.xlu1 %v375_v4  ;;  %v372_v6 = vsel %vm368_vm0, %v359_v2, 0.0  ;;  %v378_v8 = vsel %vm368_vm0, %v361_v5, 0.0  ;;  %v363_v9 = vld [vmem:[%s2807_s12 + $0x28] sm:$0xff]  ;;  %v381_v10 = vsel %vm368_vm0, %v362_v7, 0.0  ;;  %v364_v12 = vld [vmem:[%s2807_s12 + $0x30] sm:$0xff]  ;;  %v365_v13 = vld [vmem:[%s2807_s12 + $0x38] sm:$0xff] }
  0xbe   : > { %v384_v11 = vsel %vm368_vm0, %v363_v9, 0.0  ;;  %v387_v14 = vsel %vm368_vm0, %v364_v12, 0.0  ;;  %v390_v15 = vsel %vm368_vm0, %v365_v13, 0.0  ;;  %v2050_v56 = vld [vmem:[#allocation9] sm:$0xff]   ;;  %v2051_v57 = vld [vmem:[#allocation9 + $0x8] sm:$0xff]   ;;  %vm639_vm1 = vcmask 130048  }
  0xbf   : > { %1904 = vmatprep.subr.bf16.mxu0 %v2050_v56  ;;  %vm718_vm2 = vcmask 654848   ;;  %s2516_s20 = smov 64   ;;  %vm1167_vm3 = vcmask 786048   ;;  %vm1187_vm4 = vcmask 261248   ;;  %s3729_s15 = scalar_lea.vmem [#allocation14], %s1863_s9 }
  0xc0   : > { %1905 = vmatpush3.bf16.msra.mxu0 %v2050_v56  ;;  %s1891_s16 = sshll.u32 %s2494_s24, 10  ;;  %s1715_s10 = sshll.u32 %s3729_s15, 4  ;;  %s3753_s10 = int_to_ptr.vmem [resolvable:$true] %s1715_s10 }
  0xc1   : > { %373 = vadd.xlane.f32.xlu0 %v372_v6  ;;  %379 = vadd.xlane.f32.xlu1 %v378_v8  ;;  %s3751_s24 = scalar_lea.hbm %s3815_s6, %s1891_s16  ;;  %s1700_s11 = scalar_lea.sflag [#allocation5], %s2801_s18 }
  0xc2   : > { %1906 = vmatprep.subr.bf16.mxu0 %v2051_v57  ;;  %s2408_s27 = scalar_lea.vmem %s3753_s10, 1024  ;;  %p3847_p2 = scmp.ne.s32.totalorder %s3833_s30, 0 }
  0xc3   : > { %p2409_p6 = scmp.ne.s32.totalorder %s3753_s10, %s2408_s27  ;;  %s2517_s9 = smov [#allocation14]  }
  0xc4   : > { %1907 = vmatpush3.bf16.msra.mxu0 %v2051_v57  ;;  %s2412_s14 = sshll.u32 %s2517_s9, 4  ;;  %s2413_s14 = int_to_ptr.vmem [resolvable:$false] %s2412_s14 }
  0xc5   : > { %382 = vadd.xlane.f32.xlu0 %v381_v10  ;;  %385 = vadd.xlane.f32.xlu1 %v384_v11  ;;  %p2410_p5 = pnand %p2409_p6, %p3847_p2  ;;  %p2415_p11 = scmp.lt.s32.totalorder %s3753_s10, %s2413_s14 }
  0xc7   : > { %p2411_p4 = pneg %p2410_p5 }
  0xc9   : > { %388 = vadd.xlane.f32.xlu0 %v387_v14  ;;  %391 = vadd.xlane.f32.xlu1 %v390_v15 }
 0x14a   : > { %v371_v16 = vpop.xlane.xlu0 %370  ;;  %v377_v17 = vpop.xlane.xlu1 %376 }
 0x14b   : > { %v394_v18 = vmul.f32 0.03125, %v371_v16  ;;  %v396_v19 = vmul.f32 0.03125, %v377_v17 }
 0x14d   : > { %v2841_v20 = vsub.f32 %v358_v0, %v394_v18  ;;  %v2843_v21 = vsub.f32 %v360_v1, %v396_v19  ;;  %v1870_v19 = vld [vmem:[#allocation6] ss:$0 sm:$0xff] }
 0x14e   : > { %v374_v22 = vpop.xlane.xlu0 %373  ;;  %v380_v23 = vpop.xlane.xlu1 %379 }
 0x14f   : > { %v395_v24 = vmul.f32 0.03125, %v374_v22  ;;  %v397_v25 = vmul.f32 0.03125, %v380_v23  ;;  %v410_v26 = vmul.f32 %v2841_v20, %v2841_v20  ;;  %v412_v27 = vmul.f32 %v2843_v21, %v2843_v21 }
 0x151   : > { %v2849_v28 = vsub.f32 %v359_v2, %v395_v24  ;;  %v2851_v29 = vsub.f32 %v361_v5, %v397_v25  ;;  %v418_v30 = vsel %vm368_vm0, %v410_v26, 0.0  ;;  %v424_v33 = vsel %vm368_vm0, %v412_v27, 0.0  ;;  %v1871_v27 = vld [vmem:[#allocation8] ss:$0 sm:$0xff] }
 0x152   : > { %419 = vadd.xlane.f32.xlu0 %v418_v30  ;;  %v383_v31 = vpop.xlane.xlu0 %382  ;;  %v386_v32 = vpop.xlane.xlu1 %385 }
 0x153   : > { %v398_v34 = vmul.f32 0.03125, %v383_v31  ;;  %v399_v35 = vmul.f32 0.03125, %v386_v32  ;;  %v411_v36 = vmul.f32 %v2849_v28, %v2849_v28  ;;  %v413_v37 = vmul.f32 %v2851_v29, %v2851_v29 }
 0x155   : > { %v2859_v38 = vsub.f32 %v362_v7, %v398_v34  ;;  %v2861_v39 = vsub.f32 %v363_v9, %v399_v35  ;;  %v421_v40 = vsel %vm368_vm0, %v411_v36, 0.0  ;;  %v427_v43 = vsel %vm368_vm0, %v413_v37, 0.0 }
 0x156   : > { %425 = vadd.xlane.f32.xlu0 %v424_v33  ;;  %422 = vadd.xlane.f32.xlu1 %v421_v40  ;;  %v389_v41 = vpop.xlane.xlu0 %388  ;;  %v392_v42 = vpop.xlane.xlu1 %391 }
 0x157   : > { %v400_v44 = vmul.f32 0.03125, %v389_v41  ;;  %v401_v45 = vmul.f32 0.03125, %v392_v42  ;;  %v414_v46 = vmul.f32 %v2859_v38, %v2859_v38  ;;  %v415_v47 = vmul.f32 %v2861_v39, %v2861_v39 }
 0x159   : > { %v2869_v48 = vsub.f32 %v364_v12, %v400_v44  ;;  %v2871_v49 = vsub.f32 %v365_v13, %v401_v45  ;;  %v430_v50 = vsel %vm368_vm0, %v414_v46, 0.0  ;;  %v433_v51 = vsel %vm368_vm0, %v415_v47, 0.0 }
 0x15a   : > { %428 = vadd.xlane.f32.xlu1 %v427_v43  ;;  %431 = vadd.xlane.f32.xlu0 %v430_v50 }
 0x15b   : > { %v416_v52 = vmul.f32 %v2869_v48, %v2869_v48  ;;  %v417_v53 = vmul.f32 %v2871_v49, %v2871_v49 }
 0x15d   : > { %v436_v54 = vsel %vm368_vm0, %v416_v52, 0.0  ;;  %v439_v55 = vsel %vm368_vm0, %v417_v53, 0.0 }
 0x15e   : > { %434 = vadd.xlane.f32.xlu1 %v433_v51  ;;  %437 = vadd.xlane.f32.xlu0 %v436_v54 }
 0x162   : > { %440 = vadd.xlane.f32.xlu1 %v439_v55 }
 0x1df   : > { %v420_v58 = vpop.xlane.xlu0 %419 }
 0x1e0   : > { %v442_v59 = vmul.f32 0.03125, %v420_v58 }
 0x1e2   : > { %v450_v60 = vadd.f32 1e-05, %v442_v59 }
 0x1e3   : > { %v423_v61 = vpop.xlane.xlu1 %422  ;;  %v426_v62 = vpop.xlane.xlu0 %425 }
 0x1e4   : > { %2054 = vrsqrt.f32 %v450_v60  ;;  %v443_v63 = vmul.f32 0.03125, %v423_v61  ;;  %v444_v0 = vmul.f32 0.03125, %v426_v62 }
 0x1e6   : > { %v451_v1 = vadd.f32 1e-05, %v443_v63  ;;  %v452_v2 = vadd.f32 1e-05, %v444_v0 }
 0x1e7   : > { %v429_v3 = vpop.xlane.xlu1 %428  ;;  %v432_v4 = vpop.xlane.xlu0 %431 }
 0x1e8   : > { %2056 = vrsqrt.f32 %v451_v1  ;;  %v445_v5 = vmul.f32 0.03125, %v429_v3  ;;  %v446_v6 = vmul.f32 0.03125, %v432_v4 }
 0x1e9   : > { %2058 = vrsqrt.f32 %v452_v2 }
 0x1ea   : > { %v453_v7 = vadd.f32 1e-05, %v445_v5  ;;  %v454_v8 = vadd.f32 1e-05, %v446_v6 }
 0x1eb   : > { %v435_v9 = vpop.xlane.xlu1 %434  ;;  %v438_v10 = vpop.xlane.xlu0 %437 }
 0x1ec   : > { %2060 = vrsqrt.f32 %v453_v7  ;;  %v447_v11 = vmul.f32 0.03125, %v435_v9  ;;  %v448_v12 = vmul.f32 0.03125, %v438_v10 }
 0x1ed   : > { %2062 = vrsqrt.f32 %v454_v8 }
 0x1ee   : > { %v2055_v13 = vpop.eup %2054  ;;  %v455_v14 = vadd.f32 1e-05, %v447_v11  ;;  %v456_v15 = vadd.f32 1e-05, %v448_v12 }
 0x1ef   : > { %v441_v16 = vpop.xlane.xlu1 %440  ;;  %v466_v17 = vmul.f32 %v2055_v13, %v2841_v20 }
 0x1f0   : > { %2064 = vrsqrt.f32 %v455_v14  ;;  %v449_v18 = vmul.f32 0.03125, %v441_v16 }
 0x1f1   : > { %2066 = vrsqrt.f32 %v456_v15  ;;  %v480_v26 = vmul.f32 %v1870_v19, %v466_v17 }
 0x1f2   : > { %v2057_v22 = vpop.eup %2056  ;;  %v457_v23 = vadd.f32 1e-05, %v449_v18 }
 0x1f3   : > { %v2059_v24 = vpop.eup %2058  ;;  %v467_v25 = vmul.f32 %v2057_v22, %v2849_v28  ;;  %v494_v34 = vadd.f32 %v1871_v27, %v480_v26 }
 0x1f4   : > { %2068 = vrsqrt.f32 %v457_v23  ;;  %v468_v30 = vmul.f32 %v2059_v24, %v2843_v21 }
 0x1f5   : > { %v481_v31 = vmul.f32 %v1870_v19, %v467_v25 }
 0x1f6   : > { %v2061_v32 = vpop.eup %2060  ;;  %v482_v36 = vmul.f32 %v1870_v19, %v468_v30 }
 0x1f7   : > { %v2063_v33 = vpop.eup %2062  ;;  %v495_v35 = vadd.f32 %v1871_v27, %v481_v31  ;;  %v469_v20 = vmul.f32 %v2061_v32, %v2851_v29 }
 0x1f8   : > { %v470_v37 = vmul.f32 %v2063_v33, %v2859_v38  ;;  %v496_v28 = vadd.f32 %v1871_v27, %v482_v36 }
 0x1f9   : > { %v502_v40 = vpack.c.bf16 %v495_v35, %v494_v34  ;;  %v483_v41 = vmul.f32 %v1870_v19, %v469_v20 }
 0x1fa   : > { %v2065_v42 = vpop.eup %2064  ;;  %v484_v45 = vmul.f32 %v1870_v19, %v470_v37 }
 0x1fb   : > { %v2067_v43 = vpop.eup %2066  ;;  %1908 = vmatprep.mubr.msk.bf16.mxu0 %vm368_vm0, %v502_v40  ;;  %v497_v44 = vadd.f32 %v1871_v27, %v483_v41  ;;  %v471_v21 = vmul.f32 %v2065_v42, %v2861_v39 }
 0x1fc   : > { %v472_v46 = vmul.f32 %v2067_v43, %v2869_v48  ;;  %v498_v29 = vadd.f32 %v1871_v27, %v484_v45 }
 0x1fd   : > { %v503_v47 = vpack.c.bf16 %v497_v44, %v496_v28  ;;  %v485_v50 = vmul.f32 %v1870_v19, %v471_v21 }
 0x1fe   : > { %v2069_v51 = vpop.eup %2068  ;;  %v486_v53 = vmul.f32 %v1870_v19, %v472_v46 }
 0x1ff   : > { %1909 = vmatmul.mubr.msk.bf16.vlgmr.msra.gmra.mrb[0].mxu0 %vm368_vm0, %v503_v47  ;;  %v499_v38 = vadd.f32 %v1871_v27, %v485_v50  ;;  %v473_v52 = vmul.f32 %v2069_v51, %v2871_v49 }
 0x200   : > { %v500_v56 = vadd.f32 %v1871_v27, %v486_v53 }
 0x201   : > { %v504_v54 = vpack.c.bf16 %v499_v38, %v498_v29  ;;  %v487_v55 = vmul.f32 %v1870_v19, %v473_v52 }
 0x203   : > { %1912 = vmatprep.mubr.msk.bf16.mxu0 %vm368_vm0, %v504_v54  ;;  %v501_v57 = vadd.f32 %v1871_v27, %v487_v55 }
 0x205   : > { %v505_v39 = vpack.c.bf16 %v501_v57, %v500_v56 }
 0x207   : > { %1913 = vmatmul.mubr.msk.bf16.gmra.mrb[4].mxu0 %vm368_vm0, %v505_v39 }
 0x2d2   : > { %v2893_v48 = vpop.f32.mrb[0].mxu0 }
 0x2d3   : > { %611 = vrot.lane.b32.xlu1 %v2893_v48, %s2514_s28  ;;  %v2896_v58 = vpop.f32.mrb[1].mxu0 }
 0x2d4   : > { %607 = vrot.lane.b32.xlu0 %v2896_v58, %s2514_s28  ;;  %v2899_v49 = vpop.f32.mrb[2].mxu0 }
 0x2d5   : > { %v2901_v59 = vpop.f32.mrb[3].mxu0 }
 0x2d7   : > { %613 = vrot.lane.b32.xlu1 %v2899_v49, %s2514_s28 }
 0x2da   : > { %v2904_v60 = vpop.f32.mrb[4].mxu0 }
 0x2db   : > { %609 = vrot.lane.b32.xlu1 %v2901_v59, %s2514_s28  ;;  %619 = vrot.lane.b32.xlu0 %v2904_v60, %s2514_s28  ;;  %v2908_v61 = vpop.f32.mrb[5].mxu0 }
 0x2dc   : > { %v2910_v62 = vpop.f32.mrb[6].mxu0 }
 0x2dd   : > { %v2912_v63 = vpop.f32.mrb[7].mxu0 }
 0x2df   : > { %615 = vrot.lane.b32.xlu0 %v2908_v61, %s2514_s28  ;;  %621 = vrot.lane.b32.xlu1 %v2910_v62, %s2514_s28 }
 0x2e3   : > { %617 = vrot.lane.b32.xlu1 %v2912_v63, %s2514_s28  ;;  %s2414_s28 = scalar_lea.vmem %s2413_s14, 2048 }
 0x2e4   : > { %p2416_p12 = scmp.lt.s32.totalorder %s2414_s28, %s2408_s27 }
 0x2e6   : > { %p2417_p0 = por %p2416_p12, %p2415_p11 }
 0x2e8   : > { %p2418_p8 = pnand %p2417_p0, %p2411_p4 }
 0x345   : > { %v612_v0 = vpop.permute.xlu1 %611 }
 0x346   : > { %v633_v1 = vmul.f32 %v612_v0, %v2896_v58  ;;  %v741_v3 = vmul.f32 %v2893_v48, %v612_v0  ;;  %v847_v5 = vmul.f32 %v612_v0, %v2908_v61  ;;  %v953_v7 = vmul.f32 %v2904_v60, %v612_v0  ;;  %v608_v9 = vpop.permute.xlu0 %607 }
 0x347   : > { %v631_v11 = vmul.f32 %v608_v9, %v2896_v58  ;;  %v739_v14 = vmul.f32 %v2893_v48, %v608_v9  ;;  %v845_v16 = vmul.f32 %v608_v9, %v2908_v61  ;;  %v951_v18 = vmul.f32 %v2904_v60, %v608_v9 }
 0x348   : > { %1069 = vrot.lane.b32.xlu0 %v633_v1, %s2515_s29  ;;  %v646_v22 = vsel %vm639_vm1, %v633_v1, 0.0  ;;  %v753_v23 = vsel %vm639_vm1, %v741_v3, 0.0  ;;  %v859_v24 = vsel %vm639_vm1, %v847_v5, 0.0  ;;  %v965_v26 = vsel %vm639_vm1, %v953_v7, 0.0 }
 0x349   : > { %v614_v2 = vpop.permute.xlu1 %613  ;;  %v640_v30 = vsel %vm639_vm1, %v631_v11, 0.0  ;;  %v747_v32 = vsel %vm639_vm1, %v739_v14, 0.0  ;;  %v853_v34 = vsel %vm639_vm1, %v845_v16, 0.0  ;;  %v959_v20 = vsel %vm639_vm1, %v951_v18, 0.0 }
 0x34a   : > { %v634_v4 = vmul.f32 %v614_v2, %v2901_v59  ;;  %v742_v6 = vmul.f32 %v2899_v49, %v614_v2  ;;  %v848_v8 = vmul.f32 %v614_v2, %v2912_v63  ;;  %v954_v10 = vmul.f32 %v2910_v62, %v614_v2 }
 0x34c   : > { %1201 = vrot.lane.b32.xlu0 %v741_v3, %s2515_s29  ;;  %1071 = vrot.lane.b32.xlu1 %v634_v4, %s2515_s29  ;;  %v756_v25 = vsel %vm639_vm1, %v742_v6, 0.0  ;;  %v862_v27 = vsel %vm639_vm1, %v848_v8, 0.0  ;;  %v968_v31 = vsel %vm639_vm1, %v954_v10, 0.0  ;;  %v649_v37 = vsel %vm639_vm1, %v634_v4, 0.0 }
 0x34d   : > { %v610_v12 = vpop.permute.xlu1 %609  ;;  %v620_v43 = vpop.permute.xlu0 %619 }
 0x34e   : > { %v632_v13 = vmul.f32 %v610_v12, %v2901_v59  ;;  %v740_v15 = vmul.f32 %v2899_v49, %v610_v12  ;;  %v846_v17 = vmul.f32 %v610_v12, %v2912_v63  ;;  %v952_v19 = vmul.f32 %v2910_v62, %v610_v12 }
 0x34f   : > { %v637_v44 = vmul.f32 %v620_v43, %v2896_v58  ;;  %v745_v45 = vmul.f32 %v2893_v48, %v620_v43  ;;  %v851_v47 = vmul.f32 %v620_v43, %v2908_v61  ;;  %v957_v29 = vmul.f32 %v2904_v60, %v620_v43 }
 0x350   : > { %1331 = vrot.lane.b32.xlu0 %v847_v5, %s2515_s29  ;;  %1203 = vrot.lane.b32.xlu1 %v742_v6, %s2515_s29  ;;  %v643_v33 = vsel %vm639_vm1, %v632_v13, 0.0  ;;  %v750_v35 = vsel %vm639_vm1, %v740_v15, 0.0  ;;  %v856_v36 = vsel %vm639_vm1, %v846_v17, 0.0  ;;  %v962_v40 = vsel %vm639_vm1, %v952_v19, 0.0 }
 0x351   : > { %v622_v41 = vpop.permute.xlu1 %621  ;;  %v616_v38 = vpop.permute.xlu0 %615  ;;  %v658_v5 = vsel %vm639_vm1, %v637_v44, 0.0  ;;  %v765_v9 = vsel %vm639_vm1, %v745_v45, 0.0  ;;  %v871_v12 = vsel %vm639_vm1, %v851_v47, 0.0 }
 0x352   : > { %v638_v42 = vmul.f32 %v622_v41, %v2901_v59  ;;  %v746_v28 = vmul.f32 %v2899_v49, %v622_v41  ;;  %v852_v21 = vmul.f32 %v622_v41, %v2912_v63  ;;  %v958_v46 = vmul.f32 %v2910_v62, %v622_v41 }
 0x353   : > { %v635_v53 = vmul.f32 %v616_v38, %v2896_v58  ;;  %v743_v55 = vmul.f32 %v2893_v48, %v616_v38  ;;  %v849_v57 = vmul.f32 %v616_v38, %v2908_v61  ;;  %v955_v39 = vmul.f32 %v2904_v60, %v616_v38 }
 0x354   : > { %1461 = vrot.lane.b32.xlu0 %v953_v7, %s2515_s29  ;;  %1333 = vrot.lane.b32.xlu1 %v848_v8, %s2515_s29  ;;  %v661_v7 = vsel %vm639_vm1, %v638_v42, 0.0 }
 0x355   : > { %v618_v50 = vpop.permute.xlu1 %617 }
 0x356   : > { %v636_v51 = vmul.f32 %v618_v50, %v2901_v59  ;;  %v744_v52 = vmul.f32 %v2899_v49, %v618_v50  ;;  %v850_v54 = vmul.f32 %v618_v50, %v2912_v63  ;;  %v956_v56 = vmul.f32 %v2910_v62, %v618_v50 }
 0x358   : > { %1463 = vrot.lane.b32.xlu1 %v954_v10, %s2515_s29  ;;  %1065 = vrot.lane.b32.xlu0 %v631_v11, %s2515_s29  ;;  %v768_v10 = vsel %vm639_vm1, %v746_v28, 0.0 }
 0x35c   : > { %1067 = vrot.lane.b32.xlu1 %v632_v13, %s2515_s29  ;;  %1197 = vrot.lane.b32.xlu0 %v739_v14, %s2515_s29  ;;  %v874_v13 = vsel %vm639_vm1, %v852_v21, 0.0 }
 0x360   : > { %1199 = vrot.lane.b32.xlu1 %v740_v15, %s2515_s29  ;;  %1327 = vrot.lane.b32.xlu0 %v845_v16, %s2515_s29  ;;  %v977_v15 = vsel %vm639_vm1, %v957_v29, 0.0 }
 0x364   : > { %1329 = vrot.lane.b32.xlu1 %v846_v17, %s2515_s29  ;;  %1457 = vrot.lane.b32.xlu0 %v951_v18, %s2515_s29  ;;  %v980_v17 = vsel %vm639_vm1, %v958_v46, 0.0 }
 0x368   : > { %1459 = vrot.lane.b32.xlu1 %v952_v19, %s2515_s29  ;;  %v652_v19 = vsel %vm639_vm1, %v635_v53, 0.0 }
 0x383   : > { %647 = vadd.xlane.f32.xlu0 %v646_v22  ;;  %v655_v22 = vsel %vm639_vm1, %v636_v51, 0.0 }
 0x387   : > { %754 = vadd.xlane.f32.xlu0 %v753_v23 }
 0x38b   : > { %860 = vadd.xlane.f32.xlu0 %v859_v24  ;;  %v759_v24 = vsel %vm639_vm1, %v743_v55, 0.0 }
 0x38c   : > { %757 = vadd.xlane.f32.xlu1 %v756_v25  ;;  %v762_v25 = vsel %vm639_vm1, %v744_v52, 0.0 }
 0x38f   : > { %966 = vadd.xlane.f32.xlu0 %v965_v26 }
 0x390   : > { %863 = vadd.xlane.f32.xlu1 %v862_v27  ;;  %v865_v27 = vsel %vm639_vm1, %v849_v57, 0.0 }
 0x393   : > { %641 = vadd.xlane.f32.xlu0 %v640_v30 }
 0x394   : > { %969 = vadd.xlane.f32.xlu1 %v968_v31  ;;  %v868_v31 = vsel %vm639_vm1, %v850_v54, 0.0 }
 0x397   : > { %748 = vadd.xlane.f32.xlu0 %v747_v32 }
 0x398   : > { %644 = vadd.xlane.f32.xlu1 %v643_v33  ;;  %v971_v33 = vsel %vm639_vm1, %v955_v39, 0.0 }
 0x39b   : > { %854 = vadd.xlane.f32.xlu0 %v853_v34 }
 0x39c   : > { %751 = vadd.xlane.f32.xlu1 %v750_v35  ;;  %v974_v35 = vsel %vm639_vm1, %v956_v56, 0.0 }
 0x39f   : > { %960 = vadd.xlane.f32.xlu0 %v959_v20 }
 0x3a0   : > { %857 = vadd.xlane.f32.xlu1 %v856_v36 }
 0x3a3   : > { %650 = vadd.xlane.f32.xlu0 %v649_v37 }
 0x3a4   : > { %963 = vadd.xlane.f32.xlu1 %v962_v40 }
 0x3b5   : > { %1079 = vrot.lane.b32.xlu1 %v638_v42, %s2515_s29 }
 0x3b9   : > { %1211 = vrot.lane.b32.xlu1 %v746_v28, %s2515_s29  ;;  %1077 = vrot.lane.b32.xlu0 %v637_v44, %s2515_s29 }
 0x3ba   : > { %v1070_v0 = vpop.permute.xlu0 %1069 }
 0x3bb   : > { %v1095_v20 = vsel %vm639_vm1, %v1070_v0, 0.0 }
 0x3bd   : > { %1341 = vrot.lane.b32.xlu1 %v852_v21, %s2515_s29  ;;  %1209 = vrot.lane.b32.xlu0 %v745_v45, %s2515_s29 }
 0x3be   : > { %v1202_v1 = vpop.permute.xlu0 %1201  ;;  %v1072_v2 = vpop.permute.xlu1 %1071 }
 0x3bf   : > { %v1098_v37 = vsel %vm639_vm1, %v1072_v2, 0.0  ;;  %v1227_v41 = vsel %vm639_vm1, %v1202_v1, 0.0 }
 0x3c1   : > { %1471 = vrot.lane.b32.xlu1 %v958_v46, %s2515_s29  ;;  %1339 = vrot.lane.b32.xlu0 %v851_v47, %s2515_s29 }
 0x3c2   : > { %v1332_v3 = vpop.permute.xlu0 %1331  ;;  %v1204_v4 = vpop.permute.xlu1 %1203 }
 0x3c3   : > { %v1230_v43 = vsel %vm639_vm1, %v1204_v4, 0.0  ;;  %v1357_v44 = vsel %vm639_vm1, %v1332_v3, 0.0 }
 0x3c5   : > { %1075 = vrot.lane.b32.xlu1 %v636_v51, %s2515_s29  ;;  %1469 = vrot.lane.b32.xlu0 %v957_v29, %s2515_s29 }
 0x3c6   : > { %v1462_v6 = vpop.permute.xlu0 %1461  ;;  %v1334_v8 = vpop.permute.xlu1 %1333 }
 0x3c7   : > { %v1360_v45 = vsel %vm639_vm1, %v1334_v8, 0.0  ;;  %v1487_v47 = vsel %vm639_vm1, %v1462_v6, 0.0 }
 0x3c9   : > { %1207 = vrot.lane.b32.xlu1 %v744_v52, %s2515_s29  ;;  %1073 = vrot.lane.b32.xlu0 %v635_v53, %s2515_s29 }
 0x3ca   : > { %v1066_v11 = vpop.permute.xlu0 %1065  ;;  %v1464_v14 = vpop.permute.xlu1 %1463 }
 0x3cb   : > { %v1490_v51 = vsel %vm639_vm1, %v1464_v14, 0.0  ;;  %v1089_v38 = vsel %vm639_vm1, %v1066_v11, 0.0 }
 0x3cd   : > { %1337 = vrot.lane.b32.xlu1 %v850_v54, %s2515_s29  ;;  %1205 = vrot.lane.b32.xlu0 %v743_v55, %s2515_s29 }
 0x3ce   : > { %v1198_v16 = vpop.permute.xlu0 %1197  ;;  %v1068_v18 = vpop.permute.xlu1 %1067 }
 0x3cf   : > { %v1092_v53 = vsel %vm639_vm1, %v1068_v18, 0.0  ;;  %v1221_v55 = vsel %vm639_vm1, %v1198_v16, 0.0 }
 0x3d1   : > { %1467 = vrot.lane.b32.xlu1 %v956_v56, %s2515_s29  ;;  %1335 = vrot.lane.b32.xlu0 %v849_v57, %s2515_s29 }
 0x3d2   : > { %v1328_v23 = vpop.permute.xlu0 %1327  ;;  %v1200_v26 = vpop.permute.xlu1 %1199 }
 0x3d3   : > { %v1224_v56 = vsel %vm639_vm1, %v1200_v26, 0.0  ;;  %v1351_v0 = vsel %vm639_vm1, %v1328_v23, 0.0 }
 0x3d5   : > { %1465 = vrot.lane.b32.xlu0 %v955_v39, %s2515_s29 }
 0x3d6   : > { %v1458_v30 = vpop.permute.xlu0 %1457  ;;  %v1330_v32 = vpop.permute.xlu1 %1329 }
 0x3d7   : > { %v1354_v1 = vsel %vm639_vm1, %v1330_v32, 0.0  ;;  %v1481_v4 = vsel %vm639_vm1, %v1458_v30, 0.0 }
 0x3da   : > { %v1460_v40 = vpop.permute.xlu1 %1459 }
 0x3f4   : > { %659 = vadd.xlane.f32.xlu0 %v658_v5  ;;  %v1484_v5 = vsel %vm639_vm1, %v1460_v40, 0.0 }
 0x3f5   : > { %662 = vadd.xlane.f32.xlu1 %v661_v7 }
 0x3f8   : > { %766 = vadd.xlane.f32.xlu0 %v765_v9 }
 0x3f9   : > { %769 = vadd.xlane.f32.xlu1 %v768_v10 }
 0x3fc   : > { %872 = vadd.xlane.f32.xlu0 %v871_v12 }
 0x3fd   : > { %875 = vadd.xlane.f32.xlu1 %v874_v13 }
 0x400   : > { %978 = vadd.xlane.f32.xlu0 %v977_v15 }
 0x401   : > { %981 = vadd.xlane.f32.xlu1 %v980_v17 }
 0x404   : > { %653 = vadd.xlane.f32.xlu0 %v652_v19 }
 0x405   : > { %656 = vadd.xlane.f32.xlu1 %v655_v22 }
 0x408   : > { %760 = vadd.xlane.f32.xlu0 %v759_v24 }
 0x409   : > { %763 = vadd.xlane.f32.xlu1 %v762_v25 }
 0x40c   : > { %866 = vadd.xlane.f32.xlu0 %v865_v27 }
 0x40d   : > { %869 = vadd.xlane.f32.xlu1 %v868_v31 }
 0x410   : > { %972 = vadd.xlane.f32.xlu0 %v971_v33  ;;  %v3012_v34 = vpop.xlane.xlu0 %647 }
 0x411   : > { %975 = vadd.xlane.f32.xlu1 %v974_v35 }
 0x414   : > { %1096 = vadd.xlane.f32.xlu0 %v1095_v20  ;;  %v3016_v36 = vpop.xlane.xlu0 %754 }
 0x415   : > { %1099 = vadd.xlane.f32.xlu1 %v1098_v37 }
 0x418   : > { %1228 = vadd.xlane.f32.xlu0 %v1227_v41  ;;  %v3020_v42 = vpop.xlane.xlu0 %860 }
 0x419   : > { %v3023_v28 = vpop.xlane.xlu1 %757  ;;  %1231 = vadd.xlane.f32.xlu1 %v1230_v43 }
 0x41c   : > { %1358 = vadd.xlane.f32.xlu0 %v1357_v44  ;;  %v3026_v21 = vpop.xlane.xlu0 %966 }
 0x41d   : > { %v3029_v46 = vpop.xlane.xlu1 %863  ;;  %1361 = vadd.xlane.f32.xlu1 %v1360_v45 }
 0x420   : > { %1488 = vadd.xlane.f32.xlu0 %v1487_v47  ;;  %v3032_v50 = vpop.xlane.xlu0 %641 }
 0x421   : > { %v3035_v29 = vpop.xlane.xlu1 %969  ;;  %1491 = vadd.xlane.f32.xlu1 %v1490_v51 }
 0x424   : > { %1090 = vadd.xlane.f32.xlu0 %v1089_v38  ;;  %v3038_v52 = vpop.xlane.xlu0 %748 }
 0x425   : > { %v3041_v54 = vpop.xlane.xlu1 %644  ;;  %1093 = vadd.xlane.f32.xlu1 %v1092_v53 }
 0x428   : > { %1222 = vadd.xlane.f32.xlu0 %v1221_v55  ;;  %v3045_v57 = vpop.xlane.xlu0 %854 }
 0x429   : > { %v3047_v39 = vpop.xlane.xlu1 %751  ;;  %1225 = vadd.xlane.f32.xlu1 %v1224_v56 }
 0x42c   : > { %1352 = vadd.xlane.f32.xlu0 %v1351_v0  ;;  %v3051_v2 = vpop.xlane.xlu0 %960 }
 0x42d   : > { %1355 = vadd.xlane.f32.xlu1 %v1354_v1  ;;  %v3053_v3 = vpop.xlane.xlu1 %857 }
 0x430   : > { %1482 = vadd.xlane.f32.xlu0 %v1481_v4  ;;  %v3057_v6 = vpop.xlane.xlu0 %650 }
 0x431   : > { %1485 = vadd.xlane.f32.xlu1 %v1484_v5  ;;  %v3059_v7 = vpop.xlane.xlu1 %963 }
 0x434   : > { %v1078_v8 = vpop.permute.xlu0 %1077 }
 0x435   : > { %v1107_v9 = vsel %vm639_vm1, %v1078_v8, 0.0  ;;  %v1080_v10 = vpop.permute.xlu1 %1079 }
 0x436   : > { %v1110_v11 = vsel %vm639_vm1, %v1080_v10, 0.0  ;;  %1108 = vadd.xlane.f32.xlu0 %v1107_v9 }
 0x437   : > { %1111 = vadd.xlane.f32.xlu1 %v1110_v11 }
 0x438   : > { %v1210_v12 = vpop.permute.xlu0 %1209 }
 0x439   : > { %v1239_v13 = vsel %vm639_vm1, %v1210_v12, 0.0  ;;  %v1212_v14 = vpop.permute.xlu1 %1211 }
 0x43a   : > { %v1242_v15 = vsel %vm639_vm1, %v1212_v14, 0.0  ;;  %1240 = vadd.xlane.f32.xlu0 %v1239_v13 }
 0x43b   : > { %1243 = vadd.xlane.f32.xlu1 %v1242_v15 }
 0x43c   : > { %v1340_v16 = vpop.permute.xlu0 %1339 }
 0x43d   : > { %v1369_v17 = vsel %vm639_vm1, %v1340_v16, 0.0  ;;  %v1342_v18 = vpop.permute.xlu1 %1341 }
 0x43e   : > { %v1372_v19 = vsel %vm639_vm1, %v1342_v18, 0.0  ;;  %1370 = vadd.xlane.f32.xlu0 %v1369_v17 }
 0x43f   : > { %1373 = vadd.xlane.f32.xlu1 %v1372_v19 }
 0x440   : > { %v1470_v22 = vpop.permute.xlu0 %1469 }
 0x441   : > { %v1472_v23 = vpop.permute.xlu1 %1471  ;;  %v1499_v47 = vsel %vm639_vm1, %v1470_v22, 0.0 }
 0x442   : > { %v1502_v51 = vsel %vm639_vm1, %v1472_v23, 0.0 }
 0x444   : > { %v1074_v24 = vpop.permute.xlu0 %1073 }
 0x445   : > { %v1101_v25 = vsel %vm639_vm1, %v1074_v24, 0.0  ;;  %v1076_v26 = vpop.permute.xlu1 %1075 }
 0x446   : > { %v1104_v27 = vsel %vm639_vm1, %v1076_v26, 0.0  ;;  %1102 = vadd.xlane.f32.xlu0 %v1101_v25 }
 0x447   : > { %1105 = vadd.xlane.f32.xlu1 %v1104_v27 }
 0x448   : > { %v1206_v30 = vpop.permute.xlu0 %1205 }
 0x449   : > { %v1233_v31 = vsel %vm639_vm1, %v1206_v30, 0.0  ;;  %v1208_v32 = vpop.permute.xlu1 %1207 }
 0x44a   : > { %v1236_v33 = vsel %vm639_vm1, %v1208_v32, 0.0  ;;  %1234 = vadd.xlane.f32.xlu0 %v1233_v31 }
 0x44b   : > { %1237 = vadd.xlane.f32.xlu1 %v1236_v33 }
 0x44c   : > { %v1336_v35 = vpop.permute.xlu0 %1335 }
 0x44d   : > { %v1363_v20 = vsel %vm639_vm1, %v1336_v35, 0.0  ;;  %v1338_v37 = vpop.permute.xlu1 %1337 }
 0x44e   : > { %v1366_v40 = vsel %vm639_vm1, %v1338_v37, 0.0  ;;  %1364 = vadd.xlane.f32.xlu0 %v1363_v20 }
 0x44f   : > { %1367 = vadd.xlane.f32.xlu1 %v1366_v40 }
 0x450   : > { %v1466_v41 = vpop.permute.xlu0 %1465 }
 0x451   : > { %v1493_v43 = vsel %vm639_vm1, %v1466_v41, 0.0  ;;  %v1468_v44 = vpop.permute.xlu1 %1467 }
 0x452   : > { %v1496_v45 = vsel %vm639_vm1, %v1468_v44, 0.0  ;;  %1494 = vadd.xlane.f32.xlu0 %v1493_v43 }
 0x453   : > { %1497 = vadd.xlane.f32.xlu1 %v1496_v45 }
 0x456   : > { %1500 = vadd.xlane.f32.xlu0 %v1499_v47 }
 0x457   : > { %1503 = vadd.xlane.f32.xlu1 %v1502_v51 }
 0x481   : > { %v660_v38 = vpop.xlane.xlu0 %659 }
 0x482   : > { %v663_v53 = vpop.xlane.xlu1 %662  ;;  %v665_v9 = vmax.f32 %v3012_v34, %v660_v38 }
 0x483   : > { %v668_v12 = vmax.f32 %v3057_v6, %v663_v53 }
 0x485   : > { %v3077_v55 = vpop.xlane.xlu0 %766 }
 0x486   : > { %v3079_v56 = vpop.xlane.xlu1 %769  ;;  %v772_v24 = vmax.f32 %v3016_v36, %v3077_v55 }
 0x489   : > { %v3081_v0 = vpop.xlane.xlu0 %872 }
 0x48a   : > { %v3083_v1 = vpop.xlane.xlu1 %875 }
 0x48d   : > { %v3085_v4 = vpop.xlane.xlu0 %978 }
 0x48e   : > { %v3087_v5 = vpop.xlane.xlu1 %981 }
 0x491   : > { %v654_v8 = vpop.xlane.xlu0 %653 }
 0x492   : > { %v664_v10 = vmax.f32 %v3032_v50, %v654_v8  ;;  %v657_v11 = vpop.xlane.xlu1 %656 }
 0x493   : > { %v667_v13 = vmax.f32 %v3041_v54, %v657_v11 }
 0x494   : > { %v666_v14 = vmax.f32 %v664_v10, %v665_v9 }
 0x495   : > { %v669_v15 = vmax.f32 %v667_v13, %v668_v12  ;;  %v761_v16 = vpop.xlane.xlu0 %760 }
 0x496   : > { %v670_v17 = vsub.f32 %v3032_v50, %v666_v14  ;;  %v672_v18 = vsub.f32 %v3012_v34, %v666_v14  ;;  %v674_v19 = vsub.f32 %v654_v8, %v666_v14  ;;  %v676_v22 = vsub.f32 %v660_v38, %v666_v14  ;;  %v764_v23 = vpop.xlane.xlu1 %763 }
 0x497   : > { %v671_v25 = vsub.f32 %v3041_v54, %v669_v15  ;;  %v673_v26 = vsub.f32 %v3057_v6, %v669_v15  ;;  %v675_v27 = vsub.f32 %v657_v11, %v669_v15  ;;  %v771_v33 = vmax.f32 %v3038_v52, %v761_v16 }
 0x498   : > { %v678_v30 = vmul.f32 1.442695, %v670_v17  ;;  %v682_v31 = vmul.f32 1.442695, %v672_v18  ;;  %v686_v32 = vmul.f32 1.442695, %v674_v19  ;;  %v775_v50 = vmax.f32 %v3023_v28, %v3079_v56 }
 0x499   : > { %v690_v34 = vmul.f32 1.442695, %v676_v22  ;;  %v677_v35 = vsub.f32 %v663_v53, %v669_v15  ;;  %v774_v20 = vmax.f32 %v3047_v39, %v764_v23  ;;  %v3103_v37 = vpop.xlane.xlu0 %866  ;;  %v680_v40 = vmul.f32 1.442695, %v671_v25 }
 0x49a   : > { %2070 = vpow2.f32 %v678_v30  ;;  %v684_v54 = vmul.f32 1.442695, %v673_v26  ;;  %v773_v41 = vmax.f32 %v771_v33, %v772_v24  ;;  %v3105_v6 = vpop.xlane.xlu1 %869  ;;  %v688_v43 = vmul.f32 1.442695, %v675_v27 }
 0x49b   : > { %2072 = vpow2.f32 %v682_v31  ;;  %v776_v44 = vmax.f32 %v774_v20, %v775_v50  ;;  %v877_v45 = vmax.f32 %v3045_v57, %v3103_v37  ;;  %v878_v53 = vmax.f32 %v3020_v42, %v3081_v0 }
 0x49c   : > { %2074 = vpow2.f32 %v686_v32  ;;  %v777_v47 = vsub.f32 %v3038_v52, %v773_v41  ;;  %v779_v51 = vsub.f32 %v3016_v36, %v773_v41  ;;  %v781_v38 = vsub.f32 %v761_v16, %v773_v41 }
 0x49d   : > { %2076 = vpow2.f32 %v690_v34  ;;  %v692_v8 = vmul.f32 1.442695, %v677_v35  ;;  %v783_v9 = vsub.f32 %v3077_v55, %v773_v41  ;;  %v3114_v10 = vpop.xlane.xlu0 %972  ;;  %v778_v12 = vsub.f32 %v3047_v39, %v776_v44 }
 0x49e   : > { %2078 = vpow2.f32 %v680_v40  ;;  %v785_v11 = vmul.f32 1.442695, %v777_v47  ;;  %v880_v13 = vmax.f32 %v3053_v3, %v3105_v6  ;;  %v3119_v52 = vpop.xlane.xlu1 %975  ;;  %v881_v36 = vmax.f32 %v3029_v46, %v3083_v1 }
 0x49f   : > { %2080 = vpow2.f32 %v684_v54  ;;  %v789_v14 = vmul.f32 1.442695, %v779_v51  ;;  %v780_v15 = vsub.f32 %v3023_v28, %v776_v44  ;;  %v793_v55 = vmul.f32 1.442695, %v781_v38 }
 0x4a0   : > { %2082 = vpow2.f32 %v688_v43  ;;  %v782_v16 = vsub.f32 %v764_v23, %v776_v44  ;;  %v879_v17 = vmax.f32 %v877_v45, %v878_v53  ;;  %v797_v18 = vmul.f32 1.442695, %v783_v9 }
 0x4a1   : > { %2084 = vpow2.f32 %v692_v8  ;;  %v784_v39 = vsub.f32 %v3079_v56, %v776_v44  ;;  %v3125_v19 = vpop.xlane.xlu0 %1096  ;;  %v787_v22 = vmul.f32 1.442695, %v778_v12  ;;  %v3128_v25 = vmax.f32 %v880_v13, %v881_v36 }
 0x4a2   : > { %2086 = vpow2.f32 %v785_v11  ;;  %v883_v24 = vsub.f32 %v3045_v57, %v879_v17  ;;  %v3130_v26 = vpop.xlane.xlu1 %1099  ;;  %v791_v28 = vmul.f32 1.442695, %v780_v15  ;;  %v885_v27 = vsub.f32 %v3020_v42, %v879_v17 }
 0x4a3   : > { %2088 = vpow2.f32 %v789_v14  ;;  %v984_v30 = vmax.f32 %v3026_v21, %v3085_v4  ;;  %v795_v56 = vmul.f32 1.442695, %v782_v16  ;;  %v887_v31 = vsub.f32 %v3103_v37, %v879_v17 }
 0x4a4   : > { %v3133_v23 = vpop.eup %2070  ;;  %2090 = vpow2.f32 %v793_v55  ;;  %v987_v57 = vmax.f32 %v3035_v29, %v3087_v5  ;;  %v799_v33 = vmul.f32 1.442695, %v784_v39  ;;  %v889_v50 = vsub.f32 %v3081_v0, %v879_v17 }
 0x4a5   : > { %v3138_v32 = vpop.eup %2072  ;;  %2092 = vpow2.f32 %v797_v18  ;;  %v3143_v34 = vpop.xlane.xlu0 %1228  ;;  %v891_v20 = vmul.f32 1.442695, %v883_v24  ;;  %v884_v37 = vsub.f32 %v3053_v3, %v3128_v25  ;;  %v895_v41 = vmul.f32 1.442695, %v885_v27 }
 0x4a6   : > { %v3145_v42 = vpop.eup %2074  ;;  %v694_v35 = vadd.f32 %v3138_v32, %v3133_v23  ;;  %2094 = vpow2.f32 %v787_v22  ;;  %v3151_v40 = vpop.xlane.xlu1 %1231  ;;  %v886_v0 = vsub.f32 %v3029_v46, %v3128_v25  ;;  %v983_v43 = vmax.f32 %v3051_v2, %v3114_v10 }
 0x4a7   : > { %v3153_v54 = vpop.eup %2076  ;;  %2096 = vpow2.f32 %v791_v28  ;;  %v899_v47 = vmul.f32 1.442695, %v887_v31  ;;  %v986_v3 = vmax.f32 %v3059_v7, %v3119_v52  ;;  %v903_v38 = vmul.f32 1.442695, %v889_v50 }
 0x4a8   : > { %v3159_v44 = vpop.eup %2078  ;;  %v695_v45 = vadd.f32 %v3145_v42, %v694_v35  ;;  %2098 = vpow2.f32 %v795_v56  ;;  %v888_v53 = vsub.f32 %v3105_v6, %v3128_v25  ;;  %v985_v46 = vmax.f32 %v983_v43, %v984_v30 }
 0x4a9   : > { %v3164_v51 = vpop.eup %2080  ;;  %2100 = vpow2.f32 %v799_v33  ;;  %v3168_v8 = vpop.xlane.xlu0 %1358  ;;  %v890_v13 = vsub.f32 %v3083_v1, %v3128_v25  ;;  %v893_v6 = vmul.f32 1.442695, %v884_v37  ;;  %v3182_v55 = vmax.f32 %v986_v3, %v987_v57 }
 0x4aa   : > { %v3170_v9 = vpop.eup %2082  ;;  %v696_v11 = vadd.f32 %v3153_v54, %v695_v45  ;;  %v697_v12 = vadd.f32 %v3164_v51, %v3159_v44  ;;  %2102 = vpow2.f32 %v891_v20  ;;  %v3177_v36 = vpop.xlane.xlu1 %1361  ;;  %v993_v15 = vsub.f32 %v3114_v10, %v985_v46 }
 0x4ab   : > { %v3179_v14 = vpop.eup %2084  ;;  %2104 = vpow2.f32 %v895_v41  ;;  %v897_v39 = vmul.f32 1.442695, %v886_v0  ;;  %v989_v1 = vsub.f32 %v3051_v2, %v985_v46  ;;  %v991_v22 = vsub.f32 %v3026_v21, %v985_v46 }
 0x4ac   : > { %v3184_v16 = vpop.eup %2086  ;;  %2106 = vrcp.f32 %v696_v11  ;;  %v698_v17 = vadd.f32 %v3170_v9, %v697_v12  ;;  %v901_v27 = vmul.f32 1.442695, %v888_v53  ;;  %v905_v31 = vmul.f32 1.442695, %v890_v13 }
 0x4ad   : > { %v3187_v18 = vpop.eup %2088  ;;  %2108 = vpow2.f32 %v899_v47  ;;  %v3191_v24 = vpop.xlane.xlu0 %1488  ;;  %v994_v21 = vsub.f32 %v3119_v52, %v3182_v55  ;;  %v995_v33 = vsub.f32 %v3085_v4, %v985_v46  ;;  %v997_v35 = vmul.f32 1.442695, %v989_v1 }
 0x4ae   : > { %3838 = vst [vmem:[#allocation20_spill] sm:$0xff] %v3191_v24  ;;  %v3193_v25 = vpop.eup %2090  ;;  %v699_v10 = vadd.f32 %v3179_v14, %v698_v17  ;;  %v801_v28 = vadd.f32 %v3187_v18, %v3184_v16  ;;  %2110 = vpow2.f32 %v903_v38  ;;  %v3198_v30 = vpop.xlane.xlu1 %1491  ;;  %v1001_v20 = vmul.f32 1.442695, %v991_v22 }
 0x4af   : > { %3839 = vst [vmem:[#allocation21_spill] sm:$0xff] %v3198_v30  ;;  %v3200_v56 = vpop.eup %2092  ;;  %2112 = vpow2.f32 %v893_v6  ;;  %v990_v37 = vsub.f32 %v3059_v7, %v3182_v55  ;;  %v992_v4 = vsub.f32 %v3035_v29, %v3182_v55  ;;  %v1005_v3 = vmul.f32 1.442695, %v993_v15 }
 0x4b0   : > { %v3204_v2 = vpop.eup %2094  ;;  %2114 = vrcp.f32 %v699_v10  ;;  %v802_v57 = vadd.f32 %v3193_v25, %v801_v28  ;;  %v1009_v46 = vmul.f32 1.442695, %v995_v33  ;;  %v996_v11 = vsub.f32 %v3087_v5, %v3182_v55 }
 0x4b1   : > { %v3208_v50 = vpop.eup %2096  ;;  %2116 = vpow2.f32 %v897_v39  ;;  %v3212_v41 = vpop.xlane.xlu0 %1090  ;;  %v999_v29 = vmul.f32 1.442695, %v990_v37  ;;  %v1003_v17 = vmul.f32 1.442695, %v992_v4 }
 0x4b2   : > { %v3214_v0 = vpop.eup %2098  ;;  %v803_v52 = vadd.f32 %v3200_v56, %v802_v57  ;;  %v804_v43 = vadd.f32 %v3208_v50, %v3204_v2  ;;  %2118 = vpow2.f32 %v901_v27  ;;  %v3221_v45 = vpop.xlane.xlu1 %1093  ;;  %v1007_v27 = vmul.f32 1.442695, %v994_v21 }
 0x4b3   : > { %v3223_v47 = vpop.eup %2100  ;;  %2120 = vpow2.f32 %v905_v31  ;;  %v1011_v33 = vmul.f32 1.442695, %v996_v11 }
 0x4b4   : > { %v3225_v7 = vpop.eup %2102  ;;  %2122 = vrcp.f32 %v803_v52  ;;  %v805_v38 = vadd.f32 %v3214_v0, %v804_v43 }
 0x4b5   : > { %v3228_v53 = vpop.eup %2104  ;;  %2124 = vpow2.f32 %v997_v35  ;;  %v3232_v12 = vpop.xlane.xlu0 %1222 }
 0x4b6   : > { %v2107_v13 = vpop.eup %2106  ;;  %v806_v6 = vadd.f32 %v3223_v47, %v805_v38  ;;  %v907_v15 = vadd.f32 %v3228_v53, %v3225_v7  ;;  %2126 = vpow2.f32 %v1001_v20  ;;  %v3237_v39 = vpop.xlane.xlu1 %1225 }
 0x4b7   : > { %v3239_v1 = vpop.eup %2108  ;;  %v706_v22 = vmul.f32 %v2107_v13, %v3145_v42  ;;  %2128 = vpow2.f32 %v1005_v3  ;;  %v702_v5 = vmul.f32 %v2107_v13, %v3133_v23  ;;  %v704_v55 = vmul.f32 %v2107_v13, %v3138_v32 }
 0x4b8   : > { %v3244_v10 = vpop.eup %2110  ;;  %2130 = vrcp.f32 %v806_v6  ;;  %v908_v28 = vadd.f32 %v3239_v1, %v907_v15  ;;  %v708_v31 = vmul.f32 %v2107_v13, %v3153_v54 }
 0x4b9   : > { %v3248_v57 = vpop.eup %2112  ;;  %2132 = vpow2.f32 %v1009_v46  ;;  %v3250_v35 = vpop.xlane.xlu0 %1352  ;;  %v710_v42 = vmul.f32 %v702_v5, %v2896_v58  ;;  %v712_v23 = vmul.f32 %v2893_v48, %v704_v55  ;;  %v714_v21 = vmul.f32 %v706_v22, %v2908_v61 }
 0x4ba   : > { %v2115_v20 = vpop.eup %2114  ;;  %v909_v32 = vadd.f32 %v3244_v10, %v908_v28  ;;  %2134 = vpow2.f32 %v999_v29  ;;  %v3255_v37 = vpop.xlane.xlu1 %1355  ;;  %v716_v54 = vmul.f32 %v2904_v60, %v708_v31 }
 0x4bb   : > { %v3259_v52 = vpop.eup %2116  ;;  %v707_v43 = vmul.f32 %v2115_v20, %v3170_v9  ;;  %2136 = vpow2.f32 %v1003_v17  ;;  %v703_v4 = vmul.f32 %v2115_v20, %v3159_v44  ;;  %v705_v3 = vmul.f32 %v2115_v20, %v3164_v51 }
 0x4bc   : > { %v3264_v38 = vpop.eup %2118  ;;  %2138 = vrcp.f32 %v909_v32  ;;  %v910_v46 = vadd.f32 %v3259_v52, %v3248_v57  ;;  %v709_v11 = vmul.f32 %v2115_v20, %v3179_v14  ;;  %v719_v29 = vsel %vm718_vm2, %v710_v42, 0.0 }
 0x4bd   : > { %v3270_v13 = vpop.eup %2120  ;;  %2140 = vpow2.f32 %v1007_v27  ;;  %v711_v9 = vmul.f32 %v703_v4, %v2901_v59  ;;  %v713_v6 = vmul.f32 %v2899_v49, %v705_v3  ;;  %v715_v44 = vmul.f32 %v707_v43, %v2912_v63  ;;  %v3281_v55 = vpop.xlane.xlu0 %1482 }
 0x4be   : > { %v2123_v51 = vpop.eup %2122  ;;  %v911_v15 = vadd.f32 %v3264_v38, %v910_v46  ;;  %2142 = vpow2.f32 %v1011_v33  ;;  %v717_v17 = vmul.f32 %v2910_v62, %v709_v11  ;;  %v720_v22 = vsel %vm718_vm2, %v712_v23, 0.0  ;;  %v3288_v33 = vpop.xlane.xlu1 %1485 }
 0x4bf   : > { %v3278_v14 = vpop.eup %2124  ;;  %v813_v5 = vmul.f32 %v2123_v51, %v3193_v25  ;;  %v721_v28 = vadd.f32 %v720_v22, %v719_v29  ;;  %v722_v27 = vsel %vm718_vm2, %v714_v21, 0.0  ;;  %v724_v31 = vsel %vm718_vm2, %v716_v54, 0.0 }
 0x4c0   : > { %v3285_v42 = vpop.eup %2126  ;;  %v912_v20 = vadd.f32 %v3270_v13, %v911_v15  ;;  %v726_v32 = vsel %vm718_vm2, %v711_v9, 0.0  ;;  %v727_v23 = vsel %vm718_vm2, %v713_v6, 0.0  ;;  %v729_v43 = vsel %vm718_vm2, %v715_v44, 0.0 }
 0x4c1   : > { %v3293_v25 = vpop.eup %2128  ;;  %v1013_v4 = vadd.f32 %v3285_v42, %v3278_v14  ;;  %v723_v21 = vadd.f32 %v722_v27, %v721_v28  ;;  %v728_v3 = vadd.f32 %v727_v23, %v726_v32  ;;  %v731_v54 = vsel %vm718_vm2, %v717_v17, 0.0 }
 0x4c2   : > { %v2131_v46 = vpop.eup %2130  ;;  %2144 = vrcp.f32 %v912_v20  ;;  %v809_v11 = vmul.f32 %v2123_v51, %v3184_v16  ;;  %v811_v29 = vmul.f32 %v2123_v51, %v3187_v18  ;;  %v815_v9 = vmul.f32 %v2123_v51, %v3200_v56 }
 0x4c3   : > { %v3301_v6 = vpop.eup %2132  ;;  %v814_v44 = vmul.f32 %v2131_v46, %v3214_v0  ;;  %v1014_v15 = vadd.f32 %v3293_v25, %v1013_v4  ;;  %v3305_v22 = vpop.xlane.xlu0 %1108  ;;  %v725_v28 = vadd.f32 %v724_v31, %v723_v21  ;;  %v730_v27 = vadd.f32 %v729_v43, %v728_v3 }
 0x4c4   : > { %v3307_v32 = vpop.eup %2134  ;;  %v3311_v16 = vpop.xlane.xlu1 %1111  ;;  %v810_v18 = vmul.f32 %v2131_v46, %v3204_v2  ;;  %v812_v56 = vmul.f32 %v2131_v46, %v3208_v50  ;;  %v816_v51 = vmul.f32 %v2131_v46, %v3223_v47  ;;  %v817_v43 = vmul.f32 %v809_v11, %v2896_v58 }
 0x4c5   : > { %v3316_v0 = vpop.eup %2136  ;;  %v1015_v20 = vadd.f32 %v3301_v6, %v1014_v15  ;;  %v732_v23 = vadd.f32 %v731_v54, %v730_v27  ;;  %v819_v50 = vmul.f32 %v2893_v48, %v811_v29  ;;  %v821_v54 = vmul.f32 %v813_v5, %v2908_v61 }
 0x4c6   : > { %v2139_v4 = vpop.eup %2138  ;;  %v1016_v21 = vadd.f32 %v3316_v0, %v3307_v32  ;;  %v818_v2 = vmul.f32 %v810_v18, %v2901_v59  ;;  %v820_v47 = vmul.f32 %v2899_v49, %v812_v56  ;;  %v822_v56 = vmul.f32 %v814_v44, %v2912_v63 }
 0x4c7   : > { %v3327_v3 = vpop.eup %2140  ;;  %v919_v46 = vmul.f32 %v2139_v4, %v3239_v1  ;;  %2146 = vrcp.f32 %v1015_v20  ;;  %v733_v15 = vpack.c.bf16 %v732_v23, %v725_v28  ;;  %v3330_v31 = vpop.xlane.xlu0 %1240  ;;  %v823_v17 = vmul.f32 %v2904_v60, %v815_v9 }
 0x4c8   : > { %v3333_v11 = vpop.eup %2142  ;;  %v1017_v27 = vadd.f32 %v3327_v3, %v1016_v21  ;;  %v3338_v29 = vpop.xlane.xlu1 %1243  ;;  %v824_v5 = vmul.f32 %v2910_v62, %v816_v51  ;;  %v825_v28 = vsel %vm718_vm2, %v817_v43, 0.0  ;;  %v826_v20 = vsel %vm718_vm2, %v819_v50, 0.0 }
 0x4c9   : > { %735 = vrot.lane.b32.xlu0 %v733_v15, %s2516_s20  ;;  %v827_v21 = vadd.f32 %v826_v20, %v825_v28  ;;  %v828_v18 = vsel %vm718_vm2, %v821_v54, 0.0  ;;  %v830_v44 = vsel %vm718_vm2, %v823_v17, 0.0  ;;  %v832_v9 = vsel %vm718_vm2, %v818_v2, 0.0 }
 0x4ca   : > { %v1018_v23 = vadd.f32 %v3333_v11, %v1017_v27  ;;  %v833_v15 = vsel %vm718_vm2, %v820_v47, 0.0  ;;  %v835_v30 = vsel %vm718_vm2, %v822_v56, 0.0  ;;  %v837_v1 = vsel %vm718_vm2, %v824_v5, 0.0 }
 0x4cb   : > { %v3355_v51 = vpop.xlane.xlu0 %1370  ;;  %v829_v50 = vadd.f32 %v828_v18, %v827_v21  ;;  %v834_v24 = vadd.f32 %v833_v15, %v832_v9  ;;  %v915_v47 = vmul.f32 %v2139_v4, %v3225_v7  ;;  %v917_v20 = vmul.f32 %v2139_v4, %v3228_v53 }
 0x4cc   : > { %v2145_v43 = vpop.eup %2144  ;;  %2148 = vrcp.f32 %v1018_v23  ;;  %v1376_v27 = vmax.f32 %v3168_v8, %v3355_v51  ;;  %v3359_v54 = vpop.xlane.xlu1 %1373  ;;  %v921_v23 = vmul.f32 %v2139_v4, %v3244_v10 }
 0x4cd   : > { %v920_v17 = vmul.f32 %v2145_v43, %v3264_v38  ;;  %v916_v56 = vmul.f32 %v2145_v43, %v3248_v57  ;;  %v831_v5 = vadd.f32 %v830_v44, %v829_v50  ;;  %v836_v28 = vadd.f32 %v835_v30, %v834_v24 }
 0x4ce   : > { %v918_v18 = vmul.f32 %v2145_v43, %v3259_v52  ;;  %v922_v21 = vmul.f32 %v2145_v43, %v3270_v13  ;;  %v923_v9 = vmul.f32 %v915_v47, %v2896_v58  ;;  %v925_v2 = vmul.f32 %v2893_v48, %v917_v20 }
 0x4cf   : > { %v924_v38 = vmul.f32 %v916_v56, %v2901_v59  ;;  %v838_v15 = vadd.f32 %v837_v1, %v836_v28  ;;  %v927_v57 = vmul.f32 %v919_v46, %v2908_v61  ;;  %v928_v30 = vmul.f32 %v920_v17, %v2912_v63 }
 0x4d0   : > { %v926_v7 = vmul.f32 %v2899_v49, %v918_v18  ;;  %v929_v53 = vmul.f32 %v2904_v60, %v921_v23  ;;  %v930_v10 = vmul.f32 %v2910_v62, %v922_v21  ;;  %v931_v52 = vsel %vm718_vm2, %v923_v9, 0.0 }
 0x4d1   : > { %v2147_v24 = vpop.eup %2146  ;;  %v839_v4 = vpack.c.bf16 %v838_v15, %v831_v5  ;;  %v932_v1 = vsel %vm718_vm2, %v925_v2, 0.0  ;;  %v934_v44 = vsel %vm718_vm2, %v927_v57, 0.0  ;;  %v938_v46 = vsel %vm718_vm2, %v924_v38, 0.0 }
 0x4d2   : > { %v1025_v13 = vmul.f32 %v2147_v24, %v3293_v25  ;;  %v933_v43 = vadd.f32 %v932_v1, %v931_v52  ;;  %v936_v50 = vsel %vm718_vm2, %v929_v53, 0.0  ;;  %v939_v17 = vsel %vm718_vm2, %v926_v7, 0.0 }
 0x4d3   : > { %v1103_v47 = vpop.xlane.xlu0 %1102  ;;  %841 = vrot.lane.b32.xlu1 %v839_v4, %s2516_s20  ;;  %v940_v56 = vadd.f32 %v939_v17, %v938_v46  ;;  %v941_v28 = vsel %vm718_vm2, %v928_v30, 0.0  ;;  %v943_v25 = vsel %vm718_vm2, %v930_v10, 0.0  ;;  %v3391_v23 = vmul.f32 %v2147_v24, %v3278_v14 }
 0x4d4   : > { %v1113_v5 = vmax.f32 %v3212_v41, %v1103_v47  ;;  %v1106_v2 = vpop.xlane.xlu1 %1105  ;;  %v935_v20 = vadd.f32 %v934_v44, %v933_v43  ;;  %v3394_v21 = vmul.f32 %v2147_v24, %v3285_v42  ;;  %v3840_v15 = vmax.f32 %v3125_v19, %v3305_v22 }
 0x4d5   : > { %v1116_v18 = vmax.f32 %v3221_v45, %v1106_v2  ;;  %v942_v38 = vadd.f32 %v941_v28, %v940_v56  ;;  %v3400_v57 = vmul.f32 %v2147_v24, %v3301_v6  ;;  %v3403_v30 = vmul.f32 %v1025_v13, %v2908_v61 }
 0x4d6   : > { %v2149_v9 = vpop.eup %2148  ;;  %v1115_v7 = vmax.f32 %v1113_v5, %v3840_v15  ;;  %v937_v14 = vadd.f32 %v936_v50, %v935_v20  ;;  %v3841_v42 = vmax.f32 %v3130_v26, %v3311_v16 }
 0x4d7   : > { %v3406_v53 = vmul.f32 %v2149_v9, %v3327_v3  ;;  %v1235_v52 = vpop.xlane.xlu0 %1234  ;;  %v3412_v4 = vmul.f32 %v2149_v9, %v3307_v32  ;;  %v944_v1 = vadd.f32 %v943_v25, %v942_v38  ;;  %v3842_v38 = vmax.f32 %v3143_v34, %v3330_v31 }
 0x4d8   : > { %v1118_v10 = vmax.f32 %v1116_v18, %v3841_v42  ;;  %v1119_v44 = vsub.f32 %v3212_v41, %v1115_v7  ;;  %v1121_v6 = vsub.f32 %v3125_v19, %v1115_v7  ;;  %v1123_v24 = vsub.f32 %v1103_v47, %v1115_v7  ;;  %v1238_v13 = vpop.xlane.xlu1 %1237 }
 0x4d9   : > { %v1125_v43 = vsub.f32 %v3305_v22, %v1115_v7  ;;  %v945_v17 = vpack.c.bf16 %v944_v1, %v937_v14  ;;  %v1245_v22 = vmax.f32 %v3232_v12, %v1235_v52  ;;  %v3843_v7 = vmax.f32 %v3151_v40, %v3338_v29 }
 0x4da   : > { %v1120_v3 = vsub.f32 %v3221_v45, %v1118_v10  ;;  %v1122_v50 = vsub.f32 %v3130_v26, %v1118_v10  ;;  %v1124_v46 = vsub.f32 %v1106_v2, %v1118_v10  ;;  %v1127_v56 = vmul.f32 1.442695, %v1119_v44 }
 0x4db   : > { %v1131_v28 = vmul.f32 1.442695, %v1121_v6  ;;  %v1135_v5 = vmul.f32 1.442695, %v1123_v24  ;;  %v1139_v32 = vmul.f32 1.442695, %v1125_v43  ;;  %v1126_v25 = vsub.f32 %v3311_v16, %v1118_v10  ;;  %v1365_v18 = vpop.xlane.xlu0 %1364  ;;  %947 = vrot.lane.b32.xlu0 %v945_v17, %s2516_s20 }
 0x4dc   : > { %v1129_v20 = vmul.f32 1.442695, %v1120_v3  ;;  %v1133_v41 = vmul.f32 1.442695, %v1122_v50  ;;  %2150 = vpow2.f32 %v1127_v56  ;;  %v1137_v19 = vmul.f32 1.442695, %v1124_v46  ;;  %v3423_v26 = vpop.xlane.xlu1 %1367 }
 0x4dd   : > { %v1248_v45 = vmax.f32 %v3237_v39, %v1238_v13  ;;  %2152 = vpow2.f32 %v1131_v28  ;;  %v1141_v47 = vmul.f32 1.442695, %v1126_v25  ;;  %v1375_v2 = vmax.f32 %v3250_v35, %v1365_v18 }
 0x4de   : > { %v1378_v16 = vmax.f32 %v3255_v37, %v3423_v26  ;;  %2154 = vpow2.f32 %v1135_v5  ;;  %v1247_v15 = vmax.f32 %v1245_v22, %v3842_v38  ;;  %v3435_v42 = vmul.f32 %v2149_v9, %v3316_v0 }
 0x4df   : > { %v1250_v14 = vmax.f32 %v1248_v45, %v3843_v7  ;;  %2156 = vpow2.f32 %v1139_v32  ;;  %v1377_v10 = vmax.f32 %v1375_v2, %v1376_v27  ;;  %v3844_v1 = vmax.f32 %v3177_v36, %v3359_v54 }
 0x4e0   : > { %v3444_v6 = vmul.f32 %v2149_v9, %v3333_v11  ;;  %2158 = vpow2.f32 %v1129_v20  ;;  %v1251_v24 = vsub.f32 %v3232_v12, %v1247_v15  ;;  %v1253_v43 = vsub.f32 %v3143_v34, %v1247_v15  ;;  %v3452_v12 = vpop.xlane.xlu0 %1494  ;;  %v3455_v5 = vpop.xlane.xlu1 %1497 }
 0x4e1   : > { %v1380_v44 = vmax.f32 %v1378_v16, %v3844_v1  ;;  %v1255_v3 = vsub.f32 %v1235_v52, %v1247_v15  ;;  %2160 = vpow2.f32 %v1133_v41  ;;  %v1257_v0 = vsub.f32 %v3330_v31, %v1247_v15 }
 0x4e2   : > { %v1252_v50 = vsub.f32 %v3237_v39, %v1250_v14  ;;  %v1254_v27 = vsub.f32 %v3151_v40, %v1250_v14  ;;  %2162 = vpow2.f32 %v1137_v19  ;;  %v1259_v46 = vmul.f32 1.442695, %v1251_v24 }
 0x4e3   : > { %v1263_v17 = vmul.f32 1.442695, %v1253_v43  ;;  %v1267_v56 = vmul.f32 1.442695, %v1255_v3  ;;  %2164 = vpow2.f32 %v1141_v47  ;;  %v1271_v11 = vmul.f32 1.442695, %v1257_v0 }
 0x4e4   : > { %v1256_v9 = vsub.f32 %v1238_v13, %v1250_v14  ;;  %v1258_v28 = vsub.f32 %v3338_v29, %v1250_v14  ;;  %2166 = vpow2.f32 %v1259_v46  ;;  %v1261_v34 = vmul.f32 1.442695, %v1252_v50  ;;  %v1501_v15 = vpop.xlane.xlu0 %1500  ;;  %v3845_v0 = vld [vmem:[#allocation20_spill] sm:$0xff]  ;;  %v3846_v46 = vld [vmem:[#allocation21_spill] sm:$0xff] }
 0x4e5   : > { %v1265_v52 = vmul.f32 1.442695, %v1254_v27  ;;  %v1381_v31 = vsub.f32 %v3250_v35, %v1377_v10  ;;  %2168 = vpow2.f32 %v1263_v17  ;;  %v1383_v32 = vsub.f32 %v3168_v8, %v1377_v10 }
 0x4e6   : > { %v1269_v40 = vmul.f32 1.442695, %v1256_v9  ;;  %v1273_v39 = vmul.f32 1.442695, %v1258_v28  ;;  %v3458_v25 = vpop.eup %2150  ;;  %2170 = vpow2.f32 %v1267_v56  ;;  %v1385_v13 = vsub.f32 %v1365_v18, %v1377_v10 }
 0x4e7   : > { %v1387_v29 = vsub.f32 %v3355_v51, %v1377_v10  ;;  %v1389_v20 = vmul.f32 1.442695, %v1381_v31  ;;  %v3461_v41 = vpop.eup %2152  ;;  %2172 = vpow2.f32 %v1271_v11  ;;  %v1393_v19 = vmul.f32 1.442695, %v1383_v32  ;;  %v3478_v10 = vpop.xlane.xlu1 %1503 }
 0x4e8   : > { %v1382_v35 = vsub.f32 %v3255_v37, %v1380_v44  ;;  %v1384_v22 = vsub.f32 %v3177_v36, %v1380_v44  ;;  %v3465_v45 = vpop.eup %2154  ;;  %v1143_v8 = vadd.f32 %v3461_v41, %v3458_v25  ;;  %2174 = vpow2.f32 %v1261_v34 }
 0x4e9   : > { %v1397_v47 = vmul.f32 1.442695, %v1385_v13  ;;  %v1401_v2 = vmul.f32 1.442695, %v1387_v29  ;;  %v3469_v18 = vpop.eup %2156  ;;  %2176 = vpow2.f32 %v1265_v52  ;;  %v1386_v51 = vsub.f32 %v3423_v26, %v1380_v44 }
 0x4ea   : > { %v1388_v16 = vsub.f32 %v3359_v54, %v1380_v44  ;;  %v1391_v38 = vmul.f32 1.442695, %v1382_v35  ;;  %v3473_v37 = vpop.eup %2158  ;;  %v1144_v36 = vadd.f32 %v3465_v45, %v1143_v8  ;;  %2178 = vpow2.f32 %v1269_v40 }
 0x4eb   : > { %v1395_v7 = vmul.f32 1.442695, %v1384_v22  ;;  %v1505_v14 = vmax.f32 %v3281_v55, %v3452_v12  ;;  %v3480_v1 = vpop.eup %2160  ;;  %2180 = vpow2.f32 %v1273_v39  ;;  %v1399_v24 = vmul.f32 1.442695, %v1386_v51 }
 0x4ec   : > { %v1403_v26 = vmul.f32 1.442695, %v1388_v16  ;;  %v1508_v54 = vmax.f32 %v3288_v33, %v3455_v5  ;;  %v3484_v44 = vpop.eup %2162  ;;  %v1145_v43 = vadd.f32 %v3469_v18, %v1144_v36  ;;  %v1146_v3 = vadd.f32 %v3480_v1, %v3473_v37 }
 0x4ed   : > { %2182 = vpow2.f32 %v1389_v20  ;;  %v1506_v50 = vmax.f32 %v3845_v0, %v1501_v15  ;;  %v3490_v27 = vpop.eup %2164  ;;  %v1509_v17 = vmax.f32 %v3846_v46, %v3478_v10  ;;  %v1029_v56 = vmul.f32 %v3391_v23, %v2896_v58 }
 0x4ee   : > { %2184 = vpow2.f32 %v1393_v19  ;;  %v3498_v11 = vmul.f32 %v3412_v4, %v2901_v59  ;;  %v3500_v9 = vpop.eup %2166  ;;  %v1147_v28 = vadd.f32 %v3484_v44, %v1146_v3  ;;  %v1031_v52 = vmul.f32 %v2893_v48, %v3394_v21 }
 0x4ef   : > { %2186 = vrcp.f32 %v1145_v43  ;;  %v1507_v34 = vmax.f32 %v1505_v14, %v1506_v50  ;;  %v3505_v31 = vpop.eup %2168  ;;  %v1510_v40 = vmax.f32 %v1508_v54, %v1509_v17  ;;  %v3509_v23 = vmul.f32 %v2899_v49, %v3435_v42 }
 0x4f0   : > { %2188 = vpow2.f32 %v1397_v47  ;;  %v3513_v4 = vmul.f32 %v3406_v53, %v2912_v63  ;;  %v3515_v39 = vpop.eup %2170  ;;  %v1148_v32 = vadd.f32 %v3490_v27, %v1147_v28  ;;  %v1275_v13 = vadd.f32 %v3505_v31, %v3500_v9 }
 0x4f1   : > { %2190 = vpow2.f32 %v1401_v2  ;;  %v1511_v21 = vsub.f32 %v3281_v55, %v1507_v34  ;;  %v3521_v29 = vpop.eup %2172  ;;  %v1513_v42 = vsub.f32 %v3845_v0, %v1507_v34  ;;  %v1515_v20 = vsub.f32 %v3452_v12, %v1507_v34 }
 0x4f2   : > { %2192 = vpow2.f32 %v1391_v38  ;;  %v1517_v19 = vsub.f32 %v1501_v15, %v1507_v34  ;;  %v3525_v53 = vpop.eup %2174  ;;  %v1276_v35 = vadd.f32 %v3515_v39, %v1275_v13  ;;  %v1512_v8 = vsub.f32 %v3288_v33, %v1510_v40 }
 0x4f3   : > { %2194 = vrcp.f32 %v1148_v32  ;;  %v1519_v22 = vmul.f32 1.442695, %v1511_v21  ;;  %v3529_v47 = vpop.eup %2176  ;;  %v1523_v55 = vmul.f32 1.442695, %v1513_v42  ;;  %v1527_v2 = vmul.f32 1.442695, %v1515_v20 }
 0x4f4   : > { %2196 = vpow2.f32 %v1395_v7  ;;  %v1531_v51 = vmul.f32 1.442695, %v1517_v19  ;;  %v3531_v16 = vpop.eup %2178  ;;  %v1277_v12 = vadd.f32 %v3521_v29, %v1276_v35  ;;  %v1278_v38 = vadd.f32 %v3529_v47, %v3525_v53 }
 0x4f5   : > { %2198 = vpow2.f32 %v1399_v24  ;;  %v1514_v15 = vsub.f32 %v3846_v46, %v1510_v40  ;;  %v3537_v36 = vpop.eup %2180  ;;  %v1516_v33 = vsub.f32 %v3455_v5, %v1510_v40  ;;  %v1518_v7 = vsub.f32 %v3478_v10, %v1510_v40 }
 0x4f6   : > { %2200 = vpow2.f32 %v1403_v26  ;;  %v1521_v14 = vmul.f32 1.442695, %v1512_v8  ;;  %v1279_v43 = vadd.f32 %v3531_v16, %v1278_v38  ;;  %v3546_v0 = vmul.f32 %v2904_v60, %v3400_v57 }
 0x4f7   : > { %v3541_v54 = vpop.eup %2182  ;;  %2202 = vrcp.f32 %v1277_v12  ;;  %v1525_v3 = vmul.f32 1.442695, %v1514_v15  ;;  %v1529_v50 = vmul.f32 1.442695, %v1516_v33  ;;  %v1533_v26 = vmul.f32 1.442695, %v1518_v7 }
 0x4f8   : > { %v3548_v24 = vpop.eup %2184  ;;  %2204 = vpow2.f32 %v1519_v22  ;;  %v3552_v5 = vmul.f32 %v2910_v62, %v3444_v6  ;;  %v1280_v46 = vadd.f32 %v3537_v36, %v1279_v43  ;;  %v1037_v28 = vsel %vm718_vm2, %v1029_v56, 0.0 }
 0x4f9   : > { %v2187_v10 = vpop.eup %2186  ;;  %v1405_v17 = vadd.f32 %v3548_v24, %v3541_v54  ;;  %2206 = vpow2.f32 %v1523_v55  ;;  %v1038_v42 = vsel %vm718_vm2, %v1031_v52, 0.0 }
 0x4fa   : > { %v3558_v57 = vpop.eup %2188  ;;  %v1155_v34 = vmul.f32 %v2187_v10, %v3465_v45  ;;  %2208 = vpow2.f32 %v1527_v2  ;;  %v1151_v40 = vmul.f32 %v2187_v10, %v3458_v25  ;;  %v1153_v32 = vmul.f32 %v2187_v10, %v3461_v41 }
 0x4fb   : > { %v3563_v6 = vpop.eup %2190  ;;  %2210 = vrcp.f32 %v1280_v46  ;;  %v1406_v13 = vadd.f32 %v3558_v57, %v1405_v17  ;;  %v1157_v21 = vmul.f32 %v2187_v10, %v3469_v18  ;;  %v3575_v22 = vadd.f32 %v1038_v42, %v1037_v28 }
 0x4fc   : > { %v3568_v20 = vpop.eup %2192  ;;  %2212 = vpow2.f32 %v1531_v51  ;;  %v1159_v56 = vmul.f32 %v1151_v40, %v2896_v58  ;;  %v1161_v45 = vmul.f32 %v2893_v48, %v1153_v32  ;;  %v1163_v25 = vmul.f32 %v1155_v34, %v2908_v61 }
 0x4fd   : > { %v2195_v19 = vpop.eup %2194  ;;  %v1407_v41 = vadd.f32 %v3563_v6, %v1406_v13  ;;  %2214 = vpow2.f32 %v1521_v14  ;;  %v1165_v35 = vmul.f32 %v2904_v60, %v1157_v21 }
 0x4fe   : > { %v3577_v18 = vpop.eup %2196  ;;  %v1156_v52 = vmul.f32 %v2195_v19, %v3484_v44  ;;  %2216 = vpow2.f32 %v1525_v3  ;;  %v1152_v8 = vmul.f32 %v2195_v19, %v3473_v37  ;;  %v1154_v55 = vmul.f32 %v2195_v19, %v3480_v1 }
 0x4ff   : > { %v3582_v2 = vpop.eup %2198  ;;  %2218 = vrcp.f32 %v1407_v41  ;;  %v1408_v51 = vadd.f32 %v3577_v18, %v3568_v20  ;;  %v1158_v12 = vmul.f32 %v2195_v19, %v3490_v27  ;;  %v1168_v38 = vsel %vm1167_vm3, %v1159_v56, 0.0 }
 0x500   : > { %v3588_v15 = vpop.eup %2200  ;;  %2220 = vpow2.f32 %v1529_v50  ;;  %v1160_v44 = vmul.f32 %v1152_v8, %v2901_v59  ;;  %v1162_v33 = vmul.f32 %v2899_v49, %v1154_v55  ;;  %v1164_v37 = vmul.f32 %v1156_v52, %v2912_v63 }
 0x501   : > { %v2203_v1 = vpop.eup %2202  ;;  %v1409_v7 = vadd.f32 %v3582_v2, %v1408_v51  ;;  %2222 = vpow2.f32 %v1533_v26  ;;  %v1166_v14 = vmul.f32 %v2910_v62, %v1158_v12  ;;  %v1169_v43 = vsel %vm1167_vm3, %v1161_v45, 0.0 }
 0x502   : > { %v3596_v27 = vpop.eup %2204  ;;  %v1287_v3 = vmul.f32 %v2203_v1, %v3515_v39  ;;  %v1170_v10 = vadd.f32 %v1169_v43, %v1168_v38  ;;  %v1171_v50 = vsel %vm1167_vm3, %v1163_v25, 0.0  ;;  %v1173_v46 = vsel %vm1167_vm3, %v1165_v35, 0.0 }
 0x503   : > { %v3601_v17 = vpop.eup %2206  ;;  %v1410_v28 = vadd.f32 %v3588_v15, %v1409_v7  ;;  %v1175_v34 = vsel %vm1167_vm3, %v1160_v44, 0.0  ;;  %v1176_v26 = vsel %vm1167_vm3, %v1162_v33, 0.0  ;;  %v1178_v40 = vsel %vm1167_vm3, %v1164_v37, 0.0 }
 0x504   : > { %v3607_v32 = vpop.eup %2208  ;;  %v1535_v39 = vadd.f32 %v3601_v17, %v3596_v27  ;;  %v1172_v13 = vadd.f32 %v1171_v50, %v1170_v10  ;;  %v1177_v21 = vadd.f32 %v1176_v26, %v1175_v34  ;;  %v1180_v42 = vsel %vm1167_vm3, %v1166_v14, 0.0  ;;  %v2052_v14 = vld [vmem:[#allocation11] sm:$0xff]  }
 0x505   : > { %v2211_v56 = vpop.eup %2210  ;;  %2224 = vrcp.f32 %v1410_v28  ;;  %v1283_v45 = vmul.f32 %v2203_v1, %v3500_v9  ;;  %v1285_v25 = vmul.f32 %v2203_v1, %v3505_v31  ;;  %v1289_v19 = vmul.f32 %v2203_v1, %v3521_v29  ;;  %1916 = vmatprep.subr.bf16.mxu1 %v2052_v14 }
 0x506   : > { %v3615_v41 = vpop.eup %2212  ;;  %v1288_v35 = vmul.f32 %v2211_v56, %v3531_v16  ;;  %v1536_v52 = vadd.f32 %v3607_v32, %v1535_v39  ;;  %v1174_v8 = vadd.f32 %v1173_v46, %v1172_v13  ;;  %v1179_v55 = vadd.f32 %v1178_v40, %v1177_v21  ;;  %1917 = vmatpush3.bf16.msra.mxu1 %v2052_v14 }
 0x507   : > { %v3619_v51 = vpop.eup %2214  ;;  %v1284_v12 = vmul.f32 %v2211_v56, %v3525_v53  ;;  %v1286_v38 = vmul.f32 %v2211_v56, %v3529_v47  ;;  %v1290_v9 = vmul.f32 %v2211_v56, %v3537_v36  ;;  %v1291_v31 = vmul.f32 %v1283_v45, %v2896_v58 }
 0x508   : > { %v3625_v44 = vpop.eup %2216  ;;  %v1537_v29 = vadd.f32 %v3615_v41, %v1536_v52  ;;  %v1181_v33 = vadd.f32 %v1180_v42, %v1179_v55  ;;  %v1293_v16 = vmul.f32 %v2893_v48, %v1285_v25  ;;  %v1295_v37 = vmul.f32 %v1287_v3, %v2908_v61 }
 0x509   : > { %v2219_v1 = vpop.eup %2218  ;;  %v1538_v7 = vadd.f32 %v3625_v44, %v3619_v51  ;;  %v1292_v53 = vmul.f32 %v1284_v12, %v2901_v59  ;;  %v1294_v47 = vmul.f32 %v2899_v49, %v1286_v38  ;;  %v1296_v36 = vmul.f32 %v1288_v35, %v2912_v63 }
 0x50a   : > { %v3635_v43 = vpop.eup %2220  ;;  %v1417_v10 = vmul.f32 %v2219_v1, %v3558_v57  ;;  %2226 = vrcp.f32 %v1537_v29  ;;  %v1182_v50 = vpack.c.bf16 %v1181_v33, %v1174_v8  ;;  %v1297_v46 = vmul.f32 %v2904_v60, %v1289_v19 }
 0x50b   : > { %v3639_v3 = vpop.eup %2222  ;;  %v1539_v28 = vadd.f32 %v3635_v43, %v1538_v7  ;;  %v1298_v34 = vmul.f32 %v2910_v62, %v1290_v9  ;;  %v1299_v26 = vsel %vm1167_vm3, %v1291_v31, 0.0  ;;  %v1300_v40 = vsel %vm1167_vm3, %v1293_v16, 0.0 }
 0x50c   : > { %1184 = vrot.lane.b32.xlu1 %v1182_v50, %s2516_s20  ;;  %v1301_v39 = vadd.f32 %v1300_v40, %v1299_v26  ;;  %v1302_v57 = vsel %vm1167_vm3, %v1295_v37, 0.0  ;;  %v1304_v13 = vsel %vm1167_vm3, %v1297_v46, 0.0  ;;  %v1306_v21 = vsel %vm1167_vm3, %v1292_v53, 0.0 }
 0x50d   : > { %v1540_v42 = vadd.f32 %v3639_v3, %v1539_v28  ;;  %v1307_v56 = vsel %vm1167_vm3, %v1294_v47, 0.0  ;;  %v1309_v45 = vsel %vm1167_vm3, %v1296_v36, 0.0  ;;  %v1311_v25 = vsel %vm1167_vm3, %v1298_v34, 0.0 }
 0x50e   : > { %v1303_v19 = vadd.f32 %v1302_v57, %v1301_v39  ;;  %v1308_v35 = vadd.f32 %v1307_v56, %v1306_v21  ;;  %v1040_v52 = vsel %vm718_vm2, %v3403_v30, 0.0  ;;  %v1042_v8 = vsel %vm718_vm2, %v3546_v0, 0.0 }
 0x50f   : > { %v2225_v55 = vpop.eup %2224  ;;  %2228 = vrcp.f32 %v1540_v42  ;;  %v1041_v12 = vadd.f32 %v1040_v52, %v3575_v22  ;;  %v1044_v38 = vsel %vm718_vm2, %v3498_v11, 0.0  ;;  %v1045_v9 = vsel %vm718_vm2, %v3509_v23, 0.0 }
 0x510   : > { %v1418_v31 = vmul.f32 %v2225_v55, %v3582_v2  ;;  %v1305_v29 = vadd.f32 %v1304_v13, %v1303_v19  ;;  %v1310_v33 = vadd.f32 %v1309_v45, %v1308_v35  ;;  %v1046_v16 = vadd.f32 %v1045_v9, %v1044_v38 }
 0x511   : > { %v1043_v37 = vadd.f32 %v1042_v8, %v1041_v12  ;;  %v1047_v30 = vsel %vm718_vm2, %v3513_v4, 0.0  ;;  %v1049_v0 = vsel %vm718_vm2, %v3552_v5, 0.0  ;;  %v1413_v22 = vmul.f32 %v2219_v1, %v3541_v54  ;;  %v2053_v4 = vld [vmem:[#allocation11 + $0x8] sm:$0xff]  }
 0x512   : > { %v1312_v7 = vadd.f32 %v1311_v25, %v1310_v33  ;;  %v1048_v53 = vadd.f32 %v1047_v30, %v1046_v16  ;;  %v1414_v11 = vmul.f32 %v2225_v55, %v3568_v20  ;;  %v1415_v23 = vmul.f32 %v2219_v1, %v3548_v24  ;;  %1918 = vmatprep.subr.bf16.mxu1 %v2053_v4 }
 0x513   : > { %v1416_v2 = vmul.f32 %v2225_v55, %v3577_v18  ;;  %v1419_v47 = vmul.f32 %v2219_v1, %v3563_v6  ;;  %v1420_v36 = vmul.f32 %v2225_v55, %v3588_v15  ;;  %v1421_v14 = vmul.f32 %v1413_v22, %v2896_v58  ;;  %1919 = vmatpush3.bf16.msra.mxu1 %v2053_v4 }
 0x514   : > { %v2227_v50 = vpop.eup %2226  ;;  %v1313_v46 = vpack.c.bf16 %v1312_v7, %v1305_v29  ;;  %v1050_v5 = vadd.f32 %v1049_v0, %v1048_v53  ;;  %v1422_v54 = vmul.f32 %v1414_v11, %v2901_v59  ;;  %v1423_v28 = vmul.f32 %v2893_v48, %v1415_v23 }
 0x515   : > { %v1549_v20 = vmul.f32 %v2227_v50, %v3615_v41  ;;  %v1424_v24 = vmul.f32 %v2899_v49, %v1416_v2  ;;  %v1425_v18 = vmul.f32 %v1417_v10, %v2908_v61  ;;  %v1426_v6 = vmul.f32 %v1418_v31, %v2912_v63 }
 0x516   : > { %1315 = vrot.lane.b32.xlu1 %v1313_v46, %s2516_s20  ;;  %v1051_v15 = vpack.c.bf16 %v1050_v5, %v1043_v37  ;;  %v1427_v1 = vmul.f32 %v2904_v60, %v1419_v47  ;;  %v1428_v34 = vmul.f32 %v2910_v62, %v1420_v36  ;;  %v1429_v26 = vsel %vm1167_vm3, %v1421_v14, 0.0 }
 0x517   : > { %v1430_v40 = vsel %vm1167_vm3, %v1423_v28, 0.0  ;;  %v1432_v41 = vsel %vm1167_vm3, %v1425_v18, 0.0  ;;  %v1436_v39 = vsel %vm1167_vm3, %v1422_v54, 0.0  ;;  %v1437_v10 = vsel %vm1167_vm3, %v1424_v24, 0.0  ;;  %v1878_v24 = vld [vmem:[#allocation12] ss:$0 sm:$0xff] }
 0x518   : > { %v1431_v57 = vadd.f32 %v1430_v40, %v1429_v26  ;;  %v1434_v13 = vsel %vm1167_vm3, %v1427_v1, 0.0  ;;  %v1438_v21 = vadd.f32 %v1437_v10, %v1436_v39  ;;  %v1439_v42 = vsel %vm1167_vm3, %v1426_v6, 0.0  ;;  %v2230_v26 = vld [vmem:[%s2807_s12 + $0x10] sm:$0xff]  ;;  %v2231_v10 = vld [vmem:[%s2807_s12] sm:$0xff] }
 0x519   : > { %v2229_v56 = vpop.eup %2228  ;;  %v1441_v45 = vsel %vm1167_vm3, %v1428_v34, 0.0  ;;  %v1543_v25 = vmul.f32 %v2227_v50, %v3596_v27  ;;  %v1545_v19 = vmul.f32 %v2227_v50, %v3601_v17  ;;  %v1547_v35 = vmul.f32 %v2227_v50, %v3607_v32 }
 0x51a   : > { %v1550_v52 = vmul.f32 %v2229_v56, %v3639_v3  ;;  %1053 = vrot.lane.b32.xlu1 %v1051_v15, %s2516_s20  ;;  %v1433_v8 = vadd.f32 %v1432_v41, %v1431_v57  ;;  %v1440_v55 = vadd.f32 %v1439_v42, %v1438_v21  ;;  %v1544_v12 = vmul.f32 %v2229_v56, %v3619_v51  ;;  %v2232_v21 = vld [vmem:[%s2807_s12 + $0x18] sm:$0xff] }
 0x51b   : > { %v1546_v38 = vmul.f32 %v2229_v56, %v3625_v44  ;;  %v1548_v9 = vmul.f32 %v2229_v56, %v3635_v43  ;;  %v1551_v31 = vmul.f32 %v1543_v25, %v2896_v58  ;;  %v1553_v27 = vmul.f32 %v2893_v48, %v1545_v19  ;;  %v2233_v56 = vld [vmem:[%s2807_s12 + $0x8] sm:$0xff] }
 0x51c   : > { %v1435_v29 = vadd.f32 %v1434_v13, %v1433_v8  ;;  %v1442_v17 = vadd.f32 %v1441_v45, %v1440_v55  ;;  %v1552_v32 = vmul.f32 %v1544_v12, %v2901_v59  ;;  %v1555_v3 = vmul.f32 %v1547_v35, %v2908_v61  ;;  %v2234_v55 = vld [vmem:[%s2807_s12 + $0x30] sm:$0xff] }
 0x51d   : > { %v1554_v33 = vmul.f32 %v2899_v49, %v1546_v38  ;;  %v1556_v16 = vmul.f32 %v1548_v9, %v2912_v63  ;;  %v1557_v51 = vmul.f32 %v2904_v60, %v1549_v20  ;;  %v1558_v44 = vmul.f32 %v2910_v62, %v1550_v52 }
 0x51e   : > { %v1443_v37 = vpack.c.bf16 %v1442_v17, %v1435_v29  ;;  %v1559_v43 = vsel %vm1167_vm3, %v1551_v31, 0.0  ;;  %v1560_v58 = vsel %vm1167_vm3, %v1553_v27, 0.0  ;;  %v1566_v30 = vsel %vm1167_vm3, %v1552_v32, 0.0  ;;  %v2235_v31 = vld [vmem:[%s2807_s12 + $0x20] sm:$0xff]  ;;  %v2236_v17 = vld [vmem:[%s2807_s12 + $0x38] sm:$0xff] }
 0x51f   : > { %v1561_v48 = vadd.f32 %v1560_v58, %v1559_v43  ;;  %v1567_v59 = vsel %vm1167_vm3, %v1554_v33, 0.0  ;;  %v1562_v49 = vsel %vm1167_vm3, %v1555_v3, 0.0  ;;  %v1569_v60 = vsel %vm1167_vm3, %v1556_v16, 0.0  ;;  %v2237_v3 = vld [vmem:[%s2807_s12 + $0x28] sm:$0xff] }
 0x520   : > { %1445 = vrot.lane.b32.xlu0 %v1443_v37, %s2516_s20  ;;  %v1568_v61 = vadd.f32 %v1567_v59, %v1566_v30  ;;  %v1564_v62 = vsel %vm1167_vm3, %v1557_v51, 0.0  ;;  %v1571_v7 = vsel %vm1167_vm3, %v1558_v44, 0.0 }
 0x521   : > { %v1563_v63 = vadd.f32 %v1562_v49, %v1561_v48 }
 0x522   : > { %v1570_v0 = vadd.f32 %v1569_v60, %v1568_v61 }
 0x523   : > { %v1565_v22 = vadd.f32 %v1564_v62, %v1563_v63 }
 0x524   : > { %v1572_v53 = vadd.f32 %v1571_v7, %v1570_v0 }
 0x526   : > { %v1573_v11 = vpack.c.bf16 %v1572_v53, %v1565_v22 }
 0x528   : > { %1575 = vrot.lane.b32.xlu1 %v1573_v11, %s2516_s20 }
 0x53b   : > { %v736_v23 = vpop.permute.xlu0 %735 }
 0x53c   : > { %738 = vst.msk [vmem:[#allocation2] sm:$0xff] %vm639_vm1, %v736_v23 }
 0x545   : > { %v842_v2 = vpop.permute.xlu1 %841 }
 0x546   : > { %844 = vst.msk [vmem:[#allocation2 + $0x8] sm:$0xff] %vm639_vm1, %v842_v2 }
 0x54d   : > { %v948_v47 = vpop.permute.xlu0 %947 }
 0x54e   : > { %950 = vst.msk [vmem:[#allocation2 + $0x10] sm:$0xff] %vm639_vm1, %v948_v47 }
 0x57e   : > { %v1185_v36 = vpop.permute.xlu1 %1184 }
 0x57f   : > { %1188 = vst.msk [vmem:[#allocation2] sm:$0xff] %vm1187_vm4, %v1185_v36 }
 0x586   : > { %v1579_v14 = vld [vmem:[#allocation2] sm:$0xff] }
 0x587   : > { %1920 = vmatprep.mubr.msk.bf16.mxu1 %vm368_vm0, %v1579_v14 }
 0x588   : > { %v1316_v4 = vpop.permute.xlu1 %1315 }
 0x589   : > { %1318 = vst.msk [vmem:[#allocation2 + $0x8] sm:$0xff] %vm1187_vm4, %v1316_v4 }
 0x58c   : > { %v1054_v50 = vpop.permute.xlu1 %1053 }
 0x58d   : > { %1056 = vst.msk [vmem:[#allocation2 + $0x18] sm:$0xff] %vm639_vm1, %v1054_v50 }
 0x590   : > { %v1580_v46 = vld [vmem:[#allocation2 + $0x8] sm:$0xff] }
 0x591   : > { %1921 = vmatmul.mubr.msk.bf16.vlgmr.msra.gmra.mrb[0].mxu1 %vm368_vm0, %v1580_v46 }
 0x592   : > { %v1446_v5 = vpop.permute.xlu0 %1445 }
 0x593   : > { %1448 = vst.msk [vmem:[#allocation2 + $0x10] sm:$0xff] %vm1187_vm4, %v1446_v5 }
 0x59a   : > { %v1576_v54 = vpop.permute.xlu1 %1575  ;;  %v1581_v28 = vld [vmem:[#allocation2 + $0x10] sm:$0xff] }
 0x59b   : > { %1578 = vst.msk [vmem:[#allocation2 + $0x18] sm:$0xff] %vm1187_vm4, %v1576_v54  ;;  %1924 = vmatprep.mubr.msk.bf16.mxu1 %vm368_vm0, %v1581_v28 }
 0x5a2   : > { %v1582_v20 = vld [vmem:[#allocation2 + $0x18] sm:$0xff] }
 0x5a3   : > { %1925 = vmatmul.mubr.msk.bf16.gmra.mrb[4].mxu1 %vm368_vm0, %v1582_v20 }
 0x664   : > { %v1922_v18 = vpop.f32.mrb[0].mxu1 }
 0x665   : > { %v1661_v6 = vadd.f32 %v1922_v18, %v1878_v24  ;;  %v1652_v15 = vpop.f32.mrb[1].mxu1 }
 0x666   : > { %v1653_v1 = vadd.f32 %v1878_v24, %v1652_v15  ;;  %v1923_v34 = vpop.f32.mrb[2].mxu1 }
 0x667   : > { %v1685_v40 = vadd.f32 %v2230_v26, %v1661_v6  ;;  %v1664_v41 = vadd.f32 %v1923_v34, %v1878_v24  ;;  %v1655_v39 = vpop.f32.mrb[3].mxu1 }
 0x668   : > { %v1683_v57 = vadd.f32 %v2231_v10, %v1653_v1  ;;  %v1656_v13 = vadd.f32 %v1878_v24, %v1655_v39 }
 0x669   : > { %1693 = vst.msk [vmem:[%s3729_s15 + $0x10] sm:$0xff] %vm368_vm0, %v1685_v40  ;;  %v1686_v42 = vadd.f32 %v2232_v21, %v1664_v41 }
 0x66a   : > { %1691 = vst.msk [vmem:[%s3729_s15] sm:$0xff] %vm368_vm0, %v1683_v57  ;;  %v1684_v45 = vadd.f32 %v2233_v56, %v1656_v13 }
 0x66b   : > { %1694 = vst.msk [vmem:[%s3729_s15 + $0x18] sm:$0xff] %vm368_vm0, %v1686_v42 }
 0x66c   : > { %1692 = vst.msk [vmem:[%s3729_s15 + $0x8] sm:$0xff] %vm368_vm0, %v1684_v45 }
 0x676   : > { %v1926_v25 = vpop.f32.mrb[4].mxu1 }
 0x677   : > { %v1677_v19 = vadd.f32 %v1926_v25, %v1878_v24  ;;  %v1668_v35 = vpop.f32.mrb[5].mxu1 }
 0x678   : > { %v1669_v52 = vadd.f32 %v1878_v24, %v1668_v35  ;;  %v1927_v8 = vpop.f32.mrb[6].mxu1 }
 0x679   : > { %v1689_v12 = vadd.f32 %v2234_v55, %v1677_v19  ;;  %v1680_v38 = vadd.f32 %v1927_v8, %v1878_v24  ;;  %v1671_v9 = vpop.f32.mrb[7].mxu1 }
 0x67a   : > { %v1687_v27 = vadd.f32 %v2235_v31, %v1669_v52  ;;  %v1672_v29 = vadd.f32 %v1878_v24, %v1671_v9 }
 0x67b   : > { %1697 = vst.msk [vmem:[%s3729_s15 + $0x30] sm:$0xff] %vm368_vm0, %v1689_v12  ;;  %v1690_v32 = vadd.f32 %v2236_v17, %v1680_v38 }
 0x67c   : > { %1695 = vst.msk [vmem:[%s3729_s15 + $0x20] sm:$0xff] %vm368_vm0, %v1687_v27  ;;  %v1688_v33 = vadd.f32 %v2237_v3, %v1672_v29 }
 0x67d   : > { %1698 = vst.msk [vmem:[%s3729_s15 + $0x38] sm:$0xff] %vm368_vm0, %v1690_v32 }
 0x67e   : > { %1696 = vst.msk [vmem:[%s3729_s15 + $0x28] sm:$0xff] %vm368_vm0, %v1688_v33 }
 0x67f   : > { %2421 = shalt.err (!%p2418_p8)
}
 0x680   : > { %s2422_s12 = scalar_lea.hbm %s3751_s24, 1024  ;;  %s2426_s15 = scalar_lea.hbm %s3815_s6, 2048 }
 0x681   : > { %p2423_p9 = scmp.ne.s32.totalorder %s3751_s24, %s2422_s12  ;;  %p2427_p10 = scmp.lt.u32.totalorder %s3751_s24, %s3815_s6 }
 0x682   : > { %p2428_p7 = scmp.lt.u32.totalorder %s2426_s15, %s2422_s12  ;;  %p2430_p6 = scmp.lt.u32.totalorder %s2422_s12, %s3751_s24 }
 0x683   : > { %p2424_p1 = pnand %p2423_p9, %p3847_p2 }
 0x684   : > { %p2429_p13 = por %p2428_p7, %p2427_p10 }
 0x685   : > { %p2425_p3 = pneg %p2424_p1 }
 0x686   : > { %p2431_p5 = por %p2430_p6, %p2429_p13 }
 0x688   : > { %p2432_p4 = pnand %p2431_p5, %p2425_p3 }
 0x68a   : > { %2435 = shalt.err (!%p2432_p4)
}
 0x68b   : > { %s2518_s17 = smov 128   ;;  %s2519_s27 = smov 8  }
 0x68c   : > { %1950 = dma.vmem_to_hbm [thread:$0]  (%p3847_p2), %s3753_s10, 1024, %s3751_s24, %s1700_s11, %s2518_s17, %s2518_s17, %s2519_s27  }
 0x68d PF: > { %s1730_s9 = sand.u32 1, %s2482_s21   ;;  %p3848_p11 = scmp.ne.s32.totalorder %s3834_s13, 0 }
 0x68e   : > { %p3849_p12 = scmp.ge.s32.totalorder %s2502_s26, 2  ;;  %s1731_s14 = scalar_lea.sflag [#allocation5], %s1730_s9 }
 0x690   : > { %p1973_p0 = pnand %p3849_p12, %p3848_p11 }
 0x692   : > { %2477 = dma.done.wait (!%p1973_p0), %s1731_s14, 1024  }
 0x693   : > { %2479 = vsyncadd (!%p1973_p0), %s1731_s14, 4294966272  ;;  %s25_s26 = sadd.s32 1, %s2502_s26   ;;  %s3850_s21 = smov %s2486_s22 }
 0x694   : > { %p22_p8 = scmp.ge.s32.totalorder %s25_s26, 4   ;;  %s3851_s22 = smov %s2490_s23 }
 0x695   : > { %s3852_s23 = smov %s2749_s7  ;;  %s3853_s24 = smov %s2498_s25 }
 0x696   : > { %s3854_s25 = smov %s3856_s8  ;;  %24 = sbr.rel (!%p22_p8) target bundleno = 9 (0x9), region = 109 }
 0x69d   :  { %1736 = vsyncpa [#allocation4], 1 }
 0x69e   :  { %1738 = vsyncpa [#allocation4 + $0x1], 1 }
 0x69f   :  { %1739 = vsyncpa [#allocation7], 1 }
 0x6a0   :  { %1740 = vsyncpa [#allocation10], 1 }
 0x6a1   :  { %1741 = vsyncpa [#allocation13], 1 }
 0x6a2   :  { %1742 = vsyncpa [#allocation5], 1 }
 0x6a3   :  { %1744 = vsyncpa [#allocation5 + $0x1], 1 }

// kernel: block_forward.3
= control target key start
LH: loop header
LB: loop body
LE: loop exit
PB: predicated region body
PF: predicated region fallthrough
CT: control target
= control target key end

     0   :  { %s3713_s0 = inlined_call_operand.hbm [shape: f32[8,16,32], index: 0, kind: input, shape index: {}]   ;;  %s3714_s1 = inlined_call_operand.hbm [shape: f32[8,8,32], index: 1, kind: input, shape index: {}]   ;;  %s3715_s2 = inlined_call_operand.hbm [shape: f32[1,32], index: 2, kind: input, shape index: {}]   ;;  %s3716_s3 = inlined_call_operand.hbm [shape: f32[1,32], index: 3, kind: input, shape index: {}]   ;;  %s3717_s4 = inlined_call_operand.hbm [shape: bf16[32,32], index: 4, kind: input, shape index: {}]   ;;  %s3718_s5 = inlined_call_operand.hbm [shape: bf16[32,64], index: 5, kind: input, shape index: {}]   ;;  %s3719_s6 = inlined_call_operand.hbm [shape: bf16[32,32], index: 6, kind: input, shape index: {}]   ;;  %s3720_s7 = inlined_call_operand.hbm [shape: f32[1,32], index: 7, kind: input, shape index: {}]   ;;  %s3721_s8 = inlined_call_operand.hbm [shape: f32[8,16,32], index: 8, kind: output, shape index: {}]  }
   0x1   :  { %3725 = sst [smem:[#allocation25_spill]] %s3713_s0 }
   0x2   :  { %3726 = sst [smem:[#allocation26_spill]] %s3715_s2 }
   0x3   :  { %3727 = sst [smem:[#allocation27_spill]] %s3716_s3 }
   0x4   :  { %3728 = sst [smem:[#allocation28_spill]] %s3717_s4 }
   0x5   :  { %3729 = sst [smem:[#allocation29_spill]] %s3718_s5 }
   0x6   :  { %3730 = sst [smem:[#allocation30_spill]] %s3719_s6 }
   0x7   :  { %13 = vsyncpa [#allocation4], 0 }
   0x8   :  { %15 = vsyncpa [#allocation4 + $0x1], 0 }
   0x9   :  { %16 = vsyncpa [#allocation7], 0 }
   0xa   :  { %18 = vsyncpa [#allocation7 + $0x1], 0 }
   0xb   :  { %19 = vsyncpa [#allocation10], 0 }
   0xc   :  { %20 = vsyncpa [#allocation13], 0 }
   0xd   :  { %21 = vsyncpa [#allocation16], 0 }
   0xe   :  { %22 = vsyncpa [#allocation5], 0 }
   0xf   :  { %24 = vsyncpa [#allocation5 + $0x1], 0  ;;  %s2922_s27 = smov 0   ;;  %s2924_s28 = smov 0  }
  0x10   :  { %s2926_s29 = smov 0   ;;  %s2928_s30 = smov 0  }
  0x11 LB: > { %s2856_s9 = smov [#allocation8]   ;;  %s2943_s11 = sadd.s32 4294967295, %s2854_s30   ;;  %s2854_s30 = sphi %s2928_s30, %s3762_s30   ;;  %s2850_s29 = sphi %s2926_s29, %s3761_s29   ;;  %s2846_s28 = sphi %s2924_s28, %s3760_s28   ;;  %s2842_s27 = sphi %s2922_s27, %s3759_s27  }
  0x12   : > { %s252_s10 = sshll.u32 %s2856_s9, 4  ;;  %p2075_p0 = scmp.ge.s32.totalorder %s2854_s30, 1  ;;  %s2948_s10 = int_to_ptr.vmem [resolvable:$true] %s252_s10 }
  0x13   : > { %p3722_p1 = scmp.eq.s32.totalorder %s2943_s11, 0  ;;  %p239_p2 = scmp.lt.s32.totalorder %s2854_s30, 3 }
  0x14   : > { %s2857_s13 = smov [#allocation9]   ;;  %s2858_s16 = smov [#allocation12]  }
  0x15   : > { %p2950_p3 = pnand %p2075_p0, %p239_p2  ;;  %s263_s14 = sshll.u32 %s2857_s13, 4  ;;  %s2957_s14 = int_to_ptr.vmem [resolvable:$true] %s263_s14 }
  0x16   : > { %s286_s17 = sshll.u32 %s2858_s16, 4  ;;  %s3733_s2 = sld [smem:[#allocation26_spill]]  ;;  %s2965_s17 = int_to_ptr.vmem [resolvable:$true] %s286_s17 }
  0x17   : > { %s3731_s12 = scalar_select %p2950_p3, 1, 0 }
  0x18   : > { %p2352_p5 = pneg %p2950_p3 }
  0x1a   : > { %p2961_p6 = pnand %p2352_p5, %p3722_p1 }
  0x1c   : > { %s2540_s20 = scalar_lea.hbm %s3733_s2, 16  ;;  %p2975_p8 = pneg %p2961_p6 }
  0x1d   : > { %p2541_p7 = scmp.ne.s32.totalorder %s3733_s2, %s2540_s20  ;;  %p2547_p11 = scmp.lt.u32.totalorder %s2540_s20, %s3733_s2 }
  0x1f   : > { %p2543_p9 = pnand %p2975_p8, %p2541_p7 }
  0x21   : > { %p2544_p10 = pneg %p2543_p9 }
  0x23   : > { %p2549_p12 = pnand %p2547_p11, %p2544_p10 }
  0x25   : > { %2552 = shalt.err (!%p2549_p12)
}
  0x26   : > { %s2553_s26 = scalar_lea.vmem %s2948_s10, 16  ;;  %s2560_s9 = scalar_lea.vmem %s2948_s10, 32 }
  0x27   : > { %p2554_p13 = scmp.ne.s32.totalorder %s2948_s10, %s2553_s26  ;;  %p2561_p5 = scmp.lt.s32.totalorder %s2948_s10, %s2948_s10 }
  0x28   : > { %p2562_p7 = scmp.lt.s32.totalorder %s2560_s9, %s2553_s26 }
  0x29   : > { %p2556_p0 = pnand %p2554_p13, %p2975_p8 }
  0x2a   : > { %p2563_p9 = por %p2562_p7, %p2561_p5 }
  0x2b   : > { %p2557_p2 = pneg %p2556_p0 }
  0x2d   : > { %p2564_p4 = pnand %p2563_p9, %p2557_p2 }
  0x2f   : > { %2567 = shalt.err (!%p2564_p4)
}
  0x30   : > { %2355 = dma.hbm_to_vmem [thread:$0]  (!%p2961_p6), %s3733_s2, 16, %s2948_s10, [#allocation7]  }
  0x31   : > { %s3735_s3 = sld [smem:[#allocation27_spill]] }
  0x37   : > { %s2568_s20 = scalar_lea.hbm %s3735_s3, 16 }
  0x38   : > { %p2569_p10 = scmp.ne.s32.totalorder %s3735_s3, %s2568_s20  ;;  %p2575_p4 = scmp.lt.u32.totalorder %s2568_s20, %s3735_s3 }
  0x3a   : > { %p2571_p11 = pnand %p2569_p10, %p2975_p8 }
  0x3c   : > { %p2572_p12 = pneg %p2571_p11 }
  0x3e   : > { %p2577_p13 = pnand %p2575_p4, %p2572_p12 }
  0x40   : > { %2580 = shalt.err (!%p2577_p13)
}
  0x41   : > { %s2581_s10 = scalar_lea.vmem %s2957_s14, 16  ;;  %s2588_s26 = scalar_lea.vmem %s2957_s14, 32 }
  0x42   : > { %p2582_p0 = scmp.ne.s32.totalorder %s2957_s14, %s2581_s10  ;;  %p2589_p7 = scmp.lt.s32.totalorder %s2957_s14, %s2957_s14 }
  0x43   : > { %p2590_p9 = scmp.lt.s32.totalorder %s2588_s26, %s2581_s10 }
  0x44   : > { %p2584_p2 = pnand %p2582_p0, %p2975_p8 }
  0x45   : > { %p2591_p10 = por %p2590_p9, %p2589_p7 }
  0x46   : > { %p2585_p5 = pneg %p2584_p2 }
  0x48   : > { %p2592_p11 = pnand %p2591_p10, %p2585_p5 }
  0x4a   : > { %2595 = shalt.err (!%p2592_p11)
}
  0x4b   : > { %2358 = dma.hbm_to_vmem [thread:$0]  (!%p2961_p6), %s3735_s3, 16, %s2957_s14, [#allocation10]  }
  0x4c   : > { %s3736_s5 = sld [smem:[#allocation29_spill]] }
  0x52   : > { %s2596_s19 = scalar_lea.hbm %s3736_s5, 256 }
  0x53   : > { %p2597_p12 = scmp.ne.s32.totalorder %s3736_s5, %s2596_s19  ;;  %p2603_p0 = scmp.lt.u32.totalorder %s2596_s19, %s3736_s5 }
  0x55   : > { %p2599_p4 = pnand %p2597_p12, %p2975_p8 }
  0x57   : > { %p2600_p13 = pneg %p2599_p4 }
  0x59   : > { %p2605_p2 = pnand %p2603_p0, %p2600_p13 }
  0x5b   : > { %2608 = shalt.err (!%p2605_p2)
}
  0x5c   : > { %s2609_s14 = scalar_lea.vmem %s2965_s17, 256  ;;  %p2617_p10 = scmp.lt.s32.totalorder %s2965_s17, %s2965_s17 }
  0x5d   : > { %p2610_p5 = scmp.ne.s32.totalorder %s2965_s17, %s2609_s14  ;;  %p2618_p11 = scmp.lt.s32.totalorder %s2609_s14, %s2609_s14 }
  0x5f   : > { %p2612_p7 = pnand %p2610_p5, %p2975_p8  ;;  %p2619_p12 = por %p2618_p11, %p2617_p10 }
  0x61   : > { %p2613_p9 = pneg %p2612_p7 }
  0x63   : > { %p2620_p4 = pnand %p2619_p12, %p2613_p9 }
  0x65   : > { %2623 = shalt.err (!%p2620_p4)
}
  0x66   : > { %s2859_s25 = smov 64   ;;  %s2860_s10 = smov 4  }
  0x67   : > { %2364 = dma.hbm_to_vmem [thread:$0]  (!%p2961_p6), %s3736_s5, 256, %s2965_s17, [#allocation13], %s2859_s25, %s2859_s25, %s2860_s10  }
  0x68   : > { %s2861_s13 = smov [#allocation11]   ;;  %s2862_s18 = smov [#allocation14]  }
  0x69   : > { %s273_s16 = sshll.u32 %s2861_s13, 4  ;;  %s299_s19 = sshll.u32 %s2862_s18, 4  ;;  %s274_s16 = int_to_ptr.vmem [resolvable:$true] %s273_s16  ;;  %s300_s19 = int_to_ptr.vmem [resolvable:$true] %s299_s19 }
  0x6a   : > { %s3737_s4 = sld [smem:[#allocation28_spill]] }
  0x70   : > { %s2624_s22 = scalar_lea.hbm %s3737_s4, 256 }
  0x71   : > { %p2625_p13 = scmp.ne.s32.totalorder %s3737_s4, %s2624_s22  ;;  %p2631_p5 = scmp.lt.u32.totalorder %s2624_s22, %s3737_s4 }
  0x73   : > { %p2627_p0 = pnand %p2625_p13, %p2975_p8 }
  0x75   : > { %p2628_p2 = pneg %p2627_p0 }
  0x77   : > { %p2633_p7 = pnand %p2631_p5, %p2628_p2 }
  0x79   : > { %2636 = shalt.err (!%p2633_p7)
}
  0x7a   : > { %s2637_s17 = scalar_lea.vmem %s274_s16, 256  ;;  %p2645_p12 = scmp.lt.s32.totalorder %s274_s16, %s274_s16 }
  0x7b   : > { %p2638_p9 = scmp.ne.s32.totalorder %s274_s16, %s2637_s17  ;;  %p2646_p4 = scmp.lt.s32.totalorder %s2637_s17, %s2637_s17 }
  0x7d   : > { %p2640_p10 = pnand %p2638_p9, %p2975_p8  ;;  %p2647_p1 = por %p2646_p4, %p2645_p12 }
  0x7f   : > { %p2641_p11 = pneg %p2640_p10 }
  0x81   : > { %p2648_p3 = pnand %p2647_p1, %p2641_p11 }
  0x83   : > { %2651 = shalt.err (!%p2648_p3)
}
  0x84   : > { %2361 = dma.hbm_to_vmem [thread:$0]  (!%p2961_p6), %s3737_s4, 256, %s274_s16, [#allocation10], %s2859_s25, %s2859_s25, %s2860_s10  }
  0x85   : > { %s3738_s6 = sld [smem:[#allocation30_spill]] }
  0x8b   : > { %s2652_s13 = scalar_lea.hbm %s3738_s6, 256 }
  0x8c   : > { %p2653_p1 = scmp.ne.s32.totalorder %s3738_s6, %s2652_s13  ;;  %p2659_p0 = scmp.lt.u32.totalorder %s2652_s13, %s3738_s6 }
  0x8e   : > { %p2655_p3 = pnand %p2653_p1, %p2975_p8 }
  0x90   : > { %p2656_p13 = pneg %p2655_p3 }
  0x92   : > { %p2661_p2 = pnand %p2659_p0, %p2656_p13 }
  0x94   : > { %2664 = shalt.err (!%p2661_p2)
}
  0x95   : > { %s2665_s24 = scalar_lea.vmem %s300_s19, 256  ;;  %p2673_p10 = scmp.lt.s32.totalorder %s300_s19, %s300_s19 }
  0x96   : > { %p2666_p5 = scmp.ne.s32.totalorder %s300_s19, %s2665_s24  ;;  %p2674_p11 = scmp.lt.s32.totalorder %s2665_s24, %s2665_s24 }
  0x98   : > { %p2668_p7 = pnand %p2666_p5, %p2975_p8  ;;  %p2675_p12 = por %p2674_p11, %p2673_p10 }
  0x9a   : > { %p2669_p9 = pneg %p2668_p7 }
  0x9c   : > { %p2676_p4 = pnand %p2675_p12, %p2669_p9 }
  0x9e   : > { %2679 = shalt.err (!%p2676_p4)
}
  0x9f   : > { %2367 = dma.hbm_to_vmem [thread:$0]  (!%p2961_p6), %s3738_s6, 256, %s300_s19, [#allocation13], %s2859_s25, %s2859_s25, %s2860_s10  }
  0xa0   : > { %s2863_s17 = smov [#allocation15]   ;;  %s2680_s9 = scalar_lea.hbm %s3720_s7, 16 }
  0xa1   : > { %s313_s2 = sshll.u32 %s2863_s17, 4  ;;  %p2681_p1 = scmp.ne.s32.totalorder %s3720_s7, %s2680_s9  ;;  %s314_s2 = int_to_ptr.vmem [resolvable:$true] %s313_s2 }
  0xa2   : > { %p2687_p0 = scmp.lt.u32.totalorder %s2680_s9, %s3720_s7 }
  0xa3   : > { %p2683_p3 = pnand %p2681_p1, %p2975_p8 }
  0xa5   : > { %p2684_p13 = pneg %p2683_p3 }
  0xa7   : > { %p2689_p2 = pnand %p2687_p0, %p2684_p13 }
  0xa9   : > { %2692 = shalt.err (!%p2689_p2)
}
  0xaa   : > { %s2693_s25 = scalar_lea.vmem %s314_s2, 16  ;;  %s2700_s10 = scalar_lea.vmem %s314_s2, 32 }
  0xab   : > { %p2694_p5 = scmp.ne.s32.totalorder %s314_s2, %s2693_s25  ;;  %p2701_p10 = scmp.lt.s32.totalorder %s314_s2, %s314_s2 }
  0xac   : > { %p2702_p11 = scmp.lt.s32.totalorder %s2700_s10, %s2693_s25 }
  0xad   : > { %p2696_p7 = pnand %p2694_p5, %p2975_p8 }
  0xae   : > { %p2703_p12 = por %p2702_p11, %p2701_p10 }
  0xaf   : > { %p2697_p9 = pneg %p2696_p7 }
  0xb1   : > { %p2704_p4 = pnand %p2703_p12, %p2697_p9 }
  0xb3   : > { %2707 = shalt.err (!%p2704_p4)
}
  0xb4   : > { %2370 = dma.hbm_to_vmem [thread:$0]  (!%p2961_p6), %s3720_s7, 16, %s314_s2, [#allocation16]  }
  0xb5   : > { %s2074_s23 = sadd.s32 4294967294, %s2854_s30   ;;  %s3109_s15 = sadd.s32 1, %s2854_s30  }
  0xb6   : > { %s34_s24 = ssub.s32 %s2854_s30, %s3109_s15  ;;  %s37_s16 = sadd.s32 1, %s2850_s29 }
  0xb7   : > { %p35_p8 = scmp.eq.s32.totalorder %s34_s24, 0  ;;  %p44_p1 = scmp.ne.s32.totalorder %s2850_s29, %s2846_s28 }
  0xb8   : > { %p45_p3 = scmp.eq.s32.totalorder %s2854_s30, 0  ;;  %p50_p13 = scmp.ne.s32.totalorder %s2846_s28, %s2842_s27 }
  0xb9   : > { %s3120_s14 = scalar_select %p35_p8, %s2850_s29, %s37_s16  }
  0xba   : > { %p3122_p0 = por %p45_p3, %p44_p1  ;;  %p3740_p2 = scmp.eq.s32.totalorder %s2943_s11, 0 }
  0xbb   : > { %p226_p5 = scmp.eq.s32.totalorder %s2943_s11, 1  ;;  %p232_p7 = scmp.eq.s32.totalorder %s2074_s23, 1 }
  0xbc   : > { %p3128_p6 = por %p3740_p2, %p50_p13  ;;  %p2388_p9 = scmp.lt.s32.totalorder %s2854_s30, 2 }
  0xbd   : > { %s3135_s3 = sand.u32 1, %s2850_s29   ;;  %p3137_p10 = por %p226_p5, %p44_p1 }
  0xbe   : > { %p3141_p11 = por %p232_p7, %p50_p13  ;;  %s2083_s13 = sshll.u32 %s3135_s3, 6 }
  0xbf   : > { %s3742_s26 = scalar_select %p3137_p10, 1, 0 }
  0xc0   : > { %s3743_s9 = scalar_select %p3141_p11, 1, 0 }
  0xc1   : > { %s2142_s18 = sshll.u32 %s2854_s30, 10  ;;  %s3744_s0 = sld [smem:[#allocation25_spill]] }
  0xc2   : > { %s328_s10 = scalar_lea.vmem [#allocation3], %s2083_s13  ;;  %p3156_p12 = pnand %p2388_p9, %p3122_p0 }
  0xc3   : > { %s336_s19 = sshll.u32 %s328_s10, 4  ;;  %s325_s24 = scalar_lea.sflag [#allocation4], %s3135_s3  ;;  %s3152_s19 = int_to_ptr.vmem [resolvable:$true] %s336_s19 }
  0xc4   : > { %p2710_p8 = pneg %p3156_p12 }
  0xc7   : > { %s3150_s25 = scalar_lea.hbm %s3744_s0, %s2142_s18  ;;  %s2713_s17 = scalar_lea.hbm %s3744_s0, 2048 }
  0xc8   : > { %s2708_s16 = scalar_lea.hbm %s3150_s25, 1024  ;;  %p2714_p13 = scmp.lt.u32.totalorder %s3150_s25, %s3744_s0 }
  0xc9   : > { %p2709_p4 = scmp.ne.s32.totalorder %s3150_s25, %s2708_s16  ;;  %p2715_p0 = scmp.lt.u32.totalorder %s2713_s17, %s2708_s16 }
  0xca   : > { %p2717_p5 = scmp.lt.u32.totalorder %s2708_s16, %s3150_s25 }
  0xcb   : > { %p2711_p1 = pnand %p2710_p8, %p2709_p4  ;;  %p2716_p2 = por %p2715_p0, %p2714_p13 }
  0xcd   : > { %p2712_p3 = pneg %p2711_p1  ;;  %p2718_p7 = por %p2717_p5, %p2716_p2 }
  0xcf   : > { %p2719_p9 = pnand %p2718_p7, %p2712_p3 }
  0xd1   : > { %2722 = shalt.err (!%p2719_p9)
}
  0xd2   : > { %s2723_s10 = scalar_lea.vmem %s3152_s19, 1024  ;;  %s2864_s13 = smov [#allocation3]  }
  0xd3   : > { %p2724_p4 = scmp.ne.s32.totalorder %s3152_s19, %s2723_s10  ;;  %s2728_s18 = sshll.u32 %s2864_s13, 4  ;;  %s2729_s18 = int_to_ptr.vmem [resolvable:$false] %s2728_s18 }
  0xd4   : > { %s2730_s20 = scalar_lea.vmem %s2729_s18, 2048  ;;  %p2731_p10 = scmp.lt.s32.totalorder %s3152_s19, %s2729_s18 }
  0xd5   : > { %p2726_p1 = pnand %p2724_p4, %p2710_p8  ;;  %p2732_p13 = scmp.lt.s32.totalorder %s2730_s20, %s2723_s10 }
  0xd7   : > { %p2727_p11 = pneg %p2726_p1  ;;  %p2733_p0 = por %p2732_p13, %p2731_p10 }
  0xd9   : > { %p2734_p2 = pnand %p2733_p0, %p2727_p11 }
  0xdb   : > { %2737 = shalt.err (!%p2734_p2)
}
  0xdc   : > { %s2865_s16 = smov 128   ;;  %s2866_s17 = smov 8  }
  0xdd   : > { %2374 = dma.hbm_to_vmem [thread:$0]  (!%p3156_p12), %s3150_s25, 1024, %s3152_s19, %s325_s24, %s2865_s16, %s2865_s16, %s2866_s17  }
  0xde   : > { %s2087_s21 = sshll.u32 %s3135_s3, 5  ;;  %s2143_s10 = sshll.u32 %s2854_s30, 9 }
  0xdf   : > { %s3197_s20 = scalar_lea.hbm %s3714_s1, %s2143_s10  ;;  %s350_s23 = scalar_lea.vmem [#allocation6], %s2087_s21 }
  0xe0   : > { %s357_s0 = sshll.u32 %s350_s23, 4  ;;  %s3746_s4 = sand.u32 1, %s2854_s30   ;;  %s3199_s0 = int_to_ptr.vmem [resolvable:$true] %s357_s0 }
  0xe1   : > { %s3203_s5 = scalar_lea.sflag [#allocation7], %s3746_s4  ;;  %s2738_s6 = scalar_lea.hbm %s3197_s20, 512 }
  0xe2   : > { %p2739_p10 = scmp.ne.s32.totalorder %s3197_s20, %s2738_s6  ;;  %s2743_s19 = scalar_lea.hbm %s3714_s1, 1024 }
  0xe3   : > { %p2744_p5 = scmp.lt.u32.totalorder %s3197_s20, %s3714_s1  ;;  %p2745_p7 = scmp.lt.u32.totalorder %s2743_s19, %s2738_s6 }
  0xe4   : > { %p2741_p11 = pnand %p2739_p10, %p2710_p8  ;;  %p2747_p4 = scmp.lt.u32.totalorder %s2738_s6, %s3197_s20 }
  0xe5   : > { %p2746_p9 = por %p2745_p7, %p2744_p5 }
  0xe6   : > { %p2742_p3 = pneg %p2741_p11 }
  0xe7   : > { %p2748_p1 = por %p2747_p4, %p2746_p9 }
  0xe9   : > { %p2749_p13 = pnand %p2748_p1, %p2742_p3 }
  0xeb   : > { %2752 = shalt.err (!%p2749_p13)
}
  0xec   : > { %s2753_s4 = scalar_lea.vmem %s3199_s0, 512  ;;  %s2867_s23 = smov [#allocation6]  }
  0xed   : > { %p2754_p0 = scmp.ne.s32.totalorder %s3199_s0, %s2753_s4  ;;  %s2758_s21 = sshll.u32 %s2867_s23, 4  ;;  %s2759_s21 = int_to_ptr.vmem [resolvable:$false] %s2758_s21 }
  0xee   : > { %s2760_s13 = scalar_lea.vmem %s2759_s21, 1024  ;;  %p2761_p11 = scmp.lt.s32.totalorder %s3199_s0, %s2759_s21 }
  0xef   : > { %p2756_p2 = pnand %p2754_p0, %p2710_p8  ;;  %p2762_p5 = scmp.lt.s32.totalorder %s2760_s13, %s2753_s4 }
  0xf1   : > { %p2757_p10 = pneg %p2756_p2  ;;  %p2763_p7 = por %p2762_p5, %p2761_p11 }
  0xf3   : > { %p2764_p9 = pnand %p2763_p7, %p2757_p10 }
  0xf5   : > { %2767 = shalt.err (!%p2764_p9)
}
  0xf6   : > { %2377 = dma.hbm_to_vmem [thread:$0]  (!%p3156_p12), %s3197_s20, 512, %s3199_s0, %s3203_s5, %s2865_s16, %s2865_s16, %s2866_s17  }
  0xf7   : > { %p3747_p8 = scmp.ne.s32.totalorder %s3731_s12, 0 }
  0xf8   : > { %s3235_s6 = sand.u32 (!%p3747_p8), 1, %s2846_s28  }
  0xf9   : > { %369 = sbr.rel (%p3747_p8) target bundleno = 2115 (0x843), region = 52  ;;  %s2091_s18 = sshll.u32 (!%p3747_p8), %s3235_s6, 6 }
  0xfa   : > { %s372_s3 = scalar_lea.sflag (!%p3747_p8), [#allocation4], %s3235_s6  ;;  %s3241_s22 = scalar_lea.vmem (!%p3747_p8), [#allocation3], %s2091_s18 }
 0x100   : > { %2813 = dma.done.wait (%p3128_p6), %s372_s3, 1024  }
 0x101   : > { %2815 = vsyncadd (%p3128_p6), %s372_s3, 4294966272  ;;  %s380_s0 = sand.u32 1, %s2943_s11   ;;  %s2092_s5 = sshll.u32 %s3235_s6, 5 }
 0x102   : > { %s381_s12 = scalar_lea.sflag [#allocation7], %s380_s0  ;;  %s3249_s16 = scalar_lea.vmem [#allocation6], %s2092_s5 }
 0x103   : > { %2817 = dma.done.wait (%p3128_p6), %s381_s12, 512  }
 0x104   : > { %2819 = vsyncadd (%p3128_p6), %s381_s12, 4294966784  ;;  %p3748_p12 = scmp.eq.s32.totalorder %s2943_s11, 0 }
 0x106   : > { %2821 = dma.done.wait (%p3748_p12), [#allocation7], 16   ;;  %p3749_p3 = pmov %p3748_p12 }
 0x108   : > { %2823 = vsyncadd (%p3749_p3), [#allocation7], 4294967280  ;;  %p3750_p4 = pmov %p3749_p3 }
 0x109   : > { %p3751_p1 = pmov %p3749_p3 }
 0x10a   : > { %2825 = dma.done.wait (%p3750_p4), [#allocation10], 272  }
 0x10b   : > { %2827 = vsyncadd (%p3751_p1), [#allocation10], 4294967024  ;;  %p3752_p13 = pmov %p3751_p1 }
 0x10c   : > { %p3753_p0 = pmov %p3751_p1 }
 0x10d   : > { %2829 = dma.done.wait (%p3752_p13), [#allocation13], 512  }
 0x10e   : > { %2831 = vsyncadd (%p3753_p0), [#allocation13], 4294966784  ;;  %p3754_p6 = pmov %p3753_p0 }
 0x10f   : > { %p3755_p2 = pmov %p3753_p0 }
 0x110   : > { %2833 = dma.done.wait (%p3754_p6), [#allocation16], 16  }
 0x111   : > { %2835 = vsyncadd (%p3755_p2), [#allocation16], 4294967280  ;;  %vm460_vm0 = vcmask 261120   ;;  %v450_v0 = vld [vmem:[%s3241_s22] sm:$0xff]  ;;  %v452_v1 = vld [vmem:[%s3241_s22 + $0x10] sm:$0xff]  ;;  %vm774_vm1 = vcmask 130048  }
 0x112   : > { %v451_v2 = vld [vmem:[%s3241_s22 + $0x8] sm:$0xff]  ;;  %v461_v3 = vsel %vm460_vm0, %v450_v0, 0.0  ;;  %v467_v4 = vsel %vm460_vm0, %v452_v1, 0.0  ;;  %v453_v5 = vld [vmem:[%s3241_s22 + $0x18] sm:$0xff]  ;;  %v454_v7 = vld [vmem:[%s3241_s22 + $0x20] sm:$0xff]  ;;  %s2869_s2 = smov 112  }
 0x113   : > { %462 = vadd.xlane.f32.xlu0 %v461_v3  ;;  %468 = vadd.xlane.f32.xlu1 %v467_v4  ;;  %v464_v6 = vsel %vm460_vm0, %v451_v2, 0.0  ;;  %v470_v8 = vsel %vm460_vm0, %v453_v5, 0.0  ;;  %v455_v9 = vld [vmem:[%s3241_s22 + $0x28] sm:$0xff]  ;;  %v473_v10 = vsel %vm460_vm0, %v454_v7, 0.0  ;;  %v456_v12 = vld [vmem:[%s3241_s22 + $0x30] sm:$0xff]  ;;  %v457_v13 = vld [vmem:[%s3241_s22 + $0x38] sm:$0xff] }
 0x114   : > { %v476_v11 = vsel %vm460_vm0, %v455_v9, 0.0  ;;  %v479_v14 = vsel %vm460_vm0, %v456_v12, 0.0  ;;  %v482_v15 = vsel %vm460_vm0, %v457_v13, 0.0  ;;  %v2446_v16 = vld [vmem:[#allocation12] sm:$0xff]   ;;  %v2447_v57 = vld [vmem:[#allocation12 + $0x8] sm:$0xff]   ;;  %v599_v59 = vld [vmem:[%s3249_s16 + $0x8] sm:$0xff] }
 0x115   : > { %2206 = vmatprep.subr.bf16.mxu1 %v2446_v16  ;;  %v598_v58 = vld [vmem:[%s3249_s16] sm:$0xff]  ;;  %v600_v61 = vld [vmem:[%s3249_s16 + $0x10] sm:$0xff]  ;;  %v601_v62 = vld [vmem:[%s3249_s16 + $0x18] sm:$0xff]  ;;  %s2870_s17 = smov 96   ;;  %vm2871_vm2 = vmmov 0   ;;  %vm852_vm3 = vcmask 1043456  }
 0x116   : > { %2207 = vmatpush3.bf16.msra.mxu1 %v2446_v16  ;;  %v602_v60 = vpack.c.bf16 %v599_v59, %v598_v58  ;;  %v603_v63 = vpack.c.bf16 %v601_v62, %v600_v61  ;;  %vm822_vm4 = vcmask 64512   ;;  %s2872_s20 = smov 80   ;;  %s2873_s25 = smov 16   ;;  %vm1028_vm5 = vcmask 261248  }
 0x117   : > { %465 = vadd.xlane.f32.xlu0 %v464_v6  ;;  %471 = vadd.xlane.f32.xlu1 %v470_v8  ;;  %s3638_s19 = scalar_lea.vmem [#allocation17], %s2091_s18  ;;  %s2145_s24 = sshll.u32 %s2943_s11, 10 }
 0x118   : > { %2208 = vmatprep.subr.bf16.mxu1 %v2447_v57  ;;  %2210 = vmatprep.mubr.msk.bf16.mxu1 %vm460_vm0, %v602_v60  ;;  %s1921_s10 = sshll.u32 %s3638_s19, 4  ;;  %s3660_s11 = scalar_lea.hbm %s3721_s8, %s2145_s24  ;;  %s3662_s10 = int_to_ptr.vmem [resolvable:$true] %s1921_s10 }
 0x119   : > { %s1907_s21 = scalar_lea.sflag [#allocation5], %s3235_s6  ;;  %s2768_s13 = scalar_lea.vmem %s3662_s10, 1024 }
 0x11a   : > { %2209 = vmatpush3.bf16.msra.mxu1 %v2447_v57  ;;  %p2769_p10 = scmp.ne.s32.totalorder %s3662_s10, %s2768_s13  ;;  %p3756_p11 = scmp.ne.s32.totalorder %s3742_s26, 0 }
 0x11b   : > { %474 = vadd.xlane.f32.xlu0 %v473_v10  ;;  %477 = vadd.xlane.f32.xlu1 %v476_v11  ;;  %s2874_s18 = smov [#allocation17]  }
 0x11c   : > { %p2770_p5 = pnand %p2769_p10, %p3756_p11  ;;  %s2772_s3 = sshll.u32 %s2874_s18, 4  ;;  %s2773_s3 = int_to_ptr.vmem [resolvable:$false] %s2772_s3 }
 0x11d   : > { %2211 = vmatmul.mubr.msk.bf16.vlgmr.msra.gmra.mrb[0].mxu1 %vm460_vm0, %v603_v63  ;;  %s2774_s0 = scalar_lea.vmem %s2773_s3, 2048  ;;  %p2775_p9 = scmp.lt.s32.totalorder %s3662_s10, %s2773_s3 }
 0x11e   : > { %p2771_p7 = pneg %p2770_p5  ;;  %p2776_p8 = scmp.lt.s32.totalorder %s2774_s0, %s2768_s13 }
 0x11f   : > { %480 = vadd.xlane.f32.xlu0 %v479_v14  ;;  %483 = vadd.xlane.f32.xlu1 %v482_v15 }
 0x120   : > { %p2777_p12 = por %p2776_p8, %p2775_p9 }
 0x122   : > { %p2778_p3 = pnand %p2777_p12, %p2771_p7 }
 0x1a0   : > { %v463_v17 = vpop.xlane.xlu0 %462  ;;  %v469_v18 = vpop.xlane.xlu1 %468 }
 0x1a1   : > { %v486_v19 = vmul.f32 0.03125, %v463_v17  ;;  %v488_v20 = vmul.f32 0.03125, %v469_v18 }
 0x1a3   : > { %v3287_v21 = vsub.f32 %v450_v0, %v486_v19  ;;  %v3289_v22 = vsub.f32 %v452_v1, %v488_v20  ;;  %v2448_v0 = vld [vmem:[#allocation11] sm:$0xff]   ;;  %v2449_v1 = vld [vmem:[#allocation11 + $0x8] sm:$0xff]  }
 0x1a4   : > { %v466_v23 = vpop.xlane.xlu0 %465  ;;  %v472_v24 = vpop.xlane.xlu1 %471  ;;  %2194 = vmatprep.subr.bf16.mxu0 %v2448_v0 }
 0x1a5   : > { %v487_v25 = vmul.f32 0.03125, %v466_v23  ;;  %v489_v26 = vmul.f32 0.03125, %v472_v24  ;;  %v502_v27 = vmul.f32 %v3287_v21, %v3287_v21  ;;  %v504_v28 = vmul.f32 %v3289_v22, %v3289_v22  ;;  %2195 = vmatpush3.bf16.msra.mxu0 %v2448_v0 }
 0x1a6   : > { %2196 = vmatprep.subr.bf16.mxu0 %v2449_v1 }
 0x1a7   : > { %v3295_v29 = vsub.f32 %v451_v2, %v487_v25  ;;  %v3297_v30 = vsub.f32 %v453_v5, %v489_v26  ;;  %v510_v31 = vsel %vm460_vm0, %v502_v27, 0.0  ;;  %v516_v34 = vsel %vm460_vm0, %v504_v28, 0.0 }
 0x1a8   : > { %511 = vadd.xlane.f32.xlu0 %v510_v31  ;;  %v475_v32 = vpop.xlane.xlu0 %474  ;;  %v478_v33 = vpop.xlane.xlu1 %477  ;;  %v2868_v2 = vmov 0.0  }
 0x1a9   : > { %v490_v35 = vmul.f32 0.03125, %v475_v32  ;;  %v491_v36 = vmul.f32 0.03125, %v478_v33  ;;  %v503_v37 = vmul.f32 %v3295_v29, %v3295_v29  ;;  %v505_v38 = vmul.f32 %v3297_v30, %v3297_v30  ;;  %2197 = vmatpush3.bf16.msra.mxu0 %v2449_v1  ;;  %2214 = vmatprep.subr.bf16.mxu1 %v2868_v2  ;;  %v2100_v32 = vld [vmem:[#allocation8] ss:$0 sm:$0xff] }
 0x1aa   : > { %2220 = vmatprep.subr.bf16.mxu0 %v2868_v2  ;;  %2216 = vmatprep.mubr.msk.bf16.mxu1 %vm2871_vm2, %v2868_v2 }
 0x1ab   : > { %v3305_v39 = vsub.f32 %v454_v7, %v490_v35  ;;  %v3307_v40 = vsub.f32 %v455_v9, %v491_v36  ;;  %v513_v41 = vsel %vm460_vm0, %v503_v37, 0.0  ;;  %v519_v44 = vsel %vm460_vm0, %v505_v38, 0.0 }
 0x1ac   : > { %517 = vadd.xlane.f32.xlu0 %v516_v34  ;;  %514 = vadd.xlane.f32.xlu1 %v513_v41  ;;  %v481_v42 = vpop.xlane.xlu0 %480  ;;  %v484_v43 = vpop.xlane.xlu1 %483  ;;  %v2101_v41 = vld [vmem:[#allocation9] ss:$0 sm:$0xff] }
 0x1ad   : > { %v492_v45 = vmul.f32 0.03125, %v481_v42  ;;  %v493_v46 = vmul.f32 0.03125, %v484_v43  ;;  %v506_v47 = vmul.f32 %v3305_v39, %v3305_v39  ;;  %v507_v48 = vmul.f32 %v3307_v40, %v3307_v40 }
 0x1af   : > { %v3315_v49 = vsub.f32 %v456_v12, %v492_v45  ;;  %v3317_v50 = vsub.f32 %v457_v13, %v493_v46  ;;  %v522_v51 = vsel %vm460_vm0, %v506_v47, 0.0  ;;  %v525_v52 = vsel %vm460_vm0, %v507_v48, 0.0 }
 0x1b0   : > { %520 = vadd.xlane.f32.xlu1 %v519_v44  ;;  %523 = vadd.xlane.f32.xlu0 %v522_v51 }
 0x1b1   : > { %v508_v53 = vmul.f32 %v3315_v49, %v3315_v49  ;;  %v509_v54 = vmul.f32 %v3317_v50, %v3317_v50 }
 0x1b3   : > { %v528_v55 = vsel %vm460_vm0, %v508_v53, 0.0  ;;  %v531_v56 = vsel %vm460_vm0, %v509_v54, 0.0 }
 0x1b4   : > { %526 = vadd.xlane.f32.xlu1 %v525_v52  ;;  %529 = vadd.xlane.f32.xlu0 %v528_v55 }
 0x1b8   : > { %532 = vadd.xlane.f32.xlu1 %v531_v56 }
 0x235   : > { %v512_v3 = vpop.xlane.xlu0 %511 }
 0x236   : > { %v534_v4 = vmul.f32 0.03125, %v512_v3 }
 0x238   : > { %v542_v5 = vadd.f32 1e-05, %v534_v4 }
 0x239   : > { %v515_v6 = vpop.xlane.xlu1 %514  ;;  %v518_v7 = vpop.xlane.xlu0 %517 }
 0x23a   : > { %2452 = vrsqrt.f32 %v542_v5  ;;  %v535_v8 = vmul.f32 0.03125, %v515_v6  ;;  %v536_v9 = vmul.f32 0.03125, %v518_v7 }
 0x23c   : > { %v543_v10 = vadd.f32 1e-05, %v535_v8  ;;  %v544_v11 = vadd.f32 1e-05, %v536_v9 }
 0x23d   : > { %v521_v12 = vpop.xlane.xlu1 %520  ;;  %v524_v13 = vpop.xlane.xlu0 %523 }
 0x23e   : > { %2454 = vrsqrt.f32 %v543_v10  ;;  %v537_v14 = vmul.f32 0.03125, %v521_v12  ;;  %v538_v15 = vmul.f32 0.03125, %v524_v13 }
 0x23f   : > { %2456 = vrsqrt.f32 %v544_v11 }
 0x240   : > { %v545_v16 = vadd.f32 1e-05, %v537_v14  ;;  %v546_v17 = vadd.f32 1e-05, %v538_v15 }
 0x241   : > { %v527_v18 = vpop.xlane.xlu1 %526  ;;  %v530_v19 = vpop.xlane.xlu0 %529 }
 0x242   : > { %2458 = vrsqrt.f32 %v545_v16  ;;  %v539_v20 = vmul.f32 0.03125, %v527_v18  ;;  %v540_v23 = vmul.f32 0.03125, %v530_v19 }
 0x243   : > { %2460 = vrsqrt.f32 %v546_v17 }
 0x244   : > { %v2453_v24 = vpop.eup %2452  ;;  %v547_v25 = vadd.f32 1e-05, %v539_v20  ;;  %v548_v26 = vadd.f32 1e-05, %v540_v23 }
 0x245   : > { %v533_v27 = vpop.xlane.xlu1 %532  ;;  %v558_v28 = vmul.f32 %v2453_v24, %v3287_v21 }
 0x246   : > { %2462 = vrsqrt.f32 %v547_v25  ;;  %v541_v31 = vmul.f32 0.03125, %v533_v27 }
 0x247   : > { %2464 = vrsqrt.f32 %v548_v26  ;;  %v572_v37 = vmul.f32 %v2100_v32, %v558_v28 }
 0x248   : > { %v2455_v33 = vpop.eup %2454  ;;  %v549_v34 = vadd.f32 1e-05, %v541_v31 }
 0x249   : > { %v2457_v35 = vpop.eup %2456  ;;  %v559_v36 = vmul.f32 %v2455_v33, %v3295_v29  ;;  %v586_v21 = vadd.f32 %v2101_v41, %v572_v37 }
 0x24a   : > { %v560_v38 = vmul.f32 %v2457_v35, %v3289_v22  ;;  %2466 = vrsqrt.f32 %v549_v34 }
 0x24b   : > { %v573_v42 = vmul.f32 %v2100_v32, %v559_v36 }
 0x24c   : > { %v2459_v43 = vpop.eup %2458  ;;  %v574_v47 = vmul.f32 %v2100_v32, %v560_v38 }
 0x24d   : > { %v2461_v44 = vpop.eup %2460  ;;  %v561_v45 = vmul.f32 %v2459_v43, %v3297_v30  ;;  %v587_v46 = vadd.f32 %v2101_v41, %v573_v42 }
 0x24e   : > { %v562_v48 = vmul.f32 %v2461_v44, %v3305_v39  ;;  %v588_v22 = vadd.f32 %v2101_v41, %v574_v47 }
 0x24f   : > { %v594_v51 = vpack.c.bf16 %v587_v46, %v586_v21  ;;  %v575_v52 = vmul.f32 %v2100_v32, %v561_v45 }
 0x250   : > { %v2463_v53 = vpop.eup %2462  ;;  %v576_v56 = vmul.f32 %v2100_v32, %v562_v48 }
 0x251   : > { %v2465_v54 = vpop.eup %2464  ;;  %v563_v29 = vmul.f32 %v2463_v53, %v3307_v40  ;;  %2198 = vmatprep.mubr.msk.bf16.mxu0 %vm460_vm0, %v594_v51  ;;  %v589_v55 = vadd.f32 %v2101_v41, %v575_v52 }
 0x252   : > { %v564_v57 = vmul.f32 %v2465_v54, %v3315_v49  ;;  %v590_v39 = vadd.f32 %v2101_v41, %v576_v56  ;;  %v2212_v49 = vpop.f32.mrb[0].mxu1 }
 0x253   : > { %v595_v58 = vpack.c.bf16 %v589_v55, %v588_v22  ;;  %v577_v30 = vmul.f32 %v2100_v32, %v563_v29  ;;  %v757_v4 = vpop.f32.mrb[1].mxu1 }
 0x254   : > { %v2467_v59 = vpop.eup %2466  ;;  %v578_v62 = vmul.f32 %v2100_v32, %v564_v57  ;;  %v2213_v5 = vpop.f32.mrb[2].mxu1 }
 0x255   : > { %v565_v60 = vmul.f32 %v2467_v59, %v3317_v50  ;;  %2199 = vmatmul.mubr.msk.bf16.vlgmr.msra.gmra.mrb[0].mxu0 %vm460_vm0, %v595_v58  ;;  %v591_v61 = vadd.f32 %v2101_v41, %v577_v30  ;;  %v3347_v6 = vpack.c.bf16 %v2213_v5, %v2212_v49  ;;  %v760_v50 = vpop.f32.mrb[3].mxu1 }
 0x256   : > { %v592_v40 = vadd.f32 %v2101_v41, %v578_v62  ;;  %v3349_v7 = vpack.c.bf16 %v760_v50, %v757_v4 }
 0x257   : > { %v596_v63 = vpack.c.bf16 %v591_v61, %v590_v39  ;;  %v579_v0 = vmul.f32 %v2100_v32, %v565_v60  ;;  %v3359_v9 = vrot.slane %v3347_v6, 4  ;;  %v1286_v38 = vsel %vm774_vm1, %v3347_v6, 0 }
 0x258   : > { %902 = vrot.lane.b32.xlu0 %v3349_v7, %s2869_s2  ;;  %v779_v8 = vsel %vm774_vm1, %v3349_v7, 0  ;;  %v3377_v25 = vrot.slane %v3349_v7, 4 }
 0x259   : > { %2202 = vmatprep.mubr.msk.bf16.mxu0 %vm460_vm0, %v596_v63  ;;  %v593_v1 = vadd.f32 %v2101_v41, %v579_v0  ;;  %2215 = vmatpush3.bf16.xpose.msra.mxu1 %v779_v8  ;;  %v1539_v43 = vsel %vm774_vm1, %v3359_v9, 0 }
 0x25a   : > { %2226 = vmatprep.subr.bf16.mxu1 %v2868_v2  ;;  %v1035_v34 = vsel %vm774_vm1, %v3377_v25, 0 }
 0x25b   : > { %v597_v3 = vpack.c.bf16 %v593_v1, %v592_v40 }
 0x25c   : > { %1407 = vrot.lane.b32.xlu0 %v3347_v6, %s2869_s2 }
 0x25d   : > { %2203 = vmatmul.mubr.msk.bf16.gmra.mrb[4].mxu0 %vm460_vm0, %v597_v3 }
 0x25e   : > { %2222 = vmatprep.mubr.msk.bf16.mxu0 %vm2871_vm2, %v2868_v2 }
 0x260   : > { %1659 = vrot.lane.b32.xlu0 %v3359_v9, %s2869_s2 }
 0x264   : > { %847 = vrot.lane.b32.xlu0 %v3349_v7, %s2870_s17 }
 0x2ca   : > { %v903_v10 = vpop.permute.xlu0 %902 }
 0x2cb   : > { %v908_v23 = vsel %vm774_vm1, %v903_v10, 0 }
 0x2ce   : > { %v1408_v11 = vpop.permute.xlu0 %1407 }
 0x2cf   : > { %v1413_v41 = vsel %vm774_vm1, %v1408_v11, 0 }
 0x2d2   : > { %v1660_v12 = vpop.permute.xlu0 %1659 }
 0x2d3   : > { %v1665_v44 = vsel %vm774_vm1, %v1660_v12, 0 }
 0x2d6   : > { %v848_v13 = vpop.permute.xlu0 %847 }
 0x2d7   : > { %v854_v14 = vsel %vm852_vm3, %v848_v13, 0 }
 0x2d8   : > { %2221 = vmatpush3.bf16.msra.mxu0 %v854_v14 }
 0x2d9   : > { %2232 = vmatprep.subr.bf16.mxu0 %v2868_v2 }
 0x328   : > { %v2200_v15 = vpop.f32.mrb[0].mxu0 }
 0x329   : > { %v666_v16 = vpop.f32.mrb[1].mxu0 }
 0x32a   : > { %v2201_v17 = vpop.f32.mrb[2].mxu0 }
 0x32b   : > { %v698_v18 = vpack.c.bf16 %v2201_v17, %v2200_v15  ;;  %v669_v19 = vpop.f32.mrb[3].mxu0 }
 0x32c   : > { %v697_v20 = vpack.c.bf16 %v669_v19, %v666_v16 }
 0x32e   : > { %900 = vrot.lane.b32.xlu1 %v697_v20, %s2869_s2  ;;  %2217 = vmatmul.mubr.msk.bf16.vlgmr.msra.gmra.mrb[4].mxu1 %vm774_vm1, %v697_v20 }
 0x32f   : > { %2227 = vmatpush3.bf16.xpose.msra.mxu1 %v908_v23  ;;  %2228 = vmatprep.mubr.msk.bf16.mxu1 %vm2871_vm2, %v2868_v2 }
 0x330   : > { %v2204_v24 = vpop.f32.mrb[4].mxu0  ;;  %2238 = vmatprep.subr.bf16.mxu1 %v2868_v2 }
 0x331   : > { %v682_v26 = vpop.f32.mrb[5].mxu0 }
 0x332   : > { %1155 = vrot.lane.b32.xlu1 %v3377_v25, %s2869_s2  ;;  %v2205_v27 = vpop.f32.mrb[6].mxu0 }
 0x333   : > { %v700_v28 = vpack.c.bf16 %v2205_v27, %v2204_v24  ;;  %v685_v31 = vpop.f32.mrb[7].mxu0 }
 0x334   : > { %v699_v32 = vpack.c.bf16 %v685_v31, %v682_v26 }
 0x336   : > { %1153 = vrot.lane.b32.xlu1 %v698_v18, %s2869_s2 }
 0x33a   : > { %1405 = vrot.lane.b32.xlu1 %v699_v32, %s2869_s2 }
 0x33e   : > { %1657 = vrot.lane.b32.xlu1 %v700_v28, %s2869_s2 }
 0x3a0   : > { %v901_v33 = vpop.permute.xlu1 %900 }
 0x3a1   : > { %2229 = vmatmul.mubr.msk.bf16.vlgmr.msra.gmra.mrb[8].mxu1 %vm774_vm1, %v901_v33 }
 0x3a2   : > { %2239 = vmatpush3.bf16.xpose.msra.mxu1 %v1035_v34  ;;  %2240 = vmatprep.mubr.msk.bf16.mxu1 %vm2871_vm2, %v2868_v2 }
 0x3a3   : > { %2250 = vmatprep.subr.bf16.mxu1 %v2868_v2 }
 0x3a4   : > { %v1156_v35 = vpop.permute.xlu1 %1155 }
 0x3a5   : > { %v1161_v36 = vsel %vm774_vm1, %v1156_v35, 0 }
 0x3a8   : > { %v1154_v37 = vpop.permute.xlu1 %1153 }
 0x3a9   : > { %2241 = vmatmul.mubr.msk.bf16.vlgmr.msra.gmra.mrb[12].mxu1 %vm774_vm1, %v698_v18 }
 0x3aa   : > { %2251 = vmatpush3.bf16.xpose.msra.mxu1 %v1161_v36  ;;  %2252 = vmatprep.mubr.msk.bf16.mxu1 %vm2871_vm2, %v2868_v2 }
 0x3ab   : > { %2262 = vmatprep.subr.bf16.mxu1 %v2868_v2 }
 0x3ac   : > { %v1406_v42 = vpop.permute.xlu1 %1405 }
 0x3b0   : > { %v1658_v45 = vpop.permute.xlu1 %1657 }
 0x3b1   : > { %2253 = vmatmul.mubr.msk.bf16.vlgmr.msra.gmra.mrb[16].mxu1 %vm774_vm1, %v1154_v37 }
 0x3b2   : > { %2263 = vmatpush3.bf16.xpose.msra.mxu1 %v1286_v38  ;;  %2264 = vmatprep.mubr.msk.bf16.mxu1 %vm2871_vm2, %v2868_v2 }
 0x3b3   : > { %2274 = vmatprep.subr.bf16.mxu1 %v2868_v2 }
 0x3b9   : > { %2265 = vmatmul.mubr.msk.bf16.vlgmr.msra.gmra.mrb[20].mxu1 %vm774_vm1, %v699_v32 }
 0x3ba   : > { %2275 = vmatpush3.bf16.xpose.msra.mxu1 %v1413_v41  ;;  %2276 = vmatprep.mubr.msk.bf16.mxu1 %vm2871_vm2, %v2868_v2 }
 0x3bb   : > { %2286 = vmatprep.subr.bf16.mxu1 %v2868_v2 }
 0x3c1   : > { %2277 = vmatmul.mubr.msk.bf16.vlgmr.msra.gmra.mrb[24].mxu1 %vm774_vm1, %v1406_v42 }
 0x3c2   : > { %2287 = vmatpush3.bf16.xpose.msra.mxu1 %v1539_v43  ;;  %2288 = vmatprep.mubr.msk.bf16.mxu1 %vm2871_vm2, %v2868_v2 }
 0x3c3   : > { %2298 = vmatprep.subr.bf16.mxu1 %v2868_v2 }
 0x3c9   : > { %2289 = vmatmul.mubr.msk.bf16.vlgmr.msra.gmra.mrb[28].mxu1 %vm774_vm1, %v700_v28 }
 0x3ca   : > { %2299 = vmatpush3.bf16.xpose.msra.mxu1 %v1665_v44  ;;  %2300 = vmatprep.mubr.msk.bf16.mxu1 %vm2871_vm2, %v2868_v2 }
 0x3d1   : > { %2301 = vmatmul.mubr.msk.bf16.vlgmr.msra.gmra.mrb[32].mxu1 %vm774_vm1, %v1658_v45 }
 0x401   : > { %v815_v21 = vpop.f32.mrb[4].mxu1 }
 0x402   : > { %v2218_v46 = vpop.f32.mrb[5].mxu1  ;;  %v823_v47 = vsel %vm822_vm4, %v815_v21, -inf }
 0x403   : > { %824 = vmax.xlane.f32.xlu0 %v823_v47  ;;  %v818_v48 = vpop.f32.mrb[6].mxu1 }
 0x404   : > { %v2219_v51 = vpop.f32.mrb[7].mxu1  ;;  %v826_v52 = vsel %vm822_vm4, %v818_v48, -inf }
 0x405   : > { %827 = vmax.xlane.f32.xlu1 %v826_v52 }
 0x416   : > { %974 = vrot.lane.b32.xlu1 %v3349_v7, %s2872_s20 }
 0x474   : > { %v3422_v53 = vpop.f32.mrb[8].mxu1 }
 0x475   : > { %v2230_v54 = vpop.f32.mrb[9].mxu1  ;;  %v951_v29 = vsel %vm822_vm4, %v3422_v53, -inf }
 0x476   : > { %952 = vmax.xlane.f32.xlu0 %v951_v29  ;;  %v3426_v22 = vpop.f32.mrb[10].mxu1 }
 0x477   : > { %v2231_v55 = vpop.f32.mrb[11].mxu1  ;;  %v954_v56 = vsel %vm822_vm4, %v3426_v22, -inf }
 0x47a   : > { %955 = vmax.xlane.f32.xlu0 %v954_v56 }
 0x47c   : > { %v3430_v57 = vpop.f32.mrb[12].mxu1 }
 0x47d   : > { %v2242_v58 = vpop.f32.mrb[13].mxu1  ;;  %v1078_v30 = vsel %vm822_vm4, %v3430_v57, -inf }
 0x47e   : > { %1079 = vmax.xlane.f32.xlu0 %v1078_v30  ;;  %v3434_v59 = vpop.f32.mrb[14].mxu1 }
 0x47f   : > { %v2243_v60 = vpop.f32.mrb[15].mxu1  ;;  %v1081_v39 = vsel %vm822_vm4, %v3434_v59, -inf }
 0x480   : > { %1082 = vmax.xlane.f32.xlu1 %v1081_v39 }
 0x484   : > { %v3438_v61 = vpop.f32.mrb[16].mxu1 }
 0x485   : > { %v2254_v62 = vpop.f32.mrb[17].mxu1  ;;  %v1204_v63 = vsel %vm822_vm4, %v3438_v61, -inf }
 0x486   : > { %1205 = vmax.xlane.f32.xlu0 %v1204_v63  ;;  %v3442_v0 = vpop.f32.mrb[18].mxu1 }
 0x487   : > { %v2255_v40 = vpop.f32.mrb[19].mxu1  ;;  %v1207_v1 = vsel %vm822_vm4, %v3442_v0, -inf }
 0x488   : > { %1208 = vmax.xlane.f32.xlu1 %v1207_v1 }
 0x48c   : > { %v3446_v3 = vpop.f32.mrb[20].mxu1 }
 0x48d   : > { %v2266_v49 = vpop.f32.mrb[21].mxu1  ;;  %v1329_v4 = vsel %vm822_vm4, %v3446_v3, -inf }
 0x48e   : > { %1330 = vmax.xlane.f32.xlu0 %v1329_v4  ;;  %v3450_v5 = vpop.f32.mrb[22].mxu1 }
 0x48f   : > { %v2267_v50 = vpop.f32.mrb[23].mxu1  ;;  %v1332_v7 = vsel %vm822_vm4, %v3450_v5, -inf }
 0x490   : > { %1333 = vmax.xlane.f32.xlu1 %v1332_v7  ;;  %v825_v8 = vpop.xlane.xlu0 %824 }
 0x491   : > { %v829_v10 = vsub.f32 %v815_v21, %v825_v8 }
 0x492   : > { %v828_v11 = vpop.xlane.xlu1 %827 }
 0x493   : > { %v831_v12 = vmul.f32 1.442695, %v829_v10  ;;  %v830_v13 = vsub.f32 %v818_v48, %v828_v11 }
 0x494   : > { %v3454_v14 = vpop.f32.mrb[24].mxu1 }
 0x495   : > { %2468 = vpow2.f32 %v831_v12  ;;  %v833_v15 = vmul.f32 1.442695, %v830_v13  ;;  %v2278_v16 = vpop.f32.mrb[25].mxu1  ;;  %v1456_v17 = vsel %vm822_vm4, %v3454_v14, -inf }
 0x496   : > { %1457 = vmax.xlane.f32.xlu0 %v1456_v17  ;;  %v3458_v18 = vpop.f32.mrb[26].mxu1  ;;  %v3492_v48 = vpop.permute.xlu1 %974 }
 0x497   : > { %2470 = vpow2.f32 %v833_v15  ;;  %v2279_v19 = vpop.f32.mrb[27].mxu1  ;;  %v1459_v20 = vsel %vm822_vm4, %v3458_v18, -inf }
 0x498   : > { %1460 = vmax.xlane.f32.xlu1 %v1459_v20 }
 0x49c   : > { %v3462_v23 = vpop.f32.mrb[28].mxu1 }
 0x49d   : > { %v2290_v24 = vpop.f32.mrb[29].mxu1  ;;  %v1582_v26 = vsel %vm822_vm4, %v3462_v23, -inf }
 0x49e   : > { %1583 = vmax.xlane.f32.xlu0 %v1582_v26  ;;  %v3466_v27 = vpop.f32.mrb[30].mxu1 }
 0x49f   : > { %v3468_v28 = vpop.eup %2468  ;;  %v2291_v31 = vpop.f32.mrb[31].mxu1  ;;  %v1585_v32 = vsel %vm822_vm4, %v3466_v27, -inf }
 0x4a0   : > { %1586 = vmax.xlane.f32.xlu1 %v1585_v32  ;;  %v835_v33 = vsel %vm822_vm4, %v3468_v28, 0.0 }
 0x4a1   : > { %v3474_v34 = vpop.eup %2470 }
 0x4a2   : > { %836 = vadd.xlane.f32.xlu0 %v835_v33  ;;  %v838_v35 = vsel %vm822_vm4, %v3474_v34, 0.0 }
 0x4a4   : > { %839 = vadd.xlane.f32.xlu1 %v838_v35  ;;  %v3478_v36 = vpop.f32.mrb[32].mxu1 }
 0x4a5   : > { %v2302_v37 = vpop.f32.mrb[33].mxu1  ;;  %v1708_v38 = vsel %vm822_vm4, %v3478_v36, -inf }
 0x4a6   : > { %v3482_v41 = vpop.f32.mrb[34].mxu1  ;;  %1709 = vmax.xlane.f32.xlu0 %v1708_v38 }
 0x4a7   : > { %v2303_v42 = vpop.f32.mrb[35].mxu1  ;;  %v1711_v43 = vsel %vm822_vm4, %v3482_v41, -inf }
 0x4a8   : > { %1712 = vmax.xlane.f32.xlu1 %v1711_v43 }
 0x4b9   : > { %1227 = vrot.lane.b32.xlu1 %v3377_v25, %s2872_s20 }
 0x4bc   : > { %1101 = vrot.lane.b32.xlu0 %v3377_v25, %s2870_s17 }
 0x503   : > { %v953_v44 = vpop.xlane.xlu0 %952 }
 0x504   : > { %v957_v45 = vsub.f32 %v3422_v53, %v953_v44 }
 0x506   : > { %v959_v21 = vmul.f32 1.442695, %v957_v45 }
 0x507   : > { %v956_v46 = vpop.xlane.xlu0 %955 }
 0x508   : > { %2472 = vpow2.f32 %v959_v21  ;;  %v958_v47 = vsub.f32 %v3426_v22, %v956_v46 }
 0x50a   : > { %v961_v51 = vmul.f32 1.442695, %v958_v47 }
 0x50b   : > { %v1080_v52 = vpop.xlane.xlu0 %1079 }
 0x50c   : > { %2474 = vpow2.f32 %v961_v51  ;;  %v1084_v54 = vsub.f32 %v3430_v57, %v1080_v52 }
 0x50d   : > { %v1083_v29 = vpop.xlane.xlu1 %1082 }
 0x50e   : > { %v1086_v55 = vmul.f32 1.442695, %v1084_v54  ;;  %v1085_v56 = vsub.f32 %v3434_v59, %v1083_v29 }
 0x510   : > { %2476 = vpow2.f32 %v1086_v55  ;;  %v1088_v25 = vmul.f32 1.442695, %v1085_v56  ;;  %v980_v56 = vsel %vm852_vm3, %v3492_v48, 0 }
 0x512   : > { %v3496_v58 = vpop.eup %2472  ;;  %2478 = vpow2.f32 %v1088_v25 }
 0x513   : > { %v1206_v53 = vpop.xlane.xlu0 %1205  ;;  %v963_v22 = vsel %vm822_vm4, %v3496_v58, 0.0 }
 0x514   : > { %v1210_v30 = vsub.f32 %v3438_v61, %v1206_v53  ;;  %964 = vadd.xlane.f32.xlu0 %v963_v22 }
 0x515   : > { %v1209_v60 = vpop.xlane.xlu1 %1208 }
 0x516   : > { %v3501_v39 = vpop.eup %2474  ;;  %v1212_v57 = vmul.f32 1.442695, %v1210_v30  ;;  %v1211_v62 = vsub.f32 %v3442_v0, %v1209_v60 }
 0x517   : > { %v966_v59 = vsel %vm822_vm4, %v3501_v39, 0.0 }
 0x518   : > { %2480 = vpow2.f32 %v1212_v57  ;;  %v1214_v63 = vmul.f32 1.442695, %v1211_v62  ;;  %967 = vadd.xlane.f32.xlu1 %v966_v59 }
 0x51a   : > { %v3506_v40 = vpop.eup %2476  ;;  %2482 = vpow2.f32 %v1214_v63 }
 0x51b   : > { %v1331_v1 = vpop.xlane.xlu0 %1330  ;;  %v1090_v61 = vsel %vm822_vm4, %v3506_v40, 0.0 }
 0x51c   : > { %v3510_v49 = vpop.eup %2478  ;;  %v1335_v4 = vsub.f32 %v3446_v3, %v1331_v1  ;;  %1091 = vadd.xlane.f32.xlu0 %v1090_v61 }
 0x51d   : > { %v1334_v50 = vpop.xlane.xlu1 %1333  ;;  %v1093_v0 = vsel %vm822_vm4, %v3510_v49, 0.0 }
 0x51e   : > { %v1337_v7 = vmul.f32 1.442695, %v1335_v4  ;;  %v1336_v8 = vsub.f32 %v3450_v5, %v1334_v50  ;;  %1094 = vadd.xlane.f32.xlu1 %v1093_v0 }
 0x520   : > { %2484 = vpow2.f32 %v1337_v7  ;;  %v1339_v10 = vmul.f32 1.442695, %v1336_v8 }
 0x522   : > { %v3516_v11 = vpop.eup %2480  ;;  %2486 = vpow2.f32 %v1339_v10 }
 0x523   : > { %v1216_v12 = vsel %vm822_vm4, %v3516_v11, 0.0  ;;  %v1458_v5 = vpop.xlane.xlu0 %1457 }
 0x524   : > { %v3520_v13 = vpop.eup %2482  ;;  %1217 = vadd.xlane.f32.xlu0 %v1216_v12  ;;  %v1462_v25 = vsub.f32 %v3454_v14, %v1458_v5 }
 0x525   : > { %v1461_v3 = vpop.xlane.xlu1 %1460  ;;  %v1219_v15 = vsel %vm822_vm4, %v3520_v13, 0.0 }
 0x526   : > { %v1463_v16 = vsub.f32 %v3458_v18, %v1461_v3  ;;  %1220 = vadd.xlane.f32.xlu1 %v1219_v15  ;;  %v1464_v22 = vmul.f32 1.442695, %v1462_v25 }
 0x528   : > { %v1466_v17 = vmul.f32 1.442695, %v1463_v16 }
 0x52a   : > { %v3525_v19 = vpop.eup %2484  ;;  %2488 = vpow2.f32 %v1466_v17 }
 0x52b   : > { %v1584_v20 = vpop.xlane.xlu0 %1583  ;;  %v1341_v24 = vsel %vm822_vm4, %v3525_v19, 0.0 }
 0x52c   : > { %v3529_v26 = vpop.eup %2486  ;;  %v1588_v31 = vsub.f32 %v3462_v23, %v1584_v20  ;;  %1342 = vadd.xlane.f32.xlu1 %v1341_v24 }
 0x52d   : > { %v1587_v32 = vpop.xlane.xlu1 %1586  ;;  %v1344_v37 = vsel %vm822_vm4, %v3529_v26, 0.0 }
 0x52e   : > { %v1590_v33 = vmul.f32 1.442695, %v1588_v31  ;;  %v1589_v35 = vsub.f32 %v3466_v27, %v1587_v32 }
 0x52f   : > { %v837_v18 = vpop.xlane.xlu0 %836 }
 0x530   : > { %2490 = vpow2.f32 %v1590_v33  ;;  %v1592_v38 = vmul.f32 1.442695, %v1589_v35  ;;  %1345 = vadd.xlane.f32.xlu1 %v1344_v37 }
 0x531   : > { %2492 = vrcp.f32 %v837_v18  ;;  %v840_v42 = vpop.xlane.xlu1 %839 }
 0x532   : > { %2494 = vpow2.f32 %v1592_v38 }
 0x533   : > { %2496 = vrcp.f32 %v840_v42 }
 0x534   : > { %v3535_v43 = vpop.eup %2488 }
 0x535   : > { %v1713_v44 = vpop.xlane.xlu1 %1712  ;;  %v1471_v23 = vsel %vm822_vm4, %v3535_v43, 0.0 }
 0x536   : > { %v1715_v45 = vsub.f32 %v3482_v41, %v1713_v44  ;;  %1472 = vadd.xlane.f32.xlu1 %v1471_v23 }
 0x538   : > { %v1718_v27 = vmul.f32 1.442695, %v1715_v45 }
 0x539   : > { %v1228_v59 = vpop.permute.xlu1 %1227 }
 0x53a   : > { %v3540_v21 = vpop.eup %2490  ;;  %2498 = vpow2.f32 %v1718_v27  ;;  %1353 = vrot.lane.b32.xlu0 %v3347_v6, %s2870_s17  ;;  %v1233_v20 = vsel %vm852_vm3, %v1228_v59, 0 }
 0x53b   : > { %v2493_v46 = vpop.eup %2492  ;;  %v1594_v47 = vsel %vm822_vm4, %v3540_v21, 0.0  ;;  %2500 = vpow2.f32 %v1464_v22 }
 0x53c   : > { %v3546_v51 = vpop.eup %2494  ;;  %1595 = vadd.xlane.f32.xlu1 %v1594_v47  ;;  %v843_v54 = vmul.f32 %v2493_v46, %v3468_v28  ;;  %v1710_v28 = vpop.xlane.xlu0 %1709 }
 0x53d   : > { %v2497_v52 = vpop.eup %2496  ;;  %v1597_v29 = vsel %vm822_vm4, %v3546_v51, 0.0  ;;  %v1714_v48 = vsub.f32 %v3478_v36, %v1710_v28 }
 0x53e   : > { %v844_v41 = vmul.f32 %v2497_v52, %v3474_v34 }
 0x53f   : > { %v1716_v30 = vmul.f32 1.442695, %v1714_v48 }
 0x540   : > { %v845_v55 = vpack.c.bf16 %v844_v41, %v843_v54  ;;  %1598 = vadd.xlane.f32.xlu1 %v1597_v29  ;;  %v1102_v36 = vpop.permute.xlu0 %1101 }
 0x541   : > { %2502 = vpow2.f32 %v1716_v30  ;;  %v1107_v3 = vsel %vm852_vm3, %v1102_v36, 0 }
 0x542   : > { %2223 = vmatmul.mubr.msk.bf16.vlgmr.msra.gmra.mrb[8].mxu0 %vm822_vm4, %v845_v55 }
 0x543   : > { %2233 = vmatpush3.bf16.msra.mxu0 %v980_v56  ;;  %2234 = vmatprep.mubr.msk.bf16.mxu0 %vm2871_vm2, %v2868_v2 }
 0x544   : > { %v3558_v53 = vpop.eup %2498  ;;  %2244 = vmatprep.subr.bf16.mxu0 %v2868_v2 }
 0x545   : > { %v1723_v34 = vsel %vm822_vm4, %v3558_v53, 0.0  ;;  %v3564_v14 = vpop.eup %2500 }
 0x546   : > { %1724 = vadd.xlane.f32.xlu1 %v1723_v34  ;;  %v1468_v60 = vsel %vm822_vm4, %v3564_v14, 0.0 }
 0x54b   : > { %v3570_v57 = vpop.eup %2502 }
 0x54c   : > { %v1720_v62 = vsel %vm822_vm4, %v3570_v57, 0.0 }
 0x557   : > { %1479 = vrot.lane.b32.xlu1 %v3347_v6, %s2872_s20 }
 0x559   : > { %1469 = vadd.xlane.f32.xlu0 %v1468_v60 }
 0x55d   : > { %1721 = vadd.xlane.f32.xlu0 %v1720_v62 }
 0x573   : > { %1605 = vrot.lane.b32.xlu0 %v3359_v9, %s2870_s17 }
 0x577   : > { %1731 = vrot.lane.b32.xlu0 %v3359_v9, %s2872_s20 }
 0x5a1   : > { %v965_v63 = vpop.xlane.xlu0 %964 }
 0x5a2   : > { %2504 = vrcp.f32 %v965_v63 }
 0x5a5   : > { %v968_v6 = vpop.xlane.xlu1 %967 }
 0x5a6   : > { %2506 = vrcp.f32 %v968_v6 }
 0x5a9   : > { %v1092_v1 = vpop.xlane.xlu0 %1091 }
 0x5aa   : > { %2508 = vrcp.f32 %v1092_v1 }
 0x5ab   : > { %v1095_v61 = vpop.xlane.xlu1 %1094 }
 0x5ac   : > { %2510 = vrcp.f32 %v1095_v61  ;;  %v2505_v4 = vpop.eup %2504 }
 0x5ad   : > { %v971_v0 = vmul.f32 %v2505_v4, %v3496_v58 }
 0x5b0   : > { %v2507_v50 = vpop.eup %2506 }
 0x5b1   : > { %v972_v7 = vmul.f32 %v2507_v50, %v3501_v39  ;;  %v1218_v8 = vpop.xlane.xlu0 %1217 }
 0x5b2   : > { %2512 = vrcp.f32 %v1218_v8 }
 0x5b3   : > { %v1221_v10 = vpop.xlane.xlu1 %1220  ;;  %v973_v9 = vpack.c.bf16 %v972_v7, %v971_v0 }
 0x5b4   : > { %2514 = vrcp.f32 %v1221_v10  ;;  %v2509_v12 = vpop.eup %2508 }
 0x5b5   : > { %2235 = vmatmul.mubr.msk.bf16.vlgmr.msra.gmra.mrb[12].mxu0 %vm822_vm4, %v973_v9  ;;  %v1098_v58 = vmul.f32 %v2509_v12, %v3506_v40  ;;  %v1354_v32 = vpop.permute.xlu0 %1353 }
 0x5b6   : > { %v2511_v15 = vpop.eup %2510  ;;  %2245 = vmatpush3.bf16.msra.mxu0 %v1107_v3  ;;  %2246 = vmatprep.mubr.msk.bf16.mxu0 %vm2871_vm2, %v2868_v2  ;;  %v1359_v35 = vsel %vm852_vm3, %v1354_v32, 0 }
 0x5b7   : > { %v1099_v16 = vmul.f32 %v2511_v15, %v3510_v49  ;;  %2256 = vmatprep.subr.bf16.mxu0 %v2868_v2 }
 0x5b9   : > { %v1343_v39 = vpop.xlane.xlu1 %1342  ;;  %v1100_v5 = vpack.c.bf16 %v1099_v16, %v1098_v58 }
 0x5ba   : > { %2516 = vrcp.f32 %v1343_v39 }
 0x5bc   : > { %v2513_v17 = vpop.eup %2512 }
 0x5bd   : > { %v1346_v24 = vpop.xlane.xlu1 %1345  ;;  %2247 = vmatmul.mubr.msk.bf16.vlgmr.msra.gmra.mrb[16].mxu0 %vm822_vm4, %v1100_v5  ;;  %v1224_v40 = vmul.f32 %v2513_v17, %v3516_v11 }
 0x5be   : > { %v2515_v31 = vpop.eup %2514  ;;  %2518 = vrcp.f32 %v1346_v24  ;;  %2257 = vmatpush3.bf16.msra.mxu0 %v1233_v20  ;;  %2258 = vmatprep.mubr.msk.bf16.mxu0 %vm2871_vm2, %v2868_v2 }
 0x5bf   : > { %v1225_v49 = vmul.f32 %v2515_v31, %v3520_v13  ;;  %2268 = vmatprep.subr.bf16.mxu0 %v2868_v2 }
 0x5c1   : > { %v1226_v33 = vpack.c.bf16 %v1225_v49, %v1224_v40 }
 0x5c3   : > { %v1473_v18 = vpop.xlane.xlu1 %1472 }
 0x5c4   : > { %v2517_v37 = vpop.eup %2516  ;;  %2520 = vrcp.f32 %v1473_v18 }
 0x5c5   : > { %2259 = vmatmul.mubr.msk.bf16.vlgmr.msra.gmra.mrb[20].mxu0 %vm822_vm4, %v1226_v33  ;;  %v1349_v13 = vmul.f32 %v2517_v37, %v3525_v19 }
 0x5c6   : > { %2269 = vmatpush3.bf16.msra.mxu0 %v1359_v35  ;;  %2270 = vmatprep.mubr.msk.bf16.mxu0 %vm2871_vm2, %v2868_v2 }
 0x5c7   : > { %2280 = vmatprep.subr.bf16.mxu0 %v2868_v2 }
 0x5c8   : > { %v2519_v38 = vpop.eup %2518 }
 0x5c9   : > { %v1350_v42 = vmul.f32 %v2519_v38, %v3529_v26  ;;  %v1596_v11 = vpop.xlane.xlu1 %1595 }
 0x5cb   : > { %v1351_v44 = vpack.c.bf16 %v1350_v42, %v1349_v13 }
 0x5cd   : > { %2271 = vmatmul.mubr.msk.bf16.vlgmr.msra.gmra.mrb[24].mxu0 %vm822_vm4, %v1351_v44  ;;  %v1599_v23 = vpop.xlane.xlu1 %1598 }
 0x5ce   : > { %2282 = vmatprep.mubr.msk.bf16.mxu0 %vm2871_vm2, %v2868_v2  ;;  %v2521_v26 = vpop.eup %2520 }
 0x5cf   : > { %v1477_v54 = vmul.f32 %v2521_v26, %v3535_v43 }
 0x5d3   : > { %v1725_v45 = vpop.xlane.xlu1 %1724 }
 0x5d7   : > { %v1480_v27 = vpop.permute.xlu1 %1479 }
 0x5d8   : > { %v1485_v46 = vsel %vm852_vm3, %v1480_v27, 0 }
 0x5d9   : > { %2281 = vmatpush3.bf16.msra.mxu0 %v1485_v46 }
 0x5da   : > { %2292 = vmatprep.subr.bf16.mxu0 %v2868_v2 }
 0x5e6   : > { %v1470_v47 = vpop.xlane.xlu0 %1469 }
 0x5e7   : > { %2522 = vrcp.f32 %v1470_v47 }
 0x5e8   : > { %2524 = vrcp.f32 %v1599_v23 }
 0x5e9   : > { %2526 = vrcp.f32 %v1596_v11 }
 0x5ea   : > { %v1722_v19 = vpop.xlane.xlu0 %1721 }
 0x5eb   : > { %2528 = vrcp.f32 %v1722_v19 }
 0x5ec   : > { %2530 = vrcp.f32 %v1725_v45 }
 0x5ee   : > { %v1606_v29 = vpop.permute.xlu0 %1605 }
 0x5ef   : > { %v1611_v25 = vsel %vm852_vm3, %v1606_v29, 0 }
 0x5f1   : > { %v2523_v52 = vpop.eup %2522 }
 0x5f2   : > { %v1476_v41 = vmul.f32 %v2523_v52, %v3564_v14  ;;  %v2525_v56 = vpop.eup %2524  ;;  %v1732_v22 = vpop.permute.xlu0 %1731 }
 0x5f3   : > { %v2527_v28 = vpop.eup %2526  ;;  %v1603_v34 = vmul.f32 %v2525_v56, %v3546_v51  ;;  %v1737_v14 = vsel %vm852_vm3, %v1732_v22, 0  ;;  %v2532_v22 = vld [vmem:[%s3241_s22 + $0x10] sm:$0xff] }
 0x5f4   : > { %v1478_v55 = vpack.c.bf16 %v1477_v54, %v1476_v41  ;;  %v1602_v43 = vmul.f32 %v2527_v28, %v3540_v21 }
 0x5f5   : > { %v2529_v30 = vpop.eup %2528 }
 0x5f6   : > { %2283 = vmatmul.mubr.msk.bf16.vlgmr.msra.gmra.mrb[28].mxu0 %vm822_vm4, %v1478_v55  ;;  %v1604_v48 = vpack.c.bf16 %v1603_v34, %v1602_v43  ;;  %v2531_v60 = vpop.eup %2530  ;;  %v1728_v62 = vmul.f32 %v2529_v30, %v3570_v57  ;;  %v2451_v57 = vld [vmem:[#allocation14 + $0x8] sm:$0xff]   ;;  %v2128_v55 = vld [vmem:[#allocation15] ss:$0 sm:$0xff] }
 0x5f7   : > { %2293 = vmatpush3.bf16.msra.mxu0 %v1611_v25  ;;  %2294 = vmatprep.mubr.msk.bf16.mxu0 %vm2871_vm2, %v2868_v2  ;;  %v1729_v51 = vmul.f32 %v2531_v60, %v3558_v53  ;;  %v2450_v53 = vld [vmem:[#allocation14] sm:$0xff]  }
 0x5f8   : > { %2304 = vmatprep.subr.bf16.mxu0 %v2868_v2  ;;  %2310 = vmatprep.subr.bf16.mxu1 %v2450_v53  ;;  %v2533_v60 = vld [vmem:[%s3241_s22] sm:$0xff] }
 0x5f9   : > { %v1730_v36 = vpack.c.bf16 %v1729_v51, %v1728_v62  ;;  %2311 = vmatpush3.bf16.msra.mxu1 %v2450_v53 }
 0x5fa   : > { %2312 = vmatprep.subr.bf16.mxu1 %v2451_v57 }
 0x5fd   : > { %2313 = vmatpush3.bf16.msra.mxu1 %v2451_v57  ;;  %v2537_v57 = vld [vmem:[%s3241_s22 + $0x20] sm:$0xff] }
 0x5fe   : > { %2295 = vmatmul.mubr.msk.bf16.vlgmr.msra.gmra.mrb[32].mxu0 %vm822_vm4, %v1604_v48 }
 0x5ff   : > { %2305 = vmatpush3.bf16.msra.mxu0 %v1737_v14  ;;  %2306 = vmatprep.mubr.msk.bf16.mxu0 %vm2871_vm2, %v2868_v2 }
 0x606   : > { %2307 = vmatmul.mubr.msk.bf16.vlgmr.msra.gmra.mrb[36].mxu0 %vm822_vm4, %v1730_v36  ;;  %v2534_v36 = vld [vmem:[%s3241_s22 + $0x18] sm:$0xff] }
 0x615   : > { %v890_v21 = vpop.f32.mrb[8].mxu0 }
 0x616   : > { %v2224_v59 = vpop.f32.mrb[9].mxu0 }
 0x617   : > { %v893_v63 = vpop.f32.mrb[10].mxu0  ;;  %v2535_v59 = vld [vmem:[%s3241_s22 + $0x8] sm:$0xff] }
 0x618   : > { %v897_v6 = vpack.c.bf16 %v893_v63, %v890_v21  ;;  %v2225_v1 = vpop.f32.mrb[11].mxu0 }
 0x61a   : > { %898 = vst.msk [vmem:[#allocation2] sm:$0xff] %vm774_vm1, %v897_v6 }
 0x688   : > { %v1016_v61 = vpop.f32.mrb[12].mxu0 }
 0x689   : > { %v2236_v4 = vpop.f32.mrb[13].mxu0 }
 0x68a   : > { %v1019_v50 = vpop.f32.mrb[14].mxu0 }
 0x68b   : > { %v1023_v0 = vpack.c.bf16 %v1019_v50, %v1016_v61  ;;  %v2237_v7 = vpop.f32.mrb[15].mxu0 }
 0x68d   : > { %1025 = vrot.lane.b32.xlu0 %v1023_v0, %s2873_s25  ;;  %v2536_v0 = vld [vmem:[%s3241_s22 + $0x30] sm:$0xff] }
 0x690   : > { %v1143_v2 = vpop.f32.mrb[16].mxu0 }
 0x691   : > { %v2248_v8 = vpop.f32.mrb[17].mxu0 }
 0x692   : > { %v1146_v10 = vpop.f32.mrb[18].mxu0 }
 0x693   : > { %v1150_v9 = vpack.c.bf16 %v1146_v10, %v1143_v2  ;;  %v2249_v12 = vpop.f32.mrb[19].mxu0 }
 0x695   : > { %1151 = vst.msk [vmem:[#allocation2 + $0x8] sm:$0xff] %vm774_vm1, %v1150_v9  ;;  %v2538_v9 = vld [vmem:[%s3241_s22 + $0x38] sm:$0xff] }
 0x698   : > { %v1269_v3 = vpop.f32.mrb[20].mxu0 }
 0x699   : > { %v2260_v15 = vpop.f32.mrb[21].mxu0 }
 0x69a   : > { %v1272_v16 = vpop.f32.mrb[22].mxu0 }
 0x69b   : > { %v1276_v58 = vpack.c.bf16 %v1272_v16, %v1269_v3  ;;  %v2261_v39 = vpop.f32.mrb[23].mxu0  ;;  %v2539_v3 = vld [vmem:[%s3241_s22 + $0x28] sm:$0xff] }
 0x69d   : > { %1278 = vrot.lane.b32.xlu1 %v1276_v58, %s2873_s25 }
 0x6a0   : > { %v1395_v5 = vpop.f32.mrb[24].mxu0 }
 0x6a1   : > { %v2272_v17 = vpop.f32.mrb[25].mxu0 }
 0x6a2   : > { %v1398_v20 = vpop.f32.mrb[26].mxu0 }
 0x6a3   : > { %v1402_v24 = vpack.c.bf16 %v1398_v20, %v1395_v5  ;;  %v2273_v31 = vpop.f32.mrb[27].mxu0 }
 0x6a5   : > { %1403 = vst.msk [vmem:[#allocation2 + $0x10] sm:$0xff] %vm774_vm1, %v1402_v24 }
 0x6c9   : > { %v1521_v49 = vpop.f32.mrb[28].mxu0 }
 0x6ca   : > { %v2284_v40 = vpop.f32.mrb[29].mxu0 }
 0x6cb   : > { %v1524_v32 = vpop.f32.mrb[30].mxu0 }
 0x6cc   : > { %v1528_v33 = vpack.c.bf16 %v1524_v32, %v1521_v49  ;;  %v2285_v35 = vpop.f32.mrb[31].mxu0 }
 0x6ce   : > { %1530 = vrot.lane.b32.xlu0 %v1528_v33, %s2873_s25 }
 0x6d1   : > { %v1647_v18 = vpop.f32.mrb[32].mxu0 }
 0x6d2   : > { %v2296_v37 = vpop.f32.mrb[33].mxu0 }
 0x6d3   : > { %v1650_v38 = vpop.f32.mrb[34].mxu0 }
 0x6d4   : > { %v1654_v13 = vpack.c.bf16 %v1650_v38, %v1647_v18  ;;  %v2297_v42 = vpop.f32.mrb[35].mxu0 }
 0x6d6   : > { %1655 = vst.msk [vmem:[#allocation2 + $0x18] sm:$0xff] %vm774_vm1, %v1654_v13 }
 0x6d9   : > { %v1773_v11 = vpop.f32.mrb[36].mxu0 }
 0x6da   : > { %v2308_v44 = vpop.f32.mrb[37].mxu0 }
 0x6db   : > { %v1776_v23 = vpop.f32.mrb[38].mxu0 }
 0x6dc   : > { %v1780_v45 = vpack.c.bf16 %v1776_v23, %v1773_v11  ;;  %v2309_v27 = vpop.f32.mrb[39].mxu0 }
 0x6de   : > { %1782 = vrot.lane.b32.xlu1 %v1780_v45, %s2873_s25 }
 0x6ff   : > { %v1026_v46 = vpop.permute.xlu0 %1025 }
 0x700   : > { %1029 = vst.msk [vmem:[#allocation2] sm:$0xff] %vm1028_vm5, %v1026_v46 }
 0x707   : > { %v1786_v47 = vld [vmem:[#allocation2] sm:$0xff] }
 0x708   : > { %2314 = vmatprep.mubr.msk.bf16.mxu1 %vm460_vm0, %v1786_v47 }
 0x70f   : > { %v1279_v19 = vpop.permute.xlu1 %1278 }
 0x710   : > { %1281 = vst.msk [vmem:[#allocation2 + $0x8] sm:$0xff] %vm1028_vm5, %v1279_v19 }
 0x717   : > { %v1787_v26 = vld [vmem:[#allocation2 + $0x8] sm:$0xff] }
 0x718   : > { %2315 = vmatmul.mubr.msk.bf16.vlgmr.msra.gmra.mrb[36].mxu1 %vm460_vm0, %v1787_v26 }
 0x740   : > { %v1531_v52 = vpop.permute.xlu0 %1530 }
 0x741   : > { %1533 = vst.msk [vmem:[#allocation2 + $0x10] sm:$0xff] %vm1028_vm5, %v1531_v52 }
 0x748   : > { %v1788_v54 = vld [vmem:[#allocation2 + $0x10] sm:$0xff] }
 0x749   : > { %2318 = vmatprep.mubr.msk.bf16.mxu1 %vm460_vm0, %v1788_v54 }
 0x750   : > { %v1783_v41 = vpop.permute.xlu1 %1782 }
 0x751   : > { %1785 = vst.msk [vmem:[#allocation2 + $0x18] sm:$0xff] %vm1028_vm5, %v1783_v41 }
 0x758   : > { %v1789_v29 = vld [vmem:[#allocation2 + $0x18] sm:$0xff] }
 0x759   : > { %2319 = vmatmul.mubr.msk.bf16.gmra.mrb[40].mxu1 %vm460_vm0, %v1789_v29 }
 0x7eb   : > { %v2316_v56 = vpop.f32.mrb[36].mxu1 }
 0x7ec   : > { %v1868_v25 = vadd.f32 %v2316_v56, %v2128_v55  ;;  %v1859_v28 = vpop.f32.mrb[37].mxu1 }
 0x7ed   : > { %v1860_v34 = vadd.f32 %v2128_v55, %v1859_v28  ;;  %v2317_v43 = vpop.f32.mrb[38].mxu1 }
 0x7ee   : > { %v1892_v48 = vadd.f32 %v2532_v22, %v1868_v25  ;;  %v1871_v30 = vadd.f32 %v2317_v43, %v2128_v55  ;;  %v1862_v14 = vpop.f32.mrb[39].mxu1 }
 0x7ef   : > { %v1890_v62 = vadd.f32 %v2533_v60, %v1860_v34  ;;  %v1863_v51 = vadd.f32 %v2128_v55, %v1862_v14 }
 0x7f0   : > { %1900 = vst.msk [vmem:[%s3638_s19 + $0x10] sm:$0xff] %vm460_vm0, %v1892_v48  ;;  %v1893_v21 = vadd.f32 %v2534_v36, %v1871_v30 }
 0x7f1   : > { %1898 = vst.msk [vmem:[%s3638_s19] sm:$0xff] %vm460_vm0, %v1890_v62  ;;  %v1891_v63 = vadd.f32 %v2535_v59, %v1863_v51 }
 0x7f2   : > { %1901 = vst.msk [vmem:[%s3638_s19 + $0x18] sm:$0xff] %vm460_vm0, %v1893_v21 }
 0x7f3   : > { %1899 = vst.msk [vmem:[%s3638_s19 + $0x8] sm:$0xff] %vm460_vm0, %v1891_v63 }
 0x82c   : > { %v2320_v6 = vpop.f32.mrb[40].mxu1 }
 0x82d   : > { %v1884_v1 = vadd.f32 %v2320_v6, %v2128_v55  ;;  %v1875_v61 = vpop.f32.mrb[41].mxu1 }
 0x82e   : > { %v1876_v4 = vadd.f32 %v2128_v55, %v1875_v61  ;;  %v2321_v50 = vpop.f32.mrb[42].mxu1 }
 0x82f   : > { %v1896_v7 = vadd.f32 %v2536_v0, %v1884_v1  ;;  %v1887_v2 = vadd.f32 %v2321_v50, %v2128_v55  ;;  %v1878_v53 = vpop.f32.mrb[43].mxu1 }
 0x830   : > { %v1894_v8 = vadd.f32 %v2537_v57, %v1876_v4  ;;  %v1879_v10 = vadd.f32 %v2128_v55, %v1878_v53 }
 0x831   : > { %1904 = vst.msk [vmem:[%s3638_s19 + $0x30] sm:$0xff] %vm460_vm0, %v1896_v7  ;;  %v1897_v12 = vadd.f32 %v2538_v9, %v1887_v2 }
 0x832   : > { %1902 = vst.msk [vmem:[%s3638_s19 + $0x20] sm:$0xff] %vm460_vm0, %v1894_v8  ;;  %v1895_v15 = vadd.f32 %v2539_v3, %v1879_v10 }
 0x833   : > { %1905 = vst.msk [vmem:[%s3638_s19 + $0x38] sm:$0xff] %vm460_vm0, %v1897_v12 }
 0x834   : > { %1903 = vst.msk [vmem:[%s3638_s19 + $0x28] sm:$0xff] %vm460_vm0, %v1895_v15 }
 0x835   : > { %2781 = shalt.err (!%p2778_p3)
}
 0x836   : > { %s2782_s22 = scalar_lea.hbm %s3660_s11, 1024  ;;  %s2786_s16 = scalar_lea.hbm %s3721_s8, 2048 }
 0x837   : > { %p2783_p4 = scmp.ne.s32.totalorder %s3660_s11, %s2782_s22  ;;  %p2787_p0 = scmp.lt.u32.totalorder %s3660_s11, %s3721_s8 }
 0x838   : > { %p2788_p6 = scmp.lt.u32.totalorder %s2786_s16, %s2782_s22  ;;  %p2790_p10 = scmp.lt.u32.totalorder %s2782_s22, %s3660_s11 }
 0x839   : > { %p2784_p1 = pnand %p2783_p4, %p3756_p11 }
 0x83a   : > { %p2789_p2 = por %p2788_p6, %p2787_p0 }
 0x83b   : > { %p2785_p13 = pneg %p2784_p1 }
 0x83c   : > { %p2791_p5 = por %p2790_p10, %p2789_p2 }
 0x83e   : > { %p2792_p7 = pnand %p2791_p5, %p2785_p13 }
 0x840   : > { %2795 = shalt.err (!%p2792_p7)
}
 0x841   : > { %s2875_s20 = smov 128   ;;  %s2876_s25 = smov 8  }
 0x842   : > { %2350 = dma.vmem_to_hbm [thread:$0]  (%p3756_p11), %s3662_s10, 1024, %s3660_s11, %s1907_s21, %s2875_s20, %s2875_s20, %s2876_s25  }
 0x843 PF: > { %s1936_s19 = sand.u32 1, %s2842_s27   ;;  %p3757_p9 = scmp.ne.s32.totalorder %s3743_s9, 0 }
 0x844   : > { %p3758_p8 = scmp.ge.s32.totalorder %s2854_s30, 2  ;;  %s1937_s24 = scalar_lea.sflag [#allocation5], %s1936_s19 }
 0x846   : > { %p2379_p12 = pnand %p3758_p8, %p3757_p9 }
 0x848   : > { %2837 = dma.done.wait (!%p2379_p12), %s1937_s24, 1024  }
 0x849   : > { %2839 = vsyncadd (!%p2379_p12), %s1937_s24, 4294966272  ;;  %p27_p3 = scmp.ge.s32.totalorder %s3109_s15, 4   ;;  %s3759_s27 = smov %s2846_s28 }
 0x84a   : > { %s3760_s28 = smov %s2850_s29  ;;  %s3761_s29 = smov %s3120_s14 }
 0x84b   : > { %s3762_s30 = smov %s3109_s15  ;;  %29 = sbr.rel (!%p27_p3) target bundleno = 17 (0x11), region = 134 }
 0x852   :  { %1942 = vsyncpa [#allocation4], 1 }
 0x853   :  { %1944 = vsyncpa [#allocation4 + $0x1], 1 }
 0x854   :  { %1945 = vsyncpa [#allocation7], 1 }
 0x855   :  { %1947 = vsyncpa [#allocation7 + $0x1], 1 }
 0x856   :  { %1948 = vsyncpa [#allocation10], 1 }
 0x857   :  { %1949 = vsyncpa [#allocation13], 1 }
 0x858   :  { %1950 = vsyncpa [#allocation16], 1 }
 0x859   :  { %1951 = vsyncpa [#allocation5], 1 }
 0x85a   :  { %1953 = vsyncpa [#allocation5 + $0x1], 1 }

</bundles_post_ra>
